<compile_context>
chip_gen: v5e
topology: v5e:2x2
jax: 0.10.0
libtpu: 0.0.40
codegen_flags: <defaults>
</compile_context>

<pallas_src>
import jax
import jax.numpy as jnp
from jax.experimental import pallas as pl
from jax.experimental.pallas import tpu as pltpu


# ----------------------------------------------------------------------------
# Kernel
# ----------------------------------------------------------------------------
def adversarial_kernel(
    z_ref,
    g_wih, g_whh, g_b, g_bhn, g_wl, g_bl,
    s_wih, s_whh, s_b, s_bhn, s_wl, s_bl,
    d_wih, d_whh, d_b, d_bhn, d_wl, d_bl,
    y_ref,
    gi_ref, h_ref,
):
    T, Bp, Dzp = z_ref.shape
    Hp = g_whh.shape[0]
    TB = T * Bp
    f32 = jnp.float32

    def run_gru(whh_ref, bhn_ref):
        """Sequential GRU over T steps.

        Reads gi_ref[t] (input projection; b_i* and b_h{r,z} already folded
        in), writes h_ref[t]. Only ONE dependent matmul per step remains on
        the critical path.
        """
        whh = whh_ref[...]                                  # hoisted weight load
        bhn = jnp.broadcast_to(bhn_ref[...], (Bp, Hp))      # hoisted broadcast

        def cell(t, h):
            gi = gi_ref[t]
            gh = jnp.dot(h, whh, preferred_element_type=f32)
            # gates [r | z | n], each Hp lanes wide (per-gate zero padded).
            i_r, i_z, i_n = gi[:, :Hp], gi[:, Hp:2 * Hp], gi[:, 2 * Hp:]
            h_r, h_z, h_n = gh[:, :Hp], gh[:, Hp:2 * Hp], gh[:, 2 * Hp:]
            r = jax.nn.sigmoid(i_r + h_r)          # b_ir + b_hr folded into i_r
            zg = jax.nn.sigmoid(i_z + h_z)         # b_iz + b_hz folded into i_z
            n = jnp.tanh(i_n + r * (h_n + bhn))    # PyTorch: r*(W_hn h + b_hn)
            h = (1.0 - zg) * n + zg * h
            h_ref[t] = h
            return h

        # T=8: full unroll keeps LLO scheduler visibility; cap unroll / add a
        # T-chunk grid axis if T grows.
        jax.lax.fori_loop(0, T, cell, jnp.zeros((Bp, Hp), f32), unroll=True)

    # --- phase 0: generator input projection, batched over all T -------------
    z_flat = z_ref[...].reshape(TB, Dzp)
    gi_ref[...] = (
        jnp.dot(z_flat, g_wih[...], preferred_element_type=f32) + g_b[...]
    ).reshape(T, Bp, 3 * Hp)

    # --- phase 1: generator GRU recurrence ------------------------------------
    run_gru(g_whh, g_bhn)

    # --- phase 2: e_hat linear + supervisor input projection, batched ---------
    # NOTE: padded lanes of e_hat are sigmoid(0)=0.5; harmless because the
    # padded rows of s_wih are zero (invariant preserved by the wrapper).
    h1_flat = h_ref[...].reshape(TB, Hp)
    e_hat = jax.nn.sigmoid(
        jnp.dot(h1_flat, g_wl[...], preferred_element_type=f32) + g_bl[...])
    gi_ref[...] = (
        jnp.dot(e_hat, s_wih[...], preferred_element_type=f32) + s_b[...]
    ).reshape(T, Bp, 3 * Hp)

    # --- phase 3: supervisor GRU recurrence ------------------------------------
    run_gru(s_whh, s_bhn)

    # --- phase 4: h_hat linear + discriminator input projection, batched ------
    h2_flat = h_ref[...].reshape(TB, Hp)
    h_hat = jax.nn.sigmoid(
        jnp.dot(h2_flat, s_wl[...], preferred_element_type=f32) + s_bl[...])
    gi_ref[...] = (
        jnp.dot(h_hat, d_wih[...], preferred_element_type=f32) + d_b[...]
    ).reshape(T, Bp, 3 * Hp)

    # --- phase 5: discriminator GRU recurrence ---------------------------------
    run_gru(d_whh, d_bhn)

    # --- phase 6: discriminator output Linear, batched over all T --------------
    h3_flat = h_ref[...].reshape(TB, Hp)
    y = jnp.dot(h3_flat, d_wl[...], preferred_element_type=f32) + d_bl[...]
    y_ref[...] = y.reshape(T, Bp, y_ref.shape[-1]).astype(y_ref.dtype)


# ----------------------------------------------------------------------------
# Wrapper (bias folding + padding + pallas_call)
# ----------------------------------------------------------------------------
def _round_up(x, m):
    return ((x + m - 1) // m) * m


def _pad_gate_mat(w, rows_pad, hp):
    """(rows, 3H) gate matrix [r|z|n] -> (rows_pad, 3*hp): each gate in its own
    hp-wide lane block, zero padded (gate slices land on vreg boundaries)."""
    rows, three_h = w.shape
    h = three_h // 3
    out = jnp.zeros((rows_pad, 3 * hp), w.dtype)
    for g in range(3):
        out = out.at[:rows, g * hp:g * hp + h].set(w[:, g * h:(g + 1) * h])
    return out


def _pad_mat(w, rows_pad, cols_pad):
    r, c = w.shape
    return jnp.zeros((rows_pad, cols_pad), w.dtype).at[:r, :c].set(w)


def adversarial_forward(Z, params):
    """Z: (B, T, z_dim) float32.  Returns Y_fake logits: (B, T, 1)."""
    B, T, Dz = Z.shape
    H = params["g_whh"].shape[0]

    Bp = _round_up(B, 8)          # sublane tile
    Hp = _round_up(H, 128)        # lane tile (gate boundaries align to vregs)
    Dzp = _round_up(Dz, 128)
    OUTP = 128                    # lane-dense output; logit lives in column 0

    # time-major, padded input
    z_tm = jnp.transpose(Z, (1, 0, 2)).astype(jnp.float32)      # (T, B, Dz)
    z_tm = jnp.pad(z_tm, ((0, 0), (0, Bp - B), (0, Dzp - Dz)))  # (T, Bp, Dzp)

    def fold_bias(prefix):
        # Fold b_ih + b_hh for the r and z gates into the (batched) input
        # projection; b_hn must stay separate: n = tanh(i_n + r*(h_n + b_hn)).
        bih = params[prefix + "_bih"].astype(jnp.float32)
        bhh = params[prefix + "_bhh"].astype(jnp.float32)
        b = jnp.concatenate(
            [bih[:, :2 * H] + bhh[:, :2 * H], bih[:, 2 * H:]], axis=1)
        return b, bhh[:, 2 * H:]

    g_b, g_bhn = fold_bias("g")
    s_b, s_bhn = fold_bias("s")
    d_b, d_bhn = fold_bias("d")

    padded = [
        _pad_gate_mat(params["g_wih"], Dzp, Hp),
        _pad_gate_mat(params["g_whh"], Hp, Hp),
        _pad_gate_mat(g_b, 1, Hp),
        _pad_mat(g_bhn, 1, Hp),
        _pad_mat(params["g_wl"], Hp, Hp),
        _pad_mat(params["g_bl"], 1, Hp),
        _pad_gate_mat(params["s_wih"], Hp, Hp),
        _pad_gate_mat(params["s_whh"], Hp, Hp),
        _pad_gate_mat(s_b, 1, Hp),
        _pad_mat(s_bhn, 1, Hp),
        _pad_mat(params["s_wl"], Hp, Hp),
        _pad_mat(params["s_bl"], 1, Hp),
        _pad_gate_mat(params["d_wih"], Hp, Hp),
        _pad_gate_mat(params["d_whh"], Hp, Hp),
        _pad_gate_mat(d_b, 1, Hp),
        _pad_mat(d_bhn, 1, Hp),
        _pad_mat(params["d_wl"], Hp, OUTP),
        _pad_mat(params["d_bl"], 1, OUTP),
    ]

    def full_spec(w):
        nd = w.ndim
        return pl.BlockSpec(w.shape, lambda i, nd=nd: (0,) * nd)

    in_specs = [pl.BlockSpec((T, Bp, Dzp), lambda i: (0, 0, 0))] + [
        full_spec(w) for w in padded
    ]
    out_spec = pl.BlockSpec((T, Bp, OUTP), lambda i: (0, 0, 0))

    out = pl.pallas_call(
        adversarial_kernel,
        out_shape=jax.ShapeDtypeStruct((T, Bp, OUTP), jnp.float32),
        grid_spec=pltpu.PrefetchScalarGridSpec(
            num_scalar_prefetch=0,
            grid=(1,),                      # recurrence handled in-kernel
            in_specs=in_specs,
            out_specs=out_spec,
            scratch_shapes=[
                # reused by all three networks (gen/sup/disc)
                pltpu.VMEM((T, Bp, 3 * Hp), jnp.float32),  # gate pre-activations
                pltpu.VMEM((T, Bp, Hp), jnp.float32),      # hidden states
            ],
        ),
        compiler_params=pltpu.CompilerParams(
            dimension_semantics=("arbitrary",)),
    )(z_tm, *padded)

    y_tm = out[:, :B, 0]                     # (T, B) logits
    return jnp.transpose(y_tm, (1, 0))[:, :, None]  # (B, T, 1)


# ----------------------------------------------------------------------------
# Synthetic parameters + pure-JAX reference
# ----------------------------------------------------------------------------
def init_params(key, z_dim, hidden):
    """Deterministic synthetic parameters (PyTorch GRU/Linear shapes, transposed
    so matmuls are x @ W; gate order r, z, n)."""
    ks = jax.random.split(key, 18)
    s = 0.1

    def rnd(k, shape):
        return (s * jax.random.normal(k, shape)).astype(jnp.float32)

    p = {}
    p["g_wih"] = rnd(ks[0], (z_dim, 3 * hidden))
    p["g_whh"] = rnd(ks[1], (hidden, 3 * hidden))
    p["g_bih"] = rnd(ks[2], (1, 3 * hidden))
    p["g_bhh"] = rnd(ks[3], (1, 3 * hidden))
    p["g_wl"] = rnd(ks[4], (hidden, hidden))
    p["g_bl"] = rnd(ks[5], (1, hidden))
    p["s_wih"] = rnd(ks[6], (hidden, 3 * hidden))
    p["s_whh"] = rnd(ks[7], (hidden, 3 * hidden))
    p["s_bih"] = rnd(ks[8], (1, 3 * hidden))
    p["s_bhh"] = rnd(ks[9], (1, 3 * hidden))
    p["s_wl"] = rnd(ks[10], (hidden, hidden))
    p["s_bl"] = rnd(ks[11], (1, hidden))
    p["d_wih"] = rnd(ks[12], (hidden, 3 * hidden))
    p["d_whh"] = rnd(ks[13], (hidden, 3 * hidden))
    p["d_bih"] = rnd(ks[14], (1, 3 * hidden))
    p["d_bhh"] = rnd(ks[15], (1, 3 * hidden))
    p["d_wl"] = rnd(ks[16], (hidden, 1))
    p["d_bl"] = rnd(ks[17], (1, 1))
    return p


def _reference_forward(Z, params):
    """Plain-JAX reference of the same forward (PyTorch GRU semantics)."""
    B, T, _ = Z.shape
    H = params["g_whh"].shape[0]

    def gru_step(x, h, wih, whh, bih, bhh):
        gi = x @ wih + bih
        gh = h @ whh + bhh
        i_r, i_z, i_n = gi[:, :H], gi[:, H:2 * H], gi[:, 2 * H:]
        h_r, h_z, h_n = gh[:, :H], gh[:, H:2 * H], gh[:, 2 * H:]
        r = jax.nn.sigmoid(i_r + h_r)
        z = jax.nn.sigmoid(i_z + h_z)
        n = jnp.tanh(i_n + r * h_n)
        return (1.0 - z) * n + z * h

    h1 = h2 = h3 = jnp.zeros((B, H), jnp.float32)
    ys = []
    for t in range(T):
        x = Z[:, t, :]
        h1 = gru_step(x, h1, params["g_wih"], params["g_whh"],
                      params["g_bih"], params["g_bhh"])
        e_hat = jax.nn.sigmoid(h1 @ params["g_wl"] + params["g_bl"])
        h2 = gru_step(e_hat, h2, params["s_wih"], params["s_whh"],
                      params["s_bih"], params["s_bhh"])
        h_hat = jax.nn.sigmoid(h2 @ params["s_wl"] + params["s_bl"])
        h3 = gru_step(h_hat, h3, params["d_wih"], params["d_whh"],
                      params["d_bih"], params["d_bhh"])
        ys.append(h3 @ params["d_wl"] + params["d_bl"])
    return jnp.stack(ys, axis=1)  # (B, T, 1)


# ----------------------------------------------------------------------------
# Main
# ----------------------------------------------------------------------------
if __name__ == "__main__":
    B, T, Z_DIM, HIDDEN = 2, 8, 4, 32

    key = jax.random.PRNGKey(0)
    k_z, k_p = jax.random.split(key)
    Z = jax.random.normal(k_z, (B, T, Z_DIM), dtype=jnp.float32)
    params = init_params(k_p, Z_DIM, HIDDEN)

    y_fake = adversarial_forward(Z, params)
    jax.block_until_ready(y_fake)

    assert y_fake.shape == (B, T, 1), y_fake.shape
    assert y_fake.dtype == jnp.float32

    # correctness vs. pure-JAX reference at highest matmul precision; the
    # (tightened) tolerance only absorbs MXU pass-precision differences —
    # layout/padding bugs would produce O(0.1) errors.
    with jax.default_matmul_precision("highest"):
        y_ref = _reference_forward(Z, params)
        jax.block_until_ready(y_ref)
    assert jnp.allclose(y_fake, y_ref, atol=2e-3, rtol=2e-3), (
        float(jnp.max(jnp.abs(y_fake - y_ref))))

    print("KERNEL_OK")
</pallas_src>

<mosaic_0001>
module attributes {stable_mosaic.version = 11 : i64} {
  func.func @adversarial_kernel(%arg0: i32, %arg1: memref<8x8x128xf32, #tpu.memory_space<vmem>>, %arg2: memref<128x384xf32, #tpu.memory_space<vmem>>, %arg3: memref<128x384xf32, #tpu.memory_space<vmem>>, %arg4: memref<1x384xf32, #tpu.memory_space<vmem>>, %arg5: memref<1x128xf32, #tpu.memory_space<vmem>>, %arg6: memref<128x128xf32, #tpu.memory_space<vmem>>, %arg7: memref<1x128xf32, #tpu.memory_space<vmem>>, %arg8: memref<128x384xf32, #tpu.memory_space<vmem>>, %arg9: memref<128x384xf32, #tpu.memory_space<vmem>>, %arg10: memref<1x384xf32, #tpu.memory_space<vmem>>, %arg11: memref<1x128xf32, #tpu.memory_space<vmem>>, %arg12: memref<128x128xf32, #tpu.memory_space<vmem>>, %arg13: memref<1x128xf32, #tpu.memory_space<vmem>>, %arg14: memref<128x384xf32, #tpu.memory_space<vmem>>, %arg15: memref<128x384xf32, #tpu.memory_space<vmem>>, %arg16: memref<1x384xf32, #tpu.memory_space<vmem>>, %arg17: memref<1x128xf32, #tpu.memory_space<vmem>>, %arg18: memref<128x128xf32, #tpu.memory_space<vmem>>, %arg19: memref<1x128xf32, #tpu.memory_space<vmem>>, %arg20: memref<8x8x128xf32, #tpu.memory_space<vmem>>, %arg21: memref<8x8x384xf32, #tpu.memory_space<vmem>>, %arg22: memref<8x8x128xf32, #tpu.memory_space<vmem>>) attributes {dimension_semantics = [#tpu.dimension_semantics<arbitrary>], iteration_bounds = array<i64: 1>, scalar_prefetch = 0 : i64, scratch_operands = 2 : i64, tpu.core_type = #tpu.core_type<tc>, window_params = [{pipeline_mode = #tpu.pipeline_mode<synchronous>, transform_indices = @transform_0, window_bounds = array<i64: 8, 8, 128>}, {pipeline_mode = #tpu.pipeline_mode<synchronous>, transform_indices = @transform_1, window_bounds = array<i64: 128, 384>}, {pipeline_mode = #tpu.pipeline_mode<synchronous>, transform_indices = @transform_2, window_bounds = array<i64: 128, 384>}, {pipeline_mode = #tpu.pipeline_mode<synchronous>, transform_indices = @transform_3, window_bounds = array<i64: 1, 384>}, {pipeline_mode = #tpu.pipeline_mode<synchronous>, transform_indices = @transform_4, window_bounds = array<i64: 1, 128>}, {pipeline_mode = #tpu.pipeline_mode<synchronous>, transform_indices = @transform_5, window_bounds = array<i64: 128, 128>}, {pipeline_mode = #tpu.pipeline_mode<synchronous>, transform_indices = @transform_6, window_bounds = array<i64: 1, 128>}, {pipeline_mode = #tpu.pipeline_mode<synchronous>, transform_indices = @transform_7, window_bounds = array<i64: 128, 384>}, {pipeline_mode = #tpu.pipeline_mode<synchronous>, transform_indices = @transform_8, window_bounds = array<i64: 128, 384>}, {pipeline_mode = #tpu.pipeline_mode<synchronous>, transform_indices = @transform_9, window_bounds = array<i64: 1, 384>}, {pipeline_mode = #tpu.pipeline_mode<synchronous>, transform_indices = @transform_10, window_bounds = array<i64: 1, 128>}, {pipeline_mode = #tpu.pipeline_mode<synchronous>, transform_indices = @transform_11, window_bounds = array<i64: 128, 128>}, {pipeline_mode = #tpu.pipeline_mode<synchronous>, transform_indices = @transform_12, window_bounds = array<i64: 1, 128>}, {pipeline_mode = #tpu.pipeline_mode<synchronous>, transform_indices = @transform_13, window_bounds = array<i64: 128, 384>}, {pipeline_mode = #tpu.pipeline_mode<synchronous>, transform_indices = @transform_14, window_bounds = array<i64: 128, 384>}, {pipeline_mode = #tpu.pipeline_mode<synchronous>, transform_indices = @transform_15, window_bounds = array<i64: 1, 384>}, {pipeline_mode = #tpu.pipeline_mode<synchronous>, transform_indices = @transform_16, window_bounds = array<i64: 1, 128>}, {pipeline_mode = #tpu.pipeline_mode<synchronous>, transform_indices = @transform_17, window_bounds = array<i64: 128, 128>}, {pipeline_mode = #tpu.pipeline_mode<synchronous>, transform_indices = @transform_18, window_bounds = array<i64: 1, 128>}, {pipeline_mode = #tpu.pipeline_mode<synchronous>, transform_indices = @transform_19, window_bounds = array<i64: 8, 8, 128>}]} {
    %c0 = arith.constant 0 : index
    %c0_0 = arith.constant 0 : index
    %c0_1 = arith.constant 0 : index
    %0 = vector.load %arg1[%c0, %c0_0, %c0_1] : memref<8x8x128xf32, #tpu.memory_space<vmem>>, vector<8x8x128xf32>
    %1 = vector.shape_cast %0 : vector<8x8x128xf32> to vector<64x128xf32>
    %c0_2 = arith.constant 0 : index
    %c0_3 = arith.constant 0 : index
    %2 = vector.load %arg2[%c0_2, %c0_3] : memref<128x384xf32, #tpu.memory_space<vmem>>, vector<128x384xf32>
    %cst = arith.constant dense<0.000000e+00> : vector<64x384xf32>
    %3 = tpu.matmul %1, %2, %cst {dimension_numbers = #tpu.dot_dimension_numbers<[1], [0], [0], [1], [0, 0, 1, 1], [], []>} : vector<64x128xf32>, vector<128x384xf32>, vector<64x384xf32> -> vector<64x384xf32>
    %c0_4 = arith.constant 0 : index
    %c0_5 = arith.constant 0 : index
    %4 = vector.load %arg4[%c0_4, %c0_5] : memref<1x384xf32, #tpu.memory_space<vmem>>, vector<1x384xf32>
    %5 = vector.broadcast %4 : vector<1x384xf32> to vector<64x384xf32>
    %6 = arith.addf %3, %5 : vector<64x384xf32>
    %7 = vector.shape_cast %6 : vector<64x384xf32> to vector<8x8x384xf32>
    %c0_6 = arith.constant 0 : index
    %c0_7 = arith.constant 0 : index
    %c0_8 = arith.constant 0 : index
    %8 = vector.load %arg21[%c0_6, %c0_7, %c0_8] : memref<8x8x384xf32, #tpu.memory_space<vmem>>, vector<8x8x384xf32>
    tpu.vector_store %arg21[%c0_6, %c0_7, %c0_8], %7 {strides = array<i32>} : memref<8x8x384xf32, #tpu.memory_space<vmem>>, vector<8x8x384xf32>,
    %c0_9 = arith.constant 0 : index
    %c0_10 = arith.constant 0 : index
    %9 = vector.load %arg3[%c0_9, %c0_10] : memref<128x384xf32, #tpu.memory_space<vmem>>, vector<128x384xf32>
    %c0_11 = arith.constant 0 : index
    %c0_12 = arith.constant 0 : index
    %10 = vector.load %arg5[%c0_11, %c0_12] : memref<1x128xf32, #tpu.memory_space<vmem>>, vector<1x128xf32>
    %11 = vector.shape_cast %10 : vector<1x128xf32> to vector<1x128xf32>
    %12 = vector.broadcast %11 : vector<1x128xf32> to vector<8x128xf32>
    %cst_13 = arith.constant 0.000000e+00 : f32
    %13 = vector.broadcast %cst_13 : f32 to vector<8x128xf32>
    %c0_i32 = arith.constant 0 : i32
    %14 = arith.index_cast %c0_i32 : i32 to index
    %c0_14 = arith.constant 0 : index
    %c0_15 = arith.constant 0 : index
    %15 = vector.load %arg21[%14, %c0_14, %c0_15] : memref<8x8x384xf32, #tpu.memory_space<vmem>>, vector<1x8x384xf32>
    %16 = vector.shape_cast %15 : vector<1x8x384xf32> to vector<8x384xf32>
    %cst_16 = arith.constant dense<0.000000e+00> : vector<8x384xf32>
    %17 = tpu.matmul %13, %9, %cst_16 {dimension_numbers = #tpu.dot_dimension_numbers<[1], [0], [0], [1], [0, 0, 1, 1], [], []>} : vector<8x128xf32>, vector<128x384xf32>, vector<8x384xf32> -> vector<8x384xf32>
    %18 = vector.extract_strided_slice %16 {offsets = [0, 0], sizes = [8, 128], strides = [1, 1]} : vector<8x384xf32> to vector<8x128xf32>
    %19 = vector.extract_strided_slice %16 {offsets = [0, 128], sizes = [8, 128], strides = [1, 1]} : vector<8x384xf32> to vector<8x128xf32>
    %20 = vector.extract_strided_slice %16 {offsets = [0, 256], sizes = [8, 128], strides = [1, 1]} : vector<8x384xf32> to vector<8x128xf32>
    %21 = vector.extract_strided_slice %17 {offsets = [0, 0], sizes = [8, 128], strides = [1, 1]} : vector<8x384xf32> to vector<8x128xf32>
    %22 = vector.extract_strided_slice %17 {offsets = [0, 128], sizes = [8, 128], strides = [1, 1]} : vector<8x384xf32> to vector<8x128xf32>
    %23 = vector.extract_strided_slice %17 {offsets = [0, 256], sizes = [8, 128], strides = [1, 1]} : vector<8x384xf32> to vector<8x128xf32>
    %24 = arith.addf %18, %21 : vector<8x128xf32>
    %25 = arith.negf %24 : vector<8x128xf32>
    %26 = math.exp %25 : vector<8x128xf32>
    %cst_17 = arith.constant 1.000000e+00 : f32
    %27 = vector.broadcast %cst_17 : f32 to vector<8x128xf32>
    %28 = arith.addf %27, %26 : vector<8x128xf32>
    %29 = arith.divf %27, %28 : vector<8x128xf32>
    %30 = arith.addf %19, %22 : vector<8x128xf32>
    %31 = arith.negf %30 : vector<8x128xf32>
    %32 = math.exp %31 : vector<8x128xf32>
    %cst_18 = arith.constant 1.000000e+00 : f32
    %33 = vector.broadcast %cst_18 : f32 to vector<8x128xf32>
    %34 = arith.addf %33, %32 : vector<8x128xf32>
    %35 = arith.divf %33, %34 : vector<8x128xf32>
    %36 = arith.addf %23, %12 : vector<8x128xf32>
    %37 = arith.mulf %29, %36 : vector<8x128xf32>
    %38 = arith.addf %20, %37 : vector<8x128xf32>
    %39 = math.tanh %38 : vector<8x128xf32>
    %cst_19 = arith.constant 1.000000e+00 : f32
    %40 = vector.broadcast %cst_19 : f32 to vector<8x128xf32>
    %41 = arith.subf %40, %35 : vector<8x128xf32>
    %42 = arith.mulf %41, %39 : vector<8x128xf32>
    %43 = arith.mulf %35, %13 : vector<8x128xf32>
    %44 = arith.addf %42, %43 : vector<8x128xf32>
    %45 = arith.index_cast %c0_i32 : i32 to index
    %c0_20 = arith.constant 0 : index
    %c0_21 = arith.constant 0 : index
    %46 = vector.load %arg22[%45, %c0_20, %c0_21] : memref<8x8x128xf32, #tpu.memory_space<vmem>>, vector<1x8x128xf32>
    %47 = vector.shape_cast %46 : vector<1x8x128xf32> to vector<8x128xf32>
    %48 = vector.shape_cast %44 : vector<8x128xf32> to vector<1x8x128xf32>
    tpu.vector_store %arg22[%45, %c0_20, %c0_21], %48 {strides = array<i32>} : memref<8x8x128xf32, #tpu.memory_space<vmem>>, vector<1x8x128xf32>,
    %c1_i32 = arith.constant 1 : i32
    %49 = arith.index_cast %c1_i32 : i32 to index
    %c0_22 = arith.constant 0 : index
    %c0_23 = arith.constant 0 : index
    %50 = vector.load %arg21[%49, %c0_22, %c0_23] : memref<8x8x384xf32, #tpu.memory_space<vmem>>, vector<1x8x384xf32>
    %51 = vector.shape_cast %50 : vector<1x8x384xf32> to vector<8x384xf32>
    %cst_24 = arith.constant dense<0.000000e+00> : vector<8x384xf32>
    %52 = tpu.matmul %44, %9, %cst_24 {dimension_numbers = #tpu.dot_dimension_numbers<[1], [0], [0], [1], [0, 0, 1, 1], [], []>} : vector<8x128xf32>, vector<128x384xf32>, vector<8x384xf32> -> vector<8x384xf32>
    %53 = vector.extract_strided_slice %51 {offsets = [0, 0], sizes = [8, 128], strides = [1, 1]} : vector<8x384xf32> to vector<8x128xf32>
    %54 = vector.extract_strided_slice %51 {offsets = [0, 128], sizes = [8, 128], strides = [1, 1]} : vector<8x384xf32> to vector<8x128xf32>
    %55 = vector.extract_strided_slice %51 {offsets = [0, 256], sizes = [8, 128], strides = [1, 1]} : vector<8x384xf32> to vector<8x128xf32>
    %56 = vector.extract_strided_slice %52 {offsets = [0, 0], sizes = [8, 128], strides = [1, 1]} : vector<8x384xf32> to vector<8x128xf32>
    %57 = vector.extract_strided_slice %52 {offsets = [0, 128], sizes = [8, 128], strides = [1, 1]} : vector<8x384xf32> to vector<8x128xf32>
    %58 = vector.extract_strided_slice %52 {offsets = [0, 256], sizes = [8, 128], strides = [1, 1]} : vector<8x384xf32> to vector<8x128xf32>
    %59 = arith.addf %53, %56 : vector<8x128xf32>
    %60 = arith.negf %59 : vector<8x128xf32>
    %61 = math.exp %60 : vector<8x128xf32>
    %cst_25 = arith.constant 1.000000e+00 : f32
    %62 = vector.broadcast %cst_25 : f32 to vector<8x128xf32>
    %63 = arith.addf %62, %61 : vector<8x128xf32>
    %64 = arith.divf %62, %63 : vector<8x128xf32>
    %65 = arith.addf %54, %57 : vector<8x128xf32>
    %66 = arith.negf %65 : vector<8x128xf32>
    %67 = math.exp %66 : vector<8x128xf32>
    %cst_26 = arith.constant 1.000000e+00 : f32
    %68 = vector.broadcast %cst_26 : f32 to vector<8x128xf32>
    %69 = arith.addf %68, %67 : vector<8x128xf32>
    %70 = arith.divf %68, %69 : vector<8x128xf32>
    %71 = arith.addf %58, %12 : vector<8x128xf32>
    %72 = arith.mulf %64, %71 : vector<8x128xf32>
    %73 = arith.addf %55, %72 : vector<8x128xf32>
    %74 = math.tanh %73 : vector<8x128xf32>
    %cst_27 = arith.constant 1.000000e+00 : f32
    %75 = vector.broadcast %cst_27 : f32 to vector<8x128xf32>
    %76 = arith.subf %75, %70 : vector<8x128xf32>
    %77 = arith.mulf %76, %74 : vector<8x128xf32>
    %78 = arith.mulf %70, %44 : vector<8x128xf32>
    %79 = arith.addf %77, %78 : vector<8x128xf32>
    %80 = arith.index_cast %c1_i32 : i32 to index
    %c0_28 = arith.constant 0 : index
    %c0_29 = arith.constant 0 : index
    %81 = vector.load %arg22[%80, %c0_28, %c0_29] : memref<8x8x128xf32, #tpu.memory_space<vmem>>, vector<1x8x128xf32>
    %82 = vector.shape_cast %81 : vector<1x8x128xf32> to vector<8x128xf32>
    %83 = vector.shape_cast %79 : vector<8x128xf32> to vector<1x8x128xf32>
    tpu.vector_store %arg22[%80, %c0_28, %c0_29], %83 {strides = array<i32>} : memref<8x8x128xf32, #tpu.memory_space<vmem>>, vector<1x8x128xf32>,
    %c2_i32 = arith.constant 2 : i32
    %84 = arith.index_cast %c2_i32 : i32 to index
    %c0_30 = arith.constant 0 : index
    %c0_31 = arith.constant 0 : index
    %85 = vector.load %arg21[%84, %c0_30, %c0_31] : memref<8x8x384xf32, #tpu.memory_space<vmem>>, vector<1x8x384xf32>
    %86 = vector.shape_cast %85 : vector<1x8x384xf32> to vector<8x384xf32>
    %cst_32 = arith.constant dense<0.000000e+00> : vector<8x384xf32>
    %87 = tpu.matmul %79, %9, %cst_32 {dimension_numbers = #tpu.dot_dimension_numbers<[1], [0], [0], [1], [0, 0, 1, 1], [], []>} : vector<8x128xf32>, vector<128x384xf32>, vector<8x384xf32> -> vector<8x384xf32>
    %88 = vector.extract_strided_slice %86 {offsets = [0, 0], sizes = [8, 128], strides = [1, 1]} : vector<8x384xf32> to vector<8x128xf32>
    %89 = vector.extract_strided_slice %86 {offsets = [0, 128], sizes = [8, 128], strides = [1, 1]} : vector<8x384xf32> to vector<8x128xf32>
    %90 = vector.extract_strided_slice %86 {offsets = [0, 256], sizes = [8, 128], strides = [1, 1]} : vector<8x384xf32> to vector<8x128xf32>
    %91 = vector.extract_strided_slice %87 {offsets = [0, 0], sizes = [8, 128], strides = [1, 1]} : vector<8x384xf32> to vector<8x128xf32>
    %92 = vector.extract_strided_slice %87 {offsets = [0, 128], sizes = [8, 128], strides = [1, 1]} : vector<8x384xf32> to vector<8x128xf32>
    %93 = vector.extract_strided_slice %87 {offsets = [0, 256], sizes = [8, 128], strides = [1, 1]} : vector<8x384xf32> to vector<8x128xf32>
    %94 = arith.addf %88, %91 : vector<8x128xf32>
    %95 = arith.negf %94 : vector<8x128xf32>
    %96 = math.exp %95 : vector<8x128xf32>
    %cst_33 = arith.constant 1.000000e+00 : f32
    %97 = vector.broadcast %cst_33 : f32 to vector<8x128xf32>
    %98 = arith.addf %97, %96 : vector<8x128xf32>
    %99 = arith.divf %97, %98 : vector<8x128xf32>
    %100 = arith.addf %89, %92 : vector<8x128xf32>
    %101 = arith.negf %100 : vector<8x128xf32>
    %102 = math.exp %101 : vector<8x128xf32>
    %cst_34 = arith.constant 1.000000e+00 : f32
    %103 = vector.broadcast %cst_34 : f32 to vector<8x128xf32>
    %104 = arith.addf %103, %102 : vector<8x128xf32>
    %105 = arith.divf %103, %104 : vector<8x128xf32>
    %106 = arith.addf %93, %12 : vector<8x128xf32>
    %107 = arith.mulf %99, %106 : vector<8x128xf32>
    %108 = arith.addf %90, %107 : vector<8x128xf32>
    %109 = math.tanh %108 : vector<8x128xf32>
    %cst_35 = arith.constant 1.000000e+00 : f32
    %110 = vector.broadcast %cst_35 : f32 to vector<8x128xf32>
    %111 = arith.subf %110, %105 : vector<8x128xf32>
    %112 = arith.mulf %111, %109 : vector<8x128xf32>
    %113 = arith.mulf %105, %79 : vector<8x128xf32>
    %114 = arith.addf %112, %113 : vector<8x128xf32>
    %115 = arith.index_cast %c2_i32 : i32 to index
    %c0_36 = arith.constant 0 : index
    %c0_37 = arith.constant 0 : index
    %116 = vector.load %arg22[%115, %c0_36, %c0_37] : memref<8x8x128xf32, #tpu.memory_space<vmem>>, vector<1x8x128xf32>
    %117 = vector.shape_cast %116 : vector<1x8x128xf32> to vector<8x128xf32>
    %118 = vector.shape_cast %114 : vector<8x128xf32> to vector<1x8x128xf32>
    tpu.vector_store %arg22[%115, %c0_36, %c0_37], %118 {strides = array<i32>} : memref<8x8x128xf32, #tpu.memory_space<vmem>>, vector<1x8x128xf32>,
    %c3_i32 = arith.constant 3 : i32
    %119 = arith.index_cast %c3_i32 : i32 to index
    %c0_38 = arith.constant 0 : index
    %c0_39 = arith.constant 0 : index
    %120 = vector.load %arg21[%119, %c0_38, %c0_39] : memref<8x8x384xf32, #tpu.memory_space<vmem>>, vector<1x8x384xf32>
    %121 = vector.shape_cast %120 : vector<1x8x384xf32> to vector<8x384xf32>
    %cst_40 = arith.constant dense<0.000000e+00> : vector<8x384xf32>
    %122 = tpu.matmul %114, %9, %cst_40 {dimension_numbers = #tpu.dot_dimension_numbers<[1], [0], [0], [1], [0, 0, 1, 1], [], []>} : vector<8x128xf32>, vector<128x384xf32>, vector<8x384xf32> -> vector<8x384xf32>
    %123 = vector.extract_strided_slice %121 {offsets = [0, 0], sizes = [8, 128], strides = [1, 1]} : vector<8x384xf32> to vector<8x128xf32>
    %124 = vector.extract_strided_slice %121 {offsets = [0, 128], sizes = [8, 128], strides = [1, 1]} : vector<8x384xf32> to vector<8x128xf32>
    %125 = vector.extract_strided_slice %121 {offsets = [0, 256], sizes = [8, 128], strides = [1, 1]} : vector<8x384xf32> to vector<8x128xf32>
    %126 = vector.extract_strided_slice %122 {offsets = [0, 0], sizes = [8, 128], strides = [1, 1]} : vector<8x384xf32> to vector<8x128xf32>
    %127 = vector.extract_strided_slice %122 {offsets = [0, 128], sizes = [8, 128], strides = [1, 1]} : vector<8x384xf32> to vector<8x128xf32>
    %128 = vector.extract_strided_slice %122 {offsets = [0, 256], sizes = [8, 128], strides = [1, 1]} : vector<8x384xf32> to vector<8x128xf32>
    %129 = arith.addf %123, %126 : vector<8x128xf32>
    %130 = arith.negf %129 : vector<8x128xf32>
    %131 = math.exp %130 : vector<8x128xf32>
    %cst_41 = arith.constant 1.000000e+00 : f32
    %132 = vector.broadcast %cst_41 : f32 to vector<8x128xf32>
    %133 = arith.addf %132, %131 : vector<8x128xf32>
    %134 = arith.divf %132, %133 : vector<8x128xf32>
    %135 = arith.addf %124, %127 : vector<8x128xf32>
    %136 = arith.negf %135 : vector<8x128xf32>
    %137 = math.exp %136 : vector<8x128xf32>
    %cst_42 = arith.constant 1.000000e+00 : f32
    %138 = vector.broadcast %cst_42 : f32 to vector<8x128xf32>
    %139 = arith.addf %138, %137 : vector<8x128xf32>
    %140 = arith.divf %138, %139 : vector<8x128xf32>
    %141 = arith.addf %128, %12 : vector<8x128xf32>
    %142 = arith.mulf %134, %141 : vector<8x128xf32>
    %143 = arith.addf %125, %142 : vector<8x128xf32>
    %144 = math.tanh %143 : vector<8x128xf32>
    %cst_43 = arith.constant 1.000000e+00 : f32
    %145 = vector.broadcast %cst_43 : f32 to vector<8x128xf32>
    %146 = arith.subf %145, %140 : vector<8x128xf32>
    %147 = arith.mulf %146, %144 : vector<8x128xf32>
    %148 = arith.mulf %140, %114 : vector<8x128xf32>
    %149 = arith.addf %147, %148 : vector<8x128xf32>
    %150 = arith.index_cast %c3_i32 : i32 to index
    %c0_44 = arith.constant 0 : index
    %c0_45 = arith.constant 0 : index
    %151 = vector.load %arg22[%150, %c0_44, %c0_45] : memref<8x8x128xf32, #tpu.memory_space<vmem>>, vector<1x8x128xf32>
    %152 = vector.shape_cast %151 : vector<1x8x128xf32> to vector<8x128xf32>
    %153 = vector.shape_cast %149 : vector<8x128xf32> to vector<1x8x128xf32>
    tpu.vector_store %arg22[%150, %c0_44, %c0_45], %153 {strides = array<i32>} : memref<8x8x128xf32, #tpu.memory_space<vmem>>, vector<1x8x128xf32>,
    %c4_i32 = arith.constant 4 : i32
    %154 = arith.index_cast %c4_i32 : i32 to index
    %c0_46 = arith.constant 0 : index
    %c0_47 = arith.constant 0 : index
    %155 = vector.load %arg21[%154, %c0_46, %c0_47] : memref<8x8x384xf32, #tpu.memory_space<vmem>>, vector<1x8x384xf32>
    %156 = vector.shape_cast %155 : vector<1x8x384xf32> to vector<8x384xf32>
    %cst_48 = arith.constant dense<0.000000e+00> : vector<8x384xf32>
    %157 = tpu.matmul %149, %9, %cst_48 {dimension_numbers = #tpu.dot_dimension_numbers<[1], [0], [0], [1], [0, 0, 1, 1], [], []>} : vector<8x128xf32>, vector<128x384xf32>, vector<8x384xf32> -> vector<8x384xf32>
    %158 = vector.extract_strided_slice %156 {offsets = [0, 0], sizes = [8, 128], strides = [1, 1]} : vector<8x384xf32> to vector<8x128xf32>
    %159 = vector.extract_strided_slice %156 {offsets = [0, 128], sizes = [8, 128], strides = [1, 1]} : vector<8x384xf32> to vector<8x128xf32>
    %160 = vector.extract_strided_slice %156 {offsets = [0, 256], sizes = [8, 128], strides = [1, 1]} : vector<8x384xf32> to vector<8x128xf32>
    %161 = vector.extract_strided_slice %157 {offsets = [0, 0], sizes = [8, 128], strides = [1, 1]} : vector<8x384xf32> to vector<8x128xf32>
    %162 = vector.extract_strided_slice %157 {offsets = [0, 128], sizes = [8, 128], strides = [1, 1]} : vector<8x384xf32> to vector<8x128xf32>
    %163 = vector.extract_strided_slice %157 {offsets = [0, 256], sizes = [8, 128], strides = [1, 1]} : vector<8x384xf32> to vector<8x128xf32>
    %164 = arith.addf %158, %161 : vector<8x128xf32>
    %165 = arith.negf %164 : vector<8x128xf32>
    %166 = math.exp %165 : vector<8x128xf32>
    %cst_49 = arith.constant 1.000000e+00 : f32
    %167 = vector.broadcast %cst_49 : f32 to vector<8x128xf32>
    %168 = arith.addf %167, %166 : vector<8x128xf32>
    %169 = arith.divf %167, %168 : vector<8x128xf32>
    %170 = arith.addf %159, %162 : vector<8x128xf32>
    %171 = arith.negf %170 : vector<8x128xf32>
    %172 = math.exp %171 : vector<8x128xf32>
    %cst_50 = arith.constant 1.000000e+00 : f32
    %173 = vector.broadcast %cst_50 : f32 to vector<8x128xf32>
    %174 = arith.addf %173, %172 : vector<8x128xf32>
    %175 = arith.divf %173, %174 : vector<8x128xf32>
    %176 = arith.addf %163, %12 : vector<8x128xf32>
    %177 = arith.mulf %169, %176 : vector<8x128xf32>
    %178 = arith.addf %160, %177 : vector<8x128xf32>
    %179 = math.tanh %178 : vector<8x128xf32>
    %cst_51 = arith.constant 1.000000e+00 : f32
    %180 = vector.broadcast %cst_51 : f32 to vector<8x128xf32>
    %181 = arith.subf %180, %175 : vector<8x128xf32>
    %182 = arith.mulf %181, %179 : vector<8x128xf32>
    %183 = arith.mulf %175, %149 : vector<8x128xf32>
    %184 = arith.addf %182, %183 : vector<8x128xf32>
    %185 = arith.index_cast %c4_i32 : i32 to index
    %c0_52 = arith.constant 0 : index
    %c0_53 = arith.constant 0 : index
    %186 = vector.load %arg22[%185, %c0_52, %c0_53] : memref<8x8x128xf32, #tpu.memory_space<vmem>>, vector<1x8x128xf32>
    %187 = vector.shape_cast %186 : vector<1x8x128xf32> to vector<8x128xf32>
    %188 = vector.shape_cast %184 : vector<8x128xf32> to vector<1x8x128xf32>
    tpu.vector_store %arg22[%185, %c0_52, %c0_53], %188 {strides = array<i32>} : memref<8x8x128xf32, #tpu.memory_space<vmem>>, vector<1x8x128xf32>,
    %c5_i32 = arith.constant 5 : i32
    %189 = arith.index_cast %c5_i32 : i32 to index
    %c0_54 = arith.constant 0 : index
    %c0_55 = arith.constant 0 : index
    %190 = vector.load %arg21[%189, %c0_54, %c0_55] : memref<8x8x384xf32, #tpu.memory_space<vmem>>, vector<1x8x384xf32>
    %191 = vector.shape_cast %190 : vector<1x8x384xf32> to vector<8x384xf32>
    %cst_56 = arith.constant dense<0.000000e+00> : vector<8x384xf32>
    %192 = tpu.matmul %184, %9, %cst_56 {dimension_numbers = #tpu.dot_dimension_numbers<[1], [0], [0], [1], [0, 0, 1, 1], [], []>} : vector<8x128xf32>, vector<128x384xf32>, vector<8x384xf32> -> vector<8x384xf32>
    %193 = vector.extract_strided_slice %191 {offsets = [0, 0], sizes = [8, 128], strides = [1, 1]} : vector<8x384xf32> to vector<8x128xf32>
    %194 = vector.extract_strided_slice %191 {offsets = [0, 128], sizes = [8, 128], strides = [1, 1]} : vector<8x384xf32> to vector<8x128xf32>
    %195 = vector.extract_strided_slice %191 {offsets = [0, 256], sizes = [8, 128], strides = [1, 1]} : vector<8x384xf32> to vector<8x128xf32>
    %196 = vector.extract_strided_slice %192 {offsets = [0, 0], sizes = [8, 128], strides = [1, 1]} : vector<8x384xf32> to vector<8x128xf32>
    %197 = vector.extract_strided_slice %192 {offsets = [0, 128], sizes = [8, 128], strides = [1, 1]} : vector<8x384xf32> to vector<8x128xf32>
    %198 = vector.extract_strided_slice %192 {offsets = [0, 256], sizes = [8, 128], strides = [1, 1]} : vector<8x384xf32> to vector<8x128xf32>
    %199 = arith.addf %193, %196 : vector<8x128xf32>
    %200 = arith.negf %199 : vector<8x128xf32>
    %201 = math.exp %200 : vector<8x128xf32>
    %cst_57 = arith.constant 1.000000e+00 : f32
    %202 = vector.broadcast %cst_57 : f32 to vector<8x128xf32>
    %203 = arith.addf %202, %201 : vector<8x128xf32>
    %204 = arith.divf %202, %203 : vector<8x128xf32>
    %205 = arith.addf %194, %197 : vector<8x128xf32>
    %206 = arith.negf %205 : vector<8x128xf32>
    %207 = math.exp %206 : vector<8x128xf32>
    %cst_58 = arith.constant 1.000000e+00 : f32
    %208 = vector.broadcast %cst_58 : f32 to vector<8x128xf32>
    %209 = arith.addf %208, %207 : vector<8x128xf32>
    %210 = arith.divf %208, %209 : vector<8x128xf32>
    %211 = arith.addf %198, %12 : vector<8x128xf32>
    %212 = arith.mulf %204, %211 : vector<8x128xf32>
    %213 = arith.addf %195, %212 : vector<8x128xf32>
    %214 = math.tanh %213 : vector<8x128xf32>
    %cst_59 = arith.constant 1.000000e+00 : f32
    %215 = vector.broadcast %cst_59 : f32 to vector<8x128xf32>
    %216 = arith.subf %215, %210 : vector<8x128xf32>
    %217 = arith.mulf %216, %214 : vector<8x128xf32>
    %218 = arith.mulf %210, %184 : vector<8x128xf32>
    %219 = arith.addf %217, %218 : vector<8x128xf32>
    %220 = arith.index_cast %c5_i32 : i32 to index
    %c0_60 = arith.constant 0 : index
    %c0_61 = arith.constant 0 : index
    %221 = vector.load %arg22[%220, %c0_60, %c0_61] : memref<8x8x128xf32, #tpu.memory_space<vmem>>, vector<1x8x128xf32>
    %222 = vector.shape_cast %221 : vector<1x8x128xf32> to vector<8x128xf32>
    %223 = vector.shape_cast %219 : vector<8x128xf32> to vector<1x8x128xf32>
    tpu.vector_store %arg22[%220, %c0_60, %c0_61], %223 {strides = array<i32>} : memref<8x8x128xf32, #tpu.memory_space<vmem>>, vector<1x8x128xf32>,
    %c6_i32 = arith.constant 6 : i32
    %224 = arith.index_cast %c6_i32 : i32 to index
    %c0_62 = arith.constant 0 : index
    %c0_63 = arith.constant 0 : index
    %225 = vector.load %arg21[%224, %c0_62, %c0_63] : memref<8x8x384xf32, #tpu.memory_space<vmem>>, vector<1x8x384xf32>
    %226 = vector.shape_cast %225 : vector<1x8x384xf32> to vector<8x384xf32>
    %cst_64 = arith.constant dense<0.000000e+00> : vector<8x384xf32>
    %227 = tpu.matmul %219, %9, %cst_64 {dimension_numbers = #tpu.dot_dimension_numbers<[1], [0], [0], [1], [0, 0, 1, 1], [], []>} : vector<8x128xf32>, vector<128x384xf32>, vector<8x384xf32> -> vector<8x384xf32>
    %228 = vector.extract_strided_slice %226 {offsets = [0, 0], sizes = [8, 128], strides = [1, 1]} : vector<8x384xf32> to vector<8x128xf32>
    %229 = vector.extract_strided_slice %226 {offsets = [0, 128], sizes = [8, 128], strides = [1, 1]} : vector<8x384xf32> to vector<8x128xf32>
    %230 = vector.extract_strided_slice %226 {offsets = [0, 256], sizes = [8, 128], strides = [1, 1]} : vector<8x384xf32> to vector<8x128xf32>
    %231 = vector.extract_strided_slice %227 {offsets = [0, 0], sizes = [8, 128], strides = [1, 1]} : vector<8x384xf32> to vector<8x128xf32>
    %232 = vector.extract_strided_slice %227 {offsets = [0, 128], sizes = [8, 128], strides = [1, 1]} : vector<8x384xf32> to vector<8x128xf32>
    %233 = vector.extract_strided_slice %227 {offsets = [0, 256], sizes = [8, 128], strides = [1, 1]} : vector<8x384xf32> to vector<8x128xf32>
    %234 = arith.addf %228, %231 : vector<8x128xf32>
    %235 = arith.negf %234 : vector<8x128xf32>
    %236 = math.exp %235 : vector<8x128xf32>
    %cst_65 = arith.constant 1.000000e+00 : f32
    %237 = vector.broadcast %cst_65 : f32 to vector<8x128xf32>
    %238 = arith.addf %237, %236 : vector<8x128xf32>
    %239 = arith.divf %237, %238 : vector<8x128xf32>
    %240 = arith.addf %229, %232 : vector<8x128xf32>
    %241 = arith.negf %240 : vector<8x128xf32>
    %242 = math.exp %241 : vector<8x128xf32>
    %cst_66 = arith.constant 1.000000e+00 : f32
    %243 = vector.broadcast %cst_66 : f32 to vector<8x128xf32>
    %244 = arith.addf %243, %242 : vector<8x128xf32>
    %245 = arith.divf %243, %244 : vector<8x128xf32>
    %246 = arith.addf %233, %12 : vector<8x128xf32>
    %247 = arith.mulf %239, %246 : vector<8x128xf32>
    %248 = arith.addf %230, %247 : vector<8x128xf32>
    %249 = math.tanh %248 : vector<8x128xf32>
    %cst_67 = arith.constant 1.000000e+00 : f32
    %250 = vector.broadcast %cst_67 : f32 to vector<8x128xf32>
    %251 = arith.subf %250, %245 : vector<8x128xf32>
    %252 = arith.mulf %251, %249 : vector<8x128xf32>
    %253 = arith.mulf %245, %219 : vector<8x128xf32>
    %254 = arith.addf %252, %253 : vector<8x128xf32>
    %255 = arith.index_cast %c6_i32 : i32 to index
    %c0_68 = arith.constant 0 : index
    %c0_69 = arith.constant 0 : index
    %256 = vector.load %arg22[%255, %c0_68, %c0_69] : memref<8x8x128xf32, #tpu.memory_space<vmem>>, vector<1x8x128xf32>
    %257 = vector.shape_cast %256 : vector<1x8x128xf32> to vector<8x128xf32>
    %258 = vector.shape_cast %254 : vector<8x128xf32> to vector<1x8x128xf32>
    tpu.vector_store %arg22[%255, %c0_68, %c0_69], %258 {strides = array<i32>} : memref<8x8x128xf32, #tpu.memory_space<vmem>>, vector<1x8x128xf32>,
    %c7_i32 = arith.constant 7 : i32
    %259 = arith.index_cast %c7_i32 : i32 to index
    %c0_70 = arith.constant 0 : index
    %c0_71 = arith.constant 0 : index
    %260 = vector.load %arg21[%259, %c0_70, %c0_71] : memref<8x8x384xf32, #tpu.memory_space<vmem>>, vector<1x8x384xf32>
    %261 = vector.shape_cast %260 : vector<1x8x384xf32> to vector<8x384xf32>
    %cst_72 = arith.constant dense<0.000000e+00> : vector<8x384xf32>
    %262 = tpu.matmul %254, %9, %cst_72 {dimension_numbers = #tpu.dot_dimension_numbers<[1], [0], [0], [1], [0, 0, 1, 1], [], []>} : vector<8x128xf32>, vector<128x384xf32>, vector<8x384xf32> -> vector<8x384xf32>
    %263 = vector.extract_strided_slice %261 {offsets = [0, 0], sizes = [8, 128], strides = [1, 1]} : vector<8x384xf32> to vector<8x128xf32>
    %264 = vector.extract_strided_slice %261 {offsets = [0, 128], sizes = [8, 128], strides = [1, 1]} : vector<8x384xf32> to vector<8x128xf32>
    %265 = vector.extract_strided_slice %261 {offsets = [0, 256], sizes = [8, 128], strides = [1, 1]} : vector<8x384xf32> to vector<8x128xf32>
    %266 = vector.extract_strided_slice %262 {offsets = [0, 0], sizes = [8, 128], strides = [1, 1]} : vector<8x384xf32> to vector<8x128xf32>
    %267 = vector.extract_strided_slice %262 {offsets = [0, 128], sizes = [8, 128], strides = [1, 1]} : vector<8x384xf32> to vector<8x128xf32>
    %268 = vector.extract_strided_slice %262 {offsets = [0, 256], sizes = [8, 128], strides = [1, 1]} : vector<8x384xf32> to vector<8x128xf32>
    %269 = arith.addf %263, %266 : vector<8x128xf32>
    %270 = arith.negf %269 : vector<8x128xf32>
    %271 = math.exp %270 : vector<8x128xf32>
    %cst_73 = arith.constant 1.000000e+00 : f32
    %272 = vector.broadcast %cst_73 : f32 to vector<8x128xf32>
    %273 = arith.addf %272, %271 : vector<8x128xf32>
    %274 = arith.divf %272, %273 : vector<8x128xf32>
    %275 = arith.addf %264, %267 : vector<8x128xf32>
    %276 = arith.negf %275 : vector<8x128xf32>
    %277 = math.exp %276 : vector<8x128xf32>
    %cst_74 = arith.constant 1.000000e+00 : f32
    %278 = vector.broadcast %cst_74 : f32 to vector<8x128xf32>
    %279 = arith.addf %278, %277 : vector<8x128xf32>
    %280 = arith.divf %278, %279 : vector<8x128xf32>
    %281 = arith.addf %268, %12 : vector<8x128xf32>
    %282 = arith.mulf %274, %281 : vector<8x128xf32>
    %283 = arith.addf %265, %282 : vector<8x128xf32>
    %284 = math.tanh %283 : vector<8x128xf32>
    %cst_75 = arith.constant 1.000000e+00 : f32
    %285 = vector.broadcast %cst_75 : f32 to vector<8x128xf32>
    %286 = arith.subf %285, %280 : vector<8x128xf32>
    %287 = arith.mulf %286, %284 : vector<8x128xf32>
    %288 = arith.mulf %280, %254 : vector<8x128xf32>
    %289 = arith.addf %287, %288 : vector<8x128xf32>
    %290 = arith.index_cast %c7_i32 : i32 to index
    %c0_76 = arith.constant 0 : index
    %c0_77 = arith.constant 0 : index
    %291 = vector.load %arg22[%290, %c0_76, %c0_77] : memref<8x8x128xf32, #tpu.memory_space<vmem>>, vector<1x8x128xf32>
    %292 = vector.shape_cast %291 : vector<1x8x128xf32> to vector<8x128xf32>
    %293 = vector.shape_cast %289 : vector<8x128xf32> to vector<1x8x128xf32>
    tpu.vector_store %arg22[%290, %c0_76, %c0_77], %293 {strides = array<i32>} : memref<8x8x128xf32, #tpu.memory_space<vmem>>, vector<1x8x128xf32>,
    %c8_i32 = arith.constant 8 : i32
    %c0_78 = arith.constant 0 : index
    %c0_79 = arith.constant 0 : index
    %c0_80 = arith.constant 0 : index
    %294 = vector.load %arg22[%c0_78, %c0_79, %c0_80] : memref<8x8x128xf32, #tpu.memory_space<vmem>>, vector<8x8x128xf32>
    %295 = vector.shape_cast %294 : vector<8x8x128xf32> to vector<64x128xf32>
    %c0_81 = arith.constant 0 : index
    %c0_82 = arith.constant 0 : index
    %296 = vector.load %arg6[%c0_81, %c0_82] : memref<128x128xf32, #tpu.memory_space<vmem>>, vector<128x128xf32>
    %cst_83 = arith.constant dense<0.000000e+00> : vector<64x128xf32>
    %297 = tpu.matmul %295, %296, %cst_83 {dimension_numbers = #tpu.dot_dimension_numbers<[1], [0], [0], [1], [0, 0, 1, 1], [], []>} : vector<64x128xf32>, vector<128x128xf32>, vector<64x128xf32> -> vector<64x128xf32>
    %c0_84 = arith.constant 0 : index
    %c0_85 = arith.constant 0 : index
    %298 = vector.load %arg7[%c0_84, %c0_85] : memref<1x128xf32, #tpu.memory_space<vmem>>, vector<1x128xf32>
    %299 = vector.broadcast %298 : vector<1x128xf32> to vector<64x128xf32>
    %300 = arith.addf %297, %299 : vector<64x128xf32>
    %301 = arith.negf %300 : vector<64x128xf32>
    %302 = math.exp %301 : vector<64x128xf32>
    %cst_86 = arith.constant 1.000000e+00 : f32
    %303 = vector.broadcast %cst_86 : f32 to vector<64x128xf32>
    %304 = arith.addf %303, %302 : vector<64x128xf32>
    %305 = arith.divf %303, %304 : vector<64x128xf32>
    %c0_87 = arith.constant 0 : index
    %c0_88 = arith.constant 0 : index
    %306 = vector.load %arg8[%c0_87, %c0_88] : memref<128x384xf32, #tpu.memory_space<vmem>>, vector<128x384xf32>
    %cst_89 = arith.constant dense<0.000000e+00> : vector<64x384xf32>
    %307 = tpu.matmul %305, %306, %cst_89 {dimension_numbers = #tpu.dot_dimension_numbers<[1], [0], [0], [1], [0, 0, 1, 1], [], []>} : vector<64x128xf32>, vector<128x384xf32>, vector<64x384xf32> -> vector<64x384xf32>
    %c0_90 = arith.constant 0 : index
    %c0_91 = arith.constant 0 : index
    %308 = vector.load %arg10[%c0_90, %c0_91] : memref<1x384xf32, #tpu.memory_space<vmem>>, vector<1x384xf32>
    %309 = vector.broadcast %308 : vector<1x384xf32> to vector<64x384xf32>
    %310 = arith.addf %307, %309 : vector<64x384xf32>
    %311 = vector.shape_cast %310 : vector<64x384xf32> to vector<8x8x384xf32>
    %c0_92 = arith.constant 0 : index
    %c0_93 = arith.constant 0 : index
    %c0_94 = arith.constant 0 : index
    %312 = vector.load %arg21[%c0_92, %c0_93, %c0_94] : memref<8x8x384xf32, #tpu.memory_space<vmem>>, vector<8x8x384xf32>
    tpu.vector_store %arg21[%c0_92, %c0_93, %c0_94], %311 {strides = array<i32>} : memref<8x8x384xf32, #tpu.memory_space<vmem>>, vector<8x8x384xf32>,
    %c0_95 = arith.constant 0 : index
    %c0_96 = arith.constant 0 : index
    %313 = vector.load %arg9[%c0_95, %c0_96] : memref<128x384xf32, #tpu.memory_space<vmem>>, vector<128x384xf32>
    %c0_97 = arith.constant 0 : index
    %c0_98 = arith.constant 0 : index
    %314 = vector.load %arg11[%c0_97, %c0_98] : memref<1x128xf32, #tpu.memory_space<vmem>>, vector<1x128xf32>
    %315 = vector.shape_cast %314 : vector<1x128xf32> to vector<1x128xf32>
    %316 = vector.broadcast %315 : vector<1x128xf32> to vector<8x128xf32>
    %cst_99 = arith.constant 0.000000e+00 : f32
    %317 = vector.broadcast %cst_99 : f32 to vector<8x128xf32>
    %c0_i32_100 = arith.constant 0 : i32
    %318 = arith.index_cast %c0_i32_100 : i32 to index
    %c0_101 = arith.constant 0 : index
    %c0_102 = arith.constant 0 : index
    %319 = vector.load %arg21[%318, %c0_101, %c0_102] : memref<8x8x384xf32, #tpu.memory_space<vmem>>, vector<1x8x384xf32>
    %320 = vector.shape_cast %319 : vector<1x8x384xf32> to vector<8x384xf32>
    %cst_103 = arith.constant dense<0.000000e+00> : vector<8x384xf32>
    %321 = tpu.matmul %317, %313, %cst_103 {dimension_numbers = #tpu.dot_dimension_numbers<[1], [0], [0], [1], [0, 0, 1, 1], [], []>} : vector<8x128xf32>, vector<128x384xf32>, vector<8x384xf32> -> vector<8x384xf32>
    %322 = vector.extract_strided_slice %320 {offsets = [0, 0], sizes = [8, 128], strides = [1, 1]} : vector<8x384xf32> to vector<8x128xf32>
    %323 = vector.extract_strided_slice %320 {offsets = [0, 128], sizes = [8, 128], strides = [1, 1]} : vector<8x384xf32> to vector<8x128xf32>
    %324 = vector.extract_strided_slice %320 {offsets = [0, 256], sizes = [8, 128], strides = [1, 1]} : vector<8x384xf32> to vector<8x128xf32>
    %325 = vector.extract_strided_slice %321 {offsets = [0, 0], sizes = [8, 128], strides = [1, 1]} : vector<8x384xf32> to vector<8x128xf32>
    %326 = vector.extract_strided_slice %321 {offsets = [0, 128], sizes = [8, 128], strides = [1, 1]} : vector<8x384xf32> to vector<8x128xf32>
    %327 = vector.extract_strided_slice %321 {offsets = [0, 256], sizes = [8, 128], strides = [1, 1]} : vector<8x384xf32> to vector<8x128xf32>
    %328 = arith.addf %322, %325 : vector<8x128xf32>
    %329 = arith.negf %328 : vector<8x128xf32>
    %330 = math.exp %329 : vector<8x128xf32>
    %cst_104 = arith.constant 1.000000e+00 : f32
    %331 = vector.broadcast %cst_104 : f32 to vector<8x128xf32>
    %332 = arith.addf %331, %330 : vector<8x128xf32>
    %333 = arith.divf %331, %332 : vector<8x128xf32>
    %334 = arith.addf %323, %326 : vector<8x128xf32>
    %335 = arith.negf %334 : vector<8x128xf32>
    %336 = math.exp %335 : vector<8x128xf32>
    %cst_105 = arith.constant 1.000000e+00 : f32
    %337 = vector.broadcast %cst_105 : f32 to vector<8x128xf32>
    %338 = arith.addf %337, %336 : vector<8x128xf32>
    %339 = arith.divf %337, %338 : vector<8x128xf32>
    %340 = arith.addf %327, %316 : vector<8x128xf32>
    %341 = arith.mulf %333, %340 : vector<8x128xf32>
    %342 = arith.addf %324, %341 : vector<8x128xf32>
    %343 = math.tanh %342 : vector<8x128xf32>
    %cst_106 = arith.constant 1.000000e+00 : f32
    %344 = vector.broadcast %cst_106 : f32 to vector<8x128xf32>
    %345 = arith.subf %344, %339 : vector<8x128xf32>
    %346 = arith.mulf %345, %343 : vector<8x128xf32>
    %347 = arith.mulf %339, %317 : vector<8x128xf32>
    %348 = arith.addf %346, %347 : vector<8x128xf32>
    %349 = arith.index_cast %c0_i32_100 : i32 to index
    %c0_107 = arith.constant 0 : index
    %c0_108 = arith.constant 0 : index
    %350 = vector.load %arg22[%349, %c0_107, %c0_108] : memref<8x8x128xf32, #tpu.memory_space<vmem>>, vector<1x8x128xf32>
    %351 = vector.shape_cast %350 : vector<1x8x128xf32> to vector<8x128xf32>
    %352 = vector.shape_cast %348 : vector<8x128xf32> to vector<1x8x128xf32>
    tpu.vector_store %arg22[%349, %c0_107, %c0_108], %352 {strides = array<i32>} : memref<8x8x128xf32, #tpu.memory_space<vmem>>, vector<1x8x128xf32>,
    %c1_i32_109 = arith.constant 1 : i32
    %353 = arith.index_cast %c1_i32_109 : i32 to index
    %c0_110 = arith.constant 0 : index
    %c0_111 = arith.constant 0 : index
    %354 = vector.load %arg21[%353, %c0_110, %c0_111] : memref<8x8x384xf32, #tpu.memory_space<vmem>>, vector<1x8x384xf32>
    %355 = vector.shape_cast %354 : vector<1x8x384xf32> to vector<8x384xf32>
    %cst_112 = arith.constant dense<0.000000e+00> : vector<8x384xf32>
    %356 = tpu.matmul %348, %313, %cst_112 {dimension_numbers = #tpu.dot_dimension_numbers<[1], [0], [0], [1], [0, 0, 1, 1], [], []>} : vector<8x128xf32>, vector<128x384xf32>, vector<8x384xf32> -> vector<8x384xf32>
    %357 = vector.extract_strided_slice %355 {offsets = [0, 0], sizes = [8, 128], strides = [1, 1]} : vector<8x384xf32> to vector<8x128xf32>
    %358 = vector.extract_strided_slice %355 {offsets = [0, 128], sizes = [8, 128], strides = [1, 1]} : vector<8x384xf32> to vector<8x128xf32>
    %359 = vector.extract_strided_slice %355 {offsets = [0, 256], sizes = [8, 128], strides = [1, 1]} : vector<8x384xf32> to vector<8x128xf32>
    %360 = vector.extract_strided_slice %356 {offsets = [0, 0], sizes = [8, 128], strides = [1, 1]} : vector<8x384xf32> to vector<8x128xf32>
    %361 = vector.extract_strided_slice %356 {offsets = [0, 128], sizes = [8, 128], strides = [1, 1]} : vector<8x384xf32> to vector<8x128xf32>
    %362 = vector.extract_strided_slice %356 {offsets = [0, 256], sizes = [8, 128], strides = [1, 1]} : vector<8x384xf32> to vector<8x128xf32>
    %363 = arith.addf %357, %360 : vector<8x128xf32>
    %364 = arith.negf %363 : vector<8x128xf32>
    %365 = math.exp %364 : vector<8x128xf32>
    %cst_113 = arith.constant 1.000000e+00 : f32
    %366 = vector.broadcast %cst_113 : f32 to vector<8x128xf32>
    %367 = arith.addf %366, %365 : vector<8x128xf32>
    %368 = arith.divf %366, %367 : vector<8x128xf32>
    %369 = arith.addf %358, %361 : vector<8x128xf32>
    %370 = arith.negf %369 : vector<8x128xf32>
    %371 = math.exp %370 : vector<8x128xf32>
    %cst_114 = arith.constant 1.000000e+00 : f32
    %372 = vector.broadcast %cst_114 : f32 to vector<8x128xf32>
    %373 = arith.addf %372, %371 : vector<8x128xf32>
    %374 = arith.divf %372, %373 : vector<8x128xf32>
    %375 = arith.addf %362, %316 : vector<8x128xf32>
    %376 = arith.mulf %368, %375 : vector<8x128xf32>
    %377 = arith.addf %359, %376 : vector<8x128xf32>
    %378 = math.tanh %377 : vector<8x128xf32>
    %cst_115 = arith.constant 1.000000e+00 : f32
    %379 = vector.broadcast %cst_115 : f32 to vector<8x128xf32>
    %380 = arith.subf %379, %374 : vector<8x128xf32>
    %381 = arith.mulf %380, %378 : vector<8x128xf32>
    %382 = arith.mulf %374, %348 : vector<8x128xf32>
    %383 = arith.addf %381, %382 : vector<8x128xf32>
    %384 = arith.index_cast %c1_i32_109 : i32 to index
    %c0_116 = arith.constant 0 : index
    %c0_117 = arith.constant 0 : index
    %385 = vector.load %arg22[%384, %c0_116, %c0_117] : memref<8x8x128xf32, #tpu.memory_space<vmem>>, vector<1x8x128xf32>
    %386 = vector.shape_cast %385 : vector<1x8x128xf32> to vector<8x128xf32>
    %387 = vector.shape_cast %383 : vector<8x128xf32> to vector<1x8x128xf32>
    tpu.vector_store %arg22[%384, %c0_116, %c0_117], %387 {strides = array<i32>} : memref<8x8x128xf32, #tpu.memory_space<vmem>>, vector<1x8x128xf32>,
    %c2_i32_118 = arith.constant 2 : i32
    %388 = arith.index_cast %c2_i32_118 : i32 to index
    %c0_119 = arith.constant 0 : index
    %c0_120 = arith.constant 0 : index
    %389 = vector.load %arg21[%388, %c0_119, %c0_120] : memref<8x8x384xf32, #tpu.memory_space<vmem>>, vector<1x8x384xf32>
    %390 = vector.shape_cast %389 : vector<1x8x384xf32> to vector<8x384xf32>
    %cst_121 = arith.constant dense<0.000000e+00> : vector<8x384xf32>
    %391 = tpu.matmul %383, %313, %cst_121 {dimension_numbers = #tpu.dot_dimension_numbers<[1], [0], [0], [1], [0, 0, 1, 1], [], []>} : vector<8x128xf32>, vector<128x384xf32>, vector<8x384xf32> -> vector<8x384xf32>
    %392 = vector.extract_strided_slice %390 {offsets = [0, 0], sizes = [8, 128], strides = [1, 1]} : vector<8x384xf32> to vector<8x128xf32>
    %393 = vector.extract_strided_slice %390 {offsets = [0, 128], sizes = [8, 128], strides = [1, 1]} : vector<8x384xf32> to vector<8x128xf32>
    %394 = vector.extract_strided_slice %390 {offsets = [0, 256], sizes = [8, 128], strides = [1, 1]} : vector<8x384xf32> to vector<8x128xf32>
    %395 = vector.extract_strided_slice %391 {offsets = [0, 0], sizes = [8, 128], strides = [1, 1]} : vector<8x384xf32> to vector<8x128xf32>
    %396 = vector.extract_strided_slice %391 {offsets = [0, 128], sizes = [8, 128], strides = [1, 1]} : vector<8x384xf32> to vector<8x128xf32>
    %397 = vector.extract_strided_slice %391 {offsets = [0, 256], sizes = [8, 128], strides = [1, 1]} : vector<8x384xf32> to vector<8x128xf32>
    %398 = arith.addf %392, %395 : vector<8x128xf32>
    %399 = arith.negf %398 : vector<8x128xf32>
    %400 = math.exp %399 : vector<8x128xf32>
    %cst_122 = arith.constant 1.000000e+00 : f32
    %401 = vector.broadcast %cst_122 : f32 to vector<8x128xf32>
    %402 = arith.addf %401, %400 : vector<8x128xf32>
    %403 = arith.divf %401, %402 : vector<8x128xf32>
    %404 = arith.addf %393, %396 : vector<8x128xf32>
    %405 = arith.negf %404 : vector<8x128xf32>
    %406 = math.exp %405 : vector<8x128xf32>
    %cst_123 = arith.constant 1.000000e+00 : f32
    %407 = vector.broadcast %cst_123 : f32 to vector<8x128xf32>
    %408 = arith.addf %407, %406 : vector<8x128xf32>
    %409 = arith.divf %407, %408 : vector<8x128xf32>
    %410 = arith.addf %397, %316 : vector<8x128xf32>
    %411 = arith.mulf %403, %410 : vector<8x128xf32>
    %412 = arith.addf %394, %411 : vector<8x128xf32>
    %413 = math.tanh %412 : vector<8x128xf32>
    %cst_124 = arith.constant 1.000000e+00 : f32
    %414 = vector.broadcast %cst_124 : f32 to vector<8x128xf32>
    %415 = arith.subf %414, %409 : vector<8x128xf32>
    %416 = arith.mulf %415, %413 : vector<8x128xf32>
    %417 = arith.mulf %409, %383 : vector<8x128xf32>
    %418 = arith.addf %416, %417 : vector<8x128xf32>
    %419 = arith.index_cast %c2_i32_118 : i32 to index
    %c0_125 = arith.constant 0 : index
    %c0_126 = arith.constant 0 : index
    %420 = vector.load %arg22[%419, %c0_125, %c0_126] : memref<8x8x128xf32, #tpu.memory_space<vmem>>, vector<1x8x128xf32>
    %421 = vector.shape_cast %420 : vector<1x8x128xf32> to vector<8x128xf32>
    %422 = vector.shape_cast %418 : vector<8x128xf32> to vector<1x8x128xf32>
    tpu.vector_store %arg22[%419, %c0_125, %c0_126], %422 {strides = array<i32>} : memref<8x8x128xf32, #tpu.memory_space<vmem>>, vector<1x8x128xf32>,
    %c3_i32_127 = arith.constant 3 : i32
    %423 = arith.index_cast %c3_i32_127 : i32 to index
    %c0_128 = arith.constant 0 : index
    %c0_129 = arith.constant 0 : index
    %424 = vector.load %arg21[%423, %c0_128, %c0_129] : memref<8x8x384xf32, #tpu.memory_space<vmem>>, vector<1x8x384xf32>
    %425 = vector.shape_cast %424 : vector<1x8x384xf32> to vector<8x384xf32>
    %cst_130 = arith.constant dense<0.000000e+00> : vector<8x384xf32>
    %426 = tpu.matmul %418, %313, %cst_130 {dimension_numbers = #tpu.dot_dimension_numbers<[1], [0], [0], [1], [0, 0, 1, 1], [], []>} : vector<8x128xf32>, vector<128x384xf32>, vector<8x384xf32> -> vector<8x384xf32>
    %427 = vector.extract_strided_slice %425 {offsets = [0, 0], sizes = [8, 128], strides = [1, 1]} : vector<8x384xf32> to vector<8x128xf32>
    %428 = vector.extract_strided_slice %425 {offsets = [0, 128], sizes = [8, 128], strides = [1, 1]} : vector<8x384xf32> to vector<8x128xf32>
    %429 = vector.extract_strided_slice %425 {offsets = [0, 256], sizes = [8, 128], strides = [1, 1]} : vector<8x384xf32> to vector<8x128xf32>
    %430 = vector.extract_strided_slice %426 {offsets = [0, 0], sizes = [8, 128], strides = [1, 1]} : vector<8x384xf32> to vector<8x128xf32>
    %431 = vector.extract_strided_slice %426 {offsets = [0, 128], sizes = [8, 128], strides = [1, 1]} : vector<8x384xf32> to vector<8x128xf32>
    %432 = vector.extract_strided_slice %426 {offsets = [0, 256], sizes = [8, 128], strides = [1, 1]} : vector<8x384xf32> to vector<8x128xf32>
    %433 = arith.addf %427, %430 : vector<8x128xf32>
    %434 = arith.negf %433 : vector<8x128xf32>
    %435 = math.exp %434 : vector<8x128xf32>
    %cst_131 = arith.constant 1.000000e+00 : f32
    %436 = vector.broadcast %cst_131 : f32 to vector<8x128xf32>
    %437 = arith.addf %436, %435 : vector<8x128xf32>
    %438 = arith.divf %436, %437 : vector<8x128xf32>
    %439 = arith.addf %428, %431 : vector<8x128xf32>
    %440 = arith.negf %439 : vector<8x128xf32>
    %441 = math.exp %440 : vector<8x128xf32>
    %cst_132 = arith.constant 1.000000e+00 : f32
    %442 = vector.broadcast %cst_132 : f32 to vector<8x128xf32>
    %443 = arith.addf %442, %441 : vector<8x128xf32>
    %444 = arith.divf %442, %443 : vector<8x128xf32>
    %445 = arith.addf %432, %316 : vector<8x128xf32>
    %446 = arith.mulf %438, %445 : vector<8x128xf32>
    %447 = arith.addf %429, %446 : vector<8x128xf32>
    %448 = math.tanh %447 : vector<8x128xf32>
    %cst_133 = arith.constant 1.000000e+00 : f32
    %449 = vector.broadcast %cst_133 : f32 to vector<8x128xf32>
    %450 = arith.subf %449, %444 : vector<8x128xf32>
    %451 = arith.mulf %450, %448 : vector<8x128xf32>
    %452 = arith.mulf %444, %418 : vector<8x128xf32>
    %453 = arith.addf %451, %452 : vector<8x128xf32>
    %454 = arith.index_cast %c3_i32_127 : i32 to index
    %c0_134 = arith.constant 0 : index
    %c0_135 = arith.constant 0 : index
    %455 = vector.load %arg22[%454, %c0_134, %c0_135] : memref<8x8x128xf32, #tpu.memory_space<vmem>>, vector<1x8x128xf32>
    %456 = vector.shape_cast %455 : vector<1x8x128xf32> to vector<8x128xf32>
    %457 = vector.shape_cast %453 : vector<8x128xf32> to vector<1x8x128xf32>
    tpu.vector_store %arg22[%454, %c0_134, %c0_135], %457 {strides = array<i32>} : memref<8x8x128xf32, #tpu.memory_space<vmem>>, vector<1x8x128xf32>,
    %c4_i32_136 = arith.constant 4 : i32
    %458 = arith.index_cast %c4_i32_136 : i32 to index
    %c0_137 = arith.constant 0 : index
    %c0_138 = arith.constant 0 : index
    %459 = vector.load %arg21[%458, %c0_137, %c0_138] : memref<8x8x384xf32, #tpu.memory_space<vmem>>, vector<1x8x384xf32>
    %460 = vector.shape_cast %459 : vector<1x8x384xf32> to vector<8x384xf32>
    %cst_139 = arith.constant dense<0.000000e+00> : vector<8x384xf32>
    %461 = tpu.matmul %453, %313, %cst_139 {dimension_numbers = #tpu.dot_dimension_numbers<[1], [0], [0], [1], [0, 0, 1, 1], [], []>} : vector<8x128xf32>, vector<128x384xf32>, vector<8x384xf32> -> vector<8x384xf32>
    %462 = vector.extract_strided_slice %460 {offsets = [0, 0], sizes = [8, 128], strides = [1, 1]} : vector<8x384xf32> to vector<8x128xf32>
    %463 = vector.extract_strided_slice %460 {offsets = [0, 128], sizes = [8, 128], strides = [1, 1]} : vector<8x384xf32> to vector<8x128xf32>
    %464 = vector.extract_strided_slice %460 {offsets = [0, 256], sizes = [8, 128], strides = [1, 1]} : vector<8x384xf32> to vector<8x128xf32>
    %465 = vector.extract_strided_slice %461 {offsets = [0, 0], sizes = [8, 128], strides = [1, 1]} : vector<8x384xf32> to vector<8x128xf32>
    %466 = vector.extract_strided_slice %461 {offsets = [0, 128], sizes = [8, 128], strides = [1, 1]} : vector<8x384xf32> to vector<8x128xf32>
    %467 = vector.extract_strided_slice %461 {offsets = [0, 256], sizes = [8, 128], strides = [1, 1]} : vector<8x384xf32> to vector<8x128xf32>
    %468 = arith.addf %462, %465 : vector<8x128xf32>
    %469 = arith.negf %468 : vector<8x128xf32>
    %470 = math.exp %469 : vector<8x128xf32>
    %cst_140 = arith.constant 1.000000e+00 : f32
    %471 = vector.broadcast %cst_140 : f32 to vector<8x128xf32>
    %472 = arith.addf %471, %470 : vector<8x128xf32>
    %473 = arith.divf %471, %472 : vector<8x128xf32>
    %474 = arith.addf %463, %466 : vector<8x128xf32>
    %475 = arith.negf %474 : vector<8x128xf32>
    %476 = math.exp %475 : vector<8x128xf32>
    %cst_141 = arith.constant 1.000000e+00 : f32
    %477 = vector.broadcast %cst_141 : f32 to vector<8x128xf32>
    %478 = arith.addf %477, %476 : vector<8x128xf32>
    %479 = arith.divf %477, %478 : vector<8x128xf32>
    %480 = arith.addf %467, %316 : vector<8x128xf32>
    %481 = arith.mulf %473, %480 : vector<8x128xf32>
    %482 = arith.addf %464, %481 : vector<8x128xf32>
    %483 = math.tanh %482 : vector<8x128xf32>
    %cst_142 = arith.constant 1.000000e+00 : f32
    %484 = vector.broadcast %cst_142 : f32 to vector<8x128xf32>
    %485 = arith.subf %484, %479 : vector<8x128xf32>
    %486 = arith.mulf %485, %483 : vector<8x128xf32>
    %487 = arith.mulf %479, %453 : vector<8x128xf32>
    %488 = arith.addf %486, %487 : vector<8x128xf32>
    %489 = arith.index_cast %c4_i32_136 : i32 to index
    %c0_143 = arith.constant 0 : index
    %c0_144 = arith.constant 0 : index
    %490 = vector.load %arg22[%489, %c0_143, %c0_144] : memref<8x8x128xf32, #tpu.memory_space<vmem>>, vector<1x8x128xf32>
    %491 = vector.shape_cast %490 : vector<1x8x128xf32> to vector<8x128xf32>
    %492 = vector.shape_cast %488 : vector<8x128xf32> to vector<1x8x128xf32>
    tpu.vector_store %arg22[%489, %c0_143, %c0_144], %492 {strides = array<i32>} : memref<8x8x128xf32, #tpu.memory_space<vmem>>, vector<1x8x128xf32>,
    %c5_i32_145 = arith.constant 5 : i32
    %493 = arith.index_cast %c5_i32_145 : i32 to index
    %c0_146 = arith.constant 0 : index
    %c0_147 = arith.constant 0 : index
    %494 = vector.load %arg21[%493, %c0_146, %c0_147] : memref<8x8x384xf32, #tpu.memory_space<vmem>>, vector<1x8x384xf32>
    %495 = vector.shape_cast %494 : vector<1x8x384xf32> to vector<8x384xf32>
    %cst_148 = arith.constant dense<0.000000e+00> : vector<8x384xf32>
    %496 = tpu.matmul %488, %313, %cst_148 {dimension_numbers = #tpu.dot_dimension_numbers<[1], [0], [0], [1], [0, 0, 1, 1], [], []>} : vector<8x128xf32>, vector<128x384xf32>, vector<8x384xf32> -> vector<8x384xf32>
    %497 = vector.extract_strided_slice %495 {offsets = [0, 0], sizes = [8, 128], strides = [1, 1]} : vector<8x384xf32> to vector<8x128xf32>
    %498 = vector.extract_strided_slice %495 {offsets = [0, 128], sizes = [8, 128], strides = [1, 1]} : vector<8x384xf32> to vector<8x128xf32>
    %499 = vector.extract_strided_slice %495 {offsets = [0, 256], sizes = [8, 128], strides = [1, 1]} : vector<8x384xf32> to vector<8x128xf32>
    %500 = vector.extract_strided_slice %496 {offsets = [0, 0], sizes = [8, 128], strides = [1, 1]} : vector<8x384xf32> to vector<8x128xf32>
    %501 = vector.extract_strided_slice %496 {offsets = [0, 128], sizes = [8, 128], strides = [1, 1]} : vector<8x384xf32> to vector<8x128xf32>
    %502 = vector.extract_strided_slice %496 {offsets = [0, 256], sizes = [8, 128], strides = [1, 1]} : vector<8x384xf32> to vector<8x128xf32>
    %503 = arith.addf %497, %500 : vector<8x128xf32>
    %504 = arith.negf %503 : vector<8x128xf32>
    %505 = math.exp %504 : vector<8x128xf32>
    %cst_149 = arith.constant 1.000000e+00 : f32
    %506 = vector.broadcast %cst_149 : f32 to vector<8x128xf32>
    %507 = arith.addf %506, %505 : vector<8x128xf32>
    %508 = arith.divf %506, %507 : vector<8x128xf32>
    %509 = arith.addf %498, %501 : vector<8x128xf32>
    %510 = arith.negf %509 : vector<8x128xf32>
    %511 = math.exp %510 : vector<8x128xf32>
    %cst_150 = arith.constant 1.000000e+00 : f32
    %512 = vector.broadcast %cst_150 : f32 to vector<8x128xf32>
    %513 = arith.addf %512, %511 : vector<8x128xf32>
    %514 = arith.divf %512, %513 : vector<8x128xf32>
    %515 = arith.addf %502, %316 : vector<8x128xf32>
    %516 = arith.mulf %508, %515 : vector<8x128xf32>
    %517 = arith.addf %499, %516 : vector<8x128xf32>
    %518 = math.tanh %517 : vector<8x128xf32>
    %cst_151 = arith.constant 1.000000e+00 : f32
    %519 = vector.broadcast %cst_151 : f32 to vector<8x128xf32>
    %520 = arith.subf %519, %514 : vector<8x128xf32>
    %521 = arith.mulf %520, %518 : vector<8x128xf32>
    %522 = arith.mulf %514, %488 : vector<8x128xf32>
    %523 = arith.addf %521, %522 : vector<8x128xf32>
    %524 = arith.index_cast %c5_i32_145 : i32 to index
    %c0_152 = arith.constant 0 : index
    %c0_153 = arith.constant 0 : index
    %525 = vector.load %arg22[%524, %c0_152, %c0_153] : memref<8x8x128xf32, #tpu.memory_space<vmem>>, vector<1x8x128xf32>
    %526 = vector.shape_cast %525 : vector<1x8x128xf32> to vector<8x128xf32>
    %527 = vector.shape_cast %523 : vector<8x128xf32> to vector<1x8x128xf32>
    tpu.vector_store %arg22[%524, %c0_152, %c0_153], %527 {strides = array<i32>} : memref<8x8x128xf32, #tpu.memory_space<vmem>>, vector<1x8x128xf32>,
    %c6_i32_154 = arith.constant 6 : i32
    %528 = arith.index_cast %c6_i32_154 : i32 to index
    %c0_155 = arith.constant 0 : index
    %c0_156 = arith.constant 0 : index
    %529 = vector.load %arg21[%528, %c0_155, %c0_156] : memref<8x8x384xf32, #tpu.memory_space<vmem>>, vector<1x8x384xf32>
    %530 = vector.shape_cast %529 : vector<1x8x384xf32> to vector<8x384xf32>
    %cst_157 = arith.constant dense<0.000000e+00> : vector<8x384xf32>
    %531 = tpu.matmul %523, %313, %cst_157 {dimension_numbers = #tpu.dot_dimension_numbers<[1], [0], [0], [1], [0, 0, 1, 1], [], []>} : vector<8x128xf32>, vector<128x384xf32>, vector<8x384xf32> -> vector<8x384xf32>
    %532 = vector.extract_strided_slice %530 {offsets = [0, 0], sizes = [8, 128], strides = [1, 1]} : vector<8x384xf32> to vector<8x128xf32>
    %533 = vector.extract_strided_slice %530 {offsets = [0, 128], sizes = [8, 128], strides = [1, 1]} : vector<8x384xf32> to vector<8x128xf32>
    %534 = vector.extract_strided_slice %530 {offsets = [0, 256], sizes = [8, 128], strides = [1, 1]} : vector<8x384xf32> to vector<8x128xf32>
    %535 = vector.extract_strided_slice %531 {offsets = [0, 0], sizes = [8, 128], strides = [1, 1]} : vector<8x384xf32> to vector<8x128xf32>
    %536 = vector.extract_strided_slice %531 {offsets = [0, 128], sizes = [8, 128], strides = [1, 1]} : vector<8x384xf32> to vector<8x128xf32>
    %537 = vector.extract_strided_slice %531 {offsets = [0, 256], sizes = [8, 128], strides = [1, 1]} : vector<8x384xf32> to vector<8x128xf32>
    %538 = arith.addf %532, %535 : vector<8x128xf32>
    %539 = arith.negf %538 : vector<8x128xf32>
    %540 = math.exp %539 : vector<8x128xf32>
    %cst_158 = arith.constant 1.000000e+00 : f32
    %541 = vector.broadcast %cst_158 : f32 to vector<8x128xf32>
    %542 = arith.addf %541, %540 : vector<8x128xf32>
    %543 = arith.divf %541, %542 : vector<8x128xf32>
    %544 = arith.addf %533, %536 : vector<8x128xf32>
    %545 = arith.negf %544 : vector<8x128xf32>
    %546 = math.exp %545 : vector<8x128xf32>
    %cst_159 = arith.constant 1.000000e+00 : f32
    %547 = vector.broadcast %cst_159 : f32 to vector<8x128xf32>
    %548 = arith.addf %547, %546 : vector<8x128xf32>
    %549 = arith.divf %547, %548 : vector<8x128xf32>
    %550 = arith.addf %537, %316 : vector<8x128xf32>
    %551 = arith.mulf %543, %550 : vector<8x128xf32>
    %552 = arith.addf %534, %551 : vector<8x128xf32>
    %553 = math.tanh %552 : vector<8x128xf32>
    %cst_160 = arith.constant 1.000000e+00 : f32
    %554 = vector.broadcast %cst_160 : f32 to vector<8x128xf32>
    %555 = arith.subf %554, %549 : vector<8x128xf32>
    %556 = arith.mulf %555, %553 : vector<8x128xf32>
    %557 = arith.mulf %549, %523 : vector<8x128xf32>
    %558 = arith.addf %556, %557 : vector<8x128xf32>
    %559 = arith.index_cast %c6_i32_154 : i32 to index
    %c0_161 = arith.constant 0 : index
    %c0_162 = arith.constant 0 : index
    %560 = vector.load %arg22[%559, %c0_161, %c0_162] : memref<8x8x128xf32, #tpu.memory_space<vmem>>, vector<1x8x128xf32>
    %561 = vector.shape_cast %560 : vector<1x8x128xf32> to vector<8x128xf32>
    %562 = vector.shape_cast %558 : vector<8x128xf32> to vector<1x8x128xf32>
    tpu.vector_store %arg22[%559, %c0_161, %c0_162], %562 {strides = array<i32>} : memref<8x8x128xf32, #tpu.memory_space<vmem>>, vector<1x8x128xf32>,
    %c7_i32_163 = arith.constant 7 : i32
    %563 = arith.index_cast %c7_i32_163 : i32 to index
    %c0_164 = arith.constant 0 : index
    %c0_165 = arith.constant 0 : index
    %564 = vector.load %arg21[%563, %c0_164, %c0_165] : memref<8x8x384xf32, #tpu.memory_space<vmem>>, vector<1x8x384xf32>
    %565 = vector.shape_cast %564 : vector<1x8x384xf32> to vector<8x384xf32>
    %cst_166 = arith.constant dense<0.000000e+00> : vector<8x384xf32>
    %566 = tpu.matmul %558, %313, %cst_166 {dimension_numbers = #tpu.dot_dimension_numbers<[1], [0], [0], [1], [0, 0, 1, 1], [], []>} : vector<8x128xf32>, vector<128x384xf32>, vector<8x384xf32> -> vector<8x384xf32>
    %567 = vector.extract_strided_slice %565 {offsets = [0, 0], sizes = [8, 128], strides = [1, 1]} : vector<8x384xf32> to vector<8x128xf32>
    %568 = vector.extract_strided_slice %565 {offsets = [0, 128], sizes = [8, 128], strides = [1, 1]} : vector<8x384xf32> to vector<8x128xf32>
    %569 = vector.extract_strided_slice %565 {offsets = [0, 256], sizes = [8, 128], strides = [1, 1]} : vector<8x384xf32> to vector<8x128xf32>
    %570 = vector.extract_strided_slice %566 {offsets = [0, 0], sizes = [8, 128], strides = [1, 1]} : vector<8x384xf32> to vector<8x128xf32>
    %571 = vector.extract_strided_slice %566 {offsets = [0, 128], sizes = [8, 128], strides = [1, 1]} : vector<8x384xf32> to vector<8x128xf32>
    %572 = vector.extract_strided_slice %566 {offsets = [0, 256], sizes = [8, 128], strides = [1, 1]} : vector<8x384xf32> to vector<8x128xf32>
    %573 = arith.addf %567, %570 : vector<8x128xf32>
    %574 = arith.negf %573 : vector<8x128xf32>
    %575 = math.exp %574 : vector<8x128xf32>
    %cst_167 = arith.constant 1.000000e+00 : f32
    %576 = vector.broadcast %cst_167 : f32 to vector<8x128xf32>
    %577 = arith.addf %576, %575 : vector<8x128xf32>
    %578 = arith.divf %576, %577 : vector<8x128xf32>
    %579 = arith.addf %568, %571 : vector<8x128xf32>
    %580 = arith.negf %579 : vector<8x128xf32>
    %581 = math.exp %580 : vector<8x128xf32>
    %cst_168 = arith.constant 1.000000e+00 : f32
    %582 = vector.broadcast %cst_168 : f32 to vector<8x128xf32>
    %583 = arith.addf %582, %581 : vector<8x128xf32>
    %584 = arith.divf %582, %583 : vector<8x128xf32>
    %585 = arith.addf %572, %316 : vector<8x128xf32>
    %586 = arith.mulf %578, %585 : vector<8x128xf32>
    %587 = arith.addf %569, %586 : vector<8x128xf32>
    %588 = math.tanh %587 : vector<8x128xf32>
    %cst_169 = arith.constant 1.000000e+00 : f32
    %589 = vector.broadcast %cst_169 : f32 to vector<8x128xf32>
    %590 = arith.subf %589, %584 : vector<8x128xf32>
    %591 = arith.mulf %590, %588 : vector<8x128xf32>
    %592 = arith.mulf %584, %558 : vector<8x128xf32>
    %593 = arith.addf %591, %592 : vector<8x128xf32>
    %594 = arith.index_cast %c7_i32_163 : i32 to index
    %c0_170 = arith.constant 0 : index
    %c0_171 = arith.constant 0 : index
    %595 = vector.load %arg22[%594, %c0_170, %c0_171] : memref<8x8x128xf32, #tpu.memory_space<vmem>>, vector<1x8x128xf32>
    %596 = vector.shape_cast %595 : vector<1x8x128xf32> to vector<8x128xf32>
    %597 = vector.shape_cast %593 : vector<8x128xf32> to vector<1x8x128xf32>
    tpu.vector_store %arg22[%594, %c0_170, %c0_171], %597 {strides = array<i32>} : memref<8x8x128xf32, #tpu.memory_space<vmem>>, vector<1x8x128xf32>,
    %c8_i32_172 = arith.constant 8 : i32
    %c0_173 = arith.constant 0 : index
    %c0_174 = arith.constant 0 : index
    %c0_175 = arith.constant 0 : index
    %598 = vector.load %arg22[%c0_173, %c0_174, %c0_175] : memref<8x8x128xf32, #tpu.memory_space<vmem>>, vector<8x8x128xf32>
    %599 = vector.shape_cast %598 : vector<8x8x128xf32> to vector<64x128xf32>
    %c0_176 = arith.constant 0 : index
    %c0_177 = arith.constant 0 : index
    %600 = vector.load %arg12[%c0_176, %c0_177] : memref<128x128xf32, #tpu.memory_space<vmem>>, vector<128x128xf32>
    %cst_178 = arith.constant dense<0.000000e+00> : vector<64x128xf32>
    %601 = tpu.matmul %599, %600, %cst_178 {dimension_numbers = #tpu.dot_dimension_numbers<[1], [0], [0], [1], [0, 0, 1, 1], [], []>} : vector<64x128xf32>, vector<128x128xf32>, vector<64x128xf32> -> vector<64x128xf32>
    %c0_179 = arith.constant 0 : index
    %c0_180 = arith.constant 0 : index
    %602 = vector.load %arg13[%c0_179, %c0_180] : memref<1x128xf32, #tpu.memory_space<vmem>>, vector<1x128xf32>
    %603 = vector.broadcast %602 : vector<1x128xf32> to vector<64x128xf32>
    %604 = arith.addf %601, %603 : vector<64x128xf32>
    %605 = arith.negf %604 : vector<64x128xf32>
    %606 = math.exp %605 : vector<64x128xf32>
    %cst_181 = arith.constant 1.000000e+00 : f32
    %607 = vector.broadcast %cst_181 : f32 to vector<64x128xf32>
    %608 = arith.addf %607, %606 : vector<64x128xf32>
    %609 = arith.divf %607, %608 : vector<64x128xf32>
    %c0_182 = arith.constant 0 : index
    %c0_183 = arith.constant 0 : index
    %610 = vector.load %arg14[%c0_182, %c0_183] : memref<128x384xf32, #tpu.memory_space<vmem>>, vector<128x384xf32>
    %cst_184 = arith.constant dense<0.000000e+00> : vector<64x384xf32>
    %611 = tpu.matmul %609, %610, %cst_184 {dimension_numbers = #tpu.dot_dimension_numbers<[1], [0], [0], [1], [0, 0, 1, 1], [], []>} : vector<64x128xf32>, vector<128x384xf32>, vector<64x384xf32> -> vector<64x384xf32>
    %c0_185 = arith.constant 0 : index
    %c0_186 = arith.constant 0 : index
    %612 = vector.load %arg16[%c0_185, %c0_186] : memref<1x384xf32, #tpu.memory_space<vmem>>, vector<1x384xf32>
    %613 = vector.broadcast %612 : vector<1x384xf32> to vector<64x384xf32>
    %614 = arith.addf %611, %613 : vector<64x384xf32>
    %615 = vector.shape_cast %614 : vector<64x384xf32> to vector<8x8x384xf32>
    %c0_187 = arith.constant 0 : index
    %c0_188 = arith.constant 0 : index
    %c0_189 = arith.constant 0 : index
    %616 = vector.load %arg21[%c0_187, %c0_188, %c0_189] : memref<8x8x384xf32, #tpu.memory_space<vmem>>, vector<8x8x384xf32>
    tpu.vector_store %arg21[%c0_187, %c0_188, %c0_189], %615 {strides = array<i32>} : memref<8x8x384xf32, #tpu.memory_space<vmem>>, vector<8x8x384xf32>,
    %c0_190 = arith.constant 0 : index
    %c0_191 = arith.constant 0 : index
    %617 = vector.load %arg15[%c0_190, %c0_191] : memref<128x384xf32, #tpu.memory_space<vmem>>, vector<128x384xf32>
    %c0_192 = arith.constant 0 : index
    %c0_193 = arith.constant 0 : index
    %618 = vector.load %arg17[%c0_192, %c0_193] : memref<1x128xf32, #tpu.memory_space<vmem>>, vector<1x128xf32>
    %619 = vector.shape_cast %618 : vector<1x128xf32> to vector<1x128xf32>
    %620 = vector.broadcast %619 : vector<1x128xf32> to vector<8x128xf32>
    %cst_194 = arith.constant 0.000000e+00 : f32
    %621 = vector.broadcast %cst_194 : f32 to vector<8x128xf32>
    %c0_i32_195 = arith.constant 0 : i32
    %622 = arith.index_cast %c0_i32_195 : i32 to index
    %c0_196 = arith.constant 0 : index
    %c0_197 = arith.constant 0 : index
    %623 = vector.load %arg21[%622, %c0_196, %c0_197] : memref<8x8x384xf32, #tpu.memory_space<vmem>>, vector<1x8x384xf32>
    %624 = vector.shape_cast %623 : vector<1x8x384xf32> to vector<8x384xf32>
    %cst_198 = arith.constant dense<0.000000e+00> : vector<8x384xf32>
    %625 = tpu.matmul %621, %617, %cst_198 {dimension_numbers = #tpu.dot_dimension_numbers<[1], [0], [0], [1], [0, 0, 1, 1], [], []>} : vector<8x128xf32>, vector<128x384xf32>, vector<8x384xf32> -> vector<8x384xf32>
    %626 = vector.extract_strided_slice %624 {offsets = [0, 0], sizes = [8, 128], strides = [1, 1]} : vector<8x384xf32> to vector<8x128xf32>
    %627 = vector.extract_strided_slice %624 {offsets = [0, 128], sizes = [8, 128], strides = [1, 1]} : vector<8x384xf32> to vector<8x128xf32>
    %628 = vector.extract_strided_slice %624 {offsets = [0, 256], sizes = [8, 128], strides = [1, 1]} : vector<8x384xf32> to vector<8x128xf32>
    %629 = vector.extract_strided_slice %625 {offsets = [0, 0], sizes = [8, 128], strides = [1, 1]} : vector<8x384xf32> to vector<8x128xf32>
    %630 = vector.extract_strided_slice %625 {offsets = [0, 128], sizes = [8, 128], strides = [1, 1]} : vector<8x384xf32> to vector<8x128xf32>
    %631 = vector.extract_strided_slice %625 {offsets = [0, 256], sizes = [8, 128], strides = [1, 1]} : vector<8x384xf32> to vector<8x128xf32>
    %632 = arith.addf %626, %629 : vector<8x128xf32>
    %633 = arith.negf %632 : vector<8x128xf32>
    %634 = math.exp %633 : vector<8x128xf32>
    %cst_199 = arith.constant 1.000000e+00 : f32
    %635 = vector.broadcast %cst_199 : f32 to vector<8x128xf32>
    %636 = arith.addf %635, %634 : vector<8x128xf32>
    %637 = arith.divf %635, %636 : vector<8x128xf32>
    %638 = arith.addf %627, %630 : vector<8x128xf32>
    %639 = arith.negf %638 : vector<8x128xf32>
    %640 = math.exp %639 : vector<8x128xf32>
    %cst_200 = arith.constant 1.000000e+00 : f32
    %641 = vector.broadcast %cst_200 : f32 to vector<8x128xf32>
    %642 = arith.addf %641, %640 : vector<8x128xf32>
    %643 = arith.divf %641, %642 : vector<8x128xf32>
    %644 = arith.addf %631, %620 : vector<8x128xf32>
    %645 = arith.mulf %637, %644 : vector<8x128xf32>
    %646 = arith.addf %628, %645 : vector<8x128xf32>
    %647 = math.tanh %646 : vector<8x128xf32>
    %cst_201 = arith.constant 1.000000e+00 : f32
    %648 = vector.broadcast %cst_201 : f32 to vector<8x128xf32>
    %649 = arith.subf %648, %643 : vector<8x128xf32>
    %650 = arith.mulf %649, %647 : vector<8x128xf32>
    %651 = arith.mulf %643, %621 : vector<8x128xf32>
    %652 = arith.addf %650, %651 : vector<8x128xf32>
    %653 = arith.index_cast %c0_i32_195 : i32 to index
    %c0_202 = arith.constant 0 : index
    %c0_203 = arith.constant 0 : index
    %654 = vector.load %arg22[%653, %c0_202, %c0_203] : memref<8x8x128xf32, #tpu.memory_space<vmem>>, vector<1x8x128xf32>
    %655 = vector.shape_cast %654 : vector<1x8x128xf32> to vector<8x128xf32>
    %656 = vector.shape_cast %652 : vector<8x128xf32> to vector<1x8x128xf32>
    tpu.vector_store %arg22[%653, %c0_202, %c0_203], %656 {strides = array<i32>} : memref<8x8x128xf32, #tpu.memory_space<vmem>>, vector<1x8x128xf32>,
    %c1_i32_204 = arith.constant 1 : i32
    %657 = arith.index_cast %c1_i32_204 : i32 to index
    %c0_205 = arith.constant 0 : index
    %c0_206 = arith.constant 0 : index
    %658 = vector.load %arg21[%657, %c0_205, %c0_206] : memref<8x8x384xf32, #tpu.memory_space<vmem>>, vector<1x8x384xf32>
    %659 = vector.shape_cast %658 : vector<1x8x384xf32> to vector<8x384xf32>
    %cst_207 = arith.constant dense<0.000000e+00> : vector<8x384xf32>
    %660 = tpu.matmul %652, %617, %cst_207 {dimension_numbers = #tpu.dot_dimension_numbers<[1], [0], [0], [1], [0, 0, 1, 1], [], []>} : vector<8x128xf32>, vector<128x384xf32>, vector<8x384xf32> -> vector<8x384xf32>
    %661 = vector.extract_strided_slice %659 {offsets = [0, 0], sizes = [8, 128], strides = [1, 1]} : vector<8x384xf32> to vector<8x128xf32>
    %662 = vector.extract_strided_slice %659 {offsets = [0, 128], sizes = [8, 128], strides = [1, 1]} : vector<8x384xf32> to vector<8x128xf32>
    %663 = vector.extract_strided_slice %659 {offsets = [0, 256], sizes = [8, 128], strides = [1, 1]} : vector<8x384xf32> to vector<8x128xf32>
    %664 = vector.extract_strided_slice %660 {offsets = [0, 0], sizes = [8, 128], strides = [1, 1]} : vector<8x384xf32> to vector<8x128xf32>
    %665 = vector.extract_strided_slice %660 {offsets = [0, 128], sizes = [8, 128], strides = [1, 1]} : vector<8x384xf32> to vector<8x128xf32>
    %666 = vector.extract_strided_slice %660 {offsets = [0, 256], sizes = [8, 128], strides = [1, 1]} : vector<8x384xf32> to vector<8x128xf32>
    %667 = arith.addf %661, %664 : vector<8x128xf32>
    %668 = arith.negf %667 : vector<8x128xf32>
    %669 = math.exp %668 : vector<8x128xf32>
    %cst_208 = arith.constant 1.000000e+00 : f32
    %670 = vector.broadcast %cst_208 : f32 to vector<8x128xf32>
    %671 = arith.addf %670, %669 : vector<8x128xf32>
    %672 = arith.divf %670, %671 : vector<8x128xf32>
    %673 = arith.addf %662, %665 : vector<8x128xf32>
    %674 = arith.negf %673 : vector<8x128xf32>
    %675 = math.exp %674 : vector<8x128xf32>
    %cst_209 = arith.constant 1.000000e+00 : f32
    %676 = vector.broadcast %cst_209 : f32 to vector<8x128xf32>
    %677 = arith.addf %676, %675 : vector<8x128xf32>
    %678 = arith.divf %676, %677 : vector<8x128xf32>
    %679 = arith.addf %666, %620 : vector<8x128xf32>
    %680 = arith.mulf %672, %679 : vector<8x128xf32>
    %681 = arith.addf %663, %680 : vector<8x128xf32>
    %682 = math.tanh %681 : vector<8x128xf32>
    %cst_210 = arith.constant 1.000000e+00 : f32
    %683 = vector.broadcast %cst_210 : f32 to vector<8x128xf32>
    %684 = arith.subf %683, %678 : vector<8x128xf32>
    %685 = arith.mulf %684, %682 : vector<8x128xf32>
    %686 = arith.mulf %678, %652 : vector<8x128xf32>
    %687 = arith.addf %685, %686 : vector<8x128xf32>
    %688 = arith.index_cast %c1_i32_204 : i32 to index
    %c0_211 = arith.constant 0 : index
    %c0_212 = arith.constant 0 : index
    %689 = vector.load %arg22[%688, %c0_211, %c0_212] : memref<8x8x128xf32, #tpu.memory_space<vmem>>, vector<1x8x128xf32>
    %690 = vector.shape_cast %689 : vector<1x8x128xf32> to vector<8x128xf32>
    %691 = vector.shape_cast %687 : vector<8x128xf32> to vector<1x8x128xf32>
    tpu.vector_store %arg22[%688, %c0_211, %c0_212], %691 {strides = array<i32>} : memref<8x8x128xf32, #tpu.memory_space<vmem>>, vector<1x8x128xf32>,
    %c2_i32_213 = arith.constant 2 : i32
    %692 = arith.index_cast %c2_i32_213 : i32 to index
    %c0_214 = arith.constant 0 : index
    %c0_215 = arith.constant 0 : index
    %693 = vector.load %arg21[%692, %c0_214, %c0_215] : memref<8x8x384xf32, #tpu.memory_space<vmem>>, vector<1x8x384xf32>
    %694 = vector.shape_cast %693 : vector<1x8x384xf32> to vector<8x384xf32>
    %cst_216 = arith.constant dense<0.000000e+00> : vector<8x384xf32>
    %695 = tpu.matmul %687, %617, %cst_216 {dimension_numbers = #tpu.dot_dimension_numbers<[1], [0], [0], [1], [0, 0, 1, 1], [], []>} : vector<8x128xf32>, vector<128x384xf32>, vector<8x384xf32> -> vector<8x384xf32>
    %696 = vector.extract_strided_slice %694 {offsets = [0, 0], sizes = [8, 128], strides = [1, 1]} : vector<8x384xf32> to vector<8x128xf32>
    %697 = vector.extract_strided_slice %694 {offsets = [0, 128], sizes = [8, 128], strides = [1, 1]} : vector<8x384xf32> to vector<8x128xf32>
    %698 = vector.extract_strided_slice %694 {offsets = [0, 256], sizes = [8, 128], strides = [1, 1]} : vector<8x384xf32> to vector<8x128xf32>
    %699 = vector.extract_strided_slice %695 {offsets = [0, 0], sizes = [8, 128], strides = [1, 1]} : vector<8x384xf32> to vector<8x128xf32>
    %700 = vector.extract_strided_slice %695 {offsets = [0, 128], sizes = [8, 128], strides = [1, 1]} : vector<8x384xf32> to vector<8x128xf32>
    %701 = vector.extract_strided_slice %695 {offsets = [0, 256], sizes = [8, 128], strides = [1, 1]} : vector<8x384xf32> to vector<8x128xf32>
    %702 = arith.addf %696, %699 : vector<8x128xf32>
    %703 = arith.negf %702 : vector<8x128xf32>
    %704 = math.exp %703 : vector<8x128xf32>
    %cst_217 = arith.constant 1.000000e+00 : f32
    %705 = vector.broadcast %cst_217 : f32 to vector<8x128xf32>
    %706 = arith.addf %705, %704 : vector<8x128xf32>
    %707 = arith.divf %705, %706 : vector<8x128xf32>
    %708 = arith.addf %697, %700 : vector<8x128xf32>
    %709 = arith.negf %708 : vector<8x128xf32>
    %710 = math.exp %709 : vector<8x128xf32>
    %cst_218 = arith.constant 1.000000e+00 : f32
    %711 = vector.broadcast %cst_218 : f32 to vector<8x128xf32>
    %712 = arith.addf %711, %710 : vector<8x128xf32>
    %713 = arith.divf %711, %712 : vector<8x128xf32>
    %714 = arith.addf %701, %620 : vector<8x128xf32>
    %715 = arith.mulf %707, %714 : vector<8x128xf32>
    %716 = arith.addf %698, %715 : vector<8x128xf32>
    %717 = math.tanh %716 : vector<8x128xf32>
    %cst_219 = arith.constant 1.000000e+00 : f32
    %718 = vector.broadcast %cst_219 : f32 to vector<8x128xf32>
    %719 = arith.subf %718, %713 : vector<8x128xf32>
    %720 = arith.mulf %719, %717 : vector<8x128xf32>
    %721 = arith.mulf %713, %687 : vector<8x128xf32>
    %722 = arith.addf %720, %721 : vector<8x128xf32>
    %723 = arith.index_cast %c2_i32_213 : i32 to index
    %c0_220 = arith.constant 0 : index
    %c0_221 = arith.constant 0 : index
    %724 = vector.load %arg22[%723, %c0_220, %c0_221] : memref<8x8x128xf32, #tpu.memory_space<vmem>>, vector<1x8x128xf32>
    %725 = vector.shape_cast %724 : vector<1x8x128xf32> to vector<8x128xf32>
    %726 = vector.shape_cast %722 : vector<8x128xf32> to vector<1x8x128xf32>
    tpu.vector_store %arg22[%723, %c0_220, %c0_221], %726 {strides = array<i32>} : memref<8x8x128xf32, #tpu.memory_space<vmem>>, vector<1x8x128xf32>,
    %c3_i32_222 = arith.constant 3 : i32
    %727 = arith.index_cast %c3_i32_222 : i32 to index
    %c0_223 = arith.constant 0 : index
    %c0_224 = arith.constant 0 : index
    %728 = vector.load %arg21[%727, %c0_223, %c0_224] : memref<8x8x384xf32, #tpu.memory_space<vmem>>, vector<1x8x384xf32>
    %729 = vector.shape_cast %728 : vector<1x8x384xf32> to vector<8x384xf32>
    %cst_225 = arith.constant dense<0.000000e+00> : vector<8x384xf32>
    %730 = tpu.matmul %722, %617, %cst_225 {dimension_numbers = #tpu.dot_dimension_numbers<[1], [0], [0], [1], [0, 0, 1, 1], [], []>} : vector<8x128xf32>, vector<128x384xf32>, vector<8x384xf32> -> vector<8x384xf32>
    %731 = vector.extract_strided_slice %729 {offsets = [0, 0], sizes = [8, 128], strides = [1, 1]} : vector<8x384xf32> to vector<8x128xf32>
    %732 = vector.extract_strided_slice %729 {offsets = [0, 128], sizes = [8, 128], strides = [1, 1]} : vector<8x384xf32> to vector<8x128xf32>
    %733 = vector.extract_strided_slice %729 {offsets = [0, 256], sizes = [8, 128], strides = [1, 1]} : vector<8x384xf32> to vector<8x128xf32>
    %734 = vector.extract_strided_slice %730 {offsets = [0, 0], sizes = [8, 128], strides = [1, 1]} : vector<8x384xf32> to vector<8x128xf32>
    %735 = vector.extract_strided_slice %730 {offsets = [0, 128], sizes = [8, 128], strides = [1, 1]} : vector<8x384xf32> to vector<8x128xf32>
    %736 = vector.extract_strided_slice %730 {offsets = [0, 256], sizes = [8, 128], strides = [1, 1]} : vector<8x384xf32> to vector<8x128xf32>
    %737 = arith.addf %731, %734 : vector<8x128xf32>
    %738 = arith.negf %737 : vector<8x128xf32>
    %739 = math.exp %738 : vector<8x128xf32>
    %cst_226 = arith.constant 1.000000e+00 : f32
    %740 = vector.broadcast %cst_226 : f32 to vector<8x128xf32>
    %741 = arith.addf %740, %739 : vector<8x128xf32>
    %742 = arith.divf %740, %741 : vector<8x128xf32>
    %743 = arith.addf %732, %735 : vector<8x128xf32>
    %744 = arith.negf %743 : vector<8x128xf32>
    %745 = math.exp %744 : vector<8x128xf32>
    %cst_227 = arith.constant 1.000000e+00 : f32
    %746 = vector.broadcast %cst_227 : f32 to vector<8x128xf32>
    %747 = arith.addf %746, %745 : vector<8x128xf32>
    %748 = arith.divf %746, %747 : vector<8x128xf32>
    %749 = arith.addf %736, %620 : vector<8x128xf32>
    %750 = arith.mulf %742, %749 : vector<8x128xf32>
    %751 = arith.addf %733, %750 : vector<8x128xf32>
    %752 = math.tanh %751 : vector<8x128xf32>
    %cst_228 = arith.constant 1.000000e+00 : f32
    %753 = vector.broadcast %cst_228 : f32 to vector<8x128xf32>
    %754 = arith.subf %753, %748 : vector<8x128xf32>
    %755 = arith.mulf %754, %752 : vector<8x128xf32>
    %756 = arith.mulf %748, %722 : vector<8x128xf32>
    %757 = arith.addf %755, %756 : vector<8x128xf32>
    %758 = arith.index_cast %c3_i32_222 : i32 to index
    %c0_229 = arith.constant 0 : index
    %c0_230 = arith.constant 0 : index
    %759 = vector.load %arg22[%758, %c0_229, %c0_230] : memref<8x8x128xf32, #tpu.memory_space<vmem>>, vector<1x8x128xf32>
    %760 = vector.shape_cast %759 : vector<1x8x128xf32> to vector<8x128xf32>
    %761 = vector.shape_cast %757 : vector<8x128xf32> to vector<1x8x128xf32>
    tpu.vector_store %arg22[%758, %c0_229, %c0_230], %761 {strides = array<i32>} : memref<8x8x128xf32, #tpu.memory_space<vmem>>, vector<1x8x128xf32>,
    %c4_i32_231 = arith.constant 4 : i32
    %762 = arith.index_cast %c4_i32_231 : i32 to index
    %c0_232 = arith.constant 0 : index
    %c0_233 = arith.constant 0 : index
    %763 = vector.load %arg21[%762, %c0_232, %c0_233] : memref<8x8x384xf32, #tpu.memory_space<vmem>>, vector<1x8x384xf32>
    %764 = vector.shape_cast %763 : vector<1x8x384xf32> to vector<8x384xf32>
    %cst_234 = arith.constant dense<0.000000e+00> : vector<8x384xf32>
    %765 = tpu.matmul %757, %617, %cst_234 {dimension_numbers = #tpu.dot_dimension_numbers<[1], [0], [0], [1], [0, 0, 1, 1], [], []>} : vector<8x128xf32>, vector<128x384xf32>, vector<8x384xf32> -> vector<8x384xf32>
    %766 = vector.extract_strided_slice %764 {offsets = [0, 0], sizes = [8, 128], strides = [1, 1]} : vector<8x384xf32> to vector<8x128xf32>
    %767 = vector.extract_strided_slice %764 {offsets = [0, 128], sizes = [8, 128], strides = [1, 1]} : vector<8x384xf32> to vector<8x128xf32>
    %768 = vector.extract_strided_slice %764 {offsets = [0, 256], sizes = [8, 128], strides = [1, 1]} : vector<8x384xf32> to vector<8x128xf32>
    %769 = vector.extract_strided_slice %765 {offsets = [0, 0], sizes = [8, 128], strides = [1, 1]} : vector<8x384xf32> to vector<8x128xf32>
    %770 = vector.extract_strided_slice %765 {offsets = [0, 128], sizes = [8, 128], strides = [1, 1]} : vector<8x384xf32> to vector<8x128xf32>
    %771 = vector.extract_strided_slice %765 {offsets = [0, 256], sizes = [8, 128], strides = [1, 1]} : vector<8x384xf32> to vector<8x128xf32>
    %772 = arith.addf %766, %769 : vector<8x128xf32>
    %773 = arith.negf %772 : vector<8x128xf32>
    %774 = math.exp %773 : vector<8x128xf32>
    %cst_235 = arith.constant 1.000000e+00 : f32
    %775 = vector.broadcast %cst_235 : f32 to vector<8x128xf32>
    %776 = arith.addf %775, %774 : vector<8x128xf32>
    %777 = arith.divf %775, %776 : vector<8x128xf32>
    %778 = arith.addf %767, %770 : vector<8x128xf32>
    %779 = arith.negf %778 : vector<8x128xf32>
    %780 = math.exp %779 : vector<8x128xf32>
    %cst_236 = arith.constant 1.000000e+00 : f32
    %781 = vector.broadcast %cst_236 : f32 to vector<8x128xf32>
    %782 = arith.addf %781, %780 : vector<8x128xf32>
    %783 = arith.divf %781, %782 : vector<8x128xf32>
    %784 = arith.addf %771, %620 : vector<8x128xf32>
    %785 = arith.mulf %777, %784 : vector<8x128xf32>
    %786 = arith.addf %768, %785 : vector<8x128xf32>
    %787 = math.tanh %786 : vector<8x128xf32>
    %cst_237 = arith.constant 1.000000e+00 : f32
    %788 = vector.broadcast %cst_237 : f32 to vector<8x128xf32>
    %789 = arith.subf %788, %783 : vector<8x128xf32>
    %790 = arith.mulf %789, %787 : vector<8x128xf32>
    %791 = arith.mulf %783, %757 : vector<8x128xf32>
    %792 = arith.addf %790, %791 : vector<8x128xf32>
    %793 = arith.index_cast %c4_i32_231 : i32 to index
    %c0_238 = arith.constant 0 : index
    %c0_239 = arith.constant 0 : index
    %794 = vector.load %arg22[%793, %c0_238, %c0_239] : memref<8x8x128xf32, #tpu.memory_space<vmem>>, vector<1x8x128xf32>
    %795 = vector.shape_cast %794 : vector<1x8x128xf32> to vector<8x128xf32>
    %796 = vector.shape_cast %792 : vector<8x128xf32> to vector<1x8x128xf32>
    tpu.vector_store %arg22[%793, %c0_238, %c0_239], %796 {strides = array<i32>} : memref<8x8x128xf32, #tpu.memory_space<vmem>>, vector<1x8x128xf32>,
    %c5_i32_240 = arith.constant 5 : i32
    %797 = arith.index_cast %c5_i32_240 : i32 to index
    %c0_241 = arith.constant 0 : index
    %c0_242 = arith.constant 0 : index
    %798 = vector.load %arg21[%797, %c0_241, %c0_242] : memref<8x8x384xf32, #tpu.memory_space<vmem>>, vector<1x8x384xf32>
    %799 = vector.shape_cast %798 : vector<1x8x384xf32> to vector<8x384xf32>
    %cst_243 = arith.constant dense<0.000000e+00> : vector<8x384xf32>
    %800 = tpu.matmul %792, %617, %cst_243 {dimension_numbers = #tpu.dot_dimension_numbers<[1], [0], [0], [1], [0, 0, 1, 1], [], []>} : vector<8x128xf32>, vector<128x384xf32>, vector<8x384xf32> -> vector<8x384xf32>
    %801 = vector.extract_strided_slice %799 {offsets = [0, 0], sizes = [8, 128], strides = [1, 1]} : vector<8x384xf32> to vector<8x128xf32>
    %802 = vector.extract_strided_slice %799 {offsets = [0, 128], sizes = [8, 128], strides = [1, 1]} : vector<8x384xf32> to vector<8x128xf32>
    %803 = vector.extract_strided_slice %799 {offsets = [0, 256], sizes = [8, 128], strides = [1, 1]} : vector<8x384xf32> to vector<8x128xf32>
    %804 = vector.extract_strided_slice %800 {offsets = [0, 0], sizes = [8, 128], strides = [1, 1]} : vector<8x384xf32> to vector<8x128xf32>
    %805 = vector.extract_strided_slice %800 {offsets = [0, 128], sizes = [8, 128], strides = [1, 1]} : vector<8x384xf32> to vector<8x128xf32>
    %806 = vector.extract_strided_slice %800 {offsets = [0, 256], sizes = [8, 128], strides = [1, 1]} : vector<8x384xf32> to vector<8x128xf32>
    %807 = arith.addf %801, %804 : vector<8x128xf32>
    %808 = arith.negf %807 : vector<8x128xf32>
    %809 = math.exp %808 : vector<8x128xf32>
    %cst_244 = arith.constant 1.000000e+00 : f32
    %810 = vector.broadcast %cst_244 : f32 to vector<8x128xf32>
    %811 = arith.addf %810, %809 : vector<8x128xf32>
    %812 = arith.divf %810, %811 : vector<8x128xf32>
    %813 = arith.addf %802, %805 : vector<8x128xf32>
    %814 = arith.negf %813 : vector<8x128xf32>
    %815 = math.exp %814 : vector<8x128xf32>
    %cst_245 = arith.constant 1.000000e+00 : f32
    %816 = vector.broadcast %cst_245 : f32 to vector<8x128xf32>
    %817 = arith.addf %816, %815 : vector<8x128xf32>
    %818 = arith.divf %816, %817 : vector<8x128xf32>
    %819 = arith.addf %806, %620 : vector<8x128xf32>
    %820 = arith.mulf %812, %819 : vector<8x128xf32>
    %821 = arith.addf %803, %820 : vector<8x128xf32>
    %822 = math.tanh %821 : vector<8x128xf32>
    %cst_246 = arith.constant 1.000000e+00 : f32
    %823 = vector.broadcast %cst_246 : f32 to vector<8x128xf32>
    %824 = arith.subf %823, %818 : vector<8x128xf32>
    %825 = arith.mulf %824, %822 : vector<8x128xf32>
    %826 = arith.mulf %818, %792 : vector<8x128xf32>
    %827 = arith.addf %825, %826 : vector<8x128xf32>
    %828 = arith.index_cast %c5_i32_240 : i32 to index
    %c0_247 = arith.constant 0 : index
    %c0_248 = arith.constant 0 : index
    %829 = vector.load %arg22[%828, %c0_247, %c0_248] : memref<8x8x128xf32, #tpu.memory_space<vmem>>, vector<1x8x128xf32>
    %830 = vector.shape_cast %829 : vector<1x8x128xf32> to vector<8x128xf32>
    %831 = vector.shape_cast %827 : vector<8x128xf32> to vector<1x8x128xf32>
    tpu.vector_store %arg22[%828, %c0_247, %c0_248], %831 {strides = array<i32>} : memref<8x8x128xf32, #tpu.memory_space<vmem>>, vector<1x8x128xf32>,
    %c6_i32_249 = arith.constant 6 : i32
    %832 = arith.index_cast %c6_i32_249 : i32 to index
    %c0_250 = arith.constant 0 : index
    %c0_251 = arith.constant 0 : index
    %833 = vector.load %arg21[%832, %c0_250, %c0_251] : memref<8x8x384xf32, #tpu.memory_space<vmem>>, vector<1x8x384xf32>
    %834 = vector.shape_cast %833 : vector<1x8x384xf32> to vector<8x384xf32>
    %cst_252 = arith.constant dense<0.000000e+00> : vector<8x384xf32>
    %835 = tpu.matmul %827, %617, %cst_252 {dimension_numbers = #tpu.dot_dimension_numbers<[1], [0], [0], [1], [0, 0, 1, 1], [], []>} : vector<8x128xf32>, vector<128x384xf32>, vector<8x384xf32> -> vector<8x384xf32>
    %836 = vector.extract_strided_slice %834 {offsets = [0, 0], sizes = [8, 128], strides = [1, 1]} : vector<8x384xf32> to vector<8x128xf32>
    %837 = vector.extract_strided_slice %834 {offsets = [0, 128], sizes = [8, 128], strides = [1, 1]} : vector<8x384xf32> to vector<8x128xf32>
    %838 = vector.extract_strided_slice %834 {offsets = [0, 256], sizes = [8, 128], strides = [1, 1]} : vector<8x384xf32> to vector<8x128xf32>
    %839 = vector.extract_strided_slice %835 {offsets = [0, 0], sizes = [8, 128], strides = [1, 1]} : vector<8x384xf32> to vector<8x128xf32>
    %840 = vector.extract_strided_slice %835 {offsets = [0, 128], sizes = [8, 128], strides = [1, 1]} : vector<8x384xf32> to vector<8x128xf32>
    %841 = vector.extract_strided_slice %835 {offsets = [0, 256], sizes = [8, 128], strides = [1, 1]} : vector<8x384xf32> to vector<8x128xf32>
    %842 = arith.addf %836, %839 : vector<8x128xf32>
    %843 = arith.negf %842 : vector<8x128xf32>
    %844 = math.exp %843 : vector<8x128xf32>
    %cst_253 = arith.constant 1.000000e+00 : f32
    %845 = vector.broadcast %cst_253 : f32 to vector<8x128xf32>
    %846 = arith.addf %845, %844 : vector<8x128xf32>
    %847 = arith.divf %845, %846 : vector<8x128xf32>
    %848 = arith.addf %837, %840 : vector<8x128xf32>
    %849 = arith.negf %848 : vector<8x128xf32>
    %850 = math.exp %849 : vector<8x128xf32>
    %cst_254 = arith.constant 1.000000e+00 : f32
    %851 = vector.broadcast %cst_254 : f32 to vector<8x128xf32>
    %852 = arith.addf %851, %850 : vector<8x128xf32>
    %853 = arith.divf %851, %852 : vector<8x128xf32>
    %854 = arith.addf %841, %620 : vector<8x128xf32>
    %855 = arith.mulf %847, %854 : vector<8x128xf32>
    %856 = arith.addf %838, %855 : vector<8x128xf32>
    %857 = math.tanh %856 : vector<8x128xf32>
    %cst_255 = arith.constant 1.000000e+00 : f32
    %858 = vector.broadcast %cst_255 : f32 to vector<8x128xf32>
    %859 = arith.subf %858, %853 : vector<8x128xf32>
    %860 = arith.mulf %859, %857 : vector<8x128xf32>
    %861 = arith.mulf %853, %827 : vector<8x128xf32>
    %862 = arith.addf %860, %861 : vector<8x128xf32>
    %863 = arith.index_cast %c6_i32_249 : i32 to index
    %c0_256 = arith.constant 0 : index
    %c0_257 = arith.constant 0 : index
    %864 = vector.load %arg22[%863, %c0_256, %c0_257] : memref<8x8x128xf32, #tpu.memory_space<vmem>>, vector<1x8x128xf32>
    %865 = vector.shape_cast %864 : vector<1x8x128xf32> to vector<8x128xf32>
    %866 = vector.shape_cast %862 : vector<8x128xf32> to vector<1x8x128xf32>
    tpu.vector_store %arg22[%863, %c0_256, %c0_257], %866 {strides = array<i32>} : memref<8x8x128xf32, #tpu.memory_space<vmem>>, vector<1x8x128xf32>,
    %c7_i32_258 = arith.constant 7 : i32
    %867 = arith.index_cast %c7_i32_258 : i32 to index
    %c0_259 = arith.constant 0 : index
    %c0_260 = arith.constant 0 : index
    %868 = vector.load %arg21[%867, %c0_259, %c0_260] : memref<8x8x384xf32, #tpu.memory_space<vmem>>, vector<1x8x384xf32>
    %869 = vector.shape_cast %868 : vector<1x8x384xf32> to vector<8x384xf32>
    %cst_261 = arith.constant dense<0.000000e+00> : vector<8x384xf32>
    %870 = tpu.matmul %862, %617, %cst_261 {dimension_numbers = #tpu.dot_dimension_numbers<[1], [0], [0], [1], [0, 0, 1, 1], [], []>} : vector<8x128xf32>, vector<128x384xf32>, vector<8x384xf32> -> vector<8x384xf32>
    %871 = vector.extract_strided_slice %869 {offsets = [0, 0], sizes = [8, 128], strides = [1, 1]} : vector<8x384xf32> to vector<8x128xf32>
    %872 = vector.extract_strided_slice %869 {offsets = [0, 128], sizes = [8, 128], strides = [1, 1]} : vector<8x384xf32> to vector<8x128xf32>
    %873 = vector.extract_strided_slice %869 {offsets = [0, 256], sizes = [8, 128], strides = [1, 1]} : vector<8x384xf32> to vector<8x128xf32>
    %874 = vector.extract_strided_slice %870 {offsets = [0, 0], sizes = [8, 128], strides = [1, 1]} : vector<8x384xf32> to vector<8x128xf32>
    %875 = vector.extract_strided_slice %870 {offsets = [0, 128], sizes = [8, 128], strides = [1, 1]} : vector<8x384xf32> to vector<8x128xf32>
    %876 = vector.extract_strided_slice %870 {offsets = [0, 256], sizes = [8, 128], strides = [1, 1]} : vector<8x384xf32> to vector<8x128xf32>
    %877 = arith.addf %871, %874 : vector<8x128xf32>
    %878 = arith.negf %877 : vector<8x128xf32>
    %879 = math.exp %878 : vector<8x128xf32>
    %cst_262 = arith.constant 1.000000e+00 : f32
    %880 = vector.broadcast %cst_262 : f32 to vector<8x128xf32>
    %881 = arith.addf %880, %879 : vector<8x128xf32>
    %882 = arith.divf %880, %881 : vector<8x128xf32>
    %883 = arith.addf %872, %875 : vector<8x128xf32>
    %884 = arith.negf %883 : vector<8x128xf32>
    %885 = math.exp %884 : vector<8x128xf32>
    %cst_263 = arith.constant 1.000000e+00 : f32
    %886 = vector.broadcast %cst_263 : f32 to vector<8x128xf32>
    %887 = arith.addf %886, %885 : vector<8x128xf32>
    %888 = arith.divf %886, %887 : vector<8x128xf32>
    %889 = arith.addf %876, %620 : vector<8x128xf32>
    %890 = arith.mulf %882, %889 : vector<8x128xf32>
    %891 = arith.addf %873, %890 : vector<8x128xf32>
    %892 = math.tanh %891 : vector<8x128xf32>
    %cst_264 = arith.constant 1.000000e+00 : f32
    %893 = vector.broadcast %cst_264 : f32 to vector<8x128xf32>
    %894 = arith.subf %893, %888 : vector<8x128xf32>
    %895 = arith.mulf %894, %892 : vector<8x128xf32>
    %896 = arith.mulf %888, %862 : vector<8x128xf32>
    %897 = arith.addf %895, %896 : vector<8x128xf32>
    %898 = arith.index_cast %c7_i32_258 : i32 to index
    %c0_265 = arith.constant 0 : index
    %c0_266 = arith.constant 0 : index
    %899 = vector.load %arg22[%898, %c0_265, %c0_266] : memref<8x8x128xf32, #tpu.memory_space<vmem>>, vector<1x8x128xf32>
    %900 = vector.shape_cast %899 : vector<1x8x128xf32> to vector<8x128xf32>
    %901 = vector.shape_cast %897 : vector<8x128xf32> to vector<1x8x128xf32>
    tpu.vector_store %arg22[%898, %c0_265, %c0_266], %901 {strides = array<i32>} : memref<8x8x128xf32, #tpu.memory_space<vmem>>, vector<1x8x128xf32>,
    %c8_i32_267 = arith.constant 8 : i32
    %c0_268 = arith.constant 0 : index
    %c0_269 = arith.constant 0 : index
    %c0_270 = arith.constant 0 : index
    %902 = vector.load %arg22[%c0_268, %c0_269, %c0_270] : memref<8x8x128xf32, #tpu.memory_space<vmem>>, vector<8x8x128xf32>
    %903 = vector.shape_cast %902 : vector<8x8x128xf32> to vector<64x128xf32>
    %c0_271 = arith.constant 0 : index
    %c0_272 = arith.constant 0 : index
    %904 = vector.load %arg18[%c0_271, %c0_272] : memref<128x128xf32, #tpu.memory_space<vmem>>, vector<128x128xf32>
    %cst_273 = arith.constant dense<0.000000e+00> : vector<64x128xf32>
    %905 = tpu.matmul %903, %904, %cst_273 {dimension_numbers = #tpu.dot_dimension_numbers<[1], [0], [0], [1], [0, 0, 1, 1], [], []>} : vector<64x128xf32>, vector<128x128xf32>, vector<64x128xf32> -> vector<64x128xf32>
    %c0_274 = arith.constant 0 : index
    %c0_275 = arith.constant 0 : index
    %906 = vector.load %arg19[%c0_274, %c0_275] : memref<1x128xf32, #tpu.memory_space<vmem>>, vector<1x128xf32>
    %907 = vector.broadcast %906 : vector<1x128xf32> to vector<64x128xf32>
    %908 = arith.addf %905, %907 : vector<64x128xf32>
    %909 = vector.shape_cast %908 : vector<64x128xf32> to vector<8x8x128xf32>
    %c0_276 = arith.constant 0 : index
    %c0_277 = arith.constant 0 : index
    %c0_278 = arith.constant 0 : index
    %910 = vector.load %arg20[%c0_276, %c0_277, %c0_278] : memref<8x8x128xf32, #tpu.memory_space<vmem>>, vector<8x8x128xf32>
    tpu.vector_store %arg20[%c0_276, %c0_277, %c0_278], %909 {strides = array<i32>} : memref<8x8x128xf32, #tpu.memory_space<vmem>>, vector<8x8x128xf32>,
    return
  }
  func.func @transform_0(%arg0: i32) -> (i32, i32, i32) {
    %c0_i32 = arith.constant 0 : i32
    %c0_i32_0 = arith.constant 0 : i32
    %c0_i32_1 = arith.constant 0 : i32
    %c0_i32_2 = arith.constant 0 : i32
    return %c0_i32, %c0_i32_0, %c0_i32_1 : i32, i32, i32
  }
  func.func @transform_1(%arg0: i32) -> (i32, i32) {
    %c0_i32 = arith.constant 0 : i32
    %c0_i32_0 = arith.constant 0 : i32
    %c0_i32_1 = arith.constant 0 : i32
    return %c0_i32, %c0_i32_0 : i32, i32
  }
  func.func @transform_2(%arg0: i32) -> (i32, i32) {
    %c0_i32 = arith.constant 0 : i32
    %c0_i32_0 = arith.constant 0 : i32
    %c0_i32_1 = arith.constant 0 : i32
    return %c0_i32, %c0_i32_0 : i32, i32
  }
  func.func @transform_3(%arg0: i32) -> (i32, i32) {
    %c0_i32 = arith.constant 0 : i32
    %c0_i32_0 = arith.constant 0 : i32
    %c0_i32_1 = arith.constant 0 : i32
    return %c0_i32, %c0_i32_0 : i32, i32
  }
  func.func @transform_4(%arg0: i32) -> (i32, i32) {
    %c0_i32 = arith.constant 0 : i32
    %c0_i32_0 = arith.constant 0 : i32
    %c0_i32_1 = arith.constant 0 : i32
    return %c0_i32, %c0_i32_0 : i32, i32
  }
  func.func @transform_5(%arg0: i32) -> (i32, i32) {
    %c0_i32 = arith.constant 0 : i32
    %c0_i32_0 = arith.constant 0 : i32
    %c0_i32_1 = arith.constant 0 : i32
    return %c0_i32, %c0_i32_0 : i32, i32
  }
  func.func @transform_6(%arg0: i32) -> (i32, i32) {
    %c0_i32 = arith.constant 0 : i32
    %c0_i32_0 = arith.constant 0 : i32
    %c0_i32_1 = arith.constant 0 : i32
    return %c0_i32, %c0_i32_0 : i32, i32
  }
  func.func @transform_7(%arg0: i32) -> (i32, i32) {
    %c0_i32 = arith.constant 0 : i32
    %c0_i32_0 = arith.constant 0 : i32
    %c0_i32_1 = arith.constant 0 : i32
    return %c0_i32, %c0_i32_0 : i32, i32
  }
  func.func @transform_8(%arg0: i32) -> (i32, i32) {
    %c0_i32 = arith.constant 0 : i32
    %c0_i32_0 = arith.constant 0 : i32
    %c0_i32_1 = arith.constant 0 : i32
    return %c0_i32, %c0_i32_0 : i32, i32
  }
  func.func @transform_9(%arg0: i32) -> (i32, i32) {
    %c0_i32 = arith.constant 0 : i32
    %c0_i32_0 = arith.constant 0 : i32
    %c0_i32_1 = arith.constant 0 : i32
    return %c0_i32, %c0_i32_0 : i32, i32
  }
  func.func @transform_10(%arg0: i32) -> (i32, i32) {
    %c0_i32 = arith.constant 0 : i32
    %c0_i32_0 = arith.constant 0 : i32
    %c0_i32_1 = arith.constant 0 : i32
    return %c0_i32, %c0_i32_0 : i32, i32
  }
  func.func @transform_11(%arg0: i32) -> (i32, i32) {
    %c0_i32 = arith.constant 0 : i32
    %c0_i32_0 = arith.constant 0 : i32
    %c0_i32_1 = arith.constant 0 : i32
    return %c0_i32, %c0_i32_0 : i32, i32
  }
  func.func @transform_12(%arg0: i32) -> (i32, i32) {
    %c0_i32 = arith.constant 0 : i32
    %c0_i32_0 = arith.constant 0 : i32
    %c0_i32_1 = arith.constant 0 : i32
    return %c0_i32, %c0_i32_0 : i32, i32
  }
  func.func @transform_13(%arg0: i32) -> (i32, i32) {
    %c0_i32 = arith.constant 0 : i32
    %c0_i32_0 = arith.constant 0 : i32
    %c0_i32_1 = arith.constant 0 : i32
    return %c0_i32, %c0_i32_0 : i32, i32
  }
  func.func @transform_14(%arg0: i32) -> (i32, i32) {
    %c0_i32 = arith.constant 0 : i32
    %c0_i32_0 = arith.constant 0 : i32
    %c0_i32_1 = arith.constant 0 : i32
    return %c0_i32, %c0_i32_0 : i32, i32
  }
  func.func @transform_15(%arg0: i32) -> (i32, i32) {
    %c0_i32 = arith.constant 0 : i32
    %c0_i32_0 = arith.constant 0 : i32
    %c0_i32_1 = arith.constant 0 : i32
    return %c0_i32, %c0_i32_0 : i32, i32
  }
  func.func @transform_16(%arg0: i32) -> (i32, i32) {
    %c0_i32 = arith.constant 0 : i32
    %c0_i32_0 = arith.constant 0 : i32
    %c0_i32_1 = arith.constant 0 : i32
    return %c0_i32, %c0_i32_0 : i32, i32
  }
  func.func @transform_17(%arg0: i32) -> (i32, i32) {
    %c0_i32 = arith.constant 0 : i32
    %c0_i32_0 = arith.constant 0 : i32
    %c0_i32_1 = arith.constant 0 : i32
    return %c0_i32, %c0_i32_0 : i32, i32
  }
  func.func @transform_18(%arg0: i32) -> (i32, i32) {
    %c0_i32 = arith.constant 0 : i32
    %c0_i32_0 = arith.constant 0 : i32
    %c0_i32_1 = arith.constant 0 : i32
    return %c0_i32, %c0_i32_0 : i32, i32
  }
  func.func @transform_19(%arg0: i32) -> (i32, i32, i32) {
    %c0_i32 = arith.constant 0 : i32
    %c0_i32_0 = arith.constant 0 : i32
    %c0_i32_1 = arith.constant 0 : i32
    %c0_i32_2 = arith.constant 0 : i32
    return %c0_i32, %c0_i32_0, %c0_i32_1 : i32, i32, i32
  }
}

</mosaic_0001>

<bundles_post_ra>
// kernel: tpu_custom_call.1
= control target key start
LH: loop header
LB: loop body
LE: loop exit
PB: predicated region body
PF: predicated region fallthrough
CT: control target
= control target key end

     0   :  { %s7662_s0 = inlined_call_operand.hbm [shape: f32[8,8,128], index: 0, kind: input, shape index: {}]   ;;  %s7663_s1 = inlined_call_operand.hbm [shape: f32[128,384], index: 1, kind: input, shape index: {}]   ;;  %s7664_s2 = inlined_call_operand.hbm [shape: f32[128,384], index: 2, kind: input, shape index: {}]   ;;  %s7665_s3 = inlined_call_operand.hbm [shape: f32[1,384], index: 3, kind: input, shape index: {}]   ;;  %s7666_s4 = inlined_call_operand.hbm [shape: f32[1,128], index: 4, kind: input, shape index: {}]   ;;  %s7667_s5 = inlined_call_operand.hbm [shape: f32[128,128], index: 5, kind: input, shape index: {}]   ;;  %s7668_s6 = inlined_call_operand.hbm [shape: f32[1,128], index: 6, kind: input, shape index: {}]   ;;  %s7669_s7 = inlined_call_operand.hbm [shape: f32[128,384], index: 7, kind: input, shape index: {}]   ;;  %s7670_s8 = inlined_call_operand.hbm [shape: f32[128,384], index: 8, kind: input, shape index: {}]   ;;  %s7671_s9 = inlined_call_operand.vmem [shape: f32[1,384], index: 9, kind: input, shape index: {}]   ;;  %s7672_s10 = inlined_call_operand.vmem [shape: f32[1,128], index: 10, kind: input, shape index: {}]   ;;  %s7673_s11 = inlined_call_operand.hbm [shape: f32[128,128], index: 11, kind: input, shape index: {}]   ;;  %s7674_s12 = inlined_call_operand.vmem [shape: f32[1,128], index: 12, kind: input, shape index: {}]   ;;  %s7675_s13 = inlined_call_operand.hbm [shape: f32[128,384], index: 13, kind: input, shape index: {}]   ;;  %s7676_s14 = inlined_call_operand.hbm [shape: f32[128,384], index: 14, kind: input, shape index: {}]   ;;  %s7677_s15 = inlined_call_operand.vmem [shape: f32[1,384], index: 15, kind: input, shape index: {}]   ;;  %s7678_s16 = inlined_call_operand.vmem [shape: f32[1,128], index: 16, kind: input, shape index: {}]   ;;  %s7679_s17 = inlined_call_operand.hbm [shape: f32[128,128], index: 17, kind: input, shape index: {}]   ;;  %s7680_s18 = inlined_call_operand.vmem [shape: f32[1,128], index: 18, kind: input, shape index: {}]   ;;  %s7681_s19 = inlined_call_operand.hbm [shape: f32[8,8,128], index: 19, kind: output, shape index: {}]  }
   0x1   :  { %7742 = sst [smem:[#allocation65_spill]] %s7662_s0 }
   0x2   :  { %7743 = sst [smem:[#allocation66_spill]] %s7663_s1 }
   0x3   :  { %7744 = sst [smem:[#allocation67_spill]] %s7664_s2 }
   0x4   :  { %7745 = sst [smem:[#allocation68_spill]] %s7665_s3 }
   0x5   :  { %7746 = sst [smem:[#allocation69_spill]] %s7680_s18 }
   0x6   :  { %7747 = sst [smem:[#allocation70_spill]] %s7681_s19 }
   0x7   :  { %24 = vsyncpa [#allocation5], 0 }
   0x8   :  { %25 = vsyncpa [#allocation8], 0 }
   0x9   :  { %26 = vsyncpa [#allocation11], 0 }
   0xa   :  { %27 = vsyncpa [#allocation14], 0 }
   0xb   :  { %28 = vsyncpa [#allocation17], 0 }
   0xc   :  { %29 = vsyncpa [#allocation20], 0 }
   0xd   :  { %30 = vsyncpa [#allocation23], 0  ;;  %s7748_s20 = sld [smem:[#allocation66_spill]] }
  0x13   :  { %s49_s21 = sshll.u32 %s7748_s20, 4  ;;  %s50_s21 = int_to_ptr.hbm [resolvable:$true] %s49_s21 }
  0x14   :  { %31 = vsyncpa [#allocation6], 0  ;;  %s5186_s1 = smov [#allocation7]   ;;  %s7749_s24 = sld [smem:[#allocation68_spill]] }
  0x15   :  { %s51_s22 = sshll.u32 %s5186_s1, 4  ;;  %s5187_s3 = smov 384   ;;  %s52_s22 = int_to_ptr.vmem [resolvable:$true] %s51_s22 }
  0x16   :  { %s5188_s26 = smov 24   ;;  %s5189_s27 = smov [#allocation10]  }
  0x17   :  { %57 = dma.hbm_to_vmem [thread:$0]  %s50_s21, 6144, %s52_s22, [#allocation8], %s5187_s3, %s5187_s3, %s5188_s26  }
  0x18   :  { %s78_s28 = sshll.u32 %s5189_s27, 4  ;;  %s97_s30 = sshll.u32 %s7667_s5, 4  ;;  %s79_s28 = int_to_ptr.vmem [resolvable:$true] %s78_s28  ;;  %s98_s30 = int_to_ptr.hbm [resolvable:$true] %s97_s30 }
  0x19   :  { %s5190_s20 = smov [#allocation13]   ;;  %s5191_s19 = smov 128  }
  0x1a   :  { %s76_s25 = sshll.u32 %s7749_s24, 4  ;;  %s99_s1 = sshll.u32 %s5190_s20, 4  ;;  %s77_s25 = int_to_ptr.hbm [resolvable:$true] %s76_s25  ;;  %s100_s1 = int_to_ptr.vmem [resolvable:$true] %s99_s1 }
  0x1b   :  { %81 = dma.hbm_to_vmem [thread:$0]  %s77_s25, 48, %s79_s28, [#allocation11]  }
  0x1c   :  { %s121_s24 = sshll.u32 %s7669_s7, 4  ;;  %s5192_s18 = smov 8   ;;  %s122_s24 = int_to_ptr.hbm [resolvable:$true] %s121_s24 }
  0x1d   :  { %105 = dma.hbm_to_vmem [thread:$0]  %s98_s30, 2048, %s100_s1, [#allocation14], %s5191_s19, %s5191_s19, %s5192_s18  }
  0x1e   :  { %s5193_s21 = smov [#allocation16]   ;;  %s151_s5 = sshll.u32 %s7673_s11, 4  ;;  %s152_s5 = int_to_ptr.hbm [resolvable:$true] %s151_s5 }
  0x1f   :  { %s123_s22 = sshll.u32 %s5193_s21, 4  ;;  %s179_s29 = sshll.u32 %s7676_s14, 4  ;;  %s124_s22 = int_to_ptr.vmem [resolvable:$true] %s123_s22  ;;  %s180_s29 = int_to_ptr.hbm [resolvable:$true] %s179_s29 }
  0x20   :  { %129 = dma.hbm_to_vmem [thread:$0]  %s122_s24, 6144, %s124_s22, [#allocation17], %s5187_s3, %s5187_s3, %s5188_s26  }
  0x21   :  { %s5194_s0 = smov [#allocation19]   ;;  %s5195_s30 = smov [#allocation22]  }
  0x22   :  { %s153_s20 = sshll.u32 %s5194_s0, 4  ;;  %s181_s11 = sshll.u32 %s5195_s30, 4  ;;  %s154_s20 = int_to_ptr.vmem [resolvable:$true] %s153_s20  ;;  %s182_s11 = int_to_ptr.vmem [resolvable:$true] %s181_s11 }
  0x23   :  { %159 = dma.hbm_to_vmem [thread:$0]  %s152_s5, 2048, %s154_s20, [#allocation20], %s5191_s19, %s5191_s19, %s5192_s18  }
  0x24   :  { %s7750_s23 = sld [smem:[#allocation65_spill]]  ;;  %s5196_s27 = smov [#allocation4]  }
  0x25   :  { %187 = dma.hbm_to_vmem [thread:$0]  %s180_s29, 6144, %s182_s11, [#allocation23], %s5187_s3, %s5187_s3, %s5188_s26  }
  0x26   :  { %s7751_s22 = sld [smem:[#allocation67_spill]]  ;;  %s38_s7 = sshll.u32 %s5196_s27, 4  ;;  %s39_s7 = int_to_ptr.vmem [resolvable:$true] %s38_s7 }
  0x27   :  { %s5197_s5 = smov [#allocation9]   ;;  %s87_s30 = sshll.u32 %s7666_s4, 4  ;;  %s88_s30 = int_to_ptr.hbm [resolvable:$true] %s87_s30 }
  0x28   :  { %s64_s28 = sshll.u32 %s5197_s5, 4  ;;  %s111_s1 = sshll.u32 %s7668_s6, 4  ;;  %s65_s28 = int_to_ptr.vmem [resolvable:$true] %s64_s28  ;;  %s112_s1 = int_to_ptr.hbm [resolvable:$true] %s111_s1 }
  0x29   :  { %s5198_s2 = smov [#allocation12]   ;;  %s134_s4 = sshll.u32 %s7670_s8, 4  ;;  %s135_s4 = int_to_ptr.hbm [resolvable:$true] %s134_s4 }
  0x2a   :  { %s36_s21 = sshll.u32 %s7750_s23, 4  ;;  %s89_s23 = sshll.u32 %s5198_s2, 4  ;;  %s37_s21 = int_to_ptr.hbm [resolvable:$true] %s36_s21  ;;  %s90_s23 = int_to_ptr.vmem [resolvable:$true] %s89_s23 }
  0x2b   :  { %44 = dma.hbm_to_vmem [thread:$0]  %s37_s21, 1024, %s39_s7, [#allocation5], %s5191_s19, %s5191_s19, %s5192_s18  }
  0x2c   :  { %s62_s25 = sshll.u32 %s7751_s22, 4  ;;  %s5199_s21 = smov [#allocation15]   ;;  %s63_s25 = int_to_ptr.hbm [resolvable:$true] %s62_s25 }
  0x2d   :  { %70 = dma.hbm_to_vmem [thread:$0]  %s63_s25, 6144, %s65_s28, [#allocation8], %s5187_s3, %s5187_s3, %s5188_s26  }
  0x2e   :  { %92 = dma.hbm_to_vmem [thread:$0]  %s88_s30, 16, %s90_s23, [#allocation11]  }
  0x2f   :  { %s113_s14 = sshll.u32 %s5199_s21, 4  ;;  %s166_s7 = sshll.u32 %s7675_s13, 4  ;;  %s114_s14 = int_to_ptr.vmem [resolvable:$true] %s113_s14  ;;  %s167_s7 = int_to_ptr.hbm [resolvable:$true] %s166_s7 }
  0x30   :  { %116 = dma.hbm_to_vmem [thread:$0]  %s112_s1, 16, %s114_s14, [#allocation14]  }
  0x31   :  { %s5200_s5 = smov [#allocation18]   ;;  %s5201_s28 = smov [#allocation21]  }
  0x32   :  { %s136_s6 = sshll.u32 %s5200_s5, 4  ;;  %s168_s0 = sshll.u32 %s5201_s28, 4  ;;  %s137_s6 = int_to_ptr.vmem [resolvable:$true] %s136_s6  ;;  %s169_s0 = int_to_ptr.vmem [resolvable:$true] %s168_s0 }
  0x33   :  { %142 = dma.hbm_to_vmem [thread:$0]  %s135_s4, 6144, %s137_s6, [#allocation17], %s5187_s3, %s5187_s3, %s5188_s26  }
  0x34   :  { %s196_s8 = sshll.u32 %s7679_s17, 4  ;;  %s5202_s13 = smov [#allocation24]   ;;  %s197_s8 = int_to_ptr.hbm [resolvable:$true] %s196_s8 }
  0x35   :  { %174 = dma.hbm_to_vmem [thread:$0]  %s167_s7, 6144, %s169_s0, [#allocation20], %s5187_s3, %s5187_s3, %s5188_s26  }
  0x36   :  { %s198_s29 = sshll.u32 %s5202_s13, 4  ;;  %s199_s29 = int_to_ptr.vmem [resolvable:$true] %s198_s29 }
  0x37   :  { %204 = dma.hbm_to_vmem [thread:$0]  %s197_s8, 2048, %s199_s29, [#allocation23], %s5191_s19, %s5191_s19, %s5192_s18  }
  0x38   :  { %5170 = dma.done.wait [#allocation5], 1024  }
  0x39   :  { %5171 = vsyncadd [#allocation5], 4294966272 }
  0x3a   :  { %5172 = dma.done.wait [#allocation8], 12288  }
  0x3b   :  { %5173 = vsyncadd [#allocation8], 4294955008 }
  0x3c   :  { %5174 = dma.done.wait [#allocation11], 64  }
  0x3d   :  { %5175 = vsyncadd [#allocation11], 4294967232 }
  0x3e   :  { %5176 = dma.done.wait [#allocation14], 2064  }
  0x3f   :  { %5177 = vsyncadd [#allocation14], 4294965232 }
  0x40   :  { %5178 = dma.done.wait [#allocation17], 12288  }
  0x41   :  { %5179 = vsyncadd [#allocation17], 4294955008 }
  0x42   :  { %5180 = dma.done.wait [#allocation20], 8192  }
  0x43   :  { %5181 = vsyncadd [#allocation20], 4294959104 }
  0x44   :  { %5182 = dma.done.wait [#allocation23], 8192  }
  0x45   :  { %5183 = vsyncadd [#allocation23], 4294959104  ;;  %v314_v0 = vld [vmem:[#allocation7 + $0x178] sm:$0xff]  ;;  %v312_v1 = vld [vmem:[#allocation7 + $0x168] sm:$0xff]  ;;  %s7947_s4 = sld [smem:[#allocation69_spill]]  ;;  %s5204_s27 = smov [#allocation25]  }
  0x46   :  { %v311_v2 = vld [vmem:[#allocation7 + $0x160] sm:$0xff]  ;;  %4342 = vmatpush.msra.mxu3 %v314_v0  ;;  %323 = vmatpush.msra.mxu0 %v312_v1  ;;  %v309_v3 = vld [vmem:[#allocation7 + $0x150] sm:$0xff]  ;;  %v308_v4 = vld [vmem:[#allocation7 + $0x148] sm:$0xff]  ;;  %s4257_s25 = sshll.u32 %s5204_s27, 4  ;;  %s7952_s6 = sld [smem:[#allocation70_spill]]  ;;  %s4258_s25 = int_to_ptr.vmem [resolvable:$true] %s4257_s25 }
  0x47   :  { %v306_v5 = vld [vmem:[#allocation7 + $0x138] sm:$0xff]  ;;  %405 = vmatpush.msra.mxu2 %v314_v0  ;;  %v305_v6 = vld [vmem:[#allocation7 + $0x130] sm:$0xff]  ;;  %v303_v7 = vld [vmem:[#allocation7 + $0x120] sm:$0xff] }
  0x48   :  { %4343 = vmatpush.msra.mxu3 %v311_v2  ;;  %324 = vmatpush.msra.mxu0 %v309_v3  ;;  %v302_v8 = vld [vmem:[#allocation7 + $0x118] sm:$0xff]  ;;  %v300_v9 = vld [vmem:[#allocation7 + $0x108] sm:$0xff]  ;;  %v299_v10 = vld [vmem:[#allocation7 + $0x100] sm:$0xff] }
  0x49   :  { %406 = vmatpush.msra.mxu2 %v311_v2  ;;  %v297_v11 = vld [vmem:[#allocation7 + $0xf0] sm:$0xff]  ;;  %v296_v12 = vld [vmem:[#allocation7 + $0xe8] sm:$0xff]  ;;  %v294_v13 = vld [vmem:[#allocation7 + $0xd8] sm:$0xff] }
  0x4a   :  { %4344 = vmatpush.msra.mxu3 %v308_v4  ;;  %325 = vmatpush.msra.mxu0 %v306_v5  ;;  %v293_v14 = vld [vmem:[#allocation7 + $0xd0] sm:$0xff]  ;;  %v291_v15 = vld [vmem:[#allocation7 + $0xc0] sm:$0xff]  ;;  %v290_v16 = vld [vmem:[#allocation7 + $0xb8] sm:$0xff] }
  0x4b   :  { %407 = vmatpush.msra.mxu2 %v308_v4  ;;  %v288_v17 = vld [vmem:[#allocation7 + $0xa8] sm:$0xff]  ;;  %v287_v18 = vld [vmem:[#allocation7 + $0xa0] sm:$0xff]  ;;  %v285_v19 = vld [vmem:[#allocation7 + $0x90] sm:$0xff] }
  0x4c   :  { %4345 = vmatpush.msra.mxu3 %v305_v6  ;;  %326 = vmatpush.msra.mxu0 %v303_v7  ;;  %v284_v20 = vld [vmem:[#allocation7 + $0x88] sm:$0xff]  ;;  %v282_v21 = vld [vmem:[#allocation7 + $0x78] sm:$0xff]  ;;  %v281_v22 = vld [vmem:[#allocation7 + $0x70] sm:$0xff]  ;;  %s4259_s28 = sshll.u32 %s7952_s6, 4  ;;  %s4260_s28 = int_to_ptr.hbm [resolvable:$true] %s4259_s28 }
  0x4d   :  { %408 = vmatpush.msra.mxu2 %v305_v6  ;;  %v279_v23 = vld [vmem:[#allocation7 + $0x60] sm:$0xff]  ;;  %v278_v24 = vld [vmem:[#allocation7 + $0x58] sm:$0xff]  ;;  %v276_v25 = vld [vmem:[#allocation7 + $0x48] sm:$0xff] }
  0x4e   :  { %4346 = vmatpush.msra.mxu3 %v302_v8  ;;  %327 = vmatpush.msra.mxu0 %v300_v9  ;;  %v275_v26 = vld [vmem:[#allocation7 + $0x40] sm:$0xff]  ;;  %v273_v27 = vld [vmem:[#allocation7 + $0x30] sm:$0xff]  ;;  %v272_v28 = vld [vmem:[#allocation7 + $0x28] sm:$0xff] }
  0x4f   :  { %409 = vmatpush.msra.mxu2 %v302_v8  ;;  %v270_v29 = vld [vmem:[#allocation7 + $0x18] sm:$0xff]  ;;  %v269_v30 = vld [vmem:[#allocation7 + $0x10] sm:$0xff]  ;;  %v267_v31 = vld [vmem:[#allocation7] sm:$0xff] }
  0x50   :  { %4347 = vmatpush.msra.mxu3 %v299_v10  ;;  %328 = vmatpush.msra.mxu0 %v297_v11  ;;  %v5374_v32 = vld [vmem:[#allocation4 + $0x20] sm:$0xff]  ;;  %v5378_v34 = vld [vmem:[#allocation9 + $0x168] sm:$0xff]  ;;  %v5380_v35 = vld [vmem:[#allocation9 + $0x178] sm:$0xff] }
  0x51   :  { %410 = vmatpush.msra.mxu2 %v299_v10  ;;  %v5376_v33 = vld [vmem:[#allocation4] sm:$0xff]  ;;  %v5384_v36 = vld [vmem:[#allocation9 + $0x150] sm:$0xff]  ;;  %v5390_v38 = vld [vmem:[#allocation9 + $0x138] sm:$0xff] }
  0x52   :  { %4348 = vmatpush.msra.mxu3 %v296_v12  ;;  %329 = vmatpush.msra.mxu0 %v294_v13  ;;  %v5386_v37 = vld [vmem:[#allocation9 + $0x160] sm:$0xff]  ;;  %v5392_v39 = vld [vmem:[#allocation9 + $0x148] sm:$0xff]  ;;  %v313_v40 = vld [vmem:[#allocation7 + $0x170] sm:$0xff] }
  0x53   :  { %411 = vmatpush.msra.mxu2 %v296_v12  ;;  %v5396_v41 = vld [vmem:[#allocation9 + $0x120] sm:$0xff]  ;;  %364 = vmatpush.msra.mxu1 %v313_v40  ;;  %v5398_v42 = vld [vmem:[#allocation9 + $0x130] sm:$0xff]  ;;  %v310_v43 = vld [vmem:[#allocation7 + $0x158] sm:$0xff] }
  0x54   :  { %4349 = vmatpush.msra.mxu3 %v293_v14  ;;  %330 = vmatpush.msra.mxu0 %v291_v15  ;;  %v5402_v44 = vld [vmem:[#allocation4 + $0x28] sm:$0xff]  ;;  %v5406_v46 = vld [vmem:[#allocation9 + $0x170] sm:$0xff]  ;;  %v307_v48 = vld [vmem:[#allocation7 + $0x140] sm:$0xff] }
  0x55   :  { %412 = vmatpush.msra.mxu2 %v293_v14  ;;  %v5404_v45 = vld [vmem:[#allocation4 + $0x8] sm:$0xff]  ;;  %365 = vmatpush.msra.mxu1 %v310_v43  ;;  %v5416_v49 = vld [vmem:[#allocation9 + $0xf0] sm:$0xff]  ;;  %v5418_v50 = vld [vmem:[#allocation9 + $0x118] sm:$0xff] }
  0x56   :  { %4350 = vmatpush.msra.mxu3 %v290_v16  ;;  %331 = vmatpush.msra.mxu0 %v288_v17  ;;  %v5409_v47 = vld [vmem:[#allocation9 + $0x108] sm:$0xff]  ;;  %v5421_v52 = vld [vmem:[#allocation9 + $0x158] sm:$0xff]  ;;  %v301_v54 = vld [vmem:[#allocation7 + $0x110] sm:$0xff] }
  0x57   :  { %413 = vmatpush.msra.mxu2 %v290_v16  ;;  %v304_v51 = vld [vmem:[#allocation7 + $0x128] sm:$0xff]  ;;  %366 = vmatpush.msra.mxu1 %v307_v48  ;;  %v5423_v53 = vld [vmem:[#allocation9 + $0xd8] sm:$0xff]  ;;  %v5428_v55 = vld [vmem:[#allocation9 + $0x140] sm:$0xff] }
  0x58   :  { %4351 = vmatpush.msra.mxu3 %v287_v18  ;;  %332 = vmatpush.msra.mxu0 %v285_v19  ;;  %v5430_v56 = vld [vmem:[#allocation9 + $0xc0] sm:$0xff]  ;;  %v298_v58 = vld [vmem:[#allocation7 + $0xf8] sm:$0xff]  ;;  %v5436_v59 = vld [vmem:[#allocation4 + $0x30] sm:$0xff] }
  0x59   :  { %414 = vmatpush.msra.mxu2 %v287_v18  ;;  %367 = vmatpush.msra.mxu1 %v304_v51  ;;  %v5432_v57 = vld [vmem:[#allocation9 + $0x100] sm:$0xff]  ;;  %v5438_v60 = vld [vmem:[#allocation4 + $0x10] sm:$0xff]  ;;  %v5440_v61 = vld [vmem:[#allocation9 + $0x128] sm:$0xff] }
  0x5a   :  { %4352 = vmatpush.msra.mxu3 %v284_v20  ;;  %333 = vmatpush.msra.mxu0 %v282_v21  ;;  %v5442_v62 = vld [vmem:[#allocation9 + $0xa8] sm:$0xff]  ;;  %v295_v63 = vld [vmem:[#allocation7 + $0xe0] sm:$0xff]  ;;  %v5451_v1 = vld [vmem:[#allocation9 + $0x90] sm:$0xff] }
  0x5b   :  { %415 = vmatpush.msra.mxu2 %v284_v20  ;;  %368 = vmatpush.msra.mxu1 %v301_v54  ;;  %v5447_v0 = vld [vmem:[#allocation9 + $0xe8] sm:$0xff]  ;;  %v5454_v3 = vld [vmem:[#allocation9 + $0xd0] sm:$0xff]  ;;  %v5456_v4 = vld [vmem:[#allocation9 + $0x78] sm:$0xff] }
  0x5c   :  { %4353 = vmatpush.msra.mxu3 %v281_v22  ;;  %334 = vmatpush.msra.mxu0 %v279_v23  ;;  %v292_v2 = vld [vmem:[#allocation7 + $0xc8] sm:$0xff]  ;;  %v289_v5 = vld [vmem:[#allocation7 + $0xb0] sm:$0xff]  ;;  %v5463_v7 = vld [vmem:[#allocation9 + $0xb8] sm:$0xff] }
  0x5d   :  { %416 = vmatpush.msra.mxu2 %v281_v22  ;;  %369 = vmatpush.msra.mxu1 %v298_v58  ;;  %v5461_v6 = vld [vmem:[#allocation9 + $0x110] sm:$0xff]  ;;  %v5465_v8 = vld [vmem:[#allocation9 + $0x60] sm:$0xff]  ;;  %v286_v9 = vld [vmem:[#allocation7 + $0x98] sm:$0xff] }
  0x5e   :  { %4354 = vmatpush.msra.mxu3 %v278_v24  ;;  %335 = vmatpush.msra.mxu0 %v276_v25  ;;  %v5470_v10 = vld [vmem:[#allocation4 + $0x38] sm:$0xff]  ;;  %v5476_v13 = vld [vmem:[#allocation9 + $0x48] sm:$0xff]  ;;  %v5479_v14 = vld [vmem:[#allocation9 + $0xa0] sm:$0xff] }
  0x5f   :  { %417 = vmatpush.msra.mxu2 %v278_v24  ;;  %370 = vmatpush.msra.mxu1 %v295_v63  ;;  %v5472_v11 = vld [vmem:[#allocation4 + $0x18] sm:$0xff]  ;;  %v283_v15 = vld [vmem:[#allocation7 + $0x80] sm:$0xff]  ;;  %v5485_v16 = vld [vmem:[#allocation9 + $0x30] sm:$0xff] }
  0x60   :  { %4355 = vmatpush.msra.mxu3 %v275_v26  ;;  %336 = vmatpush.msra.mxu0 %v273_v27  ;;  %v5474_v12 = vld [vmem:[#allocation9 + $0xf8] sm:$0xff]  ;;  %7752 = vst [vmem:[#allocation34_spill] sm:$0xff] %v5485_v16  ;;  %v5487_v17 = vld [vmem:[#allocation9 + $0x88] sm:$0xff]  ;;  %v5490_v18 = vld [vmem:[#allocation9 + $0xe0] sm:$0xff] }
  0x61   :  { %418 = vmatpush.msra.mxu2 %v275_v26  ;;  %371 = vmatpush.msra.mxu1 %v292_v2  ;;  %v280_v19 = vld [vmem:[#allocation7 + $0x68] sm:$0xff]  ;;  %v5493_v20 = vld [vmem:[#allocation9 + $0x18] sm:$0xff]  ;;  %v5495_v21 = vld [vmem:[#allocation9 + $0x70] sm:$0xff] }
  0x62   :  { %4356 = vmatpush.msra.mxu3 %v272_v28  ;;  %337 = vmatpush.msra.mxu0 %v270_v29  ;;  %7753 = vst [vmem:[#allocation35_spill] sm:$0xff] %v5493_v20  ;;  %v5499_v22 = vld [vmem:[#allocation9 + $0xc8] sm:$0xff]  ;;  %v277_v23 = vld [vmem:[#allocation7 + $0x50] sm:$0xff]  ;;  %v5502_v24 = vld [vmem:[#allocation9] sm:$0xff]  ;;  %v7682_v29 = vmov 0.0  }
  0x63   :  { %419 = vmatpush.msra.mxu2 %v272_v28  ;;  %372 = vmatpush.msra.mxu1 %v289_v5  ;;  %7754 = vst [vmem:[#allocation36_spill] sm:$0xff] %v5502_v24  ;;  %v5504_v25 = vld [vmem:[#allocation9 + $0x58] sm:$0xff]  ;;  %v5512_v27 = vld [vmem:[#allocation9 + $0x40] sm:$0xff]  ;;  %v268_v40 = vld [vmem:[#allocation7 + $0x8] sm:$0xff] }
  0x64   :  { %4357 = vmatpush.msra.mxu3 %v269_v30  ;;  %338 = vmatpush.msra.mxu0 %v267_v31  ;;  %v274_v26 = vld [vmem:[#allocation7 + $0x38] sm:$0xff]  ;;  %7755 = vst [vmem:[#allocation37_spill] sm:$0xff] %v5512_v27  ;;  %v271_v28 = vld [vmem:[#allocation7 + $0x20] sm:$0xff]  ;;  %v5520_v31 = vld [vmem:[#allocation9 + $0xb0] sm:$0xff] }
  0x65   :  { %433 = vmatmul.f32.vlgmr.msra.gmra.mxu3 %v5374_v32  ;;  %339 = vmatmul.f32.vlgmr.msra.gmra.mxu0 %v5376_v33  ;;  %v5523_v43 = vld [vmem:[#allocation9 + $0x10] sm:$0xff]  ;;  %v5527_v48 = vld [vmem:[#allocation9 + $0x98] sm:$0xff]  ;;  %v5532_v51 = vld [vmem:[#allocation9 + $0x80] sm:$0xff] }
  0x66   :  { %525 = vmatpush.msrb.mxu3 %v5378_v34  ;;  %565 = vmatpush.msrb.mxu0 %v5380_v35  ;;  %7757 = vst [vmem:[#allocation39_spill] sm:$0xff] %v5523_v43  ;;  %v5539_v54 = vld [vmem:[#allocation9 + $0x68] sm:$0xff]  ;;  %v5544_v58 = vld [vmem:[#allocation9 + $0x50] sm:$0xff]  ;;  %v5556_v63 = vld [vmem:[#allocation9 + $0x20] sm:$0xff] }
  0x67   :  { %420 = vmatpush.msra.mxu2 %v269_v30  ;;  %373 = vmatpush.msra.mxu1 %v286_v9  ;;  %v5517_v30 = vld [vmem:[#allocation9 + $0x28] sm:$0xff]  ;;  %7758 = vst [vmem:[#allocation40_spill] sm:$0xff] %v5544_v58 }
  0x68   :  { %526 = vmatpush.msrb.mxu3 %v5384_v36  ;;  %566 = vmatpush.msrb.mxu0 %v5386_v37  ;;  %7756 = vst [vmem:[#allocation38_spill] sm:$0xff] %v5517_v30  ;;  %v5563_v2 = vld [vmem:[#allocation9 + $0x8] sm:$0xff] }
  0x69   :  { %421 = vmatmul.f32.vlgmr.msra.gmra.mxu2 %v5376_v33  ;;  %374 = vmatpush.msra.mxu1 %v283_v15  ;;  %7760 = vst [vmem:[#allocation42_spill] sm:$0xff] %v5556_v63 }
  0x6a   :  { %527 = vmatpush.msrb.mxu3 %v5390_v38  ;;  %567 = vmatpush.msrb.mxu0 %v5392_v39  ;;  %7761 = vst [vmem:[#allocation43_spill] sm:$0xff] %v5563_v2 }
  0x6b   :  { %658 = vmatpush.msrb.mxu2 %v5406_v46  ;;  %375 = vmatpush.msra.mxu1 %v280_v19 }
  0x6c   :  { %528 = vmatpush.msrb.mxu3 %v5396_v41  ;;  %568 = vmatpush.msrb.mxu0 %v5398_v42 }
  0x6d   :  { %436 = vmatmul.f32.gmra.mxu3 %v5402_v44  ;;  %342 = vmatmul.f32.gmra.mxu0 %v5404_v45 }
  0x6e   :  { %529 = vmatpush.msrb.mxu3 %v5409_v47  ;;  %569 = vmatpush.msrb.mxu0 %v5418_v50 }
  0x6f   :  { %659 = vmatpush.msrb.mxu2 %v5421_v52  ;;  %376 = vmatpush.msra.mxu1 %v277_v23 }
  0x70   :  { %530 = vmatpush.msrb.mxu3 %v5416_v49  ;;  %570 = vmatpush.msrb.mxu0 %v5432_v57 }
  0x71   :  { %660 = vmatpush.msrb.mxu2 %v5428_v55  ;;  %377 = vmatpush.msra.mxu1 %v274_v26 }
  0x72   :  { %531 = vmatpush.msrb.mxu3 %v5423_v53  ;;  %571 = vmatpush.msrb.mxu0 %v5447_v0 }
  0x73   :  { %661 = vmatpush.msrb.mxu2 %v5440_v61  ;;  %378 = vmatpush.msra.mxu1 %v271_v28 }
  0x74   :  { %532 = vmatpush.msrb.mxu3 %v5430_v56  ;;  %424 = vmatmul.f32.gmra.mxu2 %v5404_v45 }
  0x75   :  { %439 = vmatmul.f32.gmra.mxu3 %v5436_v59  ;;  %345 = vmatmul.f32.gmra.mxu0 %v5438_v60 }
  0x76   :  { %533 = vmatpush.msrb.mxu3 %v5442_v62  ;;  %572 = vmatpush.msrb.mxu0 %v5454_v3 }
  0x77   :  { %662 = vmatpush.msrb.mxu2 %v5461_v6  ;;  %379 = vmatpush.msra.mxu1 %v268_v40 }
  0x78   :  { %534 = vmatpush.msrb.mxu3 %v5451_v1  ;;  %573 = vmatpush.msrb.mxu0 %v5463_v7 }
  0x79   :  { %663 = vmatpush.msrb.mxu2 %v5474_v12  ;;  %380 = vmatmul.f32.vlgmr.msra.gmra.mxu1 %v5376_v33  ;;  %v5550_v33 = vld [vmem:[#allocation9 + $0x38] sm:$0xff] }
  0x7a   :  { %535 = vmatpush.msrb.mxu3 %v5456_v4  ;;  %574 = vmatpush.msrb.mxu0 %v5479_v14  ;;  %7759 = vst [vmem:[#allocation41_spill] sm:$0xff] %v5550_v33 }
  0x7b   :  { %664 = vmatpush.msrb.mxu2 %v5490_v18  ;;  %638 = vmatpush.msrb.mxu1 %v5378_v34 }
  0x7c   :  { %536 = vmatpush.msrb.mxu3 %v5465_v8  ;;  %575 = vmatpush.msrb.mxu0 %v5487_v17 }
  0x7d   :  { %442 = vmatmul.f32.gmra.mxu3 %v5470_v10  ;;  %348 = vmatmul.f32.gmra.mxu0 %v5472_v11 }
  0x7e   :  { %537 = vmatpush.msrb.mxu3 %v5476_v13  ;;  %665 = vmatpush.msrb.mxu2 %v5499_v22 }
  0x7f   :  { %576 = vmatpush.msrb.mxu0 %v5495_v21  ;;  %427 = vmatmul.f32.gmra.mxu2 %v5438_v60 }
  0x80   :  { %538 = vmatpush.msrb.mxu3 %v5485_v16  ;;  %666 = vmatpush.msrb.mxu2 %v5520_v31 }
  0x81   :  { %577 = vmatpush.msrb.mxu0 %v5504_v25  ;;  %639 = vmatpush.msrb.mxu1 %v5384_v36 }
  0x82   :  { %539 = vmatpush.msrb.mxu3 %v5493_v20  ;;  %667 = vmatpush.msrb.mxu2 %v5527_v48 }
  0x83   :  { %578 = vmatpush.msrb.mxu0 %v5512_v27  ;;  %640 = vmatpush.msrb.mxu1 %v5390_v38 }
  0x84   :  { %540 = vmatpush.msrb.mxu3 %v5502_v24  ;;  %668 = vmatpush.msrb.mxu2 %v5532_v51 }
  0x85   :  { %351 = vmatmul.f32.gmra.mxu0 %v5374_v32  ;;  %541 = vmatmul.f32.vlgmr.msrb.gmra.mxu3 %v7682_v29 }
  0x86   :  { %545 = vmatpush.msra.mxu3 %v5406_v46  ;;  %579 = vmatpush.msrb.mxu0 %v5517_v30 }
  0x87   :  { %669 = vmatpush.msrb.mxu2 %v5539_v54  ;;  %383 = vmatmul.f32.gmra.mxu1 %v5404_v45 }
  0x88   :  { %546 = vmatpush.msra.mxu3 %v5421_v52  ;;  %580 = vmatpush.msrb.mxu0 %v5523_v43 }
  0x89   :  { %430 = vmatmul.f32.gmra.mxu2 %v5472_v11  ;;  %641 = vmatpush.msrb.mxu1 %v5396_v41 }
  0x8a   :  { %547 = vmatpush.msra.mxu3 %v5428_v55  ;;  %670 = vmatpush.msrb.mxu2 %v5544_v58 }
  0x8b   :  { %752 = vmatpush.msra.mxu0 %v5378_v34  ;;  %642 = vmatpush.msrb.mxu1 %v5409_v47 }
  0x8c   :  { %548 = vmatpush.msra.mxu3 %v5440_v61  ;;  %671 = vmatpush.msrb.mxu2 %v5550_v33 }
  0x8d   :  { %354 = vmatmul.f32.gmra.mxu0 %v5402_v44  ;;  %643 = vmatpush.msrb.mxu1 %v5416_v49 }
  0x8e   :  { %549 = vmatpush.msra.mxu3 %v5461_v6  ;;  %753 = vmatpush.msra.mxu0 %v5384_v36 }
  0x8f   :  { %672 = vmatpush.msrb.mxu2 %v5556_v63  ;;  %386 = vmatmul.f32.gmra.mxu1 %v5438_v60 }
  0x90   :  { %550 = vmatpush.msra.mxu3 %v5474_v12  ;;  %754 = vmatpush.msra.mxu0 %v5390_v38 }
  0x91   :  { %673 = vmatpush.msrb.mxu2 %v5563_v2  ;;  %644 = vmatpush.msrb.mxu1 %v5423_v53 }
  0x92   :  { %551 = vmatpush.msra.mxu3 %v5490_v18  ;;  %755 = vmatpush.msra.mxu0 %v5396_v41 }
  0x93   :  { %792 = vmatpush.msra.mxu2 %v5380_v35  ;;  %645 = vmatpush.msrb.mxu1 %v5430_v56 }
  0x94   :  { %552 = vmatpush.msra.mxu3 %v5499_v22  ;;  %756 = vmatpush.msra.mxu0 %v5409_v47 }
  0x95   :  { %357 = vmatmul.f32.gmra.mxu0 %v5436_v59  ;;  %793 = vmatpush.msra.mxu2 %v5386_v37 }
  0x96   :  { %553 = vmatpush.msra.mxu3 %v5520_v31  ;;  %757 = vmatpush.msra.mxu0 %v5416_v49 }
  0x97   :  { %794 = vmatpush.msra.mxu2 %v5392_v39  ;;  %646 = vmatpush.msrb.mxu1 %v5442_v62 }
  0x98   :  { %554 = vmatpush.msra.mxu3 %v5527_v48  ;;  %758 = vmatpush.msra.mxu0 %v5423_v53 }
  0x99   :  { %795 = vmatpush.msra.mxu2 %v5398_v42  ;;  %389 = vmatmul.f32.gmra.mxu1 %v5472_v11 }
  0x9a   :  { %555 = vmatpush.msra.mxu3 %v5532_v51  ;;  %759 = vmatpush.msra.mxu0 %v5430_v56 }
  0x9b   :  { %796 = vmatpush.msra.mxu2 %v5418_v50  ;;  %647 = vmatpush.msrb.mxu1 %v5451_v1 }
  0x9c   :  { %556 = vmatpush.msra.mxu3 %v5539_v54  ;;  %760 = vmatpush.msra.mxu0 %v5442_v62 }
  0x9d   :  { %360 = vmatmul.f32.gmra.mxu0 %v5470_v10  ;;  %797 = vmatpush.msra.mxu2 %v5432_v57 }
  0x9e   :  { %557 = vmatpush.msra.mxu3 %v5544_v58  ;;  %648 = vmatpush.msrb.mxu1 %v5456_v4 }
  0x9f   :  { %798 = vmatpush.msra.mxu2 %v5447_v0  ;;  %761 = vmatpush.msra.mxu0 %v5451_v1 }
  0xa0   :  { %558 = vmatpush.msra.mxu3 %v5550_v33  ;;  %649 = vmatpush.msrb.mxu1 %v5465_v8 }
  0xa1   :  { %799 = vmatpush.msra.mxu2 %v5454_v3  ;;  %762 = vmatpush.msra.mxu0 %v5456_v4 }
  0xa2   :  { %559 = vmatpush.msra.mxu3 %v5556_v63  ;;  %392 = vmatmul.f32.gmra.mxu1 %v5374_v32 }
  0xa3   :  { %800 = vmatpush.msra.mxu2 %v5463_v7  ;;  %650 = vmatpush.msrb.mxu1 %v5476_v13 }
  0xa4   :  { %560 = vmatpush.msra.mxu3 %v5563_v2  ;;  %763 = vmatpush.msra.mxu0 %v5465_v8 }
  0xa5   :  { %561 = vmatmul.f32.vlgmr.msra.gmra.mxu3 %v7682_v29  ;;  %581 = vmatmul.f32.vlgmr.msrb.gmra.mxu0 %v7682_v29 }
  0xa6   :  { %678 = vmatpush.msrb.mxu3 %v5380_v35  ;;  %801 = vmatpush.msra.mxu2 %v5479_v14 }
  0xa7   :  { %651 = vmatpush.msrb.mxu1 %v5485_v16  ;;  %764 = vmatpush.msra.mxu0 %v5476_v13 }
  0xa8   :  { %679 = vmatpush.msrb.mxu3 %v5386_v37  ;;  %802 = vmatpush.msra.mxu2 %v5487_v17 }
  0xa9   :  { %652 = vmatpush.msrb.mxu1 %v5493_v20  ;;  %765 = vmatpush.msra.mxu0 %v5485_v16 }
  0xaa   :  { %680 = vmatpush.msrb.mxu3 %v5392_v39  ;;  %803 = vmatpush.msra.mxu2 %v5495_v21 }
  0xab   :  { %653 = vmatpush.msrb.mxu1 %v5502_v24  ;;  %766 = vmatpush.msra.mxu0 %v5493_v20 }
  0xac   :  { %681 = vmatpush.msrb.mxu3 %v5398_v42  ;;  %804 = vmatpush.msra.mxu2 %v5504_v25 }
  0xad   :  { %395 = vmatmul.f32.gmra.mxu1 %v5402_v44  ;;  %767 = vmatpush.msra.mxu0 %v5502_v24 }
  0xae   :  { %682 = vmatpush.msrb.mxu3 %v5418_v50  ;;  %805 = vmatpush.msra.mxu2 %v5512_v27 }
  0xaf   :  { %772 = vmatpush.msra.mxu1 %v5406_v46  ;;  %886 = vmatpush.msrb.mxu0 %v5406_v46 }
  0xb0   :  { %683 = vmatpush.msrb.mxu3 %v5432_v57  ;;  %806 = vmatpush.msra.mxu2 %v5517_v30 }
  0xb1   :  { %773 = vmatpush.msra.mxu1 %v5421_v52  ;;  %887 = vmatpush.msrb.mxu0 %v5421_v52 }
  0xb2   :  { %684 = vmatpush.msrb.mxu3 %v5447_v0  ;;  %807 = vmatpush.msra.mxu2 %v5523_v43 }
  0xb3   :  { %774 = vmatpush.msra.mxu1 %v5428_v55  ;;  %888 = vmatpush.msrb.mxu0 %v5428_v55 }
  0xb4   :  { %685 = vmatpush.msrb.mxu3 %v5454_v3 }
  0xb5   :  { %775 = vmatpush.msra.mxu1 %v5440_v61  ;;  %889 = vmatpush.msrb.mxu0 %v5440_v61 }
  0xb6   :  { %686 = vmatpush.msrb.mxu3 %v5463_v7  ;;  %398 = vmatmul.f32.gmra.mxu1 %v5436_v59 }
  0xb7   :  { %776 = vmatpush.msra.mxu1 %v5461_v6  ;;  %890 = vmatpush.msrb.mxu0 %v5461_v6 }
  0xb8   :  { %687 = vmatpush.msrb.mxu3 %v5479_v14 }
  0xb9   :  { %777 = vmatpush.msra.mxu1 %v5474_v12  ;;  %891 = vmatpush.msrb.mxu0 %v5474_v12 }
  0xba   :  { %688 = vmatpush.msrb.mxu3 %v5487_v17 }
  0xbb   :  { %778 = vmatpush.msra.mxu1 %v5490_v18  ;;  %892 = vmatpush.msrb.mxu0 %v5490_v18 }
  0xbc   :  { %689 = vmatpush.msrb.mxu3 %v5495_v21 }
  0xbd   :  { %779 = vmatpush.msra.mxu1 %v5499_v22  ;;  %893 = vmatpush.msrb.mxu0 %v5499_v22 }
  0xbe   :  { %690 = vmatpush.msrb.mxu3 %v5504_v25  ;;  %401 = vmatmul.f32.gmra.mxu1 %v5470_v10  ;;  %v315_v10 = vld [vmem:[#allocation10] sm:$0x7] }
  0xbf   :  { %780 = vmatpush.msra.mxu1 %v5520_v31  ;;  %894 = vmatpush.msrb.mxu0 %v5520_v31  ;;  %v5703_v15 = vperm.slane %v315_v10, 0 }
  0xc0   :  { %691 = vmatpush.msrb.mxu3 %v5512_v27 }
  0xc1   :  { %781 = vmatpush.msra.mxu1 %v5527_v48  ;;  %895 = vmatpush.msrb.mxu0 %v5527_v48  ;;  %7769 = vst [vmem:[#allocation51_spill] sm:$0xff] %v5703_v15 }
  0xc2   :  { %692 = vmatpush.msrb.mxu3 %v5517_v30 }
  0xc3   :  { %782 = vmatpush.msra.mxu1 %v5532_v51  ;;  %896 = vmatpush.msrb.mxu0 %v5532_v51 }
  0xc4   :  { %693 = vmatpush.msrb.mxu3 %v5523_v43 }
  0xc5   :  { %783 = vmatpush.msra.mxu1 %v5539_v54  ;;  %897 = vmatpush.msrb.mxu0 %v5539_v54 }
  0xc6   :  { %866 = vmatpush.msra.mxu3 %v5378_v34 }
  0xc7   :  { %784 = vmatpush.msra.mxu1 %v5544_v58  ;;  %898 = vmatpush.msrb.mxu0 %v5544_v58 }
  0xc8   :  { %867 = vmatpush.msra.mxu3 %v5384_v36 }
  0xc9   :  { %785 = vmatpush.msra.mxu1 %v5550_v33  ;;  %899 = vmatpush.msrb.mxu0 %v5550_v33 }
  0xca   :  { %868 = vmatpush.msra.mxu3 %v5390_v38 }
  0xcb   :  { %786 = vmatpush.msra.mxu1 %v5556_v63  ;;  %900 = vmatpush.msrb.mxu0 %v5556_v63 }
  0xcc   :  { %869 = vmatpush.msra.mxu3 %v5396_v41 }
  0xcd   :  { %787 = vmatpush.msra.mxu1 %v5563_v2  ;;  %901 = vmatpush.msrb.mxu0 %v5563_v2  ;;  %v5717_v2 = vld [vmem:[#allocation12] ss:$0 sm:$0xff] }
  0xce   :  { %870 = vmatpush.msra.mxu3 %v5409_v47 }
  0xd0   :  { %871 = vmatpush.msra.mxu3 %v5416_v49 }
  0xd2   :  { %872 = vmatpush.msra.mxu3 %v5423_v53 }
  0xd4   :  { %873 = vmatpush.msra.mxu3 %v5430_v56 }
  0xd6   :  { %874 = vmatpush.msra.mxu3 %v5442_v62 }
  0xd8   :  { %875 = vmatpush.msra.mxu3 %v5451_v1 }
  0xda   :  { %876 = vmatpush.msra.mxu3 %v5456_v4 }
  0xdc   :  { %877 = vmatpush.msra.mxu3 %v5465_v8 }
  0xde   :  { %878 = vmatpush.msra.mxu3 %v5476_v13 }
  0xe0   :  { %879 = vmatpush.msra.mxu3 %v5485_v16 }
  0xe2   :  { %880 = vmatpush.msra.mxu3 %v5493_v20  ;;  %v340_v32 = vpop.f32.mrf.mxu0 }
  0xe3   :  { %v341_v19 = vadd.f32 %v340_v32, %v5703_v15 }
  0xe4   :  { %881 = vmatpush.msra.mxu3 %v5502_v24 }
  0xe8   :  { %v5689_v44 = vpop.f32.mrf.mxu3 }
  0xe9   :  { %7762 = vst [vmem:[#allocation44_spill] sm:$0xff] %v5689_v44 }
  0xea   :  { %v5691_v45 = vpop.f32.mrf.mxu0 }
  0xeb   :  { %7763 = vst [vmem:[#allocation45_spill] sm:$0xff] %v5691_v45 }
  0xf0   :  { %v5693_v59 = vpop.f32.mrf.mxu3 }
  0xf1   :  { %7764 = vst [vmem:[#allocation46_spill] sm:$0xff] %v5693_v59 }
  0xf2   :  { %v5695_v60 = vpop.f32.mrf.mxu0 }
  0xf3   :  { %7765 = vst [vmem:[#allocation47_spill] sm:$0xff] %v5695_v60 }
  0xf6   :  { %v381_v60 = vpop.f32.mrf.mxu1 }
  0xf8   :  { %v5697_v5 = vpop.f32.mrf.mxu3 }
  0xf9   :  { %7766 = vst [vmem:[#allocation48_spill] sm:$0xff] %v5697_v5 }
  0xfa   :  { %v5701_v11 = vpop.f32.mrf.mxu0 }
  0xfb   :  { %7768 = vst [vmem:[#allocation50_spill] sm:$0xff] %v5701_v11 }
 0x100   :  { %v5699_v9 = vpop.f32.mrf.mxu3 }
 0x101   :  { %7767 = vst [vmem:[#allocation49_spill] sm:$0xff] %v5699_v9  ;;  %v5712_v9 = vperm.slane %v315_v10, 1 }
 0x102   :  { %v5706_v28 = vpop.f32.mrf.mxu0 }
 0x103   :  { %7770 = vst [vmem:[#allocation52_spill] sm:$0xff] %v5706_v28  ;;  %v382_v45 = vadd.f32 %v381_v60, %v5712_v9 }
 0x104   :  { %7773 = vst [vmem:[#allocation55_spill] sm:$0xff] %v5712_v9 }
 0x108   :  { %v542_v23 = vpop.f32.mrf.mxu3 }
 0x109   :  { %v585_v26 = vadd.f32 %v542_v23, %v341_v19 }
 0x10a   :  { %v5708_v59 = vpop.f32.mrf.mxu0 }
 0x10b   :  { %v4278_v40 = vmul.f32 -1.442695, %v585_v26  ;;  %7771 = vst [vmem:[#allocation53_spill] sm:$0xff] %v5708_v59 }
 0x10d   :  { %4383 = vpow2.f32 %v4278_v40 }
 0x112   :  { %v5710_v5 = vpop.f32.mrf.mxu0 }
 0x113   :  { %v4384_v29 = vpop.eup %4383  ;;  %7772 = vst [vmem:[#allocation54_spill] sm:$0xff] %v5710_v5 }
 0x114   :  { %v589_v44 = vadd.f32 1.0, %v4384_v29 }
 0x116   :  { %4385 = vrcp.f32 %v589_v44  ;;  %v601_v29 = vand.u32 2147483648, %v589_v44  ;;  %vm595_vm1 = vweird.f32 %v589_v44  ;;  %v599_v5 = vand.u32 2147483647, %v589_v44 }
 0x118   :  { %v602_v63 = vor.u32 1.1754944e-38, %v601_v29  ;;  %vm600_vm3 = vcmp.eq.f32.partialorder %v599_v5, 8.507059e+37 }
 0x11a   :  { %v5715_v28 = vpop.f32.mrf.mxu0 }
 0x11b   :  { %7774 = vst [vmem:[#allocation56_spill] sm:$0xff] %v5715_v28 }
 0x11c   :  { %v4386_v11 = vpop.eup %4385 }
 0x11d   :  { %v591_v32 = vmul.f32 %v4386_v11, %v589_v44  ;;  %vm596_vm0 = vweird.f32 %v4386_v11 }
 0x11e   :  { %vm597_vm2 = vmor %vm595_vm1, %vm596_vm0 }
 0x11f   :  { %v592_v19 = vsub.f32 1.0, %v591_v32  ;;  %v422_v32 = vpop.f32.mrf.mxu2 }
 0x121   :  { %v593_v40 = vmul.f32 %v4386_v11, %v592_v19  ;;  %v5720_v19 = vperm.slane %v315_v10, 2 }
 0x122   :  { %v582_v43 = vpop.f32.mrf.mxu0 }
 0x123   :  { %v594_v59 = vadd.f32 %v4386_v11, %v593_v40 }
 0x125   :  { %v598_v60 = vsel %vm597_vm2, %v4386_v11, %v594_v59 }
 0x128   :  { %v562_v15 = vpop.f32.mrf.mxu3 }
 0x129   :  { %v605_v23 = vadd.f32 %v562_v15, %v382_v45  ;;  %v625_v45 = vadd.f32 %v5717_v2, %v582_v43  ;;  %v603_v15 = vsel %vm600_vm3, %v602_v63, %v598_v60 }
 0x12b   :  { %v4279_v26 = vmul.f32 -1.442695, %v605_v23  ;;  %v626_v23 = vmul.f32 %v625_v45, %v603_v15  ;;  %v7780_v15 = vld [vmem:[#allocation36_spill] sm:$0xff] }
 0x12d   :  { %4387 = vpow2.f32 %v4279_v26  ;;  %v423_v26 = vadd.f32 %v422_v32, %v5720_v19  ;;  %v7781_v32 = vld [vmem:[#allocation43_spill] sm:$0xff] }
 0x12f   :  { %v627_v44 = vadd.f32 %v626_v23, %v423_v26  ;;  %v384_v23 = vpop.f32.mrf.mxu1 }
 0x133   :  { %v4388_v24 = vpop.eup %4387 }
 0x134   :  { %v609_v9 = vadd.f32 1.0, %v4388_v24 }
 0x136   :  { %4389 = vrcp.f32 %v609_v9  ;;  %v621_v30 = vand.u32 2147483648, %v609_v9  ;;  %v619_v24 = vand.u32 2147483647, %v609_v9  ;;  %vm615_vm5 = vweird.f32 %v609_v9 }
 0x137   :  { %4391 = vtanh.f32 %v627_v44  ;;  %v5776_v26 = vpop.f32.mrf.mxu1 }
 0x138   :  { %v622_v43 = vor.u32 1.1754944e-38, %v621_v30  ;;  %vm620_vm7 = vcmp.eq.f32.partialorder %v619_v24, 8.507059e+37  ;;  %v7776_v30 = vld [vmem:[#allocation38_spill] sm:$0xff]  ;;  %7782 = vst [vmem:[#allocation57_spill] sm:$0xff] %v5776_v26 }
 0x13c   :  { %v4390_v40 = vpop.eup %4389 }
 0x13d   :  { %v611_v28 = vmul.f32 %v4390_v40, %v609_v9  ;;  %vm616_vm4 = vweird.f32 %v4390_v40  ;;  %v4392_v11 = vpop.eup %4391  ;;  %v7778_v9 = vld [vmem:[#allocation42_spill] sm:$0xff] }
 0x13e   :  { %vm617_vm6 = vmor %vm615_vm5, %vm616_vm4 }
 0x13f   :  { %v612_v20 = vsub.f32 1.0, %v611_v28  ;;  %v7779_v28 = vld [vmem:[#allocation39_spill] sm:$0xff] }
 0x141   :  { %v613_v33 = vmul.f32 %v4390_v40, %v612_v20  ;;  %v7775_v20 = vld [vmem:[#allocation41_spill] sm:$0xff] }
 0x143   :  { %v614_v59 = vadd.f32 %v4390_v40, %v613_v33  ;;  %v7777_v33 = vld [vmem:[#allocation35_spill] sm:$0xff] }
 0x145   :  { %v618_v63 = vsel %vm617_vm6, %v4390_v40, %v614_v59  ;;  %v5778_v40 = vpop.f32.mrf.mxu1  ;;  %v425_v59 = vpop.f32.mrf.mxu2 }
 0x146   :  { %v623_v5 = vsel %vm620_vm7, %v622_v43, %v618_v63  ;;  %7783 = vst [vmem:[#allocation58_spill] sm:$0xff] %v5778_v40  ;;  %v7792_v40 = vld [vmem:[#allocation55_spill] sm:$0xff] }
 0x147   :  { %v629_v10 = vsub.f32 1.0, %v623_v5  ;;  %v631_v60 = vmul.f32 0.0, %v623_v5 }
 0x149   :  { %v630_v29 = vmul.f32 %v4392_v11, %v629_v10  ;;  %v7790_v11 = vld [vmem:[#allocation51_spill] sm:$0xff] }
 0x14b   :  { %v5723_v45 = vadd.f32 %v631_v60, %v630_v29  ;;  %v7791_v29 = vld [vmem:[#allocation45_spill] sm:$0xff] }
 0x14c   :  { %v344_v60 = vadd.f32 %v7791_v29, %v7790_v11 }
 0x14d   :  { %654 = vmatmul.f32.vlgmr.msrb.gmra.mxu1 %v5723_v45  ;;  %674 = vmatmul.f32.vlgmr.msrb.gmra.mxu2 %v5723_v45  ;;  %v5780_v44 = vpop.f32.mrf.mxu1  ;;  %v5786_v63 = vpop.f32.mrf.mxu2 }
 0x14e   :  { %694 = vmatmul.f32.vlgmr.msrb.gmra.mxu3 %v5723_v45  ;;  %906 = vmatpush.msrb.mxu1 %v5380_v35  ;;  %7784 = vst [vmem:[#allocation59_spill] sm:$0xff] %v5780_v44 }
 0x14f   :  { %980 = vmatpush.msrb.mxu2 %v5378_v34  ;;  %1000 = vmatpush.msrb.mxu3 %v5406_v46  ;;  %7787 = vst [vmem:[#allocation62_spill] sm:$0xff] %v5786_v63 }
 0x150   :  { %907 = vmatpush.msrb.mxu1 %v5386_v37 }
 0x151   :  { %981 = vmatpush.msrb.mxu2 %v5384_v36  ;;  %1001 = vmatpush.msrb.mxu3 %v5421_v52 }
 0x152   :  { %908 = vmatpush.msrb.mxu1 %v5392_v39 }
 0x153   :  { %982 = vmatpush.msrb.mxu2 %v5390_v38  ;;  %1002 = vmatpush.msrb.mxu3 %v5428_v55 }
 0x154   :  { %909 = vmatpush.msrb.mxu1 %v5398_v42 }
 0x155   :  { %983 = vmatpush.msrb.mxu2 %v5396_v41  ;;  %1003 = vmatpush.msrb.mxu3 %v5440_v61  ;;  %v5782_v24 = vpop.f32.mrf.mxu1  ;;  %v5790_v10 = vpop.f32.mrf.mxu2 }
 0x156   :  { %910 = vmatpush.msrb.mxu1 %v5418_v50  ;;  %7785 = vst [vmem:[#allocation60_spill] sm:$0xff] %v5782_v24 }
 0x157   :  { %984 = vmatpush.msrb.mxu2 %v5409_v47  ;;  %1004 = vmatpush.msrb.mxu3 %v5461_v6  ;;  %7789 = vst [vmem:[#allocation64_spill] sm:$0xff] %v5790_v10 }
 0x158   :  { %911 = vmatpush.msrb.mxu1 %v5432_v57 }
 0x159   :  { %985 = vmatpush.msrb.mxu2 %v5416_v49  ;;  %1005 = vmatpush.msrb.mxu3 %v5474_v12 }
 0x15a   :  { %912 = vmatpush.msrb.mxu1 %v5447_v0 }
 0x15b   :  { %986 = vmatpush.msrb.mxu2 %v5423_v53  ;;  %1006 = vmatpush.msrb.mxu3 %v5490_v18 }
 0x15c   :  { %913 = vmatpush.msrb.mxu1 %v5454_v3 }
 0x15d   :  { %987 = vmatpush.msrb.mxu2 %v5430_v56  ;;  %1007 = vmatpush.msrb.mxu3 %v5499_v22  ;;  %v5784_v43 = vpop.f32.mrf.mxu1 }
 0x15e   :  { %914 = vmatpush.msrb.mxu1 %v5463_v7  ;;  %7786 = vst [vmem:[#allocation61_spill] sm:$0xff] %v5784_v43 }
 0x15f   :  { %988 = vmatpush.msrb.mxu2 %v5442_v62  ;;  %1008 = vmatpush.msrb.mxu3 %v5520_v31 }
 0x160   :  { %915 = vmatpush.msrb.mxu1 %v5479_v14 }
 0x161   :  { %989 = vmatpush.msrb.mxu2 %v5451_v1  ;;  %1009 = vmatpush.msrb.mxu3 %v5527_v48 }
 0x162   :  { %916 = vmatpush.msrb.mxu1 %v5487_v17 }
 0x163   :  { %990 = vmatpush.msrb.mxu2 %v5456_v4  ;;  %1010 = vmatpush.msrb.mxu3 %v5532_v51 }
 0x164   :  { %917 = vmatpush.msrb.mxu1 %v5495_v21 }
 0x165   :  { %991 = vmatpush.msrb.mxu2 %v5465_v8  ;;  %1011 = vmatpush.msrb.mxu3 %v5539_v54  ;;  %v5788_v5 = vpop.f32.mrf.mxu1 }
 0x166   :  { %918 = vmatpush.msrb.mxu1 %v5504_v25  ;;  %7788 = vst [vmem:[#allocation63_spill] sm:$0xff] %v5788_v5 }
 0x167   :  { %992 = vmatpush.msrb.mxu2 %v5476_v13  ;;  %1012 = vmatpush.msrb.mxu3 %v5544_v58 }
 0x168   :  { %919 = vmatpush.msrb.mxu1 %v5512_v27 }
 0x169   :  { %993 = vmatpush.msrb.mxu2 %v5485_v16  ;;  %1013 = vmatpush.msrb.mxu3 %v7775_v20 }
 0x16a   :  { %920 = vmatpush.msrb.mxu1 %v7776_v30 }
 0x16b   :  { %994 = vmatpush.msrb.mxu2 %v7777_v33  ;;  %1014 = vmatpush.msrb.mxu3 %v7778_v9 }
 0x16c   :  { %921 = vmatpush.msrb.mxu1 %v7779_v28  ;;  %v385_v28 = vadd.f32 %v384_v23, %v7792_v40 }
 0x16d   :  { %995 = vmatpush.msrb.mxu2 %v7780_v15  ;;  %1015 = vmatpush.msrb.mxu3 %v7781_v32 }
 0x1ca   :  { %v655_v32 = vpop.f32.mrf.mxu1 }
 0x1cb   :  { %v698_v26 = vadd.f32 %v655_v32, %v344_v60 }
 0x1cd   :  { %v4280_v15 = vmul.f32 -1.442695, %v698_v26 }
 0x1cf   :  { %4393 = vpow2.f32 %v4280_v15 }
 0x1d0   :  { %v675_v44 = vpop.f32.mrf.mxu2 }
 0x1d1   :  { %v718_v24 = vadd.f32 %v675_v44, %v385_v28  ;;  %v695_v23 = vpop.f32.mrf.mxu3 }
 0x1d2   :  { %v738_v44 = vadd.f32 %v5717_v2, %v695_v23 }
 0x1d3   :  { %v4281_v9 = vmul.f32 -1.442695, %v718_v24  ;;  %v426_v24 = vadd.f32 %v425_v59, %v5720_v19 }
 0x1d5   :  { %v4394_v33 = vpop.eup %4393  ;;  %4395 = vpow2.f32 %v4281_v9 }
 0x1d6   :  { %v702_v43 = vadd.f32 1.0, %v4394_v33 }
 0x1d8   :  { %4397 = vrcp.f32 %v702_v43  ;;  %v714_v29 = vand.u32 2147483648, %v702_v43  ;;  %v712_v32 = vand.u32 2147483647, %v702_v43  ;;  %vm708_vm9 = vweird.f32 %v702_v43 }
 0x1da   :  { %v715_v28 = vor.u32 1.1754944e-38, %v714_v29  ;;  %vm713_vm11 = vcmp.eq.f32.partialorder %v712_v32, 8.507059e+37 }
 0x1db   :  { %v4396_v63 = vpop.eup %4395 }
 0x1dc   :  { %v722_v5 = vadd.f32 1.0, %v4396_v63 }
 0x1de   :  { %v4398_v30 = vpop.eup %4397  ;;  %4399 = vrcp.f32 %v722_v5  ;;  %v732_v16 = vand.u32 2147483647, %v722_v5  ;;  %vm728_vm13 = vweird.f32 %v722_v5 }
 0x1df   :  { %v704_v10 = vmul.f32 %v4398_v30, %v702_v43  ;;  %vm709_vm8 = vweird.f32 %v4398_v30 }
 0x1e0   :  { %vm710_vm10 = vmor %vm708_vm9, %vm709_vm8  ;;  %vm733_vm15 = vcmp.eq.f32.partialorder %v732_v16, 8.507059e+37 }
 0x1e1   :  { %v705_v20 = vsub.f32 1.0, %v704_v10 }
 0x1e3   :  { %v706_v11 = vmul.f32 %v4398_v30, %v705_v20  ;;  %v734_v20 = vand.u32 2147483648, %v722_v5 }
 0x1e4   :  { %v4400_v26 = vpop.eup %4399 }
 0x1e5   :  { %v724_v15 = vmul.f32 %v4400_v26, %v722_v5  ;;  %v707_v60 = vadd.f32 %v4398_v30, %v706_v11  ;;  %vm729_vm12 = vweird.f32 %v4400_v26  ;;  %v735_v43 = vor.u32 1.1754944e-38, %v734_v20 }
 0x1e6   :  { %vm730_vm14 = vmor %vm728_vm13, %vm729_vm12 }
 0x1e7   :  { %v725_v9 = vsub.f32 1.0, %v724_v15  ;;  %v711_v33 = vsel %vm710_vm10, %v4398_v30, %v707_v60 }
 0x1e8   :  { %v716_v63 = vsel %vm713_vm11, %v715_v28, %v711_v33 }
 0x1e9   :  { %v726_v10 = vmul.f32 %v4400_v26, %v725_v9  ;;  %v739_v40 = vmul.f32 %v738_v44, %v716_v63  ;;  %v7807_v44 = vld [vmem:[#allocation62_spill] sm:$0xff] }
 0x1eb   :  { %v727_v27 = vadd.f32 %v4400_v26, %v726_v10  ;;  %v740_v58 = vadd.f32 %v739_v40, %v426_v24  ;;  %v429_v24 = vadd.f32 %v7807_v44, %v5720_v19  ;;  %v7809_v44 = vld [vmem:[#allocation50_spill] sm:$0xff] }
 0x1ed   :  { %v731_v11 = vsel %vm730_vm14, %v4400_v26, %v727_v27  ;;  %4401 = vtanh.f32 %v740_v58 }
 0x1ee   :  { %v736_v30 = vsel %vm733_vm15, %v735_v43, %v731_v11 }
 0x1ef   :  { %v742_v29 = vsub.f32 1.0, %v736_v30  ;;  %v744_v59 = vmul.f32 %v736_v30, %v5723_v45 }
 0x1f3   :  { %v4402_v32 = vpop.eup %4401 }
 0x1f4   :  { %v743_v23 = vmul.f32 %v4402_v32, %v742_v29 }
 0x1f6   :  { %v5798_v15 = vadd.f32 %v744_v59, %v743_v23 }
 0x1f8   :  { %768 = vmatmul.f32.vlgmr.msra.gmra.mxu0 %v5798_v15  ;;  %788 = vmatmul.f32.vlgmr.msra.gmra.mxu1 %v5798_v15 }
 0x1f9   :  { %808 = vmatmul.f32.vlgmr.msra.gmra.mxu2 %v5798_v15  ;;  %1020 = vmatpush.msra.mxu0 %v5380_v35  ;;  %v7794_v35 = vld [vmem:[#allocation37_spill] sm:$0xff] }
 0x1fa   :  { %1094 = vmatpush.msra.mxu1 %v5378_v34  ;;  %1114 = vmatpush.msra.mxu2 %v5406_v46  ;;  %v7793_v34 = vld [vmem:[#allocation40_spill] sm:$0xff] }
 0x1fb   :  { %1021 = vmatpush.msra.mxu0 %v5386_v37  ;;  %v7796_v37 = vld [vmem:[#allocation41_spill] sm:$0xff]  ;;  %v7801_v46 = vld [vmem:[#allocation36_spill] sm:$0xff] }
 0x1fc   :  { %1095 = vmatpush.msra.mxu1 %v5384_v36  ;;  %1115 = vmatpush.msra.mxu2 %v5421_v52  ;;  %v7795_v36 = vld [vmem:[#allocation34_spill] sm:$0xff] }
 0x1fd   :  { %1022 = vmatpush.msra.mxu0 %v5392_v39  ;;  %v7798_v39 = vld [vmem:[#allocation35_spill] sm:$0xff] }
 0x1fe   :  { %1096 = vmatpush.msra.mxu1 %v5390_v38  ;;  %1116 = vmatpush.msra.mxu2 %v5428_v55  ;;  %v7797_v38 = vld [vmem:[#allocation38_spill] sm:$0xff]  ;;  %v7806_v55 = vld [vmem:[#allocation57_spill] sm:$0xff] }
 0x1ff   :  { %1023 = vmatpush.msra.mxu0 %v5398_v42  ;;  %v7800_v42 = vld [vmem:[#allocation39_spill] sm:$0xff] }
 0x200   :  { %1097 = vmatpush.msra.mxu1 %v5396_v41  ;;  %1117 = vmatpush.msra.mxu2 %v5440_v61  ;;  %v7799_v41 = vld [vmem:[#allocation42_spill] sm:$0xff] }
 0x201   :  { %1024 = vmatpush.msra.mxu0 %v5418_v50  ;;  %v7804_v50 = vld [vmem:[#allocation47_spill] sm:$0xff] }
 0x202   :  { %1098 = vmatpush.msra.mxu1 %v5409_v47  ;;  %1118 = vmatpush.msra.mxu2 %v5461_v6  ;;  %v7802_v47 = vld [vmem:[#allocation43_spill] sm:$0xff] }
 0x203   :  { %1025 = vmatpush.msra.mxu0 %v5432_v57 }
 0x204   :  { %1099 = vmatpush.msra.mxu1 %v5416_v49  ;;  %1119 = vmatpush.msra.mxu2 %v5474_v12  ;;  %v7803_v49 = vld [vmem:[#allocation51_spill] sm:$0xff] }
 0x205   :  { %1026 = vmatpush.msra.mxu0 %v5447_v0  ;;  %v347_v52 = vadd.f32 %v7804_v50, %v7803_v49  ;;  %v5867_v50 = vld [vmem:[#allocation9 + $0x168] sm:$0xff] }
 0x206   :  { %1100 = vmatpush.msra.mxu1 %v5423_v53  ;;  %1120 = vmatpush.msra.mxu2 %v5490_v18  ;;  %v7805_v53 = vld [vmem:[#allocation55_spill] sm:$0xff] }
 0x207   :  { %1027 = vmatpush.msra.mxu0 %v5454_v3 }
 0x208   :  { %1101 = vmatpush.msra.mxu1 %v5430_v56  ;;  %1121 = vmatpush.msra.mxu2 %v5499_v22  ;;  %v388_v56 = vadd.f32 %v7806_v55, %v7805_v53  ;;  %v5873_v55 = vld [vmem:[#allocation9 + $0x160] sm:$0xff] }
 0x209   :  { %1028 = vmatpush.msra.mxu0 %v5463_v7 }
 0x20a   :  { %1102 = vmatpush.msra.mxu1 %v5442_v62  ;;  %1122 = vmatpush.msra.mxu2 %v5520_v31 }
 0x20b   :  { %1029 = vmatpush.msra.mxu0 %v5479_v14 }
 0x20c   :  { %1103 = vmatpush.msra.mxu1 %v5451_v1  ;;  %1123 = vmatpush.msra.mxu2 %v5527_v48 }
 0x20d   :  { %1030 = vmatpush.msra.mxu0 %v5487_v17 }
 0x20e   :  { %1104 = vmatpush.msra.mxu1 %v5456_v4  ;;  %1124 = vmatpush.msra.mxu2 %v5532_v51 }
 0x20f   :  { %1031 = vmatpush.msra.mxu0 %v5495_v21 }
 0x210   :  { %1105 = vmatpush.msra.mxu1 %v5465_v8  ;;  %1125 = vmatpush.msra.mxu2 %v5539_v54 }
 0x211   :  { %1032 = vmatpush.msra.mxu0 %v5504_v25 }
 0x212   :  { %1106 = vmatpush.msra.mxu1 %v5476_v13  ;;  %1126 = vmatpush.msra.mxu2 %v7793_v34 }
 0x213   :  { %1033 = vmatpush.msra.mxu0 %v7794_v35 }
 0x214   :  { %1107 = vmatpush.msra.mxu1 %v7795_v36  ;;  %1127 = vmatpush.msra.mxu2 %v7796_v37 }
 0x215   :  { %1034 = vmatpush.msra.mxu0 %v7797_v38 }
 0x216   :  { %1108 = vmatpush.msra.mxu1 %v7798_v39  ;;  %1128 = vmatpush.msra.mxu2 %v7799_v41 }
 0x217   :  { %1035 = vmatpush.msra.mxu0 %v7800_v42 }
 0x218   :  { %1109 = vmatpush.msra.mxu1 %v7801_v46  ;;  %1129 = vmatpush.msra.mxu2 %v7802_v47  ;;  %v5864_v46 = vld [vmem:[#allocation9 + $0x178] sm:$0xff] }
 0x275   :  { %v769_v57 = vpop.f32.mrf.mxu0  ;;  %v789_v61 = vpop.f32.mrf.mxu1 }
 0x276   :  { %v812_v62 = vadd.f32 %v769_v57, %v347_v52  ;;  %v832_v0 = vadd.f32 %v789_v61, %v388_v56  ;;  %v5870_v52 = vld [vmem:[#allocation9 + $0x170] sm:$0xff]  ;;  %v5879_v57 = vld [vmem:[#allocation9 + $0x158] sm:$0xff]  ;;  %v5882_v61 = vld [vmem:[#allocation9 + $0x148] sm:$0xff] }
 0x277   :  { %v5876_v56 = vld [vmem:[#allocation9 + $0x150] sm:$0xff] }
 0x278   :  { %v4282_v1 = vmul.f32 -1.442695, %v812_v62  ;;  %v4283_v3 = vmul.f32 -1.442695, %v832_v0  ;;  %v5885_v62 = vld [vmem:[#allocation9 + $0x138] sm:$0xff]  ;;  %v5888_v0 = vld [vmem:[#allocation9 + $0x140] sm:$0xff] }
 0x27a   :  { %4403 = vpow2.f32 %v4282_v1  ;;  %v5891_v1 = vld [vmem:[#allocation9 + $0x130] sm:$0xff] }
 0x27b   :  { %4405 = vpow2.f32 %v4283_v3  ;;  %v5894_v3 = vld [vmem:[#allocation9 + $0x120] sm:$0xff] }
 0x27c   :  { %v809_v40 = vpop.f32.mrf.mxu2 }
 0x27d   :  { %v852_v28 = vadd.f32 %v5717_v2, %v809_v40  ;;  %v5941_v40 = vld [vmem:[#allocation9 + $0xa0] sm:$0xff] }
 0x280   :  { %v4404_v4 = vpop.eup %4403 }
 0x281   :  { %v4406_v6 = vpop.eup %4405  ;;  %v816_v7 = vadd.f32 1.0, %v4404_v4  ;;  %v5897_v4 = vld [vmem:[#allocation9 + $0x128] sm:$0xff] }
 0x282   :  { %v836_v8 = vadd.f32 1.0, %v4406_v6  ;;  %v5900_v6 = vld [vmem:[#allocation9 + $0x118] sm:$0xff] }
 0x283   :  { %4407 = vrcp.f32 %v816_v7  ;;  %v828_v21 = vand.u32 2147483648, %v816_v7  ;;  %v826_v27 = vand.u32 2147483647, %v816_v7  ;;  %vm822_vm1 = vweird.f32 %v816_v7 }
 0x284   :  { %4409 = vrcp.f32 %v836_v8  ;;  %v848_v63 = vand.u32 2147483648, %v836_v8  ;;  %vm842_vm5 = vweird.f32 %v836_v8  ;;  %v846_v20 = vand.u32 2147483647, %v836_v8 }
 0x285   :  { %v829_v26 = vor.u32 1.1754944e-38, %v828_v21  ;;  %vm827_vm3 = vcmp.eq.f32.partialorder %v826_v27, 8.507059e+37  ;;  %v5927_v21 = vld [vmem:[#allocation9 + $0xd0] sm:$0xff]  ;;  %v5934_v27 = vld [vmem:[#allocation9 + $0xb8] sm:$0xff] }
 0x286   :  { %v849_v30 = vor.u32 1.1754944e-38, %v848_v63  ;;  %vm847_vm7 = vcmp.eq.f32.partialorder %v846_v20, 8.507059e+37 }
 0x289   :  { %v4408_v12 = vpop.eup %4407 }
 0x28a   :  { %v4410_v13 = vpop.eup %4409  ;;  %v818_v14 = vmul.f32 %v4408_v12, %v816_v7  ;;  %vm823_vm0 = vweird.f32 %v4408_v12  ;;  %v5903_v7 = vld [vmem:[#allocation9 + $0x108] sm:$0xff] }
 0x28b   :  { %v838_v16 = vmul.f32 %v4410_v13, %v836_v8  ;;  %vm824_vm2 = vmor %vm822_vm1, %vm823_vm0  ;;  %vm843_vm4 = vweird.f32 %v4410_v13  ;;  %v5906_v8 = vld [vmem:[#allocation9 + $0x110] sm:$0xff] }
 0x28c   :  { %v819_v17 = vsub.f32 1.0, %v818_v14  ;;  %vm844_vm6 = vmor %vm842_vm5, %vm843_vm4  ;;  %v5915_v14 = vld [vmem:[#allocation9 + $0xf8] sm:$0xff] }
 0x28d   :  { %v839_v18 = vsub.f32 1.0, %v838_v16  ;;  %v5918_v16 = vld [vmem:[#allocation9 + $0xe8] sm:$0xff] }
 0x28e   :  { %v820_v25 = vmul.f32 %v4408_v12, %v819_v17  ;;  %v5921_v17 = vld [vmem:[#allocation9 + $0xd8] sm:$0xff] }
 0x28f   :  { %v840_v58 = vmul.f32 %v4410_v13, %v839_v18  ;;  %v5924_v18 = vld [vmem:[#allocation9 + $0xe0] sm:$0xff] }
 0x290   :  { %v821_v5 = vadd.f32 %v4408_v12, %v820_v25  ;;  %v5930_v25 = vld [vmem:[#allocation9 + $0xc0] sm:$0xff] }
 0x291   :  { %v841_v9 = vadd.f32 %v4410_v13, %v840_v58  ;;  %v5937_v58 = vld [vmem:[#allocation9 + $0xa8] sm:$0xff] }
 0x292   :  { %v825_v60 = vsel %vm824_vm2, %v4408_v12, %v821_v5  ;;  %v5909_v12 = vld [vmem:[#allocation9 + $0x100] sm:$0xff]  ;;  %v5944_v5 = vld [vmem:[#allocation9 + $0x90] sm:$0xff] }
 0x293   :  { %v830_v33 = vsel %vm827_vm3, %v829_v26, %v825_v60  ;;  %v845_v11 = vsel %vm844_vm6, %v4410_v13, %v841_v9  ;;  %v5912_v13 = vld [vmem:[#allocation9 + $0xf0] sm:$0xff]  ;;  %v5951_v26 = vld [vmem:[#allocation9 + $0x78] sm:$0xff]  ;;  %v5958_v60 = vld [vmem:[#allocation9 + $0x60] sm:$0xff] }
 0x294   :  { %v853_v10 = vmul.f32 %v852_v28, %v830_v33  ;;  %v850_v29 = vsel %vm847_vm7, %v849_v30, %v845_v11  ;;  %v5965_v28 = vld [vmem:[#allocation9 + $0x48] sm:$0xff]  ;;  %v5980_v9 = vld [vmem:[#allocation9] sm:$0xff] }
 0x295   :  { %v856_v32 = vsub.f32 1.0, %v850_v29  ;;  %v858_v36 = vmul.f32 %v850_v29, %v5798_v15 }
 0x296   :  { %v854_v43 = vadd.f32 %v853_v10, %v429_v24  ;;  %v350_v24 = vadd.f32 %v7809_v44, %v7803_v49 }
 0x298   :  { %4411 = vtanh.f32 %v854_v43 }
 0x29e   :  { %v4412_v23 = vpop.eup %4411 }
 0x29f   :  { %v857_v59 = vmul.f32 %v4412_v23, %v856_v32 }
 0x2a1   :  { %v5859_v39 = vadd.f32 %v858_v36, %v857_v59 }
 0x2a3   :  { %882 = vmatmul.f32.vlgmr.msra.gmra.mxu3 %v5859_v39  ;;  %902 = vmatmul.f32.vlgmr.msrb.gmra.mxu0 %v5859_v39 }
 0x2a4   :  { %922 = vmatmul.f32.vlgmr.msrb.gmra.mxu1 %v5859_v39  ;;  %1134 = vmatpush.msra.mxu3 %v5864_v46 }
 0x2a5   :  { %1208 = vmatpush.msrb.mxu0 %v5867_v50  ;;  %1228 = vmatpush.msrb.mxu1 %v5870_v52 }
 0x2a6   :  { %1135 = vmatpush.msra.mxu3 %v5873_v55 }
 0x2a7   :  { %1209 = vmatpush.msrb.mxu0 %v5876_v56  ;;  %1229 = vmatpush.msrb.mxu1 %v5879_v57 }
 0x2a8   :  { %1136 = vmatpush.msra.mxu3 %v5882_v61 }
 0x2a9   :  { %1210 = vmatpush.msrb.mxu0 %v5885_v62  ;;  %1230 = vmatpush.msrb.mxu1 %v5888_v0 }
 0x2aa   :  { %1137 = vmatpush.msra.mxu3 %v5891_v1 }
 0x2ab   :  { %1211 = vmatpush.msrb.mxu0 %v5894_v3  ;;  %1231 = vmatpush.msrb.mxu1 %v5897_v4 }
 0x2ac   :  { %1138 = vmatpush.msra.mxu3 %v5900_v6 }
 0x2ad   :  { %1212 = vmatpush.msrb.mxu0 %v5903_v7  ;;  %1232 = vmatpush.msrb.mxu1 %v5906_v8 }
 0x2ae   :  { %1139 = vmatpush.msra.mxu3 %v5909_v12 }
 0x2af   :  { %1213 = vmatpush.msrb.mxu0 %v5912_v13  ;;  %1233 = vmatpush.msrb.mxu1 %v5915_v14 }
 0x2b0   :  { %1140 = vmatpush.msra.mxu3 %v5918_v16 }
 0x2b1   :  { %1214 = vmatpush.msrb.mxu0 %v5921_v17  ;;  %1234 = vmatpush.msrb.mxu1 %v5924_v18 }
 0x2b2   :  { %1141 = vmatpush.msra.mxu3 %v5927_v21 }
 0x2b3   :  { %1215 = vmatpush.msrb.mxu0 %v5930_v25  ;;  %1235 = vmatpush.msrb.mxu1 %v5499_v22  ;;  %v5948_v22 = vld [vmem:[#allocation9 + $0x88] sm:$0xff] }
 0x2b4   :  { %1142 = vmatpush.msra.mxu3 %v5934_v27 }
 0x2b5   :  { %1216 = vmatpush.msrb.mxu0 %v5937_v58  ;;  %1236 = vmatpush.msrb.mxu1 %v5520_v31  ;;  %v5955_v31 = vld [vmem:[#allocation9 + $0x70] sm:$0xff] }
 0x2b6   :  { %1143 = vmatpush.msra.mxu3 %v5941_v40 }
 0x2b7   :  { %1217 = vmatpush.msrb.mxu0 %v5944_v5  ;;  %1237 = vmatpush.msrb.mxu1 %v5527_v48  ;;  %v5962_v48 = vld [vmem:[#allocation9 + $0x58] sm:$0xff] }
 0x2b8   :  { %1144 = vmatpush.msra.mxu3 %v5948_v22 }
 0x2b9   :  { %1218 = vmatpush.msrb.mxu0 %v5951_v26  ;;  %1238 = vmatpush.msrb.mxu1 %v5532_v51  ;;  %v5970_v51 = vld [vmem:[#allocation9 + $0x30] sm:$0xff] }
 0x2ba   :  { %1145 = vmatpush.msra.mxu3 %v5955_v31 }
 0x2bb   :  { %1219 = vmatpush.msrb.mxu0 %v5958_v60  ;;  %1239 = vmatpush.msrb.mxu1 %v5539_v54  ;;  %v5975_v54 = vld [vmem:[#allocation9 + $0x18] sm:$0xff] }
 0x2bc   :  { %1146 = vmatpush.msra.mxu3 %v5962_v48 }
 0x2bd   :  { %1220 = vmatpush.msrb.mxu0 %v5965_v28  ;;  %1240 = vmatpush.msrb.mxu1 %v7793_v34  ;;  %v7808_v34 = vld [vmem:[#allocation58_spill] sm:$0xff] }
 0x2be   :  { %1147 = vmatpush.msra.mxu3 %v7794_v35  ;;  %v391_v35 = vadd.f32 %v7808_v34, %v7805_v53 }
 0x2bf   :  { %1221 = vmatpush.msrb.mxu0 %v5970_v51  ;;  %1241 = vmatpush.msrb.mxu1 %v7796_v37 }
 0x2c0   :  { %1148 = vmatpush.msra.mxu3 %v7797_v38 }
 0x2c1   :  { %1222 = vmatpush.msrb.mxu0 %v5975_v54  ;;  %1242 = vmatpush.msrb.mxu1 %v7799_v41 }
 0x2c2   :  { %1149 = vmatpush.msra.mxu3 %v7800_v42 }
 0x2c3   :  { %1223 = vmatpush.msrb.mxu0 %v5980_v9  ;;  %1243 = vmatpush.msrb.mxu1 %v7802_v47 }
 0x320   :  { %v903_v37 = vpop.f32.mrf.mxu0 }
 0x321   :  { %v946_v33 = vadd.f32 %v903_v37, %v391_v35 }
 0x323   :  { %v4285_v38 = vmul.f32 -1.442695, %v946_v33  ;;  %v923_v33 = vpop.f32.mrf.mxu1 }
 0x325   :  { %4413 = vpow2.f32 %v4285_v38 }
 0x326   :  { %v883_v63 = vpop.f32.mrf.mxu3 }
 0x327   :  { %v926_v41 = vadd.f32 %v883_v63, %v350_v24  ;;  %v966_v24 = vadd.f32 %v5717_v2, %v923_v33 }
 0x329   :  { %v4284_v10 = vmul.f32 -1.442695, %v926_v41 }
 0x32b   :  { %v4414_v42 = vpop.eup %4413  ;;  %4415 = vpow2.f32 %v4284_v10 }
 0x32c   :  { %v950_v20 = vadd.f32 1.0, %v4414_v42  ;;  %v7810_v42 = vld [vmem:[#allocation64_spill] sm:$0xff] }
 0x32e   :  { %4417 = vrcp.f32 %v950_v20  ;;  %vm956_vm13 = vweird.f32 %v950_v20 }
 0x331   :  { %v4416_v43 = vpop.eup %4415 }
 0x332   :  { %v930_v11 = vadd.f32 1.0, %v4416_v43  ;;  %v432_v43 = vadd.f32 %v7810_v42, %v5720_v19 }
 0x334   :  { %4419 = vrcp.f32 %v930_v11  ;;  %v4418_v47 = vpop.eup %4417  ;;  %v942_v36 = vand.u32 2147483648, %v930_v11  ;;  %v940_v35 = vand.u32 2147483647, %v930_v11  ;;  %vm936_vm9 = vweird.f32 %v930_v11 }
 0x335   :  { %v952_v30 = vmul.f32 %v4418_v47, %v950_v20  ;;  %vm957_vm12 = vweird.f32 %v4418_v47 }
 0x336   :  { %v943_v44 = vor.u32 1.1754944e-38, %v942_v36  ;;  %vm941_vm11 = vcmp.eq.f32.partialorder %v940_v35, 8.507059e+37  ;;  %vm958_vm14 = vmor %vm956_vm13, %vm957_vm12 }
 0x337   :  { %v953_v23 = vsub.f32 1.0, %v952_v30  ;;  %v962_v30 = vand.u32 2147483648, %v950_v20 }
 0x339   :  { %v954_v37 = vmul.f32 %v4418_v47, %v953_v23 }
 0x33a   :  { %v4420_v29 = vpop.eup %4419 }
 0x33b   :  { %v932_v32 = vmul.f32 %v4420_v29, %v930_v11  ;;  %vm937_vm8 = vweird.f32 %v4420_v29  ;;  %v955_v41 = vadd.f32 %v4418_v47, %v954_v37  ;;  %v963_v11 = vor.u32 1.1754944e-38, %v962_v30 }
 0x33c   :  { %vm938_vm10 = vmor %vm936_vm9, %vm937_vm8 }
 0x33d   :  { %v933_v59 = vsub.f32 1.0, %v932_v32 }
 0x33f   :  { %v934_v34 = vmul.f32 %v4420_v29, %v933_v59  ;;  %v960_v59 = vand.u32 2147483647, %v950_v20 }
 0x341   :  { %v935_v38 = vadd.f32 %v4420_v29, %v934_v34  ;;  %v959_v34 = vsel %vm958_vm14, %v4418_v47, %v955_v41  ;;  %vm961_vm15 = vcmp.eq.f32.partialorder %v960_v59, 8.507059e+37 }
 0x342   :  { %v964_v36 = vsel %vm961_vm15, %v963_v11, %v959_v34 }
 0x343   :  { %v939_v63 = vsel %vm938_vm10, %v4420_v29, %v935_v38  ;;  %v970_v33 = vsub.f32 1.0, %v964_v36  ;;  %v972_v37 = vmul.f32 %v964_v36, %v5859_v39 }
 0x344   :  { %v944_v10 = vsel %vm941_vm11, %v943_v44, %v939_v63 }
 0x345   :  { %v967_v32 = vmul.f32 %v966_v24, %v944_v10 }
 0x347   :  { %v968_v23 = vadd.f32 %v967_v32, %v432_v43 }
 0x349   :  { %4421 = vtanh.f32 %v968_v23 }
 0x34f   :  { %v4422_v29 = vpop.eup %4421 }
 0x350   :  { %v971_v35 = vmul.f32 %v4422_v29, %v970_v33 }
 0x352   :  { %v5992_v38 = vadd.f32 %v972_v37, %v971_v35 }
 0x354   :  { %996 = vmatmul.f32.vlgmr.msrb.gmra.mxu2 %v5992_v38  ;;  %1016 = vmatmul.f32.vlgmr.msrb.gmra.mxu3 %v5992_v38 }
 0x355   :  { %1036 = vmatmul.f32.vlgmr.msra.gmra.mxu0 %v5992_v38  ;;  %1248 = vmatpush.msrb.mxu2 %v5864_v46 }
 0x356   :  { %1322 = vmatpush.msrb.mxu3 %v5867_v50  ;;  %1342 = vmatpush.msra.mxu0 %v5870_v52  ;;  %v4723_v50 = vld [vmem:[#allocation9 + $0xc8] sm:$0xff]  ;;  %v4724_v52 = vld [vmem:[#allocation9 + $0xb0] sm:$0xff] }
 0x357   :  { %1249 = vmatpush.msrb.mxu2 %v5873_v55 }
 0x358   :  { %1323 = vmatpush.msrb.mxu3 %v5876_v56  ;;  %1343 = vmatpush.msra.mxu0 %v5879_v57  ;;  %v4725_v56 = vld [vmem:[#allocation9 + $0x98] sm:$0xff]  ;;  %v4726_v57 = vld [vmem:[#allocation9 + $0x80] sm:$0xff] }
 0x359   :  { %1250 = vmatpush.msrb.mxu2 %v5882_v61 }
 0x35a   :  { %1324 = vmatpush.msrb.mxu3 %v5885_v62  ;;  %1344 = vmatpush.msra.mxu0 %v5888_v0  ;;  %v4727_v62 = vld [vmem:[#allocation9 + $0x68] sm:$0xff]  ;;  %v4728_v0 = vld [vmem:[#allocation9 + $0x50] sm:$0xff] }
 0x35b   :  { %1251 = vmatpush.msrb.mxu2 %v5891_v1 }
 0x35c   :  { %1325 = vmatpush.msrb.mxu3 %v5894_v3  ;;  %1345 = vmatpush.msra.mxu0 %v5897_v4  ;;  %v6030_v3 = vld [vmem:[#allocation9 + $0x40] sm:$0xff]  ;;  %v4730_v4 = vld [vmem:[#allocation9 + $0x38] sm:$0xff] }
 0x35d   :  { %1252 = vmatpush.msrb.mxu2 %v5900_v6 }
 0x35e   :  { %1326 = vmatpush.msrb.mxu3 %v5903_v7  ;;  %1346 = vmatpush.msra.mxu0 %v5906_v8  ;;  %v6034_v7 = vld [vmem:[#allocation9 + $0x28] sm:$0xff]  ;;  %v4732_v8 = vld [vmem:[#allocation9 + $0x20] sm:$0xff] }
 0x35f   :  { %1253 = vmatpush.msrb.mxu2 %v5909_v12 }
 0x360   :  { %1327 = vmatpush.msrb.mxu3 %v5912_v13  ;;  %1347 = vmatpush.msra.mxu0 %v5915_v14  ;;  %v6038_v13 = vld [vmem:[#allocation9 + $0x10] sm:$0xff]  ;;  %v4734_v14 = vld [vmem:[#allocation9 + $0x8] sm:$0xff] }
 0x361   :  { %1254 = vmatpush.msrb.mxu2 %v5918_v16 }
 0x362   :  { %1328 = vmatpush.msrb.mxu3 %v5921_v17  ;;  %1348 = vmatpush.msra.mxu0 %v5924_v18  ;;  %v7811_v17 = vld [vmem:[#allocation52_spill] sm:$0xff] }
 0x363   :  { %1255 = vmatpush.msrb.mxu2 %v5927_v21  ;;  %v353_v18 = vadd.f32 %v7811_v17, %v7803_v49 }
 0x364   :  { %1329 = vmatpush.msrb.mxu3 %v5930_v25  ;;  %1349 = vmatpush.msra.mxu0 %v4723_v50  ;;  %v7812_v25 = vld [vmem:[#allocation59_spill] sm:$0xff]  ;;  %v7813_v50 = vld [vmem:[#allocation44_spill] sm:$0xff] }
 0x365   :  { %1256 = vmatpush.msrb.mxu2 %v5934_v27 }
 0x366   :  { %1330 = vmatpush.msrb.mxu3 %v5937_v58  ;;  %1350 = vmatpush.msra.mxu0 %v4724_v52  ;;  %v394_v58 = vadd.f32 %v7812_v25, %v7805_v53  ;;  %v435_v52 = vadd.f32 %v7813_v50, %v5720_v19  ;;  %v6075_v50 = vld [vmem:[#allocation12] ss:$0 sm:$0xff] }
 0x367   :  { %1257 = vmatpush.msrb.mxu2 %v5941_v40 }
 0x368   :  { %1331 = vmatpush.msrb.mxu3 %v5944_v5  ;;  %1351 = vmatpush.msra.mxu0 %v4725_v56 }
 0x369   :  { %1258 = vmatpush.msrb.mxu2 %v5948_v22 }
 0x36a   :  { %1332 = vmatpush.msrb.mxu3 %v5951_v26  ;;  %1352 = vmatpush.msra.mxu0 %v4726_v57 }
 0x36b   :  { %1259 = vmatpush.msrb.mxu2 %v5955_v31 }
 0x36c   :  { %1333 = vmatpush.msrb.mxu3 %v5958_v60  ;;  %1353 = vmatpush.msra.mxu0 %v4727_v62 }
 0x36d   :  { %1260 = vmatpush.msrb.mxu2 %v5962_v48 }
 0x36e   :  { %1334 = vmatpush.msrb.mxu3 %v5965_v28  ;;  %1354 = vmatpush.msra.mxu0 %v4728_v0 }
 0x36f   :  { %1261 = vmatpush.msrb.mxu2 %v6030_v3 }
 0x370   :  { %1335 = vmatpush.msrb.mxu3 %v5970_v51  ;;  %1355 = vmatpush.msra.mxu0 %v4730_v4 }
 0x371   :  { %1262 = vmatpush.msrb.mxu2 %v6034_v7 }
 0x372   :  { %1336 = vmatpush.msrb.mxu3 %v5975_v54  ;;  %1356 = vmatpush.msra.mxu0 %v4732_v8 }
 0x373   :  { %1263 = vmatpush.msrb.mxu2 %v6038_v13 }
 0x374   :  { %1337 = vmatpush.msrb.mxu3 %v5980_v9  ;;  %1357 = vmatpush.msra.mxu0 %v4734_v14 }
 0x3d2   :  { %v1037_v23 = vpop.f32.mrf.mxu0 }
 0x3d3   :  { %v1080_v33 = vadd.f32 %v5717_v2, %v1037_v23 }
 0x3d7   :  { %v997_v5 = vpop.f32.mrf.mxu2  ;;  %v1017_v26 = vpop.f32.mrf.mxu3 }
 0x3d8   :  { %v1040_v60 = vadd.f32 %v997_v5, %v353_v18  ;;  %v1060_v28 = vadd.f32 %v1017_v26, %v394_v58  ;;  %v1447_v26 = vld [vmem:[#allocation13 + $0x38] sm:$0xff] }
 0x3da   :  { %v4286_v51 = vmul.f32 -1.442695, %v1040_v60  ;;  %v4287_v54 = vmul.f32 -1.442695, %v1060_v28  ;;  %v1446_v28 = vld [vmem:[#allocation13 + $0x30] sm:$0xff] }
 0x3dc   :  { %4423 = vpow2.f32 %v4286_v51  ;;  %v1445_v51 = vld [vmem:[#allocation13 + $0x28] sm:$0xff] }
 0x3dd   :  { %4425 = vpow2.f32 %v4287_v54 }
 0x3e2   :  { %v4424_v20 = vpop.eup %4423 }
 0x3e3   :  { %v4426_v47 = vpop.eup %4425  ;;  %v1044_v44 = vadd.f32 1.0, %v4424_v20  ;;  %v1444_v20 = vld [vmem:[#allocation13 + $0x20] sm:$0xff] }
 0x3e4   :  { %v1064_v9 = vadd.f32 1.0, %v4426_v47 }
 0x3e5   :  { %4427 = vrcp.f32 %v1044_v44  ;;  %v1056_v43 = vand.u32 2147483648, %v1044_v44  ;;  %v1054_v59 = vand.u32 2147483647, %v1044_v44  ;;  %vm1050_vm1 = vweird.f32 %v1044_v44 }
 0x3e6   :  { %4429 = vrcp.f32 %v1064_v9  ;;  %v1076_v57 = vand.u32 2147483648, %v1064_v9  ;;  %vm1070_vm5 = vweird.f32 %v1064_v9  ;;  %v1074_v62 = vand.u32 2147483647, %v1064_v9 }
 0x3e7   :  { %v1057_v36 = vor.u32 1.1754944e-38, %v1056_v43  ;;  %vm1055_vm3 = vcmp.eq.f32.partialorder %v1054_v59, 8.507059e+37 }
 0x3e8   :  { %v1077_v8 = vor.u32 1.1754944e-38, %v1076_v57  ;;  %vm1075_vm7 = vcmp.eq.f32.partialorder %v1074_v62, 8.507059e+37 }
 0x3eb   :  { %v4428_v24 = vpop.eup %4427 }
 0x3ec   :  { %v4430_v63 = vpop.eup %4429  ;;  %v1046_v41 = vmul.f32 %v4428_v24, %v1044_v44  ;;  %vm1051_vm0 = vweird.f32 %v4428_v24  ;;  %v1443_v44 = vld [vmem:[#allocation13 + $0x18] sm:$0xff] }
 0x3ed   :  { %v1066_v10 = vmul.f32 %v4430_v63, %v1064_v9  ;;  %vm1052_vm2 = vmor %vm1050_vm1, %vm1051_vm0  ;;  %vm1071_vm4 = vweird.f32 %v4430_v63  ;;  %v1442_v9 = vld [vmem:[#allocation13 + $0x10] sm:$0xff] }
 0x3ee   :  { %v1047_v42 = vsub.f32 1.0, %v1046_v41  ;;  %vm1072_vm6 = vmor %vm1070_vm5, %vm1071_vm4 }
 0x3ef   :  { %v1067_v30 = vsub.f32 1.0, %v1066_v10  ;;  %v1440_v10 = vld [vmem:[#allocation13] sm:$0xff] }
 0x3f0   :  { %v1048_v32 = vmul.f32 %v4428_v24, %v1047_v42 }
 0x3f1   :  { %v1068_v34 = vmul.f32 %v4430_v63, %v1067_v30 }
 0x3f2   :  { %v1049_v11 = vadd.f32 %v4428_v24, %v1048_v32 }
 0x3f3   :  { %v1069_v37 = vadd.f32 %v4430_v63, %v1068_v34 }
 0x3f4   :  { %v1053_v29 = vsel %vm1052_vm2, %v4428_v24, %v1049_v11 }
 0x3f5   :  { %v1058_v35 = vsel %vm1055_vm3, %v1057_v36, %v1053_v29  ;;  %v1073_v4 = vsel %vm1072_vm6, %v4430_v63, %v1069_v37  ;;  %v1441_v63 = vld [vmem:[#allocation13 + $0x8] sm:$0xff] }
 0x3f6   :  { %v1081_v56 = vmul.f32 %v1080_v33, %v1058_v35  ;;  %v1078_v14 = vsel %vm1075_vm7, %v1077_v8, %v1073_v4 }
 0x3f7   :  { %v1084_v2 = vsub.f32 1.0, %v1078_v14  ;;  %v1086_v25 = vmul.f32 %v1078_v14, %v5992_v38 }
 0x3f8   :  { %v1082_v0 = vadd.f32 %v1081_v56, %v435_v52  ;;  %v7816_v56 = vld [vmem:[#allocation46_spill] sm:$0xff] }
 0x3f9   :  { %v438_v57 = vadd.f32 %v7816_v56, %v5720_v19  ;;  %v1669_v56 = vld [vmem:[#allocation16 + $0x80] sm:$0xff] }
 0x3fa   :  { %4431 = vtanh.f32 %v1082_v0 }
 0x400   :  { %v4432_v17 = vpop.eup %4431 }
 0x401   :  { %v1085_v18 = vmul.f32 %v4432_v17, %v1084_v2 }
 0x403   :  { %v6050_v58 = vadd.f32 %v1086_v25, %v1085_v18 }
 0x405   :  { %1110 = vmatmul.f32.vlgmr.msra.gmra.mxu1 %v6050_v58  ;;  %1130 = vmatmul.f32.vlgmr.msra.gmra.mxu2 %v6050_v58 }
 0x406   :  { %1150 = vmatmul.f32.vlgmr.msra.gmra.mxu3 %v6050_v58  ;;  %1362 = vmatpush.msra.mxu1 %v5864_v46  ;;  %v1455_v46 = vld [vmem:[#allocation13 + $0x78] sm:$0xff] }
 0x407   :  { %1460 = vmatpush.msra.mxu2 %v1455_v46 }
 0x408   :  { %1363 = vmatpush.msra.mxu1 %v5873_v55  ;;  %v1454_v55 = vld [vmem:[#allocation13 + $0x70] sm:$0xff] }
 0x409   :  { %1461 = vmatpush.msra.mxu2 %v1454_v55 }
 0x40a   :  { %1364 = vmatpush.msra.mxu1 %v5882_v61  ;;  %v1453_v61 = vld [vmem:[#allocation13 + $0x68] sm:$0xff] }
 0x40b   :  { %1462 = vmatpush.msra.mxu2 %v1453_v61 }
 0x40c   :  { %1365 = vmatpush.msra.mxu1 %v5891_v1  ;;  %v1452_v1 = vld [vmem:[#allocation13 + $0x60] sm:$0xff] }
 0x40d   :  { %1463 = vmatpush.msra.mxu2 %v1452_v1 }
 0x40e   :  { %1366 = vmatpush.msra.mxu1 %v5900_v6  ;;  %v7814_v6 = vld [vmem:[#allocation53_spill] sm:$0xff] }
 0x410   :  { %1367 = vmatpush.msra.mxu1 %v5909_v12  ;;  %v356_v12 = vadd.f32 %v7814_v6, %v7803_v49 }
 0x412   :  { %1368 = vmatpush.msra.mxu1 %v5918_v16  ;;  %v1451_v16 = vld [vmem:[#allocation13 + $0x58] sm:$0xff] }
 0x413   :  { %1464 = vmatpush.msra.mxu2 %v1451_v16  ;;  %v1698_v16 = vld [vmem:[#allocation16 + $0x168] sm:$0xff] }
 0x414   :  { %1369 = vmatpush.msra.mxu1 %v5927_v21  ;;  %1709 = vmatpush.msra.mxu3 %v1698_v16  ;;  %v1661_v16 = vld [vmem:[#allocation16 + $0x40] sm:$0xff] }
 0x416   :  { %1370 = vmatpush.msra.mxu1 %v5934_v27 }
 0x418   :  { %1371 = vmatpush.msra.mxu1 %v5941_v40  ;;  %v1450_v40 = vld [vmem:[#allocation13 + $0x50] sm:$0xff] }
 0x419   :  { %1465 = vmatpush.msra.mxu2 %v1450_v40  ;;  %v1695_v40 = vld [vmem:[#allocation16 + $0x150] sm:$0xff] }
 0x41a   :  { %1372 = vmatpush.msra.mxu1 %v5948_v22  ;;  %1710 = vmatpush.msra.mxu3 %v1695_v40  ;;  %v1657_v40 = vld [vmem:[#allocation16 + $0x20] sm:$0xff] }
 0x41c   :  { %1373 = vmatpush.msra.mxu1 %v5955_v31  ;;  %v1449_v31 = vld [vmem:[#allocation13 + $0x48] sm:$0xff] }
 0x41d   :  { %1466 = vmatpush.msra.mxu2 %v1449_v31  ;;  %v1697_v31 = vld [vmem:[#allocation16 + $0x160] sm:$0xff] }
 0x41e   :  { %1374 = vmatpush.msra.mxu1 %v5962_v48  ;;  %v7815_v48 = vld [vmem:[#allocation60_spill] sm:$0xff] }
 0x420   :  { %1375 = vmatpush.msra.mxu1 %v6030_v3  ;;  %v397_v3 = vadd.f32 %v7815_v48, %v7805_v53  ;;  %v1691_v48 = vld [vmem:[#allocation16 + $0x130] sm:$0xff] }
 0x422   :  { %1376 = vmatpush.msra.mxu1 %v6034_v7  ;;  %v1448_v7 = vld [vmem:[#allocation13 + $0x40] sm:$0xff] }
 0x423   :  { %1467 = vmatpush.msra.mxu2 %v1448_v7 }
 0x424   :  { %1377 = vmatpush.msra.mxu1 %v6038_v13 }
 0x425   :  { %1468 = vmatpush.msra.mxu2 %v1447_v26  ;;  %v1686_v26 = vld [vmem:[#allocation16 + $0x108] sm:$0xff] }
 0x427   :  { %1469 = vmatpush.msra.mxu2 %v1446_v28  ;;  %v1688_v28 = vld [vmem:[#allocation16 + $0x118] sm:$0xff] }
 0x429   :  { %1470 = vmatpush.msra.mxu2 %v1445_v51 }
 0x42b   :  { %1471 = vmatpush.msra.mxu2 %v1444_v20 }
 0x42d   :  { %1472 = vmatpush.msra.mxu2 %v1443_v44  ;;  %v1683_v44 = vld [vmem:[#allocation16 + $0xf0] sm:$0xff] }
 0x42f   :  { %1473 = vmatpush.msra.mxu2 %v1442_v9  ;;  %v1684_v9 = vld [vmem:[#allocation16 + $0xf8] sm:$0xff] }
 0x431   :  { %1474 = vmatpush.msra.mxu2 %v1441_v63 }
 0x433   :  { %1475 = vmatpush.msra.mxu2 %v1440_v10  ;;  %v1680_v10 = vld [vmem:[#allocation16 + $0xd8] sm:$0xff] }
 0x482   :  { %v1111_v21 = vpop.f32.mrf.mxu1 }
 0x483   :  { %v1154_v27 = vadd.f32 %v1111_v21, %v356_v12  ;;  %v1699_v21 = vld [vmem:[#allocation16 + $0x170] sm:$0xff] }
 0x485   :  { %v4288_v22 = vmul.f32 -1.442695, %v1154_v27  ;;  %v1700_v27 = vld [vmem:[#allocation16 + $0x178] sm:$0xff] }
 0x487   :  { %4433 = vpow2.f32 %v4288_v22  ;;  %v1696_v22 = vld [vmem:[#allocation16 + $0x158] sm:$0xff] }
 0x488   :  { %v1131_v13 = vpop.f32.mrf.mxu2 }
 0x489   :  { %v1174_v5 = vadd.f32 %v1131_v13, %v397_v3  ;;  %v1151_v11 = vpop.f32.mrf.mxu3  ;;  %v7817_v3 = vld [vmem:[#allocation54_spill] sm:$0xff]  ;;  %v7818_v13 = vld [vmem:[#allocation61_spill] sm:$0xff] }
 0x48a   :  { %v1194_v52 = vadd.f32 %v6075_v50, %v1151_v11  ;;  %v359_v7 = vadd.f32 %v7817_v3, %v7803_v49  ;;  %v1675_v11 = vld [vmem:[#allocation16 + $0xb0] sm:$0xff] }
 0x48b   :  { %v4289_v60 = vmul.f32 -1.442695, %v1174_v5  ;;  %v400_v5 = vadd.f32 %v7818_v13, %v7805_v53 }
 0x48d   :  { %v4434_v54 = vpop.eup %4433  ;;  %4435 = vpow2.f32 %v4289_v60  ;;  %v1687_v60 = vld [vmem:[#allocation16 + $0x110] sm:$0xff] }
 0x48e   :  { %v1158_v47 = vadd.f32 1.0, %v4434_v54 }
 0x490   :  { %4437 = vrcp.f32 %v1158_v47  ;;  %v1170_v32 = vand.u32 2147483648, %v1158_v47  ;;  %v1168_v23 = vand.u32 2147483647, %v1158_v47  ;;  %vm1164_vm9 = vweird.f32 %v1158_v47 }
 0x492   :  { %v1171_v29 = vor.u32 1.1754944e-38, %v1170_v32  ;;  %vm1169_vm11 = vcmp.eq.f32.partialorder %v1168_v23, 8.507059e+37  ;;  %v1678_v32 = vld [vmem:[#allocation16 + $0xc8] sm:$0xff] }
 0x493   :  { %v4436_v24 = vpop.eup %4435 }
 0x494   :  { %v1178_v41 = vadd.f32 1.0, %v4436_v24  ;;  %v1685_v24 = vld [vmem:[#allocation16 + $0x100] sm:$0xff] }
 0x496   :  { %v4438_v42 = vpop.eup %4437  ;;  %4439 = vrcp.f32 %v1178_v41  ;;  %v1190_v4 = vand.u32 2147483648, %v1178_v41  ;;  %v1188_v14 = vand.u32 2147483647, %v1178_v41  ;;  %vm1184_vm13 = vweird.f32 %v1178_v41 }
 0x497   :  { %v1160_v43 = vmul.f32 %v4438_v42, %v1158_v47  ;;  %vm1165_vm8 = vweird.f32 %v4438_v42 }
 0x498   :  { %vm1166_vm10 = vmor %vm1164_vm9, %vm1165_vm8  ;;  %v1191_v18 = vor.u32 1.1754944e-38, %v1190_v4  ;;  %vm1189_vm15 = vcmp.eq.f32.partialorder %v1188_v14, 8.507059e+37  ;;  %v6100_v4 = vld [vmem:[#allocation15] ss:$0 sm:$0xff]  ;;  %v1665_v14 = vld [vmem:[#allocation16 + $0x60] sm:$0xff] }
 0x499   :  { %v1161_v30 = vsub.f32 1.0, %v1160_v43  ;;  %v1682_v43 = vld [vmem:[#allocation16 + $0xe8] sm:$0xff] }
 0x49b   :  { %v1162_v59 = vmul.f32 %v4438_v42, %v1161_v30  ;;  %v1677_v30 = vld [vmem:[#allocation16 + $0xc0] sm:$0xff] }
 0x49c   :  { %v4440_v34 = vpop.eup %4439 }
 0x49d   :  { %v1180_v36 = vmul.f32 %v4440_v34, %v1178_v41  ;;  %v1163_v33 = vadd.f32 %v4438_v42, %v1162_v59  ;;  %vm1185_vm12 = vweird.f32 %v4440_v34  ;;  %v1679_v59 = vld [vmem:[#allocation16 + $0xd0] sm:$0xff] }
 0x49e   :  { %vm1186_vm14 = vmor %vm1184_vm13, %vm1185_vm12 }
 0x49f   :  { %v1181_v35 = vsub.f32 1.0, %v1180_v36  ;;  %v1167_v37 = vsel %vm1166_vm10, %v4438_v42, %v1163_v33  ;;  %v1681_v42 = vld [vmem:[#allocation16 + $0xe0] sm:$0xff]  ;;  %v1676_v36 = vld [vmem:[#allocation16 + $0xb8] sm:$0xff]  ;;  %v1671_v33 = vld [vmem:[#allocation16 + $0x90] sm:$0xff] }
 0x4a0   :  { %v1172_v62 = vsel %vm1169_vm11, %v1171_v29, %v1167_v37  ;;  %v1672_v29 = vld [vmem:[#allocation16 + $0x98] sm:$0xff] }
 0x4a1   :  { %v1182_v0 = vmul.f32 %v4440_v34, %v1181_v35  ;;  %v1195_v8 = vmul.f32 %v1194_v52, %v1172_v62  ;;  %v1673_v35 = vld [vmem:[#allocation16 + $0xa0] sm:$0xff]  ;;  %v1668_v52 = vld [vmem:[#allocation16 + $0x78] sm:$0xff] }
 0x4a3   :  { %v1183_v2 = vadd.f32 %v4440_v34, %v1182_v0  ;;  %v1196_v17 = vadd.f32 %v1195_v8, %v438_v57  ;;  %v1670_v57 = vld [vmem:[#allocation16 + $0x88] sm:$0xff] }
 0x4a5   :  { %v1187_v25 = vsel %vm1186_vm14, %v4440_v34, %v1183_v2  ;;  %4441 = vtanh.f32 %v1196_v17  ;;  %v1674_v34 = vld [vmem:[#allocation16 + $0xa8] sm:$0xff]  ;;  %v1667_v17 = vld [vmem:[#allocation16 + $0x70] sm:$0xff] }
 0x4a6   :  { %v1192_v46 = vsel %vm1189_vm15, %v1191_v18, %v1187_v25  ;;  %v1666_v2 = vld [vmem:[#allocation16 + $0x68] sm:$0xff] }
 0x4a7   :  { %v1198_v55 = vsub.f32 1.0, %v1192_v46  ;;  %v1200_v6 = vmul.f32 %v1192_v46, %v6050_v58  ;;  %v1662_v25 = vld [vmem:[#allocation16 + $0x48] sm:$0xff]  ;;  %v1663_v46 = vld [vmem:[#allocation16 + $0x50] sm:$0xff] }
 0x4ab   :  { %v4442_v61 = vpop.eup %4441 }
 0x4ac   :  { %v1199_v1 = vmul.f32 %v4442_v61, %v1198_v55  ;;  %v1664_v55 = vld [vmem:[#allocation16 + $0x58] sm:$0xff] }
 0x4ae   :  { %v6081_v12 = vadd.f32 %v1200_v6, %v1199_v1  ;;  %v1659_v1 = vld [vmem:[#allocation16 + $0x30] sm:$0xff]  ;;  %v1660_v6 = vld [vmem:[#allocation16 + $0x38] sm:$0xff] }
 0x4b0   :  { %1224 = vmatmul.f32.vlgmr.msrb.gmra.mxu0 %v6081_v12  ;;  %1244 = vmatmul.f32.vlgmr.msrb.gmra.mxu1 %v6081_v12 }
 0x4b1   :  { %1264 = vmatmul.f32.vlgmr.msrb.gmra.mxu2 %v6081_v12  ;;  %1750 = vmatpush.msrb.mxu0 %v1699_v21 }
 0x4b2   :  { %1791 = vmatpush.msrb.mxu1 %v1700_v27  ;;  %v1656_v27 = vld [vmem:[#allocation16 + $0x18] sm:$0xff] }
 0x4b3   :  { %1751 = vmatpush.msrb.mxu0 %v1696_v22  ;;  %v1658_v22 = vld [vmem:[#allocation16 + $0x28] sm:$0xff] }
 0x4b4   :  { %1792 = vmatpush.msrb.mxu1 %v1697_v31 }
 0x4b9   :  { %1476 = vmatmul.f32.vlgmr.msra.gmra.mxu2 %v5723_v45  ;;  %v1692_v45 = vld [vmem:[#allocation16 + $0x138] sm:$0xff] }
 0x4ba   :  { %1711 = vmatpush.msra.mxu3 %v1692_v45 }
 0x4c1   :  { %1479 = vmatmul.f32.gmra.mxu2 %v5798_v15  ;;  %v1693_v15 = vld [vmem:[#allocation16 + $0x140] sm:$0xff] }
 0x4c2   :  { %1752 = vmatpush.msrb.mxu0 %v1693_v15 }
 0x4c9   :  { %1482 = vmatmul.f32.gmra.mxu2 %v5859_v39  ;;  %v1694_v39 = vld [vmem:[#allocation16 + $0x148] sm:$0xff] }
 0x4ca   :  { %1793 = vmatpush.msrb.mxu1 %v1694_v39  ;;  %v1653_v39 = vld [vmem:[#allocation16] sm:$0xff] }
 0x4cc   :  { %1794 = vmatpush.msrb.mxu1 %v1691_v48 }
 0x4ce   :  { %1795 = vmatpush.msrb.mxu1 %v1688_v28 }
 0x4d0   :  { %1796 = vmatpush.msrb.mxu1 %v1685_v24 }
 0x4d1   :  { %1485 = vmatmul.f32.gmra.mxu2 %v5992_v38  ;;  %v1689_v38 = vld [vmem:[#allocation16 + $0x120] sm:$0xff] }
 0x4d2   :  { %1712 = vmatpush.msra.mxu3 %v1689_v38  ;;  %1797 = vmatpush.msrb.mxu1 %v1682_v43  ;;  %v1654_v38 = vld [vmem:[#allocation16 + $0x8] sm:$0xff] }
 0x4d4   :  { %1713 = vmatpush.msra.mxu3 %v1686_v26  ;;  %1798 = vmatpush.msrb.mxu1 %v1679_v59 }
 0x4d6   :  { %1714 = vmatpush.msra.mxu3 %v1683_v44  ;;  %1799 = vmatpush.msrb.mxu1 %v1676_v36 }
 0x4d8   :  { %1715 = vmatpush.msra.mxu3 %v1680_v10  ;;  %1800 = vmatpush.msrb.mxu1 %v1673_v35 }
 0x4d9   :  { %1488 = vmatmul.f32.gmra.mxu2 %v6050_v58  ;;  %v1690_v58 = vld [vmem:[#allocation16 + $0x128] sm:$0xff] }
 0x4da   :  { %1753 = vmatpush.msrb.mxu0 %v1690_v58  ;;  %1716 = vmatpush.msra.mxu3 %v1677_v30  ;;  %v1655_v58 = vld [vmem:[#allocation16 + $0x10] sm:$0xff] }
 0x4db   :  { %1801 = vmatpush.msrb.mxu1 %v1670_v57 }
 0x4dc   :  { %1754 = vmatpush.msrb.mxu0 %v1687_v60  ;;  %1717 = vmatpush.msra.mxu3 %v1674_v34 }
 0x4dd   :  { %1802 = vmatpush.msrb.mxu1 %v1667_v17 }
 0x4de   :  { %1755 = vmatpush.msrb.mxu0 %v1684_v9  ;;  %1718 = vmatpush.msra.mxu3 %v1671_v33 }
 0x4df   :  { %1803 = vmatpush.msrb.mxu1 %v1664_v55 }
 0x4e0   :  { %1756 = vmatpush.msrb.mxu0 %v1681_v42  ;;  %1719 = vmatpush.msra.mxu3 %v1668_v52  ;;  %v7819_v42 = vld [vmem:[#allocation48_spill] sm:$0xff] }
 0x4e1   :  { %1491 = vmatmul.f32.gmra.mxu2 %v6081_v12  ;;  %1804 = vmatpush.msrb.mxu1 %v1661_v16  ;;  %v441_v43 = vadd.f32 %v7819_v42, %v5720_v19 }
 0x4e2   :  { %1757 = vmatpush.msrb.mxu0 %v1678_v32  ;;  %1720 = vmatpush.msra.mxu3 %v1665_v14 }
 0x4e3   :  { %1805 = vmatpush.msrb.mxu1 %v1658_v22 }
 0x4e4   :  { %1758 = vmatpush.msrb.mxu0 %v1675_v11  ;;  %1721 = vmatpush.msra.mxu3 %v1662_v25 }
 0x4e5   :  { %1806 = vmatpush.msrb.mxu1 %v1655_v58 }
 0x4e6   :  { %1759 = vmatpush.msrb.mxu0 %v1672_v29  ;;  %1722 = vmatpush.msra.mxu3 %v1659_v1 }
 0x4e8   :  { %1760 = vmatpush.msrb.mxu0 %v1669_v56  ;;  %1723 = vmatpush.msra.mxu3 %v1656_v27 }
 0x4ea   :  { %1761 = vmatpush.msrb.mxu0 %v1666_v2  ;;  %1724 = vmatpush.msra.mxu3 %v1653_v39 }
 0x4ec   :  { %1762 = vmatpush.msrb.mxu0 %v1663_v46 }
 0x4ee   :  { %1763 = vmatpush.msrb.mxu0 %v1660_v6 }
 0x4f0   :  { %1764 = vmatpush.msrb.mxu0 %v1657_v40 }
 0x4f2   :  { %1765 = vmatpush.msrb.mxu0 %v1654_v38 }
 0x52d   :  { %v1225_v51 = vpop.f32.mrf.mxu0  ;;  %v1245_v54 = vpop.f32.mrf.mxu1 }
 0x52e   :  { %v1268_v20 = vadd.f32 %v1225_v51, %v359_v7  ;;  %v1288_v47 = vadd.f32 %v1245_v54, %v400_v5 }
 0x530   :  { %v4290_v63 = vmul.f32 -1.442695, %v1268_v20  ;;  %v4291_v41 = vmul.f32 -1.442695, %v1288_v47 }
 0x532   :  { %4443 = vpow2.f32 %v4290_v63 }
 0x533   :  { %4445 = vpow2.f32 %v4291_v41 }
 0x534   :  { %v6096_v23 = vpop.f32.mrf.mxu2 }
 0x535   :  { %v1308_v63 = vadd.f32 %v6075_v50, %v6096_v23 }
 0x538   :  { %v4444_v37 = vpop.eup %4443 }
 0x539   :  { %v4446_v62 = vpop.eup %4445  ;;  %v6098_v0 = vadd.f32 1.0, %v4444_v37 }
 0x53a   :  { %v6102_v8 = vadd.f32 1.0, %v4446_v62 }
 0x53b   :  { %4447 = vrcp.f32 %v6098_v0  ;;  %v1284_v5 = vand.u32 2147483648, %v6098_v0  ;;  %v1282_v28 = vand.u32 2147483647, %v6098_v0  ;;  %vm1278_vm1 = vweird.f32 %v6098_v0 }
 0x53c   :  { %4449 = vrcp.f32 %v6102_v8  ;;  %v1477_v18 = vpop.f32.mrf.mxu2  ;;  %v1304_v30 = vand.u32 2147483648, %v6102_v8  ;;  %vm1298_vm5 = vweird.f32 %v6102_v8  ;;  %v1302_v34 = vand.u32 2147483647, %v6102_v8 }
 0x53d   :  { %v1478_v61 = vadd.f32 %v6100_v4, %v1477_v18  ;;  %v1285_v9 = vor.u32 1.1754944e-38, %v1284_v5  ;;  %vm1283_vm3 = vcmp.eq.f32.partialorder %v1282_v28, 8.507059e+37 }
 0x53e   :  { %v1305_v37 = vor.u32 1.1754944e-38, %v1304_v30  ;;  %vm1303_vm7 = vcmp.eq.f32.partialorder %v1302_v34, 8.507059e+37 }
 0x53f   :  { %v4294_v21 = vmul.f32 -1.442695, %v1478_v61 }
 0x541   :  { %v4448_v31 = vpop.eup %4447  ;;  %4451 = vpow2.f32 %v4294_v21 }
 0x542   :  { %v4450_v45 = vpop.eup %4449  ;;  %v1274_v15 = vmul.f32 %v4448_v31, %v6098_v0  ;;  %vm1279_vm0 = vweird.f32 %v4448_v31 }
 0x543   :  { %v1294_v48 = vmul.f32 %v4450_v45, %v6102_v8  ;;  %vm1280_vm2 = vmor %vm1278_vm1, %vm1279_vm0  ;;  %vm1299_vm4 = vweird.f32 %v4450_v45 }
 0x544   :  { %v1275_v3 = vsub.f32 1.0, %v1274_v15  ;;  %v1480_v7 = vpop.f32.mrf.mxu2  ;;  %vm1300_vm6 = vmor %vm1298_vm5, %vm1299_vm4 }
 0x545   :  { %v1295_v13 = vsub.f32 1.0, %v1294_v48  ;;  %v1481_v26 = vadd.f32 %v6100_v4, %v1480_v7 }
 0x546   :  { %v1276_v60 = vmul.f32 %v4448_v31, %v1275_v3 }
 0x547   :  { %v4452_v51 = vpop.eup %4451  ;;  %v1296_v54 = vmul.f32 %v4450_v45, %v1295_v13  ;;  %v4295_v20 = vmul.f32 -1.442695, %v1481_v26 }
 0x548   :  { %v1277_v47 = vadd.f32 %v4448_v31, %v1276_v60  ;;  %v6113_v44 = vadd.f32 1.0, %v4452_v51 }
 0x549   :  { %4453 = vpow2.f32 %v4295_v20  ;;  %v1297_v41 = vadd.f32 %v4450_v45, %v1296_v54 }
 0x54a   :  { %v1281_v24 = vsel %vm1280_vm2, %v4448_v31, %v1277_v47  ;;  %4455 = vrcp.f32 %v6113_v44  ;;  %v1544_v40 = vand.u32 2147483648, %v6113_v44  ;;  %vm1538_vm9 = vweird.f32 %v6113_v44 }
 0x54b   :  { %v1286_v10 = vsel %vm1283_vm3, %v1285_v9, %v1281_v24  ;;  %v1301_v33 = vsel %vm1300_vm6, %v4450_v45, %v1297_v41  ;;  %v1542_v31 = vand.u32 2147483647, %v6113_v44 }
 0x54c   :  { %v1309_v32 = vmul.f32 %v1308_v63, %v1286_v10  ;;  %v1483_v59 = vpop.f32.mrf.mxu2  ;;  %v1306_v57 = vsel %vm1303_vm7, %v1305_v37, %v1301_v33  ;;  %v1545_v3 = vor.u32 1.1754944e-38, %v1544_v40 }
 0x54d   :  { %v1484_v11 = vadd.f32 %v6100_v4, %v1483_v59  ;;  %v1312_v8 = vsub.f32 1.0, %v1306_v57  ;;  %v1314_v46 = vmul.f32 %v1306_v57, %v6081_v12  ;;  %vm1543_vm11 = vcmp.eq.f32.partialorder %v1542_v31, 8.507059e+37 }
 0x54e   :  { %v1310_v23 = vadd.f32 %v1309_v32, %v441_v43 }
 0x54f   :  { %v4454_v36 = vpop.eup %4453  ;;  %v4296_v29 = vmul.f32 -1.442695, %v1484_v11 }
 0x550   :  { %v4456_v35 = vpop.eup %4455  ;;  %4457 = vtanh.f32 %v1310_v23  ;;  %v6124_v52 = vadd.f32 1.0, %v4454_v36 }
 0x551   :  { %4459 = vpow2.f32 %v4296_v29  ;;  %v1534_v56 = vmul.f32 %v4456_v35, %v6113_v44  ;;  %vm1539_vm8 = vweird.f32 %v4456_v35 }
 0x552   :  { %4461 = vrcp.f32 %v6124_v52  ;;  %vm1540_vm10 = vmor %vm1538_vm9, %vm1539_vm8  ;;  %v1559_v28 = vand.u32 2147483648, %v6124_v52  ;;  %vm1553_vm13 = vweird.f32 %v6124_v52  ;;  %v1557_v54 = vand.u32 2147483647, %v6124_v52 }
 0x553   :  { %v1535_v62 = vsub.f32 1.0, %v1534_v56 }
 0x554   :  { %v1486_v0 = vpop.f32.mrf.mxu2  ;;  %v1560_v41 = vor.u32 1.1754944e-38, %v1559_v28  ;;  %vm1558_vm15 = vcmp.eq.f32.partialorder %v1557_v54, 8.507059e+37 }
 0x555   :  { %v1487_v14 = vadd.f32 %v6100_v4, %v1486_v0  ;;  %v1536_v55 = vmul.f32 %v4456_v35, %v1535_v62 }
 0x556   :  { %v4458_v2 = vpop.eup %4457 }
 0x557   :  { %v4460_v17 = vpop.eup %4459  ;;  %v1313_v18 = vmul.f32 %v4458_v2, %v1312_v8  ;;  %v4297_v25 = vmul.f32 -1.442695, %v1487_v14  ;;  %v1537_v21 = vadd.f32 %v4456_v35, %v1536_v55 }
 0x558   :  { %v4462_v61 = vpop.eup %4461  ;;  %v6130_v1 = vadd.f32 1.0, %v4460_v17 }
 0x559   :  { %4463 = vpow2.f32 %v4297_v25  ;;  %v6132_v6 = vadd.f32 %v1314_v46, %v1313_v18  ;;  %v1549_v16 = vmul.f32 %v4462_v61, %v6124_v52  ;;  %v1541_v39 = vsel %vm1540_vm10, %v4456_v35, %v1537_v21 }
 0x55a   :  { %4465 = vrcp.f32 %v6130_v1  ;;  %v1546_v13 = vsel %vm1543_vm11, %v1545_v3, %v1541_v39  ;;  %vm1554_vm12 = vweird.f32 %v4462_v61  ;;  %v1574_v32 = vand.u32 2147483648, %v6130_v1  ;;  %v6159_v39 = vld [vmem:[#allocation18 + $0x168] sm:$0xff] }
 0x55b   :  { %1338 = vmatmul.f32.vlgmr.msrb.gmra.mxu3 %v6132_v6  ;;  %1358 = vmatmul.f32.vlgmr.msra.gmra.mxu0 %v6132_v6  ;;  %v1550_v27 = vsub.f32 1.0, %v1549_v16  ;;  %vm1555_vm14 = vmor %vm1553_vm13, %vm1554_vm12  ;;  %vm1568_vm1 = vweird.f32 %v6130_v1  ;;  %v1572_v59 = vand.u32 2147483647, %v6130_v1 }
 0x55c   :  { %1378 = vmatmul.f32.vlgmr.msra.gmra.mxu1 %v6132_v6  ;;  %v1489_v12 = vpop.f32.mrf.mxu2  ;;  %1494 = vmatmul.f32.gmra.mxu2 %v6132_v6  ;;  %v1575_v29 = vor.u32 1.1754944e-38, %v1574_v32 }
 0x55d   :  { %v1490_v22 = vadd.f32 %v6100_v4, %v1489_v12  ;;  %v1551_v38 = vmul.f32 %v4462_v61, %v1550_v27  ;;  %vm1573_vm3 = vcmp.eq.f32.partialorder %v1572_v59, 8.507059e+37  ;;  %1911 = vmatpush.msrb.mxu2 %v6159_v39  ;;  %2023 = vmatpush.msra.mxu1 %v6159_v39 }
 0x55f   :  { %v4464_v45 = vpop.eup %4463  ;;  %v4298_v15 = vmul.f32 -1.442695, %v1490_v22  ;;  %v1552_v5 = vadd.f32 %v4462_v61, %v1551_v38  ;;  %v7820_v38 = vld [vmem:[#allocation63_spill] sm:$0xff] }
 0x560   :  { %v4466_v58 = vpop.eup %4465  ;;  %v6144_v48 = vadd.f32 1.0, %v4464_v45 }
 0x561   :  { %4467 = vpow2.f32 %v4298_v15  ;;  %v1564_v7 = vmul.f32 %v4466_v58, %v6130_v1  ;;  %v1556_v44 = vsel %vm1555_vm14, %v4462_v61, %v1552_v5  ;;  %vm1569_vm0 = vweird.f32 %v4466_v58  ;;  %v6171_v5 = vld [vmem:[#allocation18 + $0x120] sm:$0xff] }
 0x562   :  { %4469 = vrcp.f32 %v6144_v48  ;;  %v1561_v42 = vsel %vm1558_vm15, %v1560_v41, %v1556_v44  ;;  %vm1570_vm2 = vmor %vm1568_vm1, %vm1569_vm0  ;;  %v1589_v57 = vand.u32 2147483648, %v6144_v48  ;;  %vm1583_vm5 = vweird.f32 %v6144_v48 }
 0x563   :  { %1725 = vmatmul.f32.vlgmr.msra.gmra.mxu3 %v1546_v13  ;;  %1766 = vmatmul.f32.vlgmr.msrb.gmra.mxu0 %v1546_v13  ;;  %v1565_v26 = vsub.f32 1.0, %v1564_v7  ;;  %v1587_v62 = vand.u32 2147483647, %v6144_v48 }
 0x564   :  { %v1492_v60 = vpop.f32.mrf.mxu2  ;;  %1807 = vmatmul.f32.vlgmr.msrb.gmra.mxu1 %v1546_v13  ;;  %v1590_v2 = vor.u32 1.1754944e-38, %v1589_v57  ;;  %v6169_v13 = vld [vmem:[#allocation18 + $0x138] sm:$0xff] }
 0x565   :  { %v1493_v51 = vadd.f32 %v6100_v4, %v1492_v60  ;;  %v1566_v9 = vmul.f32 %v4466_v58, %v1565_v26  ;;  %vm1588_vm7 = vcmp.eq.f32.partialorder %v1587_v62, 8.507059e+37 }
 0x567   :  { %v4468_v20 = vpop.eup %4467  ;;  %v4299_v47 = vmul.f32 -1.442695, %v1493_v51  ;;  %v1567_v43 = vadd.f32 %v4466_v58, %v1566_v9  ;;  %v6179_v51 = vld [vmem:[#allocation18 + $0x108] sm:$0xff] }
 0x568   :  { %v4470_v24 = vpop.eup %4469  ;;  %v1529_v63 = vadd.f32 1.0, %v4468_v20 }
 0x569   :  { %4471 = vpow2.f32 %v4299_v47  ;;  %v1579_v10 = vmul.f32 %v4470_v24, %v6144_v48  ;;  %v1571_v11 = vsel %vm1570_vm2, %v4466_v58, %v1567_v43  ;;  %vm1584_vm4 = vweird.f32 %v4470_v24  ;;  %v6164_v48 = vld [vmem:[#allocation18 + $0x150] sm:$0xff] }
 0x56a   :  { %4473 = vrcp.f32 %v1529_v63  ;;  %v1576_v37 = vsel %vm1573_vm3, %v1575_v29, %v1571_v11  ;;  %vm1585_vm6 = vmor %vm1583_vm5, %vm1584_vm4  ;;  %v1604_v55 = vand.u32 2147483648, %v1529_v63  ;;  %vm1598_vm9 = vweird.f32 %v1529_v63  ;;  %1912 = vmatpush.msrb.mxu2 %v6164_v48  ;;  %2024 = vmatpush.msra.mxu1 %v6164_v48  ;;  %v6182_v47 = vld [vmem:[#allocation18 + $0xf0] sm:$0xff]  ;;  %v6209_v11 = vld [vmem:[#allocation18 + $0x60] sm:$0xff] }
 0x56b   :  { %1728 = vmatmul.f32.gmra.mxu3 %v1561_v42  ;;  %1769 = vmatmul.f32.gmra.mxu0 %v1561_v42  ;;  %v1580_v30 = vsub.f32 1.0, %v1579_v10  ;;  %v1602_v61 = vand.u32 2147483647, %v1529_v63  ;;  %v403_v58 = vadd.f32 %v7820_v38, %v7805_v53  ;;  %v7821_v53 = vld [vmem:[#allocation56_spill] sm:$0xff] }
 0x56c   :  { %1810 = vmatmul.f32.gmra.mxu1 %v1561_v42  ;;  %v1605_v21 = vor.u32 1.1754944e-38, %v1604_v55  ;;  %1913 = vmatpush.msrb.mxu2 %v6169_v13  ;;  %v362_v60 = vadd.f32 %v7821_v53, %v7803_v49  ;;  %v6196_v42 = vld [vmem:[#allocation18 + $0xa8] sm:$0xff]  ;;  %v6202_v43 = vld [vmem:[#allocation18 + $0x90] sm:$0xff] }
 0x56d   :  { %v1581_v23 = vmul.f32 %v4470_v24, %v1580_v30  ;;  %vm1603_vm11 = vcmp.eq.f32.partialorder %v1602_v61, 8.507059e+37  ;;  %2025 = vmatpush.msra.mxu1 %v6169_v13  ;;  %v6220_v29 = vld [vmem:[#allocation18 + $0x30] sm:$0xff] }
 0x56e   :  { %1914 = vmatpush.msrb.mxu2 %v6171_v5 }
 0x56f   :  { %v4472_v34 = vpop.eup %4471  ;;  %v1582_v52 = vadd.f32 %v4470_v24, %v1581_v23  ;;  %2026 = vmatpush.msra.mxu1 %v6171_v5 }
 0x570   :  { %v4474_v36 = vpop.eup %4473  ;;  %v1530_v33 = vadd.f32 1.0, %v4472_v34  ;;  %1915 = vmatpush.msrb.mxu2 %v6179_v51  ;;  %v6207_v34 = vld [vmem:[#allocation18 + $0x78] sm:$0xff] }
 0x571   :  { %v1594_v35 = vmul.f32 %v4474_v36, %v1529_v63  ;;  %v1586_v0 = vsel %vm1585_vm6, %v4470_v24, %v1582_v52  ;;  %vm1599_vm8 = vweird.f32 %v4474_v36  ;;  %2027 = vmatpush.msra.mxu1 %v6179_v51  ;;  %v6188_v24 = vld [vmem:[#allocation18 + $0xd8] sm:$0xff]  ;;  %v6190_v63 = vld [vmem:[#allocation18 + $0xc0] sm:$0xff] }
 0x572   :  { %4475 = vrcp.f32 %v1530_v33  ;;  %v1591_v18 = vsel %vm1588_vm7, %v1590_v2, %v1586_v0  ;;  %vm1600_vm10 = vmor %vm1598_vm9, %vm1599_vm8  ;;  %v1619_v40 = vand.u32 2147483648, %v1530_v33  ;;  %vm1613_vm13 = vweird.f32 %v1530_v33  ;;  %1916 = vmatpush.msrb.mxu2 %v6182_v47 }
 0x573   :  { %1731 = vmatmul.f32.gmra.mxu3 %v1576_v37  ;;  %1772 = vmatmul.f32.gmra.mxu0 %v1576_v37  ;;  %v1595_v56 = vsub.f32 1.0, %v1594_v35  ;;  %v1617_v22 = vand.u32 2147483647, %v1530_v33 }
 0x574   :  { %1813 = vmatmul.f32.gmra.mxu1 %v1576_v37  ;;  %v1620_v45 = vor.u32 1.1754944e-38, %v1619_v40  ;;  %1917 = vmatpush.msrb.mxu2 %v6188_v24  ;;  %v6225_v37 = vld [vmem:[#allocation18 + $0x18] sm:$0xff] }
 0x575   :  { %v1596_v8 = vmul.f32 %v4474_v36, %v1595_v56  ;;  %vm1618_vm15 = vcmp.eq.f32.partialorder %v1617_v22, 8.507059e+37  ;;  %2028 = vmatpush.msra.mxu1 %v6182_v47  ;;  %7822 = vst [vmem:[#allocation45_spill] sm:$0xff] %v6225_v37  ;;  %v6229_v56 = vld [vmem:[#allocation18] sm:$0xff] }
 0x576   :  { %1918 = vmatpush.msrb.mxu2 %v6190_v63  ;;  %7823 = vst [vmem:[#allocation40_spill] sm:$0xff] %v6229_v56 }
 0x577   :  { %v1597_v25 = vadd.f32 %v4474_v36, %v1596_v8  ;;  %2029 = vmatpush.msra.mxu1 %v6188_v24 }
 0x578   :  { %v4476_v14 = vpop.eup %4475  ;;  %1919 = vmatpush.msrb.mxu2 %v6196_v42 }
 0x579   :  { %v1609_v17 = vmul.f32 %v4476_v14, %v1530_v33  ;;  %v1601_v1 = vsel %vm1600_vm10, %v4474_v36, %v1597_v25  ;;  %vm1614_vm12 = vweird.f32 %v4476_v14  ;;  %2030 = vmatpush.msra.mxu1 %v6190_v63  ;;  %v6213_v36 = vld [vmem:[#allocation18 + $0x48] sm:$0xff] }
 0x57a   :  { %v1606_v27 = vsel %vm1603_vm11, %v1605_v21, %v1601_v1  ;;  %vm1615_vm14 = vmor %vm1613_vm13, %vm1614_vm12  ;;  %1920 = vmatpush.msrb.mxu2 %v6202_v43 }
 0x57b   :  { %1734 = vmatmul.f32.gmra.mxu3 %v1591_v18  ;;  %1775 = vmatmul.f32.gmra.mxu0 %v1591_v18  ;;  %v1610_v46 = vsub.f32 1.0, %v1609_v17 }
 0x57c   :  { %1816 = vmatmul.f32.gmra.mxu1 %v1591_v18  ;;  %1921 = vmatpush.msrb.mxu2 %v6207_v34 }
 0x57d   :  { %v1611_v16 = vmul.f32 %v4476_v14, %v1610_v46  ;;  %2031 = vmatpush.msra.mxu1 %v6196_v42 }
 0x57e   :  { %1922 = vmatpush.msrb.mxu2 %v6209_v11 }
 0x57f   :  { %v1612_v12 = vadd.f32 %v4476_v14, %v1611_v16  ;;  %2032 = vmatpush.msra.mxu1 %v6202_v43 }
 0x580   :  { %1923 = vmatpush.msrb.mxu2 %v6213_v36 }
 0x581   :  { %v1616_v31 = vsel %vm1615_vm14, %v4476_v14, %v1612_v12  ;;  %2033 = vmatpush.msra.mxu1 %v6207_v34  ;;  %v6233_v14 = vld [vmem:[#allocation18 + $0x170] sm:$0xff] }
 0x582   :  { %v1621_v15 = vsel %vm1618_vm15, %v1620_v45, %v1616_v31  ;;  %1924 = vmatpush.msrb.mxu2 %v6220_v29  ;;  %1931 = vmatpush.msrb.mxu3 %v6233_v14 }
 0x583   :  { %1737 = vmatmul.f32.gmra.mxu3 %v1606_v27  ;;  %1778 = vmatmul.f32.gmra.mxu0 %v1606_v27 }
 0x584   :  { %1819 = vmatmul.f32.gmra.mxu1 %v1606_v27  ;;  %1925 = vmatpush.msrb.mxu2 %v6225_v37 }
 0x585   :  { %2034 = vmatpush.msra.mxu1 %v6209_v11 }
 0x586   :  { %1926 = vmatpush.msrb.mxu2 %v6229_v56 }
 0x587   :  { %2035 = vmatpush.msra.mxu1 %v6213_v36 }
 0x588   :  { %2043 = vmatpush.msra.mxu2 %v6233_v14 }
 0x589   :  { %2036 = vmatpush.msra.mxu1 %v6220_v29 }
 0x58b   :  { %1740 = vmatmul.f32.gmra.mxu3 %v1621_v15  ;;  %1781 = vmatmul.f32.gmra.mxu0 %v1621_v15 }
 0x58c   :  { %1822 = vmatmul.f32.gmra.mxu1 %v1621_v15 }
 0x58d   :  { %2037 = vmatpush.msra.mxu1 %v6225_v37 }
 0x58f   :  { %2038 = vmatpush.msra.mxu1 %v6229_v56 }
 0x591   :  { %2155 = vmatpush.msrb.mxu1 %v6233_v14 }
 0x5d8   :  { %v1359_v3 = vpop.f32.mrf.mxu0 }
 0x5d9   :  { %v1402_v7 = vadd.f32 %v1359_v3, %v403_v58  ;;  %v1379_v25 = vpop.f32.mrf.mxu1  ;;  %v7824_v3 = vld [vmem:[#allocation49_spill] sm:$0xff] }
 0x5da   :  { %v1422_v12 = vadd.f32 %v6075_v50, %v1379_v25  ;;  %v6310_v25 = vld [vmem:[#allocation18 + $0xe8] sm:$0xff] }
 0x5db   :  { %v4293_v26 = vmul.f32 -1.442695, %v1402_v7  ;;  %v444_v7 = vadd.f32 %v7824_v3, %v5720_v19  ;;  %v6361_v3 = vld [vmem:[#allocation18 + $0x8] sm:$0xff] }
 0x5dc   :  { %7827 = vst [vmem:[#allocation34_spill] sm:$0xff] %v6361_v3 }
 0x5dd   :  { %4477 = vpow2.f32 %v4293_v26 }
 0x5de   :  { %v1339_v28 = vpop.f32.mrf.mxu3 }
 0x5df   :  { %v1382_v54 = vadd.f32 %v1339_v28, %v362_v60  ;;  %v1495_v20 = vpop.f32.mrf.mxu2 }
 0x5e0   :  { %v1496_v44 = vadd.f32 %v6100_v4, %v1495_v20 }
 0x5e1   :  { %v4292_v9 = vmul.f32 -1.442695, %v1382_v54 }
 0x5e2   :  { %v4300_v49 = vmul.f32 -1.442695, %v1496_v44 }
 0x5e3   :  { %v4478_v41 = vpop.eup %4477  ;;  %4479 = vpow2.f32 %v4292_v9 }
 0x5e4   :  { %v6194_v10 = vadd.f32 1.0, %v4478_v41  ;;  %4481 = vpow2.f32 %v4300_v49 }
 0x5e6   :  { %4483 = vrcp.f32 %v6194_v10  ;;  %v1418_v50 = vand.u32 2147483648, %v6194_v10  ;;  %vm1412_vm9 = vweird.f32 %v6194_v10  ;;  %v1416_v60 = vand.u32 2147483647, %v6194_v10 }
 0x5e8   :  { %v1419_v20 = vor.u32 1.1754944e-38, %v1418_v50  ;;  %vm1417_vm11 = vcmp.eq.f32.partialorder %v1416_v60, 8.507059e+37 }
 0x5e9   :  { %v4480_v30 = vpop.eup %4479 }
 0x5ea   :  { %v4482_v32 = vpop.eup %4481  ;;  %v1386_v59 = vadd.f32 1.0, %v4480_v30 }
 0x5eb   :  { %v1531_v23 = vadd.f32 1.0, %v4482_v32  ;;  %v7825_v32 = vmov 0.0  }
 0x5ec   :  { %4485 = vrcp.f32 %v1386_v59  ;;  %v6215_v33 = vpop.eup %4483  ;;  %v1398_v17 = vand.u32 2147483648, %v1386_v59  ;;  %v1396_v61 = vand.u32 2147483647, %v1386_v59  ;;  %vm1392_vm2 = vweird.f32 %v1386_v59 }
 0x5ed   :  { %4487 = vrcp.f32 %v1531_v23  ;;  %v1408_v35 = vmul.f32 %v6215_v33, %v6194_v10  ;;  %v1634_v55 = vand.u32 2147483648, %v1531_v23  ;;  %v1632_v16 = vand.u32 2147483647, %v1531_v23  ;;  %v6254_v10 = vld [vmem:[#allocation18 + $0x140] sm:$0xff] }
 0x5ee   :  { %v1399_v40 = vor.u32 1.1754944e-38, %v1398_v17  ;;  %vm1628_vm4 = vweird.f32 %v1531_v23  ;;  %vm1397_vm6 = vcmp.eq.f32.partialorder %v1396_v61, 8.507059e+37  ;;  %vm1413_vm7 = vweird.f32 %v6215_v33  ;;  %v6302_v17 = vld [vmem:[#allocation18 + $0x118] sm:$0xff]  ;;  %v6318_v61 = vld [vmem:[#allocation18 + $0xd0] sm:$0xff] }
 0x5ef   :  { %v1409_v8 = vsub.f32 1.0, %v1408_v35  ;;  %v1635_v31 = vor.u32 1.1754944e-38, %v1634_v55  ;;  %vm1633_vm8 = vcmp.eq.f32.partialorder %v1632_v16, 8.507059e+37  ;;  %vm1414_vm10 = vmor %vm1412_vm9, %vm1413_vm7  ;;  %v6273_v35 = vld [vmem:[#allocation18 + $0xe0] sm:$0xff]  ;;  %v6323_v16 = vld [vmem:[#allocation18 + $0x68] sm:$0xff] }
 0x5f0   :  { %v6314_v55 = vld [vmem:[#allocation18 + $0x80] sm:$0xff] }
 0x5f1   :  { %v1410_v21 = vmul.f32 %v6215_v33, %v1409_v8  ;;  %v6292_v8 = vld [vmem:[#allocation18 + $0xb0] sm:$0xff] }
 0x5f2   :  { %v4486_v52 = vpop.eup %4485 }
 0x5f3   :  { %v4488_v57 = vpop.eup %4487  ;;  %v1388_v62 = vmul.f32 %v4486_v52, %v1386_v59  ;;  %vm1393_vm0 = vweird.f32 %v4486_v52  ;;  %v1411_v58 = vadd.f32 %v6215_v33, %v1410_v21  ;;  %v6252_v59 = vld [vmem:[#allocation18 + $0x158] sm:$0xff]  ;;  %v6328_v21 = vld [vmem:[#allocation18 + $0xa0] sm:$0xff] }
 0x5f4   :  { %v1624_v0 = vmul.f32 %v4488_v57, %v1531_v23  ;;  %vm1629_vm1 = vweird.f32 %v4488_v57  ;;  %vm1394_vm3 = vmor %vm1392_vm2, %vm1393_vm0  ;;  %1932 = vmatpush.msrb.mxu3 %v6252_v59  ;;  %2044 = vmatpush.msra.mxu2 %v6252_v59  ;;  %v6264_v23 = vld [vmem:[#allocation18 + $0x110] sm:$0xff] }
 0x5f5   :  { %v1389_v2 = vsub.f32 1.0, %v1388_v62  ;;  %vm1630_vm5 = vmor %vm1628_vm4, %vm1629_vm1  ;;  %v1415_v54 = vsel %vm1414_vm10, %v6215_v33, %v1411_v58  ;;  %2156 = vmatpush.msrb.mxu1 %v6252_v59  ;;  %v6268_v33 = vld [vmem:[#allocation18 + $0xf8] sm:$0xff]  ;;  %v6288_v62 = vld [vmem:[#allocation18 + $0x148] sm:$0xff] }
 0x5f6   :  { %v1625_v18 = vsub.f32 1.0, %v1624_v0  ;;  %v1420_v44 = vsel %vm1417_vm11, %v1419_v20, %v1415_v54  ;;  %1933 = vmatpush.msrb.mxu3 %v6254_v10  ;;  %2045 = vmatpush.msra.mxu2 %v6254_v10  ;;  %v6290_v0 = vld [vmem:[#allocation18 + $0xc8] sm:$0xff]  ;;  %v6359_v58 = vld [vmem:[#allocation18 + $0x40] sm:$0xff] }
 0x5f7   :  { %v1390_v46 = vmul.f32 %v4486_v52, %v1389_v2  ;;  %v1426_v19 = vsub.f32 1.0, %v1420_v44  ;;  %v1428_v41 = vmul.f32 %v1420_v44, %v6132_v6  ;;  %2157 = vmatpush.msrb.mxu1 %v6254_v10  ;;  %v6262_v6 = vld [vmem:[#allocation18 + $0x128] sm:$0xff]  ;;  %v6296_v2 = vld [vmem:[#allocation18 + $0x130] sm:$0xff] }
 0x5f8   :  { %v1626_v1 = vmul.f32 %v4488_v57, %v1625_v18  ;;  %1934 = vmatpush.msrb.mxu3 %v6262_v6  ;;  %2046 = vmatpush.msra.mxu2 %v6262_v6  ;;  %v6307_v18 = vld [vmem:[#allocation18 + $0x100] sm:$0xff] }
 0x5f9   :  { %v1391_v27 = vadd.f32 %v4486_v52, %v1390_v46  ;;  %2158 = vmatpush.msrb.mxu1 %v6262_v6  ;;  %v6312_v46 = vld [vmem:[#allocation18 + $0x98] sm:$0xff] }
 0x5fa   :  { %v1627_v22 = vadd.f32 %v4488_v57, %v1626_v1  ;;  %1935 = vmatpush.msrb.mxu3 %v6264_v23  ;;  %2047 = vmatpush.msra.mxu2 %v6264_v23  ;;  %v6320_v1 = vld [vmem:[#allocation18 + $0xb8] sm:$0xff] }
 0x5fb   :  { %v1395_v45 = vsel %vm1394_vm3, %v4486_v52, %v1391_v27  ;;  %2159 = vmatpush.msrb.mxu1 %v6264_v23  ;;  %v6282_v52 = vld [vmem:[#allocation18 + $0x178] sm:$0xff]  ;;  %v6331_v27 = vld [vmem:[#allocation18 + $0x50] sm:$0xff] }
 0x5fc   :  { %v1631_v15 = vsel %vm1630_vm5, %v4488_v57, %v1627_v22  ;;  %v1400_v38 = vsel %vm1397_vm6, %v1399_v40, %v1395_v45  ;;  %1936 = vmatpush.msrb.mxu3 %v6268_v33  ;;  %2048 = vmatpush.msra.mxu2 %v6268_v33  ;;  %v6285_v57 = vld [vmem:[#allocation18 + $0x160] sm:$0xff]  ;;  %v6340_v40 = vld [vmem:[#allocation18 + $0x38] sm:$0xff]  ;;  %v6344_v22 = vld [vmem:[#allocation18 + $0x70] sm:$0xff] }
 0x5fd   :  { %v1636_v26 = vsel %vm1633_vm8, %v1635_v31, %v1631_v15  ;;  %v1423_v53 = vmul.f32 %v1422_v12, %v1400_v38  ;;  %2160 = vmatpush.msrb.mxu1 %v6268_v33  ;;  %1951 = vmatpush.msra.mxu0 %v6282_v52  ;;  %v6336_v12 = vld [vmem:[#allocation18 + $0x88] sm:$0xff]  ;;  %v6352_v45 = vld [vmem:[#allocation18 + $0x20] sm:$0xff]  ;;  %v6354_v15 = vld [vmem:[#allocation18 + $0x58] sm:$0xff] }
 0x5fe   :  { %1743 = vmatmul.f32.gmra.mxu3 %v1636_v26  ;;  %1784 = vmatmul.f32.gmra.mxu0 %v1636_v26  ;;  %7826 = vst [vmem:[#allocation37_spill] sm:$0xff] %v6352_v45 }
 0x5ff   :  { %1825 = vmatmul.f32.gmra.mxu1 %v1636_v26  ;;  %v1424_v28 = vadd.f32 %v1423_v53, %v444_v7  ;;  %1937 = vmatpush.msrb.mxu3 %v6273_v35  ;;  %v6367_v26 = vld [vmem:[#allocation18 + $0x28] sm:$0xff] }
 0x600   :  { %2049 = vmatpush.msra.mxu2 %v6273_v35  ;;  %2161 = vmatpush.msrb.mxu1 %v6273_v35  ;;  %7828 = vst [vmem:[#allocation41_spill] sm:$0xff] %v6367_v26 }
 0x601   :  { %4489 = vtanh.f32 %v1424_v28  ;;  %1952 = vmatpush.msra.mxu0 %v6285_v57  ;;  %1938 = vmatpush.msrb.mxu3 %v6290_v0 }
 0x602   :  { %2050 = vmatpush.msra.mxu2 %v6290_v0  ;;  %2162 = vmatpush.msrb.mxu1 %v6290_v0 }
 0x603   :  { %1953 = vmatpush.msra.mxu0 %v6288_v62  ;;  %1939 = vmatpush.msrb.mxu3 %v6292_v8 }
 0x604   :  { %2051 = vmatpush.msra.mxu2 %v6292_v8  ;;  %2163 = vmatpush.msrb.mxu1 %v6292_v8 }
 0x605   :  { %1954 = vmatpush.msra.mxu0 %v6296_v2  ;;  %1940 = vmatpush.msrb.mxu3 %v6312_v46 }
 0x606   :  { %2052 = vmatpush.msra.mxu2 %v6312_v46  ;;  %2164 = vmatpush.msrb.mxu1 %v6312_v46 }
 0x607   :  { %v4490_v9 = vpop.eup %4489  ;;  %1955 = vmatpush.msra.mxu0 %v6302_v17  ;;  %1941 = vmatpush.msrb.mxu3 %v6314_v55 }
 0x608   :  { %v1427_v49 = vmul.f32 %v4490_v9, %v1426_v19  ;;  %2053 = vmatpush.msra.mxu2 %v6314_v55  ;;  %2165 = vmatpush.msrb.mxu1 %v6314_v55 }
 0x609   :  { %1956 = vmatpush.msra.mxu0 %v6307_v18  ;;  %1942 = vmatpush.msrb.mxu3 %v6323_v16 }
 0x60a   :  { %v1429_v30 = vadd.f32 %v1428_v41, %v1427_v49  ;;  %2054 = vmatpush.msra.mxu2 %v6323_v16  ;;  %2166 = vmatpush.msrb.mxu1 %v6323_v16 }
 0x60b   :  { %1957 = vmatpush.msra.mxu0 %v6310_v25  ;;  %1943 = vmatpush.msrb.mxu3 %v6331_v27 }
 0x60c   :  { %1497 = vmatmul.f32.gmra.mxu2 %v1429_v30  ;;  %2167 = vmatpush.msrb.mxu1 %v6331_v27 }
 0x60d   :  { %1958 = vmatpush.msra.mxu0 %v6318_v61  ;;  %2055 = vmatpush.msra.mxu2 %v6331_v27 }
 0x60e   :  { %1944 = vmatpush.msrb.mxu3 %v6340_v40  ;;  %2168 = vmatpush.msrb.mxu1 %v6340_v40 }
 0x60f   :  { %1959 = vmatpush.msra.mxu0 %v6320_v1  ;;  %2056 = vmatpush.msra.mxu2 %v6340_v40 }
 0x610   :  { %1945 = vmatpush.msrb.mxu3 %v6352_v45  ;;  %2169 = vmatpush.msrb.mxu1 %v6352_v45 }
 0x611   :  { %1960 = vmatpush.msra.mxu0 %v6328_v21  ;;  %2057 = vmatpush.msra.mxu2 %v6352_v45 }
 0x612   :  { %1946 = vmatpush.msrb.mxu3 %v6361_v3  ;;  %2170 = vmatpush.msrb.mxu1 %v6361_v3 }
 0x613   :  { %1961 = vmatpush.msra.mxu0 %v6336_v12  ;;  %2058 = vmatpush.msra.mxu2 %v6361_v3 }
 0x614   :  { %1927 = vmatmul.f32.vlgmr.msrb.gmra.mxu2 %v7825_v32  ;;  %2063 = vmatpush.msra.mxu3 %v6282_v52 }
 0x615   :  { %1962 = vmatpush.msra.mxu0 %v6344_v22  ;;  %2175 = vmatpush.msrb.mxu2 %v6282_v52 }
 0x616   :  { %2064 = vmatpush.msra.mxu3 %v6285_v57 }
 0x617   :  { %1963 = vmatpush.msra.mxu0 %v6354_v15  ;;  %2176 = vmatpush.msrb.mxu2 %v6285_v57 }
 0x618   :  { %2065 = vmatpush.msra.mxu3 %v6288_v62 }
 0x619   :  { %1964 = vmatpush.msra.mxu0 %v6359_v58  ;;  %2177 = vmatpush.msrb.mxu2 %v6288_v62 }
 0x61a   :  { %2066 = vmatpush.msra.mxu3 %v6296_v2 }
 0x61b   :  { %1965 = vmatpush.msra.mxu0 %v6367_v26  ;;  %2178 = vmatpush.msrb.mxu2 %v6296_v2 }
 0x61c   :  { %2067 = vmatpush.msra.mxu3 %v6302_v17 }
 0x61d   :  { %2179 = vmatpush.msrb.mxu2 %v6302_v17 }
 0x61e   :  { %2068 = vmatpush.msra.mxu3 %v6307_v18 }
 0x61f   :  { %2180 = vmatpush.msrb.mxu2 %v6307_v18 }
 0x620   :  { %2069 = vmatpush.msra.mxu3 %v6310_v25 }
 0x621   :  { %2181 = vmatpush.msrb.mxu2 %v6310_v25 }
 0x622   :  { %2070 = vmatpush.msra.mxu3 %v6318_v61 }
 0x623   :  { %2182 = vmatpush.msrb.mxu2 %v6318_v61 }
 0x624   :  { %2071 = vmatpush.msra.mxu3 %v6320_v1 }
 0x625   :  { %2183 = vmatpush.msrb.mxu2 %v6320_v1 }
 0x626   :  { %2072 = vmatpush.msra.mxu3 %v6328_v21 }
 0x627   :  { %2184 = vmatpush.msrb.mxu2 %v6328_v21 }
 0x628   :  { %2073 = vmatpush.msra.mxu3 %v6336_v12 }
 0x629   :  { %2185 = vmatpush.msrb.mxu2 %v6336_v12 }
 0x62a   :  { %2074 = vmatpush.msra.mxu3 %v6344_v22 }
 0x62b   :  { %2186 = vmatpush.msrb.mxu2 %v6344_v22 }
 0x62c   :  { %2075 = vmatpush.msra.mxu3 %v6354_v15 }
 0x62d   :  { %2187 = vmatpush.msrb.mxu2 %v6354_v15 }
 0x62e   :  { %2076 = vmatpush.msra.mxu3 %v6359_v58 }
 0x62f   :  { %2188 = vmatpush.msrb.mxu2 %v6359_v58 }
 0x630   :  { %2077 = vmatpush.msra.mxu3 %v6367_v26 }
 0x631   :  { %2189 = vmatpush.msrb.mxu2 %v6367_v26 }
 0x68f   :  { %v1498_v31 = vpop.f32.mrf.mxu2 }
 0x690   :  { %v1499_v38 = vadd.f32 %v6100_v4, %v1498_v31  ;;  %v6372_v4 = vld [vmem:[#allocation18 + $0x10] sm:$0xff]  ;;  %v1726_v31 = vpop.f32.mrf.mxu3 }
 0x691   :  { %7829 = vst [vmem:[#allocation38_spill] sm:$0xff] %v6372_v4  ;;  %1966 = vmatpush.msra.mxu0 %v6372_v4  ;;  %2078 = vmatpush.msra.mxu3 %v6372_v4 }
 0x692   :  { %v4301_v7 = vmul.f32 -1.442695, %v1499_v38  ;;  %2190 = vmatpush.msrb.mxu2 %v6372_v4  ;;  %v1767_v38 = vpop.f32.mrf.mxu0 }
 0x693   :  { %2135 = vmatpush.msrb.mxu0 %v6159_v39 }
 0x694   :  { %4491 = vpow2.f32 %v4301_v7 }
 0x695   :  { %2136 = vmatpush.msrb.mxu0 %v6164_v48 }
 0x697   :  { %2137 = vmatpush.msrb.mxu0 %v6169_v13 }
 0x698   :  { %v6458_v7 = vpop.f32.mrf.mxu3 }
 0x699   :  { %2138 = vmatpush.msrb.mxu0 %v6171_v5  ;;  %7830 = vst [vmem:[#allocation35_spill] sm:$0xff] %v6458_v7 }
 0x69a   :  { %v4492_v50 = vpop.eup %4491 }
 0x69b   :  { %v1532_v53 = vadd.f32 1.0, %v4492_v50  ;;  %2139 = vmatpush.msrb.mxu0 %v6179_v51  ;;  %v6460_v50 = vpop.f32.mrf.mxu0 }
 0x69c   :  { %7831 = vst [vmem:[#allocation42_spill] sm:$0xff] %v6460_v50 }
 0x69d   :  { %4493 = vrcp.f32 %v1532_v53  ;;  %2140 = vmatpush.msrb.mxu0 %v6182_v47  ;;  %v1649_v20 = vand.u32 2147483648, %v1532_v53  ;;  %v1647_v19 = vand.u32 2147483647, %v1532_v53  ;;  %vm1643_vm13 = vweird.f32 %v1532_v53 }
 0x69f   :  { %2141 = vmatpush.msrb.mxu0 %v6188_v24  ;;  %v1650_v49 = vor.u32 1.1754944e-38, %v1649_v20  ;;  %vm1648_vm15 = vcmp.eq.f32.partialorder %v1647_v19, 8.507059e+37  ;;  %v1928_v19 = vpop.f32.mrf.mxu2 }
 0x6a1   :  { %2142 = vmatpush.msrb.mxu0 %v6190_v63 }
 0x6a3   :  { %v4494_v60 = vpop.eup %4493  ;;  %2143 = vmatpush.msrb.mxu0 %v6196_v42 }
 0x6a4   :  { %v1639_v28 = vmul.f32 %v4494_v60, %v1532_v53  ;;  %vm1644_vm12 = vweird.f32 %v4494_v60  ;;  %v6462_v53 = vpop.f32.mrf.mxu3 }
 0x6a5   :  { %2144 = vmatpush.msrb.mxu0 %v6202_v43  ;;  %vm1645_vm14 = vmor %vm1643_vm13, %vm1644_vm12  ;;  %7832 = vst [vmem:[#allocation39_spill] sm:$0xff] %v6462_v53 }
 0x6a6   :  { %v1640_v54 = vsub.f32 1.0, %v1639_v28 }
 0x6a7   :  { %2145 = vmatpush.msrb.mxu0 %v6207_v34 }
 0x6a8   :  { %v1641_v44 = vmul.f32 %v4494_v60, %v1640_v54  ;;  %v1701_v54 = vld [vmem:[%s7671_s9] sm:$0x7] }
 0x6a9   :  { %2146 = vmatpush.msrb.mxu0 %v6209_v11  ;;  %v6471_v20 = vperm.slane %v1701_v54, 0 }
 0x6aa   :  { %v1642_v9 = vadd.f32 %v4494_v60, %v1641_v44 }
 0x6ab   :  { %2147 = vmatpush.msrb.mxu0 %v6213_v36  ;;  %7835 = vst [vmem:[#allocation51_spill] sm:$0xff] %v6471_v20 }
 0x6ac   :  { %v1646_v41 = vsel %vm1645_vm14, %v4494_v60, %v1642_v9  ;;  %v6464_v60 = vpop.f32.mrf.mxu0  ;;  %v6466_v28 = vpop.f32.mrf.mxu3  ;;  %v1727_v9 = vadd.f32 %v1726_v31, %v6471_v20 }
 0x6ad   :  { %v1651_v30 = vsel %vm1648_vm15, %v1650_v49, %v1646_v41  ;;  %2148 = vmatpush.msrb.mxu0 %v6220_v29  ;;  %7833 = vst [vmem:[#allocation36_spill] sm:$0xff] %v6464_v60 }
 0x6ae   :  { %1746 = vmatmul.f32.gmra.mxu3 %v1651_v30  ;;  %1787 = vmatmul.f32.gmra.mxu0 %v1651_v30  ;;  %7834 = vst [vmem:[#allocation43_spill] sm:$0xff] %v6466_v28  ;;  %v1971_v41 = vadd.f32 %v1928_v19, %v1727_v9 }
 0x6af   :  { %1828 = vmatmul.f32.gmra.mxu1 %v1651_v30  ;;  %2149 = vmatpush.msrb.mxu0 %v6225_v37 }
 0x6b0   :  { %v4302_v30 = vmul.f32 -1.442695, %v1971_v41 }
 0x6b1   :  { %2150 = vmatpush.msrb.mxu0 %v6229_v56 }
 0x6b2   :  { %4495 = vpow2.f32 %v4302_v30 }
 0x6b4   :  { %v6473_v44 = vpop.f32.mrf.mxu0  ;;  %v6476_v49 = vpop.f32.mrf.mxu3 }
 0x6b5   :  { %7836 = vst [vmem:[#allocation47_spill] sm:$0xff] %v6473_v44 }
 0x6b6   :  { %1947 = vmatmul.f32.vlgmr.msrb.gmra.mxu3 %v7825_v32  ;;  %1967 = vmatmul.f32.vlgmr.msra.gmra.mxu0 %v7825_v32  ;;  %7837 = vst [vmem:[#allocation55_spill] sm:$0xff] %v6476_v49  ;;  %v6490_v49 = vperm.slane %v1701_v54, 1 }
 0x6b7   :  { %2247 = vmatpush.msrb.mxu3 %v6159_v39  ;;  %2267 = vmatpush.msra.mxu0 %v6233_v14 }
 0x6b8   :  { %v4496_v28 = vpop.eup %4495  ;;  %7844 = vst [vmem:[#allocation59_spill] sm:$0xff] %v6490_v49  ;;  %v1768_v9 = vadd.f32 %v1767_v38, %v6490_v49 }
 0x6b9   :  { %2248 = vmatpush.msrb.mxu3 %v6164_v48  ;;  %2268 = vmatpush.msra.mxu0 %v6252_v59  ;;  %v1975_v7 = vadd.f32 1.0, %v4496_v28  ;;  %v6498_v28 = vld [vmem:[%s7672_s10] ss:$0 sm:$0xff] }
 0x6bb   :  { %2249 = vmatpush.msrb.mxu3 %v6169_v13  ;;  %2269 = vmatpush.msra.mxu0 %v6254_v10  ;;  %4497 = vrcp.f32 %v1975_v7  ;;  %vm1981_vm1 = vweird.f32 %v1975_v7  ;;  %v1985_v38 = vand.u32 2147483647, %v1975_v7 }
 0x6bc   :  { %v6478_v32 = vpop.f32.mrf.mxu0  ;;  %v6480_v53 = vpop.f32.mrf.mxu3 }
 0x6bd   :  { %2250 = vmatpush.msrb.mxu3 %v6171_v5  ;;  %2270 = vmatpush.msra.mxu0 %v6262_v6  ;;  %7838 = vst [vmem:[#allocation57_spill] sm:$0xff] %v6478_v32  ;;  %vm1986_vm3 = vcmp.eq.f32.partialorder %v1985_v38, 8.507059e+37 }
 0x6be   :  { %7839 = vst [vmem:[#allocation62_spill] sm:$0xff] %v6480_v53 }
 0x6bf   :  { %2251 = vmatpush.msrb.mxu3 %v6179_v51  ;;  %2271 = vmatpush.msra.mxu0 %v6264_v23 }
 0x6c1   :  { %2252 = vmatpush.msrb.mxu3 %v6182_v47  ;;  %2272 = vmatpush.msra.mxu0 %v6268_v33  ;;  %v4498_v31 = vpop.eup %4497 }
 0x6c2   :  { %v1977_v19 = vmul.f32 %v4498_v31, %v1975_v7  ;;  %vm1982_vm0 = vweird.f32 %v4498_v31 }
 0x6c3   :  { %2253 = vmatpush.msrb.mxu3 %v6188_v24  ;;  %2273 = vmatpush.msra.mxu0 %v6273_v35  ;;  %vm1983_vm2 = vmor %vm1981_vm1, %vm1982_vm0 }
 0x6c4   :  { %v6482_v60 = vpop.f32.mrf.mxu3  ;;  %v6484_v50 = vpop.f32.mrf.mxu0  ;;  %v1978_v32 = vsub.f32 1.0, %v1977_v19 }
 0x6c5   :  { %2254 = vmatpush.msrb.mxu3 %v6190_v63  ;;  %2274 = vmatpush.msra.mxu0 %v6290_v0  ;;  %7840 = vst [vmem:[#allocation58_spill] sm:$0xff] %v6482_v60 }
 0x6c6   :  { %7841 = vst [vmem:[#allocation50_spill] sm:$0xff] %v6484_v50  ;;  %v1979_v50 = vmul.f32 %v4498_v31, %v1978_v32  ;;  %v6501_v32 = vperm.slane %v1701_v54, 2 }
 0x6c7   :  { %2255 = vmatpush.msrb.mxu3 %v6196_v42  ;;  %2275 = vmatpush.msra.mxu0 %v6292_v8 }
 0x6c9   :  { %2256 = vmatpush.msrb.mxu3 %v6202_v43  ;;  %2276 = vmatpush.msra.mxu0 %v6312_v46 }
 0x6cb   :  { %2257 = vmatpush.msrb.mxu3 %v6207_v34  ;;  %2277 = vmatpush.msra.mxu0 %v6314_v55 }
 0x6cd   :  { %2258 = vmatpush.msrb.mxu3 %v6209_v11  ;;  %2278 = vmatpush.msra.mxu0 %v6323_v16 }
 0x6cf   :  { %2259 = vmatpush.msrb.mxu3 %v6213_v36  ;;  %2279 = vmatpush.msra.mxu0 %v6331_v27 }
 0x6d1   :  { %2260 = vmatpush.msrb.mxu3 %v6220_v29  ;;  %2280 = vmatpush.msra.mxu0 %v6340_v40 }
 0x6d3   :  { %2261 = vmatpush.msrb.mxu3 %v6225_v37  ;;  %2281 = vmatpush.msra.mxu0 %v6352_v45 }
 0x6d5   :  { %2262 = vmatpush.msrb.mxu3 %v6229_v56  ;;  %2282 = vmatpush.msra.mxu0 %v6361_v3  ;;  %v6488_v3 = vpop.f32.mrf.mxu0  ;;  %v1987_v56 = vand.u32 2147483648, %v1975_v7 }
 0x6d6   :  { %7843 = vst [vmem:[#allocation52_spill] sm:$0xff] %v6488_v3 }
 0x72b   :  { %v6493_v53 = vpop.f32.mrf.mxu0 }
 0x72c   :  { %7845 = vst [vmem:[#allocation44_spill] sm:$0xff] %v6493_v53 }
 0x731   :  { %v6486_v44 = vpop.f32.mrf.mxu3 }
 0x732   :  { %7842 = vst [vmem:[#allocation64_spill] sm:$0xff] %v6486_v44  ;;  %v1980_v44 = vadd.f32 %v4498_v31, %v1979_v50 }
 0x733   :  { %v1968_v20 = vpop.f32.mrf.mxu0 }
 0x734   :  { %v1984_v53 = vsel %vm1983_vm2, %v4498_v31, %v1980_v44  ;;  %v2011_v19 = vadd.f32 %v6498_v28, %v1968_v20 }
 0x739   :  { %v1948_v41 = vpop.f32.mrf.mxu3 }
 0x73a   :  { %v1991_v30 = vadd.f32 %v1948_v41, %v1768_v9  ;;  %v1808_v9 = vpop.f32.mrf.mxu1 }
 0x73b   :  { %v1809_v4 = vadd.f32 %v1808_v9, %v6501_v32 }
 0x73c   :  { %v4303_v60 = vmul.f32 -1.442695, %v1991_v30 }
 0x73e   :  { %4499 = vpow2.f32 %v4303_v60  ;;  %v1988_v60 = vor.u32 1.1754944e-38, %v1987_v56 }
 0x740   :  { %v1989_v41 = vsel %vm1986_vm3, %v1988_v60, %v1984_v53 }
 0x741   :  { %v2012_v30 = vmul.f32 %v2011_v19, %v1989_v41  ;;  %v7859_v41 = vld [vmem:[#allocation51_spill] sm:$0xff] }
 0x743   :  { %v2013_v37 = vadd.f32 %v2012_v30, %v1809_v4  ;;  %v7860_v30 = vld [vmem:[#allocation35_spill] sm:$0xff] }
 0x744   :  { %v4500_v3 = vpop.eup %4499 }
 0x745   :  { %v1995_v49 = vadd.f32 1.0, %v4500_v3 }
 0x747   :  { %4501 = vrcp.f32 %v1995_v49  ;;  %v2007_v7 = vand.u32 2147483648, %v1995_v49  ;;  %v2005_v44 = vand.u32 2147483647, %v1995_v49  ;;  %vm2001_vm5 = vweird.f32 %v1995_v49 }
 0x748   :  { %4503 = vtanh.f32 %v2013_v37 }
 0x749   :  { %v2008_v56 = vor.u32 1.1754944e-38, %v2007_v7  ;;  %vm2006_vm7 = vcmp.eq.f32.partialorder %v2005_v44, 8.507059e+37 }
 0x74d   :  { %v4502_v50 = vpop.eup %4501 }
 0x74e   :  { %v1997_v45 = vmul.f32 %v4502_v50, %v1995_v49  ;;  %vm2002_vm4 = vweird.f32 %v4502_v50  ;;  %v4504_v38 = vpop.eup %4503 }
 0x74f   :  { %vm2003_vm6 = vmor %vm2001_vm5, %vm2002_vm4 }
 0x750   :  { %v1998_v26 = vsub.f32 1.0, %v1997_v45 }
 0x752   :  { %v1999_v3 = vmul.f32 %v4502_v50, %v1998_v26 }
 0x754   :  { %v2000_v20 = vadd.f32 %v4502_v50, %v1999_v3 }
 0x756   :  { %v2004_v54 = vsel %vm2003_vm6, %v4502_v50, %v2000_v20  ;;  %v1730_v50 = vadd.f32 %v7860_v30, %v7859_v41  ;;  %v7861_v20 = vld [vmem:[#allocation59_spill] sm:$0xff] }
 0x757   :  { %v2009_v31 = vsel %vm2006_vm7, %v2008_v56, %v2004_v54  ;;  %v7862_v56 = vld [vmem:[#allocation42_spill] sm:$0xff] }
 0x758   :  { %v2015_v53 = vsub.f32 1.0, %v2009_v31  ;;  %v2017_v60 = vmul.f32 0.0, %v2009_v31  ;;  %v1771_v54 = vadd.f32 %v7862_v56, %v7861_v20 }
 0x75a   :  { %v2016_v19 = vmul.f32 %v4504_v38, %v2015_v53 }
 0x75c   :  { %v6504_v9 = vadd.f32 %v2017_v60, %v2016_v19 }
 0x75e   :  { %7846 = vst [vmem:[#allocation53_spill] sm:$0xff] %v6504_v9  ;;  %2039 = vmatmul.f32.vlgmr.msra.gmra.mxu1 %v6504_v9  ;;  %2059 = vmatmul.f32.vlgmr.msra.gmra.mxu2 %v6504_v9 }
 0x75f   :  { %2079 = vmatmul.f32.vlgmr.msra.gmra.mxu3 %v6504_v9  ;;  %2287 = vmatpush.msra.mxu1 %v6282_v52 }
 0x760   :  { %2359 = vmatpush.msra.mxu2 %v6159_v39  ;;  %2379 = vmatpush.msra.mxu3 %v6233_v14  ;;  %v7847_v39 = vld [vmem:[#allocation41_spill] sm:$0xff] }
 0x761   :  { %2288 = vmatpush.msra.mxu1 %v6285_v57 }
 0x762   :  { %2360 = vmatpush.msra.mxu2 %v6164_v48  ;;  %2380 = vmatpush.msra.mxu3 %v6252_v59  ;;  %v7848_v48 = vld [vmem:[#allocation45_spill] sm:$0xff] }
 0x763   :  { %2289 = vmatpush.msra.mxu1 %v6288_v62 }
 0x764   :  { %2361 = vmatpush.msra.mxu2 %v6169_v13  ;;  %2381 = vmatpush.msra.mxu3 %v6254_v10  ;;  %v7849_v13 = vld [vmem:[#allocation37_spill] sm:$0xff] }
 0x765   :  { %2290 = vmatpush.msra.mxu1 %v6296_v2 }
 0x766   :  { %2362 = vmatpush.msra.mxu2 %v6171_v5  ;;  %2382 = vmatpush.msra.mxu3 %v6262_v6  ;;  %v7850_v5 = vld [vmem:[#allocation38_spill] sm:$0xff] }
 0x767   :  { %2291 = vmatpush.msra.mxu1 %v6302_v17 }
 0x768   :  { %2363 = vmatpush.msra.mxu2 %v6179_v51  ;;  %2383 = vmatpush.msra.mxu3 %v6264_v23  ;;  %v7851_v51 = vld [vmem:[#allocation40_spill] sm:$0xff] }
 0x769   :  { %2292 = vmatpush.msra.mxu1 %v6307_v18 }
 0x76a   :  { %2364 = vmatpush.msra.mxu2 %v6182_v47  ;;  %2384 = vmatpush.msra.mxu3 %v6268_v33  ;;  %v7852_v47 = vld [vmem:[#allocation34_spill] sm:$0xff] }
 0x76b   :  { %2293 = vmatpush.msra.mxu1 %v6310_v25 }
 0x76c   :  { %2365 = vmatpush.msra.mxu2 %v6188_v24  ;;  %2385 = vmatpush.msra.mxu3 %v6273_v35  ;;  %v1811_v24 = vpop.f32.mrf.mxu1 }
 0x76d   :  { %2294 = vmatpush.msra.mxu1 %v6318_v61 }
 0x76e   :  { %2366 = vmatpush.msra.mxu2 %v6190_v63  ;;  %2386 = vmatpush.msra.mxu3 %v6290_v0 }
 0x76f   :  { %2295 = vmatpush.msra.mxu1 %v6320_v1 }
 0x770   :  { %2367 = vmatpush.msra.mxu2 %v6196_v42  ;;  %2387 = vmatpush.msra.mxu3 %v6292_v8 }
 0x771   :  { %2296 = vmatpush.msra.mxu1 %v6328_v21 }
 0x772   :  { %2368 = vmatpush.msra.mxu2 %v6202_v43  ;;  %2388 = vmatpush.msra.mxu3 %v6312_v46 }
 0x773   :  { %2297 = vmatpush.msra.mxu1 %v6336_v12 }
 0x774   :  { %2369 = vmatpush.msra.mxu2 %v6207_v34  ;;  %2389 = vmatpush.msra.mxu3 %v6314_v55  ;;  %v6557_v63 = vpop.f32.mrf.mxu1 }
 0x775   :  { %2298 = vmatpush.msra.mxu1 %v6344_v22  ;;  %7853 = vst [vmem:[#allocation60_spill] sm:$0xff] %v6557_v63 }
 0x776   :  { %2370 = vmatpush.msra.mxu2 %v6209_v11  ;;  %2390 = vmatpush.msra.mxu3 %v6323_v16 }
 0x777   :  { %2299 = vmatpush.msra.mxu1 %v6354_v15 }
 0x778   :  { %2371 = vmatpush.msra.mxu2 %v6213_v36  ;;  %2391 = vmatpush.msra.mxu3 %v6331_v27 }
 0x779   :  { %2300 = vmatpush.msra.mxu1 %v6359_v58 }
 0x77a   :  { %2372 = vmatpush.msra.mxu2 %v6220_v29  ;;  %2392 = vmatpush.msra.mxu3 %v6340_v40 }
 0x77b   :  { %2301 = vmatpush.msra.mxu1 %v7847_v39 }
 0x77c   :  { %2373 = vmatpush.msra.mxu2 %v7848_v48  ;;  %2393 = vmatpush.msra.mxu3 %v7849_v13  ;;  %v6559_v37 = vpop.f32.mrf.mxu1 }
 0x77d   :  { %2302 = vmatpush.msra.mxu1 %v7850_v5  ;;  %7854 = vst [vmem:[#allocation46_spill] sm:$0xff] %v6559_v37 }
 0x77e   :  { %2374 = vmatpush.msra.mxu2 %v7851_v51  ;;  %2394 = vmatpush.msra.mxu3 %v7852_v47 }
 0x784   :  { %v6561_v45 = vpop.f32.mrf.mxu1 }
 0x785   :  { %7855 = vst [vmem:[#allocation54_spill] sm:$0xff] %v6561_v45 }
 0x78c   :  { %v6563_v26 = vpop.f32.mrf.mxu1 }
 0x78d   :  { %7856 = vst [vmem:[#allocation61_spill] sm:$0xff] %v6563_v26 }
 0x794   :  { %v6565_v4 = vpop.f32.mrf.mxu1 }
 0x795   :  { %7857 = vst [vmem:[#allocation48_spill] sm:$0xff] %v6565_v4 }
 0x79c   :  { %v6567_v49 = vpop.f32.mrf.mxu1 }
 0x79d   :  { %7858 = vst [vmem:[#allocation63_spill] sm:$0xff] %v6567_v49 }
 0x7db   :  { %v2040_v7 = vpop.f32.mrf.mxu1 }
 0x7dc   :  { %v2083_v3 = vadd.f32 %v2040_v7, %v1730_v50 }
 0x7de   :  { %v4304_v44 = vmul.f32 -1.442695, %v2083_v3 }
 0x7e0   :  { %4505 = vpow2.f32 %v4304_v44 }
 0x7e1   :  { %v2060_v31 = vpop.f32.mrf.mxu2 }
 0x7e2   :  { %v2103_v53 = vadd.f32 %v2060_v31, %v1771_v54  ;;  %v2080_v56 = vpop.f32.mrf.mxu3 }
 0x7e4   :  { %v4305_v38 = vmul.f32 -1.442695, %v2103_v53 }
 0x7e6   :  { %v4506_v19 = vpop.eup %4505  ;;  %4507 = vpow2.f32 %v4305_v38  ;;  %v1812_v38 = vadd.f32 %v1811_v24, %v6501_v32 }
 0x7e7   :  { %v2087_v60 = vadd.f32 1.0, %v4506_v19 }
 0x7e9   :  { %4509 = vrcp.f32 %v2087_v60  ;;  %v2099_v37 = vand.u32 2147483648, %v2087_v60  ;;  %v2097_v7 = vand.u32 2147483647, %v2087_v60  ;;  %vm2093_vm9 = vweird.f32 %v2087_v60 }
 0x7eb   :  { %v2100_v54 = vor.u32 1.1754944e-38, %v2099_v37  ;;  %vm2098_vm11 = vcmp.eq.f32.partialorder %v2097_v7, 8.507059e+37 }
 0x7ec   :  { %v4508_v4 = vpop.eup %4507 }
 0x7ed   :  { %v2107_v26 = vadd.f32 1.0, %v4508_v4  ;;  %v2123_v4 = vadd.f32 %v6498_v28, %v2080_v56 }
 0x7ef   :  { %v4510_v49 = vpop.eup %4509  ;;  %4511 = vrcp.f32 %v2107_v26  ;;  %v2117_v20 = vand.u32 2147483647, %v2107_v26  ;;  %vm2113_vm13 = vweird.f32 %v2107_v26 }
 0x7f0   :  { %v2089_v45 = vmul.f32 %v4510_v49, %v2087_v60  ;;  %vm2094_vm8 = vweird.f32 %v4510_v49 }
 0x7f1   :  { %vm2095_vm10 = vmor %vm2093_vm9, %vm2094_vm8  ;;  %vm2118_vm15 = vcmp.eq.f32.partialorder %v2117_v20, 8.507059e+37  ;;  %v6607_v20 = vld [vmem:[#allocation18 + $0xf0] sm:$0xff] }
 0x7f2   :  { %v2090_v30 = vsub.f32 1.0, %v2089_v45 }
 0x7f4   :  { %v2091_v50 = vmul.f32 %v4510_v49, %v2090_v30  ;;  %v2119_v30 = vand.u32 2147483648, %v2107_v26 }
 0x7f5   :  { %v4512_v3 = vpop.eup %4511 }
 0x7f6   :  { %v2109_v44 = vmul.f32 %v4512_v3, %v2107_v26  ;;  %v2092_v63 = vadd.f32 %v4510_v49, %v2091_v50  ;;  %vm2114_vm12 = vweird.f32 %v4512_v3  ;;  %v2120_v60 = vor.u32 1.1754944e-38, %v2119_v30  ;;  %v6582_v26 = vld [vmem:[#allocation18 + $0x168] sm:$0xff] }
 0x7f7   :  { %vm2115_vm14 = vmor %vm2113_vm13, %vm2114_vm12 }
 0x7f8   :  { %v2110_v31 = vsub.f32 1.0, %v2109_v44  ;;  %v2096_v53 = vsel %vm2095_vm10, %v4510_v49, %v2092_v63  ;;  %v6617_v44 = vld [vmem:[#allocation18 + $0xc0] sm:$0xff] }
 0x7f9   :  { %v2101_v19 = vsel %vm2098_vm11, %v2100_v54, %v2096_v53  ;;  %v7867_v54 = vld [vmem:[#allocation51_spill] sm:$0xff] }
 0x7fa   :  { %v2111_v45 = vmul.f32 %v4512_v3, %v2110_v31  ;;  %v2124_v41 = vmul.f32 %v2123_v4, %v2101_v19  ;;  %v7868_v31 = vld [vmem:[#allocation39_spill] sm:$0xff] }
 0x7fc   :  { %v2112_v47 = vadd.f32 %v4512_v3, %v2111_v45  ;;  %v2125_v51 = vadd.f32 %v2124_v41, %v1812_v38  ;;  %v6597_v41 = vld [vmem:[#allocation18 + $0x120] sm:$0xff] }
 0x7fe   :  { %v2116_v50 = vsel %vm2115_vm14, %v4512_v3, %v2112_v47  ;;  %4513 = vtanh.f32 %v2125_v51  ;;  %v6587_v51 = vld [vmem:[#allocation18 + $0x150] sm:$0xff]  ;;  %v6592_v47 = vld [vmem:[#allocation18 + $0x138] sm:$0xff] }
 0x7ff   :  { %v2121_v63 = vsel %vm2118_vm15, %v2120_v60, %v2116_v50  ;;  %v6612_v3 = vld [vmem:[#allocation18 + $0xd8] sm:$0xff] }
 0x800   :  { %v2127_v37 = vsub.f32 1.0, %v2121_v63  ;;  %v2129_v24 = vmul.f32 %v2121_v63, %v6504_v9 }
 0x804   :  { %v4514_v49 = vpop.eup %4513 }
 0x805   :  { %v2128_v7 = vmul.f32 %v4514_v49, %v2127_v37 }
 0x807   :  { %v6576_v56 = vadd.f32 %v2129_v24, %v2128_v7 }
 0x809   :  { %2151 = vmatmul.f32.vlgmr.msrb.gmra.mxu0 %v6576_v56  ;;  %2171 = vmatmul.f32.vlgmr.msrb.gmra.mxu1 %v6576_v56 }
 0x80a   :  { %2191 = vmatmul.f32.vlgmr.msrb.gmra.mxu2 %v6576_v56  ;;  %2399 = vmatpush.msrb.mxu0 %v6282_v52 }
 0x80b   :  { %2471 = vmatpush.msrb.mxu1 %v6582_v26  ;;  %2491 = vmatpush.msrb.mxu2 %v6233_v14  ;;  %v6602_v14 = vld [vmem:[#allocation18 + $0x108] sm:$0xff] }
 0x80c   :  { %2400 = vmatpush.msrb.mxu0 %v6285_v57 }
 0x80d   :  { %2472 = vmatpush.msrb.mxu1 %v6587_v51  ;;  %2492 = vmatpush.msrb.mxu2 %v6252_v59 }
 0x80e   :  { %2401 = vmatpush.msrb.mxu0 %v6288_v62 }
 0x80f   :  { %2473 = vmatpush.msrb.mxu1 %v6592_v47  ;;  %2493 = vmatpush.msrb.mxu2 %v6254_v10 }
 0x810   :  { %2402 = vmatpush.msrb.mxu0 %v6296_v2 }
 0x811   :  { %2474 = vmatpush.msrb.mxu1 %v6597_v41  ;;  %2494 = vmatpush.msrb.mxu2 %v6262_v6 }
 0x812   :  { %2403 = vmatpush.msrb.mxu0 %v6302_v17 }
 0x813   :  { %2475 = vmatpush.msrb.mxu1 %v6602_v14  ;;  %2495 = vmatpush.msrb.mxu2 %v6264_v23 }
 0x814   :  { %2404 = vmatpush.msrb.mxu0 %v6307_v18 }
 0x815   :  { %2476 = vmatpush.msrb.mxu1 %v6607_v20  ;;  %2496 = vmatpush.msrb.mxu2 %v6268_v33 }
 0x816   :  { %2405 = vmatpush.msrb.mxu0 %v6310_v25 }
 0x817   :  { %2477 = vmatpush.msrb.mxu1 %v6612_v3  ;;  %2497 = vmatpush.msrb.mxu2 %v6273_v35 }
 0x818   :  { %2406 = vmatpush.msrb.mxu0 %v6318_v61 }
 0x819   :  { %2478 = vmatpush.msrb.mxu1 %v6617_v44  ;;  %2498 = vmatpush.msrb.mxu2 %v6290_v0 }
 0x81a   :  { %2407 = vmatpush.msrb.mxu0 %v6320_v1 }
 0x81b   :  { %2479 = vmatpush.msrb.mxu1 %v6196_v42  ;;  %2499 = vmatpush.msrb.mxu2 %v6292_v8  ;;  %v7863_v42 = vld [vmem:[#allocation40_spill] sm:$0xff] }
 0x81c   :  { %2408 = vmatpush.msrb.mxu0 %v6328_v21 }
 0x81d   :  { %2480 = vmatpush.msrb.mxu1 %v6202_v43  ;;  %2500 = vmatpush.msrb.mxu2 %v6312_v46  ;;  %v7864_v43 = vld [vmem:[#allocation34_spill] sm:$0xff] }
 0x81e   :  { %2409 = vmatpush.msrb.mxu0 %v6336_v12 }
 0x81f   :  { %2481 = vmatpush.msrb.mxu1 %v6207_v34  ;;  %2501 = vmatpush.msrb.mxu2 %v6314_v55  ;;  %v7865_v34 = vld [vmem:[#allocation59_spill] sm:$0xff] }
 0x820   :  { %2410 = vmatpush.msrb.mxu0 %v6344_v22 }
 0x821   :  { %2482 = vmatpush.msrb.mxu1 %v6209_v11  ;;  %2502 = vmatpush.msrb.mxu2 %v6323_v16  ;;  %v7866_v11 = vld [vmem:[#allocation36_spill] sm:$0xff] }
 0x822   :  { %2411 = vmatpush.msrb.mxu0 %v6354_v15 }
 0x823   :  { %2483 = vmatpush.msrb.mxu1 %v6213_v36  ;;  %2503 = vmatpush.msrb.mxu2 %v6331_v27  ;;  %v1774_v36 = vadd.f32 %v7866_v11, %v7865_v34 }
 0x824   :  { %2412 = vmatpush.msrb.mxu0 %v6359_v58 }
 0x825   :  { %2484 = vmatpush.msrb.mxu1 %v6220_v29  ;;  %2504 = vmatpush.msrb.mxu2 %v6340_v40  ;;  %v1733_v29 = vadd.f32 %v7868_v31, %v7867_v54 }
 0x826   :  { %2413 = vmatpush.msrb.mxu0 %v7847_v39 }
 0x827   :  { %2485 = vmatpush.msrb.mxu1 %v7848_v48  ;;  %2505 = vmatpush.msrb.mxu2 %v7849_v13 }
 0x828   :  { %2414 = vmatpush.msrb.mxu0 %v7850_v5 }
 0x829   :  { %2486 = vmatpush.msrb.mxu1 %v7863_v42  ;;  %2506 = vmatpush.msrb.mxu2 %v7864_v43 }
 0x886   :  { %v2152_v53 = vpop.f32.mrf.mxu0  ;;  %v2172_v4 = vpop.f32.mrf.mxu1 }
 0x887   :  { %v2195_v38 = vadd.f32 %v2152_v53, %v1733_v29  ;;  %v2215_v19 = vadd.f32 %v2172_v4, %v1774_v36 }
 0x889   :  { %v4306_v45 = vmul.f32 -1.442695, %v2195_v38  ;;  %v4307_v48 = vmul.f32 -1.442695, %v2215_v19 }
 0x88b   :  { %4515 = vpow2.f32 %v4306_v45 }
 0x88c   :  { %4517 = vpow2.f32 %v4307_v48 }
 0x88d   :  { %v2192_v53 = vpop.f32.mrf.mxu2 }
 0x88e   :  { %v2235_v45 = vadd.f32 %v6498_v28, %v2192_v53 }
 0x891   :  { %v4516_v30 = vpop.eup %4515 }
 0x892   :  { %v4518_v60 = vpop.eup %4517  ;;  %v2199_v50 = vadd.f32 1.0, %v4516_v30 }
 0x893   :  { %v2219_v63 = vadd.f32 1.0, %v4518_v60  ;;  %v7869_v60 = vld [vmem:[#allocation60_spill] sm:$0xff] }
 0x894   :  { %4519 = vrcp.f32 %v2199_v50  ;;  %v2211_v31 = vand.u32 2147483648, %v2199_v50  ;;  %v2209_v36 = vand.u32 2147483647, %v2199_v50  ;;  %vm2205_vm1 = vweird.f32 %v2199_v50 }
 0x895   :  { %4521 = vrcp.f32 %v2219_v63  ;;  %vm2225_vm5 = vweird.f32 %v2219_v63  ;;  %v2229_v54 = vand.u32 2147483647, %v2219_v63 }
 0x896   :  { %v2212_v38 = vor.u32 1.1754944e-38, %v2211_v31  ;;  %vm2210_vm3 = vcmp.eq.f32.partialorder %v2209_v36, 8.507059e+37 }
 0x897   :  { %vm2230_vm7 = vcmp.eq.f32.partialorder %v2229_v54, 8.507059e+37 }
 0x89a   :  { %v4520_v37 = vpop.eup %4519 }
 0x89b   :  { %v4522_v49 = vpop.eup %4521  ;;  %v2201_v7 = vmul.f32 %v4520_v37, %v2199_v50  ;;  %vm2206_vm0 = vweird.f32 %v4520_v37 }
 0x89c   :  { %v2221_v24 = vmul.f32 %v4522_v49, %v2219_v63  ;;  %vm2207_vm2 = vmor %vm2205_vm1, %vm2206_vm0  ;;  %vm2226_vm4 = vweird.f32 %v4522_v49 }
 0x89d   :  { %v2202_v42 = vsub.f32 1.0, %v2201_v7  ;;  %v1815_v7 = vadd.f32 %v7869_v60, %v6501_v32  ;;  %vm2227_vm6 = vmor %vm2225_vm5, %vm2226_vm4 }
 0x89e   :  { %v2222_v11 = vsub.f32 1.0, %v2221_v24  ;;  %v2231_v24 = vand.u32 2147483648, %v2219_v63  ;;  %v6660_v63 = vld [vmem:[#allocation18 + $0x170] sm:$0xff] }
 0x89f   :  { %v2203_v9 = vmul.f32 %v4520_v37, %v2202_v42 }
 0x8a0   :  { %v2223_v29 = vmul.f32 %v4522_v49, %v2222_v11  ;;  %v2232_v50 = vor.u32 1.1754944e-38, %v2231_v24  ;;  %v7873_v24 = vld [vmem:[#allocation46_spill] sm:$0xff] }
 0x8a1   :  { %v2204_v4 = vadd.f32 %v4520_v37, %v2203_v9 }
 0x8a2   :  { %v2224_v48 = vadd.f32 %v4522_v49, %v2223_v29 }
 0x8a3   :  { %v2208_v19 = vsel %vm2207_vm2, %v4520_v37, %v2204_v4 }
 0x8a4   :  { %v2213_v30 = vsel %vm2210_vm3, %v2212_v38, %v2208_v19  ;;  %v2228_v9 = vsel %vm2227_vm6, %v4522_v49, %v2224_v48 }
 0x8a5   :  { %v2236_v42 = vmul.f32 %v2235_v45, %v2213_v30  ;;  %v2233_v37 = vsel %vm2230_vm7, %v2232_v50, %v2228_v9 }
 0x8a6   :  { %v2239_v31 = vsub.f32 1.0, %v2233_v37  ;;  %v2241_v29 = vmul.f32 %v2233_v37, %v6576_v56 }
 0x8a7   :  { %v2237_v11 = vadd.f32 %v2236_v42, %v1815_v7  ;;  %v1818_v42 = vadd.f32 %v7873_v24, %v6501_v32 }
 0x8a9   :  { %4523 = vtanh.f32 %v2237_v11 }
 0x8af   :  { %v4524_v36 = vpop.eup %4523 }
 0x8b0   :  { %v2240_v53 = vmul.f32 %v4524_v36, %v2239_v31 }
 0x8b2   :  { %v6653_v4 = vadd.f32 %v2241_v29, %v2240_v53 }
 0x8b4   :  { %2263 = vmatmul.f32.vlgmr.msrb.gmra.mxu3 %v6653_v4  ;;  %2283 = vmatmul.f32.vlgmr.msra.gmra.mxu0 %v6653_v4 }
 0x8b5   :  { %2303 = vmatmul.f32.vlgmr.msra.gmra.mxu1 %v6653_v4  ;;  %2511 = vmatpush.msrb.mxu3 %v6282_v52  ;;  %v6715_v52 = vld [vmem:[#allocation18 + $0x18] sm:$0xff] }
 0x8b6   :  { %2583 = vmatpush.msra.mxu0 %v6582_v26  ;;  %2603 = vmatpush.msra.mxu1 %v6660_v63 }
 0x8b7   :  { %2512 = vmatpush.msrb.mxu3 %v6285_v57  ;;  %v6720_v57 = vld [vmem:[#allocation18] sm:$0xff] }
 0x8b8   :  { %2584 = vmatpush.msra.mxu0 %v6587_v51  ;;  %2604 = vmatpush.msra.mxu1 %v6252_v59  ;;  %v6685_v59 = vld [vmem:[#allocation18 + $0xa8] sm:$0xff] }
 0x8b9   :  { %2513 = vmatpush.msrb.mxu3 %v6288_v62  ;;  %v7870_v62 = vld [vmem:[#allocation47_spill] sm:$0xff] }
 0x8ba   :  { %2585 = vmatpush.msra.mxu0 %v6592_v47  ;;  %2605 = vmatpush.msra.mxu1 %v6254_v10  ;;  %v6690_v10 = vld [vmem:[#allocation18 + $0x90] sm:$0xff] }
 0x8bb   :  { %2514 = vmatpush.msrb.mxu3 %v6296_v2 }
 0x8bc   :  { %2586 = vmatpush.msra.mxu0 %v6597_v41  ;;  %2606 = vmatpush.msra.mxu1 %v6262_v6  ;;  %v6695_v6 = vld [vmem:[#allocation18 + $0x78] sm:$0xff] }
 0x8bd   :  { %2515 = vmatpush.msrb.mxu3 %v6302_v17 }
 0x8be   :  { %2587 = vmatpush.msra.mxu0 %v6602_v14  ;;  %2607 = vmatpush.msra.mxu1 %v6264_v23  ;;  %v6700_v23 = vld [vmem:[#allocation18 + $0x60] sm:$0xff] }
 0x8bf   :  { %2516 = vmatpush.msrb.mxu3 %v6307_v18  ;;  %v7871_v18 = vld [vmem:[#allocation51_spill] sm:$0xff] }
 0x8c0   :  { %2588 = vmatpush.msra.mxu0 %v6607_v20  ;;  %2608 = vmatpush.msra.mxu1 %v6268_v33  ;;  %v6705_v33 = vld [vmem:[#allocation18 + $0x48] sm:$0xff] }
 0x8c1   :  { %2517 = vmatpush.msrb.mxu3 %v6310_v25  ;;  %v7872_v25 = vld [vmem:[#allocation43_spill] sm:$0xff] }
 0x8c2   :  { %2589 = vmatpush.msra.mxu0 %v6612_v3  ;;  %2609 = vmatpush.msra.mxu1 %v6273_v35  ;;  %v6710_v35 = vld [vmem:[#allocation18 + $0x30] sm:$0xff] }
 0x8c3   :  { %2518 = vmatpush.msrb.mxu3 %v6318_v61 }
 0x8c4   :  { %2590 = vmatpush.msra.mxu0 %v6617_v44  ;;  %2610 = vmatpush.msra.mxu1 %v6290_v0  ;;  %v1777_v0 = vadd.f32 %v7870_v62, %v7865_v34 }
 0x8c5   :  { %2519 = vmatpush.msrb.mxu3 %v6320_v1 }
 0x8c6   :  { %2591 = vmatpush.msra.mxu0 %v6685_v59  ;;  %2611 = vmatpush.msra.mxu1 %v6292_v8 }
 0x8c7   :  { %2520 = vmatpush.msrb.mxu3 %v6328_v21 }
 0x8c8   :  { %2592 = vmatpush.msra.mxu0 %v6690_v10  ;;  %2612 = vmatpush.msra.mxu1 %v6312_v46  ;;  %v1736_v46 = vadd.f32 %v7872_v25, %v7871_v18  ;;  %v6742_v25 = vld [vmem:[#allocation18 + $0x160] sm:$0xff] }
 0x8c9   :  { %2521 = vmatpush.msrb.mxu3 %v6336_v12 }
 0x8ca   :  { %2593 = vmatpush.msra.mxu0 %v6695_v6  ;;  %2613 = vmatpush.msra.mxu1 %v6314_v55 }
 0x8cb   :  { %2522 = vmatpush.msrb.mxu3 %v6344_v22 }
 0x8cc   :  { %2594 = vmatpush.msra.mxu0 %v6700_v23  ;;  %2614 = vmatpush.msra.mxu1 %v6323_v16 }
 0x8cd   :  { %2523 = vmatpush.msrb.mxu3 %v6354_v15 }
 0x8ce   :  { %2595 = vmatpush.msra.mxu0 %v6705_v33  ;;  %2615 = vmatpush.msra.mxu1 %v6331_v27 }
 0x8cf   :  { %2524 = vmatpush.msrb.mxu3 %v6359_v58 }
 0x8d0   :  { %2596 = vmatpush.msra.mxu0 %v6710_v35  ;;  %2616 = vmatpush.msra.mxu1 %v6340_v40 }
 0x8d1   :  { %2525 = vmatpush.msrb.mxu3 %v7847_v39 }
 0x8d2   :  { %2597 = vmatpush.msra.mxu0 %v6715_v52  ;;  %2617 = vmatpush.msra.mxu1 %v7849_v13 }
 0x8d3   :  { %2526 = vmatpush.msrb.mxu3 %v7850_v5 }
 0x8d4   :  { %2598 = vmatpush.msra.mxu0 %v6720_v57  ;;  %2618 = vmatpush.msra.mxu1 %v7864_v43 }
 0x931   :  { %v2284_v8 = vpop.f32.mrf.mxu0 }
 0x932   :  { %v2327_v2 = vadd.f32 %v2284_v8, %v1777_v0  ;;  %v2304_v38 = vpop.f32.mrf.mxu1 }
 0x933   :  { %v2347_v48 = vadd.f32 %v6498_v28, %v2304_v38 }
 0x934   :  { %v4309_v17 = vmul.f32 -1.442695, %v2327_v2 }
 0x936   :  { %4525 = vpow2.f32 %v4309_v17  ;;  %v6737_v17 = vld [vmem:[#allocation18 + $0x178] sm:$0xff] }
 0x937   :  { %v2264_v55 = vpop.f32.mrf.mxu3 }
 0x938   :  { %v2307_v61 = vadd.f32 %v2264_v55, %v1736_v46  ;;  %v4755_v46 = vld [vmem:[#allocation18 + $0x158] sm:$0xff]  ;;  %v6746_v55 = vld [vmem:[#allocation18 + $0x148] sm:$0xff] }
 0x93a   :  { %v4308_v1 = vmul.f32 -1.442695, %v2307_v61  ;;  %v4757_v61 = vld [vmem:[#allocation18 + $0x140] sm:$0xff] }
 0x93c   :  { %v4526_v16 = vpop.eup %4525  ;;  %4527 = vpow2.f32 %v4308_v1  ;;  %v6750_v1 = vld [vmem:[#allocation18 + $0x130] sm:$0xff] }
 0x93d   :  { %v2331_v21 = vadd.f32 1.0, %v4526_v16  ;;  %v6758_v16 = vld [vmem:[#allocation18 + $0x100] sm:$0xff] }
 0x93f   :  { %4529 = vrcp.f32 %v2331_v21  ;;  %v2343_v11 = vand.u32 2147483648, %v2331_v21  ;;  %vm2337_vm13 = vweird.f32 %v2331_v21  ;;  %v2341_v50 = vand.u32 2147483647, %v2331_v21 }
 0x941   :  { %v2344_v36 = vor.u32 1.1754944e-38, %v2343_v11  ;;  %vm2342_vm15 = vcmp.eq.f32.partialorder %v2341_v50, 8.507059e+37 }
 0x942   :  { %v4528_v27 = vpop.eup %4527 }
 0x943   :  { %v2311_v12 = vadd.f32 1.0, %v4528_v27  ;;  %v6766_v27 = vld [vmem:[#allocation18 + $0xd0] sm:$0xff] }
 0x945   :  { %4531 = vrcp.f32 %v2311_v12  ;;  %v4530_v40 = vpop.eup %4529  ;;  %v2323_v5 = vand.u32 2147483648, %v2311_v12  ;;  %v2321_v54 = vand.u32 2147483647, %v2311_v12  ;;  %vm2317_vm9 = vweird.f32 %v2311_v12 }
 0x946   :  { %v2333_v22 = vmul.f32 %v4530_v40, %v2331_v21  ;;  %vm2338_vm12 = vweird.f32 %v4530_v40  ;;  %v6762_v21 = vld [vmem:[#allocation18 + $0xe8] sm:$0xff] }
 0x947   :  { %v2324_v45 = vor.u32 1.1754944e-38, %v2323_v5  ;;  %vm2322_vm11 = vcmp.eq.f32.partialorder %v2321_v54, 8.507059e+37  ;;  %vm2339_vm14 = vmor %vm2337_vm13, %vm2338_vm12  ;;  %v6798_v5 = vld [vmem:[#allocation18 + $0x10] sm:$0xff]  ;;  %v7875_v54 = vld [vmem:[#allocation55_spill] sm:$0xff] }
 0x948   :  { %v2334_v39 = vsub.f32 1.0, %v2333_v22  ;;  %v6778_v22 = vld [vmem:[#allocation18 + $0x88] sm:$0xff] }
 0x94a   :  { %v2335_v49 = vmul.f32 %v4530_v40, %v2334_v39  ;;  %v6790_v39 = vld [vmem:[#allocation18 + $0x40] sm:$0xff] }
 0x94b   :  { %v4532_v15 = vpop.eup %4531 }
 0x94c   :  { %v2313_v58 = vmul.f32 %v4532_v15, %v2311_v12  ;;  %vm2318_vm8 = vweird.f32 %v4532_v15  ;;  %v2336_v60 = vadd.f32 %v4530_v40, %v2335_v49  ;;  %v6770_v12 = vld [vmem:[#allocation18 + $0xb8] sm:$0xff]  ;;  %v1739_v49 = vadd.f32 %v7875_v54, %v7871_v18 }
 0x94d   :  { %vm2319_vm10 = vmor %vm2317_vm9, %vm2318_vm8 }
 0x94e   :  { %v2314_v13 = vsub.f32 1.0, %v2313_v58  ;;  %v2340_v31 = vsel %vm2339_vm14, %v4530_v40, %v2336_v60  ;;  %v6774_v40 = vld [vmem:[#allocation18 + $0xa0] sm:$0xff]  ;;  %v6786_v58 = vld [vmem:[#allocation18 + $0x58] sm:$0xff] }
 0x94f   :  { %v2345_v53 = vsel %vm2342_vm15, %v2344_v36, %v2340_v31 }
 0x950   :  { %v2315_v43 = vmul.f32 %v4532_v15, %v2314_v13  ;;  %v2351_v29 = vsub.f32 1.0, %v2345_v53  ;;  %v2353_v8 = vmul.f32 %v2345_v53, %v6653_v4  ;;  %v6794_v13 = vld [vmem:[#allocation18 + $0x28] sm:$0xff] }
 0x952   :  { %v2316_v19 = vadd.f32 %v4532_v15, %v2315_v43 }
 0x954   :  { %v2320_v30 = vsel %vm2319_vm10, %v4532_v15, %v2316_v19  ;;  %v6782_v15 = vld [vmem:[#allocation18 + $0x70] sm:$0xff] }
 0x955   :  { %v2325_v7 = vsel %vm2322_vm11, %v2324_v45, %v2320_v30 }
 0x956   :  { %v2348_v9 = vmul.f32 %v2347_v48, %v2325_v7 }
 0x958   :  { %v2349_v37 = vadd.f32 %v2348_v9, %v1818_v42 }
 0x95a   :  { %4533 = vtanh.f32 %v2349_v37 }
 0x960   :  { %v4534_v62 = vpop.eup %4533 }
 0x961   :  { %v2352_v0 = vmul.f32 %v4534_v62, %v2351_v29 }
 0x963   :  { %v6732_v2 = vadd.f32 %v2353_v8, %v2352_v0 }
 0x965   :  { %2375 = vmatmul.f32.vlgmr.msra.gmra.mxu2 %v6732_v2  ;;  %2395 = vmatmul.f32.vlgmr.msra.gmra.mxu3 %v6732_v2 }
 0x966   :  { %2415 = vmatmul.f32.vlgmr.msrb.gmra.mxu0 %v6732_v2  ;;  %2623 = vmatpush.msra.mxu2 %v6737_v17 }
 0x967   :  { %2695 = vmatpush.msra.mxu3 %v6582_v26  ;;  %2715 = vmatpush.msrb.mxu0 %v6660_v63  ;;  %v4759_v26 = vld [vmem:[#allocation18 + $0x128] sm:$0xff]  ;;  %v6754_v63 = vld [vmem:[#allocation18 + $0x118] sm:$0xff] }
 0x968   :  { %2624 = vmatpush.msra.mxu2 %v6742_v25 }
 0x969   :  { %2696 = vmatpush.msra.mxu3 %v6587_v51  ;;  %2716 = vmatpush.msrb.mxu0 %v4755_v46  ;;  %v4761_v51 = vld [vmem:[#allocation18 + $0x110] sm:$0xff] }
 0x96a   :  { %2625 = vmatpush.msra.mxu2 %v6746_v55 }
 0x96b   :  { %2697 = vmatpush.msra.mxu3 %v6592_v47  ;;  %2717 = vmatpush.msrb.mxu0 %v4757_v61  ;;  %v4763_v47 = vld [vmem:[#allocation18 + $0xf8] sm:$0xff] }
 0x96c   :  { %2626 = vmatpush.msra.mxu2 %v6750_v1 }
 0x96d   :  { %2698 = vmatpush.msra.mxu3 %v6597_v41  ;;  %2718 = vmatpush.msrb.mxu0 %v4759_v26  ;;  %v4765_v41 = vld [vmem:[#allocation18 + $0xe0] sm:$0xff] }
 0x96e   :  { %2627 = vmatpush.msra.mxu2 %v6754_v63 }
 0x96f   :  { %2699 = vmatpush.msra.mxu3 %v6602_v14  ;;  %2719 = vmatpush.msrb.mxu0 %v4761_v51  ;;  %v4767_v14 = vld [vmem:[#allocation18 + $0xc8] sm:$0xff] }
 0x970   :  { %2628 = vmatpush.msra.mxu2 %v6758_v16 }
 0x971   :  { %2700 = vmatpush.msra.mxu3 %v6607_v20  ;;  %2720 = vmatpush.msrb.mxu0 %v4763_v47  ;;  %v4769_v20 = vld [vmem:[#allocation18 + $0xb0] sm:$0xff] }
 0x972   :  { %2629 = vmatpush.msra.mxu2 %v6762_v21 }
 0x973   :  { %2701 = vmatpush.msra.mxu3 %v6612_v3  ;;  %2721 = vmatpush.msrb.mxu0 %v4765_v41  ;;  %v4771_v3 = vld [vmem:[#allocation18 + $0x98] sm:$0xff]  ;;  %v7876_v41 = vld [vmem:[#allocation54_spill] sm:$0xff] }
 0x974   :  { %2630 = vmatpush.msra.mxu2 %v6766_v27 }
 0x975   :  { %2702 = vmatpush.msra.mxu3 %v6617_v44  ;;  %2722 = vmatpush.msrb.mxu0 %v4767_v14  ;;  %v4773_v44 = vld [vmem:[#allocation18 + $0x80] sm:$0xff]  ;;  %v1821_v14 = vadd.f32 %v7876_v41, %v6501_v32 }
 0x976   :  { %2631 = vmatpush.msra.mxu2 %v6770_v12 }
 0x977   :  { %2703 = vmatpush.msra.mxu3 %v6685_v59  ;;  %2723 = vmatpush.msrb.mxu0 %v4769_v20  ;;  %v4775_v59 = vld [vmem:[#allocation18 + $0x68] sm:$0xff] }
 0x978   :  { %2632 = vmatpush.msra.mxu2 %v6774_v40 }
 0x979   :  { %2704 = vmatpush.msra.mxu3 %v6690_v10  ;;  %2724 = vmatpush.msrb.mxu0 %v4771_v3  ;;  %v4777_v10 = vld [vmem:[#allocation18 + $0x50] sm:$0xff] }
 0x97a   :  { %2633 = vmatpush.msra.mxu2 %v6778_v22 }
 0x97b   :  { %2705 = vmatpush.msra.mxu3 %v6695_v6  ;;  %2725 = vmatpush.msrb.mxu0 %v4773_v44  ;;  %v4779_v6 = vld [vmem:[#allocation18 + $0x38] sm:$0xff] }
 0x97c   :  { %2634 = vmatpush.msra.mxu2 %v6782_v15 }
 0x97d   :  { %2706 = vmatpush.msra.mxu3 %v6700_v23  ;;  %2726 = vmatpush.msrb.mxu0 %v4775_v59  ;;  %v4781_v23 = vld [vmem:[#allocation18 + $0x20] sm:$0xff] }
 0x97e   :  { %2635 = vmatpush.msra.mxu2 %v6786_v58 }
 0x97f   :  { %2707 = vmatpush.msra.mxu3 %v6705_v33  ;;  %2727 = vmatpush.msrb.mxu0 %v4777_v10  ;;  %v4783_v33 = vld [vmem:[#allocation18 + $0x8] sm:$0xff] }
 0x980   :  { %2636 = vmatpush.msra.mxu2 %v6790_v39 }
 0x981   :  { %2708 = vmatpush.msra.mxu3 %v6710_v35  ;;  %2728 = vmatpush.msrb.mxu0 %v4779_v6  ;;  %v7874_v35 = vld [vmem:[#allocation57_spill] sm:$0xff] }
 0x982   :  { %2637 = vmatpush.msra.mxu2 %v6794_v13  ;;  %v1780_v43 = vadd.f32 %v7874_v35, %v7865_v34 }
 0x983   :  { %2709 = vmatpush.msra.mxu3 %v6715_v52  ;;  %2729 = vmatpush.msrb.mxu0 %v4781_v23 }
 0x984   :  { %2638 = vmatpush.msra.mxu2 %v6798_v5 }
 0x985   :  { %2710 = vmatpush.msra.mxu3 %v6720_v57  ;;  %2730 = vmatpush.msrb.mxu0 %v4783_v33 }
 0x9e3   :  { %v2416_v62 = vpop.f32.mrf.mxu0 }
 0x9e4   :  { %v2459_v61 = vadd.f32 %v6498_v28, %v2416_v62 }
 0x9e8   :  { %v2376_v38 = vpop.f32.mrf.mxu2  ;;  %v2396_v19 = vpop.f32.mrf.mxu3 }
 0x9e9   :  { %v2419_v45 = vadd.f32 %v2376_v38, %v1739_v49  ;;  %v2439_v52 = vadd.f32 %v2396_v19, %v1780_v43  ;;  %v2819_v38 = vld [vmem:[#allocation19 + $0x38] sm:$0xff] }
 0x9eb   :  { %v4310_v48 = vmul.f32 -1.442695, %v2419_v45  ;;  %v4311_v30 = vmul.f32 -1.442695, %v2439_v52  ;;  %v2818_v45 = vld [vmem:[#allocation19 + $0x30] sm:$0xff]  ;;  %v2817_v52 = vld [vmem:[#allocation19 + $0x28] sm:$0xff] }
 0x9ed   :  { %4535 = vpow2.f32 %v4310_v48 }
 0x9ee   :  { %4537 = vpow2.f32 %v4311_v30 }
 0x9f3   :  { %v4536_v60 = vpop.eup %4535 }
 0x9f4   :  { %v4538_v7 = vpop.eup %4537  ;;  %v2423_v24 = vadd.f32 1.0, %v4536_v60  ;;  %v2816_v60 = vld [vmem:[#allocation19 + $0x20] sm:$0xff] }
 0x9f5   :  { %v2443_v57 = vadd.f32 1.0, %v4538_v7  ;;  %v2815_v7 = vld [vmem:[#allocation19 + $0x18] sm:$0xff] }
 0x9f6   :  { %4539 = vrcp.f32 %v2423_v24  ;;  %v2435_v31 = vand.u32 2147483648, %v2423_v24  ;;  %v2433_v29 = vand.u32 2147483647, %v2423_v24  ;;  %vm2429_vm1 = vweird.f32 %v2423_v24 }
 0x9f7   :  { %4541 = vrcp.f32 %v2443_v57  ;;  %v2455_v3 = vand.u32 2147483648, %v2443_v57  ;;  %vm2449_vm5 = vweird.f32 %v2443_v57  ;;  %v2453_v44 = vand.u32 2147483647, %v2443_v57 }
 0x9f8   :  { %v2436_v46 = vor.u32 1.1754944e-38, %v2435_v31  ;;  %vm2434_vm3 = vcmp.eq.f32.partialorder %v2433_v29, 8.507059e+37 }
 0x9f9   :  { %v2456_v6 = vor.u32 1.1754944e-38, %v2455_v3  ;;  %vm2454_vm7 = vcmp.eq.f32.partialorder %v2453_v44, 8.507059e+37 }
 0x9fc   :  { %v4540_v42 = vpop.eup %4539 }
 0x9fd   :  { %v4542_v11 = vpop.eup %4541  ;;  %v2425_v9 = vmul.f32 %v4540_v42, %v2423_v24  ;;  %vm2430_vm0 = vweird.f32 %v4540_v42  ;;  %v2814_v24 = vld [vmem:[#allocation19 + $0x10] sm:$0xff] }
 0x9fe   :  { %v2445_v50 = vmul.f32 %v4542_v11, %v2443_v57  ;;  %vm2431_vm2 = vmor %vm2429_vm1, %vm2430_vm0  ;;  %vm2450_vm4 = vweird.f32 %v4542_v11 }
 0x9ff   :  { %v2426_v37 = vsub.f32 1.0, %v2425_v9  ;;  %vm2451_vm6 = vmor %vm2449_vm5, %vm2450_vm4 }
 0xa00   :  { %v2446_v36 = vsub.f32 1.0, %v2445_v50  ;;  %v2812_v50 = vld [vmem:[#allocation19] sm:$0xff] }
 0xa01   :  { %v2427_v53 = vmul.f32 %v4540_v42, %v2426_v37 }
 0xa02   :  { %v2447_v0 = vmul.f32 %v4542_v11, %v2446_v36 }
 0xa03   :  { %v2428_v8 = vadd.f32 %v4540_v42, %v2427_v53 }
 0xa04   :  { %v2448_v47 = vadd.f32 %v4542_v11, %v2447_v0 }
 0xa05   :  { %v2432_v26 = vsel %vm2431_vm2, %v4540_v42, %v2428_v8 }
 0xa06   :  { %v2437_v51 = vsel %vm2434_vm3, %v2436_v46, %v2432_v26  ;;  %v2452_v10 = vsel %vm2451_vm6, %v4542_v11, %v2448_v47  ;;  %v2813_v11 = vld [vmem:[#allocation19 + $0x8] sm:$0xff]  ;;  %v6838_v47 = vld [vmem:[%s7672_s10] ss:$0 sm:$0xff] }
 0xa07   :  { %v2460_v20 = vmul.f32 %v2459_v61, %v2437_v51  ;;  %v2457_v23 = vsel %vm2454_vm7, %v2456_v6, %v2452_v10 }
 0xa08   :  { %v2463_v28 = vsub.f32 1.0, %v2457_v23  ;;  %v2465_v43 = vmul.f32 %v2457_v23, %v6732_v2 }
 0xa09   :  { %v2461_v59 = vadd.f32 %v2460_v20, %v1821_v14  ;;  %v7879_v14 = vld [vmem:[#allocation61_spill] sm:$0xff] }
 0xa0a   :  { %v1824_v20 = vadd.f32 %v7879_v14, %v6501_v32  ;;  %v6864_v14 = vld [vmem:[%s7674_s12] ss:$0 sm:$0xff] }
 0xa0b   :  { %4543 = vtanh.f32 %v2461_v59 }
 0xa11   :  { %v4544_v33 = vpop.eup %4543 }
 0xa12   :  { %v2464_v35 = vmul.f32 %v4544_v33, %v2463_v28 }
 0xa14   :  { %v6810_v54 = vadd.f32 %v2465_v43, %v2464_v35 }
 0xa16   :  { %2487 = vmatmul.f32.vlgmr.msrb.gmra.mxu1 %v6810_v54  ;;  %2507 = vmatmul.f32.vlgmr.msrb.gmra.mxu2 %v6810_v54 }
 0xa17   :  { %2527 = vmatmul.f32.vlgmr.msrb.gmra.mxu3 %v6810_v54  ;;  %2735 = vmatpush.msrb.mxu1 %v6737_v17  ;;  %v2827_v17 = vld [vmem:[#allocation19 + $0x78] sm:$0xff] }
 0xa18   :  { %2832 = vmatpush.msrb.mxu2 %v2827_v17 }
 0xa19   :  { %2736 = vmatpush.msrb.mxu1 %v6742_v25  ;;  %v2826_v25 = vld [vmem:[#allocation19 + $0x70] sm:$0xff] }
 0xa1a   :  { %2833 = vmatpush.msrb.mxu2 %v2826_v25 }
 0xa1b   :  { %2737 = vmatpush.msrb.mxu1 %v6746_v55  ;;  %v2825_v55 = vld [vmem:[#allocation19 + $0x68] sm:$0xff] }
 0xa1c   :  { %2834 = vmatpush.msrb.mxu2 %v2825_v55 }
 0xa1d   :  { %2738 = vmatpush.msrb.mxu1 %v6750_v1  ;;  %v2824_v1 = vld [vmem:[#allocation19 + $0x60] sm:$0xff] }
 0xa1e   :  { %2835 = vmatpush.msrb.mxu2 %v2824_v1 }
 0xa1f   :  { %2739 = vmatpush.msrb.mxu1 %v6754_v63  ;;  %v7877_v63 = vld [vmem:[#allocation62_spill] sm:$0xff] }
 0xa21   :  { %2740 = vmatpush.msrb.mxu1 %v6758_v16  ;;  %v1742_v16 = vadd.f32 %v7877_v63, %v7871_v18 }
 0xa23   :  { %2741 = vmatpush.msrb.mxu1 %v6762_v21 }
 0xa25   :  { %2742 = vmatpush.msrb.mxu1 %v6766_v27  ;;  %v2823_v27 = vld [vmem:[#allocation19 + $0x58] sm:$0xff] }
 0xa26   :  { %2836 = vmatpush.msrb.mxu2 %v2823_v27  ;;  %v3071_v27 = vld [vmem:[#allocation21 + $0x170] sm:$0xff] }
 0xa27   :  { %2743 = vmatpush.msrb.mxu1 %v6770_v12 }
 0xa29   :  { %2744 = vmatpush.msrb.mxu1 %v6774_v40  ;;  %v2822_v40 = vld [vmem:[#allocation19 + $0x50] sm:$0xff] }
 0xa2a   :  { %2837 = vmatpush.msrb.mxu2 %v2822_v40  ;;  %v3067_v40 = vld [vmem:[#allocation21 + $0x150] sm:$0xff] }
 0xa2b   :  { %2745 = vmatpush.msrb.mxu1 %v6778_v22 }
 0xa2d   :  { %2746 = vmatpush.msrb.mxu1 %v6782_v15  ;;  %v2821_v15 = vld [vmem:[#allocation19 + $0x48] sm:$0xff] }
 0xa2e   :  { %2838 = vmatpush.msrb.mxu2 %v2821_v15  ;;  %v3069_v15 = vld [vmem:[#allocation21 + $0x160] sm:$0xff] }
 0xa2f   :  { %2747 = vmatpush.msrb.mxu1 %v6786_v58  ;;  %v7878_v58 = vld [vmem:[#allocation50_spill] sm:$0xff] }
 0xa31   :  { %2748 = vmatpush.msrb.mxu1 %v6790_v39  ;;  %v1783_v39 = vadd.f32 %v7878_v58, %v7865_v34  ;;  %v3066_v58 = vld [vmem:[#allocation21 + $0x148] sm:$0xff] }
 0xa33   :  { %2749 = vmatpush.msrb.mxu1 %v6794_v13 }
 0xa35   :  { %2750 = vmatpush.msrb.mxu1 %v6798_v5  ;;  %v2820_v5 = vld [vmem:[#allocation19 + $0x40] sm:$0xff] }
 0xa36   :  { %2839 = vmatpush.msrb.mxu2 %v2820_v5 }
 0xa38   :  { %2840 = vmatpush.msrb.mxu2 %v2819_v38 }
 0xa3a   :  { %2841 = vmatpush.msrb.mxu2 %v2818_v45 }
 0xa3c   :  { %2842 = vmatpush.msrb.mxu2 %v2817_v52  ;;  %v3058_v52 = vld [vmem:[#allocation21 + $0x108] sm:$0xff] }
 0xa3e   :  { %2843 = vmatpush.msrb.mxu2 %v2816_v60 }
 0xa40   :  { %2844 = vmatpush.msrb.mxu2 %v2815_v7 }
 0xa42   :  { %2845 = vmatpush.msrb.mxu2 %v2814_v24  ;;  %v3055_v24 = vld [vmem:[#allocation21 + $0xf0] sm:$0xff] }
 0xa44   :  { %2846 = vmatpush.msrb.mxu2 %v2813_v11 }
 0xa46   :  { %2847 = vmatpush.msrb.mxu2 %v2812_v50  ;;  %v3052_v50 = vld [vmem:[#allocation21 + $0xd8] sm:$0xff] }
 0xa93   :  { %v2488_v21 = vpop.f32.mrf.mxu1 }
 0xa94   :  { %v2531_v12 = vadd.f32 %v2488_v21, %v1742_v16  ;;  %v7880_v16 = vld [vmem:[#allocation53_spill] sm:$0xff]  ;;  %v3070_v21 = vld [vmem:[#allocation21 + $0x168] sm:$0xff] }
 0xa95   :  { %3081 = vmatpush.msrb.mxu3 %v3070_v21  ;;  %v3032_v21 = vld [vmem:[#allocation21 + $0x38] sm:$0xff] }
 0xa96   :  { %v4312_v22 = vmul.f32 -1.442695, %v2531_v12  ;;  %v3072_v12 = vld [vmem:[#allocation21 + $0x178] sm:$0xff] }
 0xa97   :  { %3082 = vmatpush.msrb.mxu3 %v3067_v40  ;;  %v3028_v40 = vld [vmem:[#allocation21 + $0x18] sm:$0xff] }
 0xa98   :  { %4545 = vpow2.f32 %v4312_v22  ;;  %v3068_v22 = vld [vmem:[#allocation21 + $0x158] sm:$0xff] }
 0xa99   :  { %v2508_v13 = vpop.f32.mrf.mxu2 }
 0xa9a   :  { %v2551_v49 = vadd.f32 %v2508_v13, %v1783_v39  ;;  %v2528_v0 = vpop.f32.mrf.mxu3  ;;  %v3063_v39 = vld [vmem:[#allocation21 + $0x130] sm:$0xff] }
 0xa9b   :  { %v2571_v41 = vadd.f32 %v6838_v47, %v2528_v0  ;;  %v7881_v13 = vld [vmem:[#allocation52_spill] sm:$0xff]  ;;  %v3046_v0 = vld [vmem:[#allocation21 + $0xa8] sm:$0xff] }
 0xa9c   :  { %v4313_v19 = vmul.f32 -1.442695, %v2551_v49  ;;  %v1786_v5 = vadd.f32 %v7881_v13, %v7865_v34  ;;  %v7882_v49 = vld [vmem:[#allocation58_spill] sm:$0xff] }
 0xa9d   :  { %v1745_v38 = vadd.f32 %v7882_v49, %v7871_v18 }
 0xa9e   :  { %v4546_v48 = vpop.eup %4545  ;;  %4547 = vpow2.f32 %v4313_v19 }
 0xa9f   :  { %v2535_v30 = vadd.f32 1.0, %v4546_v48  ;;  %v3059_v48 = vld [vmem:[#allocation21 + $0x110] sm:$0xff] }
 0xaa1   :  { %4549 = vrcp.f32 %v2535_v30  ;;  %v2547_v36 = vand.u32 2147483648, %v2535_v30  ;;  %v2545_v29 = vand.u32 2147483647, %v2535_v30  ;;  %vm2541_vm9 = vweird.f32 %v2535_v30 }
 0xaa3   :  { %v2548_v61 = vor.u32 1.1754944e-38, %v2547_v36  ;;  %vm2546_vm11 = vcmp.eq.f32.partialorder %v2545_v29, 8.507059e+37  ;;  %v3049_v36 = vld [vmem:[#allocation21 + $0xc0] sm:$0xff]  ;;  %v3051_v29 = vld [vmem:[#allocation21 + $0xd0] sm:$0xff] }
 0xaa4   :  { %v4548_v57 = vpop.eup %4547 }
 0xaa5   :  { %v2555_v42 = vadd.f32 1.0, %v4548_v57  ;;  %v3056_v57 = vld [vmem:[#allocation21 + $0xf8] sm:$0xff] }
 0xaa7   :  { %v4550_v9 = vpop.eup %4549  ;;  %4551 = vrcp.f32 %v2555_v42  ;;  %v2567_v59 = vand.u32 2147483648, %v2555_v42  ;;  %v2565_v6 = vand.u32 2147483647, %v2555_v42  ;;  %vm2561_vm13 = vweird.f32 %v2555_v42 }
 0xaa8   :  { %v2537_v37 = vmul.f32 %v4550_v9, %v2535_v30  ;;  %vm2542_vm8 = vweird.f32 %v4550_v9  ;;  %v3060_v30 = vld [vmem:[#allocation21 + $0x118] sm:$0xff] }
 0xaa9   :  { %vm2543_vm10 = vmor %vm2541_vm9, %vm2542_vm8  ;;  %v2568_v33 = vor.u32 1.1754944e-38, %v2567_v59  ;;  %vm2566_vm15 = vcmp.eq.f32.partialorder %v2565_v6, 8.507059e+37  ;;  %v3041_v59 = vld [vmem:[#allocation21 + $0x80] sm:$0xff] }
 0xaaa   :  { %v2538_v31 = vsub.f32 1.0, %v2537_v37  ;;  %v3053_v37 = vld [vmem:[#allocation21 + $0xe0] sm:$0xff] }
 0xaac   :  { %v2539_v53 = vmul.f32 %v4550_v9, %v2538_v31  ;;  %v3054_v31 = vld [vmem:[#allocation21 + $0xe8] sm:$0xff] }
 0xaad   :  { %v4552_v62 = vpop.eup %4551 }
 0xaae   :  { %v2557_v8 = vmul.f32 %v4552_v62, %v2555_v42  ;;  %v2540_v46 = vadd.f32 %v4550_v9, %v2539_v53  ;;  %vm2562_vm12 = vweird.f32 %v4552_v62  ;;  %v3057_v42 = vld [vmem:[#allocation21 + $0x100] sm:$0xff]  ;;  %v3050_v53 = vld [vmem:[#allocation21 + $0xc8] sm:$0xff] }
 0xaaf   :  { %vm2563_vm14 = vmor %vm2561_vm13, %vm2562_vm12 }
 0xab0   :  { %v2558_v26 = vsub.f32 1.0, %v2557_v8  ;;  %v2544_v51 = vsel %vm2543_vm10, %v4550_v9, %v2540_v46  ;;  %v3047_v8 = vld [vmem:[#allocation21 + $0xb0] sm:$0xff]  ;;  %v3048_v46 = vld [vmem:[#allocation21 + $0xb8] sm:$0xff] }
 0xab1   :  { %v2549_v3 = vsel %vm2546_vm11, %v2548_v61, %v2544_v51  ;;  %v3043_v61 = vld [vmem:[#allocation21 + $0x90] sm:$0xff]  ;;  %v3045_v51 = vld [vmem:[#allocation21 + $0xa0] sm:$0xff] }
 0xab2   :  { %v2559_v44 = vmul.f32 %v4552_v62, %v2558_v26  ;;  %v2572_v10 = vmul.f32 %v2571_v41, %v2549_v3  ;;  %v3044_v26 = vld [vmem:[#allocation21 + $0x98] sm:$0xff] }
 0xab4   :  { %v2560_v23 = vadd.f32 %v4552_v62, %v2559_v44  ;;  %v2573_v28 = vadd.f32 %v2572_v10, %v1824_v20  ;;  %v3040_v44 = vld [vmem:[#allocation21 + $0x78] sm:$0xff]  ;;  %v3042_v10 = vld [vmem:[#allocation21 + $0x88] sm:$0xff] }
 0xab6   :  { %v2564_v35 = vsel %vm2563_vm14, %v4552_v62, %v2560_v23  ;;  %4553 = vtanh.f32 %v2573_v28  ;;  %v3037_v23 = vld [vmem:[#allocation21 + $0x60] sm:$0xff]  ;;  %v3038_v28 = vld [vmem:[#allocation21 + $0x68] sm:$0xff] }
 0xab7   :  { %v2569_v43 = vsel %vm2566_vm15, %v2568_v33, %v2564_v35  ;;  %v3039_v33 = vld [vmem:[#allocation21 + $0x70] sm:$0xff] }
 0xab8   :  { %v2575_v17 = vsub.f32 1.0, %v2569_v43  ;;  %v2577_v1 = vmul.f32 %v2569_v43, %v6810_v54 }
 0xabc   :  { %v4554_v25 = vpop.eup %4553 }
 0xabd   :  { %v2576_v55 = vmul.f32 %v4554_v25, %v2575_v17  ;;  %v3034_v17 = vld [vmem:[#allocation21 + $0x48] sm:$0xff]  ;;  %v3035_v25 = vld [vmem:[#allocation21 + $0x50] sm:$0xff] }
 0xabf   :  { %v6844_v63 = vadd.f32 %v2577_v1, %v2576_v55  ;;  %v3036_v55 = vld [vmem:[#allocation21 + $0x58] sm:$0xff] }
 0xac1   :  { %2599 = vmatmul.f32.vlgmr.msra.gmra.mxu0 %v6844_v63  ;;  %2619 = vmatmul.f32.vlgmr.msra.gmra.mxu1 %v6844_v63 }
 0xac2   :  { %2639 = vmatmul.f32.vlgmr.msra.gmra.mxu2 %v6844_v63  ;;  %3122 = vmatpush.msra.mxu0 %v3071_v27  ;;  %v3033_v27 = vld [vmem:[#allocation21 + $0x40] sm:$0xff] }
 0xac3   :  { %3163 = vmatpush.msra.mxu1 %v3072_v12 }
 0xac4   :  { %3123 = vmatpush.msra.mxu0 %v3068_v22  ;;  %v3029_v22 = vld [vmem:[#allocation21 + $0x20] sm:$0xff] }
 0xac5   :  { %3164 = vmatpush.msra.mxu1 %v3069_v15  ;;  %v3030_v15 = vld [vmem:[#allocation21 + $0x28] sm:$0xff] }
 0xac7   :  { %3165 = vmatpush.msra.mxu1 %v3066_v58 }
 0xac9   :  { %3166 = vmatpush.msra.mxu1 %v3063_v39 }
 0xaca   :  { %2848 = vmatmul.f32.vlgmr.msrb.gmra.mxu2 %v7880_v16  ;;  %v3031_v16 = vld [vmem:[#allocation21 + $0x30] sm:$0xff] }
 0xacb   :  { %3167 = vmatpush.msra.mxu1 %v3060_v30 }
 0xacd   :  { %3168 = vmatpush.msra.mxu1 %v3057_v42 }
 0xacf   :  { %3169 = vmatpush.msra.mxu1 %v3054_v31 }
 0xad1   :  { %3170 = vmatpush.msra.mxu1 %v3051_v29 }
 0xad2   :  { %2851 = vmatmul.f32.gmra.mxu2 %v6576_v56  ;;  %v3064_v56 = vld [vmem:[#allocation21 + $0x138] sm:$0xff] }
 0xad3   :  { %3083 = vmatpush.msrb.mxu3 %v3064_v56  ;;  %3171 = vmatpush.msra.mxu1 %v3048_v46 }
 0xad5   :  { %3172 = vmatpush.msra.mxu1 %v3045_v51 }
 0xad7   :  { %3173 = vmatpush.msra.mxu1 %v3042_v10 }
 0xad9   :  { %3174 = vmatpush.msra.mxu1 %v3039_v33 }
 0xada   :  { %2854 = vmatmul.f32.gmra.mxu2 %v6653_v4  ;;  %v3065_v4 = vld [vmem:[#allocation21 + $0x140] sm:$0xff] }
 0xadb   :  { %3124 = vmatpush.msra.mxu0 %v3065_v4  ;;  %3175 = vmatpush.msra.mxu1 %v3036_v55 }
 0xadd   :  { %3176 = vmatpush.msra.mxu1 %v3033_v27 }
 0xadf   :  { %3177 = vmatpush.msra.mxu1 %v3030_v15 }
 0xae2   :  { %2857 = vmatmul.f32.gmra.mxu2 %v6732_v2  ;;  %v3061_v2 = vld [vmem:[#allocation21 + $0x120] sm:$0xff] }
 0xae3   :  { %3084 = vmatpush.msrb.mxu3 %v3061_v2  ;;  %v3025_v2 = vld [vmem:[#allocation21] sm:$0xff] }
 0xae5   :  { %3085 = vmatpush.msrb.mxu3 %v3058_v52 }
 0xae7   :  { %3086 = vmatpush.msrb.mxu3 %v3055_v24 }
 0xae9   :  { %3087 = vmatpush.msrb.mxu3 %v3052_v50 }
 0xaea   :  { %2860 = vmatmul.f32.gmra.mxu2 %v6810_v54  ;;  %v3062_v54 = vld [vmem:[#allocation21 + $0x128] sm:$0xff] }
 0xaeb   :  { %3125 = vmatpush.msra.mxu0 %v3062_v54  ;;  %3088 = vmatpush.msrb.mxu3 %v3049_v36  ;;  %v3026_v54 = vld [vmem:[#allocation21 + $0x8] sm:$0xff] }
 0xaed   :  { %3126 = vmatpush.msra.mxu0 %v3059_v48  ;;  %3089 = vmatpush.msrb.mxu3 %v3046_v0 }
 0xaef   :  { %3127 = vmatpush.msra.mxu0 %v3056_v57  ;;  %3090 = vmatpush.msrb.mxu3 %v3043_v61 }
 0xaf1   :  { %3128 = vmatpush.msra.mxu0 %v3053_v37  ;;  %3091 = vmatpush.msrb.mxu3 %v3040_v44  ;;  %v7883_v37 = vld [vmem:[#allocation48_spill] sm:$0xff] }
 0xaf2   :  { %2863 = vmatmul.f32.gmra.mxu2 %v6844_v63  ;;  %v1827_v31 = vadd.f32 %v7883_v37, %v6501_v32 }
 0xaf3   :  { %3129 = vmatpush.msra.mxu0 %v3050_v53  ;;  %3092 = vmatpush.msrb.mxu3 %v3037_v23 }
 0xaf5   :  { %3130 = vmatpush.msra.mxu0 %v3047_v8  ;;  %3093 = vmatpush.msrb.mxu3 %v3034_v17 }
 0xaf7   :  { %3131 = vmatpush.msra.mxu0 %v3044_v26  ;;  %3094 = vmatpush.msrb.mxu3 %v3031_v16 }
 0xaf9   :  { %3132 = vmatpush.msra.mxu0 %v3041_v59  ;;  %3095 = vmatpush.msrb.mxu3 %v3028_v40 }
 0xafb   :  { %3133 = vmatpush.msra.mxu0 %v3038_v28  ;;  %3096 = vmatpush.msrb.mxu3 %v3025_v2 }
 0xafd   :  { %3134 = vmatpush.msra.mxu0 %v3035_v25 }
 0xaff   :  { %3135 = vmatpush.msra.mxu0 %v3032_v21 }
 0xb01   :  { %3136 = vmatpush.msra.mxu0 %v3029_v22 }
 0xb03   :  { %3137 = vmatpush.msra.mxu0 %v3026_v54 }
 0xb3e   :  { %v2600_v19 = vpop.f32.mrf.mxu0  ;;  %v2620_v45 = vpop.f32.mrf.mxu1 }
 0xb3f   :  { %v2643_v60 = vadd.f32 %v2600_v19, %v1745_v38  ;;  %v2663_v7 = vadd.f32 %v2620_v45, %v1786_v5  ;;  %v3027_v5 = vld [vmem:[#allocation21 + $0x10] sm:$0xff] }
 0xb40   :  { %3178 = vmatpush.msra.mxu1 %v3027_v5 }
 0xb41   :  { %v4314_v11 = vmul.f32 -1.442695, %v2643_v60  ;;  %v4315_v9 = vmul.f32 -1.442695, %v2663_v7 }
 0xb43   :  { %4555 = vpow2.f32 %v4314_v11 }
 0xb44   :  { %4557 = vpow2.f32 %v4315_v9 }
 0xb45   :  { %v6859_v62 = vpop.f32.mrf.mxu2 }
 0xb46   :  { %v2683_v11 = vadd.f32 %v6838_v47, %v6859_v62 }
 0xb49   :  { %v4556_v41 = vpop.eup %4555 }
 0xb4a   :  { %v4558_v20 = vpop.eup %4557  ;;  %v6866_v3 = vadd.f32 1.0, %v4556_v41 }
 0xb4b   :  { %v6868_v6 = vadd.f32 1.0, %v4558_v20 }
 0xb4c   :  { %4559 = vrcp.f32 %v6866_v3  ;;  %v2659_v38 = vand.u32 2147483648, %v6866_v3  ;;  %v2657_v52 = vand.u32 2147483647, %v6866_v3  ;;  %vm2653_vm1 = vweird.f32 %v6866_v3 }
 0xb4d   :  { %4561 = vrcp.f32 %v6868_v6  ;;  %v2849_v35 = vpop.f32.mrf.mxu2  ;;  %v2679_v36 = vand.u32 2147483648, %v6868_v6  ;;  %vm2673_vm5 = vweird.f32 %v6868_v6  ;;  %v2677_v0 = vand.u32 2147483647, %v6868_v6 }
 0xb4e   :  { %v2850_v43 = vadd.f32 %v6864_v14, %v2849_v35  ;;  %v2660_v57 = vor.u32 1.1754944e-38, %v2659_v38  ;;  %vm2658_vm3 = vcmp.eq.f32.partialorder %v2657_v52, 8.507059e+37 }
 0xb4f   :  { %v2680_v41 = vor.u32 1.1754944e-38, %v2679_v36  ;;  %vm2678_vm7 = vcmp.eq.f32.partialorder %v2677_v0, 8.507059e+37 }
 0xb50   :  { %v4318_v1 = vmul.f32 -1.442695, %v2850_v43 }
 0xb52   :  { %v4560_v12 = vpop.eup %4559  ;;  %4563 = vpow2.f32 %v4318_v1 }
 0xb53   :  { %v4562_v56 = vpop.eup %4561  ;;  %v2649_v4 = vmul.f32 %v4560_v12, %v6866_v3  ;;  %vm2654_vm0 = vweird.f32 %v4560_v12 }
 0xb54   :  { %v2669_v58 = vmul.f32 %v4562_v56, %v6868_v6  ;;  %vm2655_vm2 = vmor %vm2653_vm1, %vm2654_vm0  ;;  %vm2674_vm4 = vweird.f32 %v4562_v56 }
 0xb55   :  { %v2650_v39 = vsub.f32 1.0, %v2649_v4  ;;  %v2852_v13 = vpop.f32.mrf.mxu2  ;;  %vm2675_vm6 = vmor %vm2673_vm5, %vm2674_vm4 }
 0xb56   :  { %v2670_v49 = vsub.f32 1.0, %v2669_v58  ;;  %v2853_v19 = vadd.f32 %v6864_v14, %v2852_v13 }
 0xb57   :  { %v2651_v45 = vmul.f32 %v4560_v12, %v2650_v39 }
 0xb58   :  { %v4564_v48 = vpop.eup %4563  ;;  %v2671_v30 = vmul.f32 %v4562_v56, %v2670_v49  ;;  %v4319_v60 = vmul.f32 -1.442695, %v2853_v19 }
 0xb59   :  { %v2652_v7 = vadd.f32 %v4560_v12, %v2651_v45  ;;  %v6879_v24 = vadd.f32 1.0, %v4564_v48 }
 0xb5a   :  { %4565 = vpow2.f32 %v4319_v60  ;;  %v2672_v9 = vadd.f32 %v4562_v56, %v2671_v30 }
 0xb5b   :  { %v2656_v42 = vsel %vm2655_vm2, %v4560_v12, %v2652_v7  ;;  %4567 = vrcp.f32 %v6879_v24  ;;  %v2916_v40 = vand.u32 2147483648, %v6879_v24  ;;  %vm2910_vm9 = vweird.f32 %v6879_v24 }
 0xb5c   :  { %v2661_v50 = vsel %vm2658_vm3, %v2660_v57, %v2656_v42  ;;  %v2676_v61 = vsel %vm2675_vm6, %v4562_v56, %v2672_v9  ;;  %v2914_v15 = vand.u32 2147483647, %v6879_v24 }
 0xb5d   :  { %v2684_v53 = vmul.f32 %v2683_v11, %v2661_v50  ;;  %v2855_v29 = vpop.f32.mrf.mxu2  ;;  %v2681_v44 = vsel %vm2678_vm7, %v2680_v41, %v2676_v61  ;;  %v2917_v13 = vor.u32 1.1754944e-38, %v2916_v40 }
 0xb5e   :  { %v2856_v8 = vadd.f32 %v6864_v14, %v2855_v29  ;;  %v2687_v6 = vsub.f32 1.0, %v2681_v44  ;;  %v2689_v17 = vmul.f32 %v2681_v44, %v6844_v63  ;;  %vm2915_vm11 = vcmp.eq.f32.partialorder %v2914_v15, 8.507059e+37 }
 0xb5f   :  { %v2685_v62 = vadd.f32 %v2684_v53, %v1827_v31 }
 0xb60   :  { %v4566_v46 = vpop.eup %4565  ;;  %v4320_v26 = vmul.f32 -1.442695, %v2856_v8 }
 0xb61   :  { %v4568_v51 = vpop.eup %4567  ;;  %4569 = vtanh.f32 %v2685_v62  ;;  %v6890_v20 = vadd.f32 1.0, %v4566_v46 }
 0xb62   :  { %v2906_v3 = vmul.f32 %v4568_v51, %v6879_v24  ;;  %4571 = vpow2.f32 %v4320_v26  ;;  %vm2911_vm8 = vweird.f32 %v4568_v51 }
 0xb63   :  { %4573 = vrcp.f32 %v6890_v20  ;;  %vm2912_vm10 = vmor %vm2910_vm9, %vm2911_vm8  ;;  %v2931_v52 = vand.u32 2147483648, %v6890_v20  ;;  %vm2925_vm13 = vweird.f32 %v6890_v20  ;;  %v2929_v30 = vand.u32 2147483647, %v6890_v20 }
 0xb64   :  { %v2907_v59 = vsub.f32 1.0, %v2906_v3 }
 0xb65   :  { %v2858_v10 = vpop.f32.mrf.mxu2  ;;  %v2932_v9 = vor.u32 1.1754944e-38, %v2931_v52  ;;  %vm2930_vm15 = vcmp.eq.f32.partialorder %v2929_v30, 8.507059e+37 }
 0xb66   :  { %v2859_v23 = vadd.f32 %v6864_v14, %v2858_v10  ;;  %v2908_v25 = vmul.f32 %v4568_v51, %v2907_v59 }
 0xb67   :  { %v4570_v28 = vpop.eup %4569 }
 0xb68   :  { %v4572_v33 = vpop.eup %4571  ;;  %v2688_v35 = vmul.f32 %v4570_v28, %v2687_v6  ;;  %v4321_v43 = vmul.f32 -1.442695, %v2859_v23  ;;  %v2909_v27 = vadd.f32 %v4568_v51, %v2908_v25 }
 0xb69   :  { %v4574_v55 = vpop.eup %4573  ;;  %v6896_v1 = vadd.f32 1.0, %v4572_v33 }
 0xb6a   :  { %4575 = vpow2.f32 %v4321_v43  ;;  %v6898_v16 = vadd.f32 %v2689_v17, %v2688_v35  ;;  %v2921_v21 = vmul.f32 %v4574_v55, %v6890_v20  ;;  %v2913_v58 = vsel %vm2912_vm10, %v4568_v51, %v2909_v27 }
 0xb6b   :  { %4577 = vrcp.f32 %v6896_v1  ;;  %v2918_v49 = vsel %vm2915_vm11, %v2917_v13, %v2913_v58  ;;  %vm2926_vm12 = vweird.f32 %v4574_v55  ;;  %v2946_v53 = vand.u32 2147483648, %v6896_v1  ;;  %v6925_v58 = vld [vmem:[#allocation22 + $0x168] sm:$0xff]  ;;  %v6931_v13 = vld [vmem:[#allocation22 + $0x150] sm:$0xff] }
 0xb6c   :  { %2711 = vmatmul.f32.vlgmr.msra.gmra.mxu3 %v6898_v16  ;;  %2731 = vmatmul.f32.vlgmr.msrb.gmra.mxu0 %v6898_v16  ;;  %v2922_v12 = vsub.f32 1.0, %v2921_v21  ;;  %vm2927_vm14 = vmor %vm2925_vm13, %vm2926_vm12  ;;  %vm2940_vm1 = vweird.f32 %v6896_v1  ;;  %v2944_v29 = vand.u32 2147483647, %v6896_v1 }
 0xb6d   :  { %2751 = vmatmul.f32.vlgmr.msrb.gmra.mxu1 %v6898_v16  ;;  %v2861_v63 = vpop.f32.mrf.mxu2  ;;  %2866 = vmatmul.f32.gmra.mxu2 %v6898_v16  ;;  %v2947_v26 = vor.u32 1.1754944e-38, %v2946_v53 }
 0xb6e   :  { %v2862_v22 = vadd.f32 %v6864_v14, %v2861_v63  ;;  %v2923_v2 = vmul.f32 %v4574_v55, %v2922_v12  ;;  %vm2945_vm3 = vcmp.eq.f32.partialorder %v2944_v29, 8.507059e+37  ;;  %3283 = vmatpush.msra.mxu2 %v6925_v58  ;;  %3395 = vmatpush.msrb.mxu1 %v6925_v58 }
 0xb70   :  { %v4576_v56 = vpop.eup %4575  ;;  %v4322_v4 = vmul.f32 -1.442695, %v2862_v22  ;;  %v2924_v38 = vadd.f32 %v4574_v55, %v2923_v2  ;;  %v7884_v2 = vld [vmem:[#allocation44_spill] sm:$0xff]  ;;  %3284 = vmatpush.msra.mxu2 %v6931_v13  ;;  %3396 = vmatpush.msrb.mxu1 %v6931_v13 }
 0xb71   :  { %v4578_v54 = vpop.eup %4577  ;;  %v6910_v39 = vadd.f32 1.0, %v4576_v56 }
 0xb72   :  { %4579 = vpow2.f32 %v4322_v4  ;;  %v2936_v5 = vmul.f32 %v4578_v54, %v6896_v1  ;;  %v2928_v24 = vsel %vm2927_vm14, %v4574_v55, %v2924_v38  ;;  %vm2941_vm0 = vweird.f32 %v4578_v54  ;;  %v6937_v38 = vld [vmem:[#allocation22 + $0x120] sm:$0xff] }
 0xb73   :  { %4581 = vrcp.f32 %v6910_v39  ;;  %v2933_v37 = vsel %vm2930_vm15, %v2932_v9, %v2928_v24  ;;  %vm2942_vm2 = vmor %vm2940_vm1, %vm2941_vm0  ;;  %v2961_v44 = vand.u32 2147483648, %v6910_v39  ;;  %vm2955_vm5 = vweird.f32 %v6910_v39 }
 0xb74   :  { %3097 = vmatmul.f32.vlgmr.msrb.gmra.mxu3 %v2918_v49  ;;  %3138 = vmatmul.f32.vlgmr.msra.gmra.mxu0 %v2918_v49  ;;  %v2937_v19 = vsub.f32 1.0, %v2936_v5  ;;  %v2959_v59 = vand.u32 2147483647, %v6910_v39 }
 0xb75   :  { %v2864_v45 = vpop.f32.mrf.mxu2  ;;  %3179 = vmatmul.f32.vlgmr.msra.gmra.mxu1 %v2918_v49  ;;  %v2962_v28 = vor.u32 1.1754944e-38, %v2961_v44  ;;  %v6935_v49 = vld [vmem:[#allocation22 + $0x138] sm:$0xff] }
 0xb76   :  { %v2865_v48 = vadd.f32 %v6864_v14, %v2864_v45  ;;  %v2938_v57 = vmul.f32 %v4578_v54, %v2937_v19  ;;  %vm2960_vm7 = vcmp.eq.f32.partialorder %v2959_v59, 8.507059e+37  ;;  %3285 = vmatpush.msra.mxu2 %v6935_v49  ;;  %3397 = vmatpush.msrb.mxu1 %v6935_v49 }
 0xb78   :  { %v4580_v60 = vpop.eup %4579  ;;  %v4323_v7 = vmul.f32 -1.442695, %v2865_v48  ;;  %v2939_v31 = vadd.f32 %v4578_v54, %v2938_v57  ;;  %3286 = vmatpush.msra.mxu2 %v6937_v38  ;;  %3398 = vmatpush.msrb.mxu1 %v6937_v38  ;;  %v6945_v48 = vld [vmem:[#allocation22 + $0x108] sm:$0xff] }
 0xb79   :  { %v4582_v42 = vpop.eup %4581  ;;  %v2901_v11 = vadd.f32 1.0, %v4580_v60 }
 0xb7a   :  { %4583 = vpow2.f32 %v4323_v7  ;;  %v2951_v50 = vmul.f32 %v4582_v42, %v6910_v39  ;;  %v2943_v8 = vsel %vm2942_vm2, %v4578_v54, %v2939_v31  ;;  %vm2956_vm4 = vweird.f32 %v4582_v42  ;;  %3287 = vmatpush.msra.mxu2 %v6945_v48  ;;  %v6948_v7 = vld [vmem:[#allocation22 + $0xf0] sm:$0xff]  ;;  %3399 = vmatpush.msrb.mxu1 %v6945_v48 }
 0xb7b   :  { %4585 = vrcp.f32 %v2901_v11  ;;  %v2948_v41 = vsel %vm2945_vm3, %v2947_v26, %v2943_v8  ;;  %vm2957_vm6 = vmor %vm2955_vm5, %vm2956_vm4  ;;  %v2976_v25 = vand.u32 2147483648, %v2901_v11  ;;  %vm2970_vm9 = vweird.f32 %v2901_v11  ;;  %v6968_v31 = vld [vmem:[#allocation22 + $0x90] sm:$0xff]  ;;  %v6975_v8 = vld [vmem:[#allocation22 + $0x60] sm:$0xff] }
 0xb7c   :  { %3100 = vmatmul.f32.gmra.mxu3 %v2933_v37  ;;  %3141 = vmatmul.f32.gmra.mxu0 %v2933_v37  ;;  %v2952_v36 = vsub.f32 1.0, %v2951_v50  ;;  %v2974_v55 = vand.u32 2147483647, %v2901_v11  ;;  %v1789_v54 = vadd.f32 %v7884_v2, %v7865_v34  ;;  %v7885_v34 = vld [vmem:[#allocation64_spill] sm:$0xff] }
 0xb7d   :  { %3182 = vmatmul.f32.gmra.mxu1 %v2933_v37  ;;  %v2977_v27 = vor.u32 1.1754944e-38, %v2976_v25  ;;  %v1748_v45 = vadd.f32 %v7885_v34, %v7871_v18  ;;  %3288 = vmatpush.msra.mxu2 %v6948_v7  ;;  %v6962_v37 = vld [vmem:[#allocation22 + $0xa8] sm:$0xff]  ;;  %v6986_v26 = vld [vmem:[#allocation22 + $0x30] sm:$0xff] }
 0xb7e   :  { %v2953_v62 = vmul.f32 %v4582_v42, %v2952_v36  ;;  %vm2975_vm11 = vcmp.eq.f32.partialorder %v2974_v55, 8.507059e+37  ;;  %3400 = vmatpush.msrb.mxu1 %v6948_v7 }
 0xb80   :  { %v4584_v0 = vpop.eup %4583  ;;  %v2954_v20 = vadd.f32 %v4582_v42, %v2953_v62 }
 0xb81   :  { %v4586_v46 = vpop.eup %4585  ;;  %v2902_v61 = vadd.f32 1.0, %v4584_v0  ;;  %v6973_v0 = vld [vmem:[#allocation22 + $0x78] sm:$0xff] }
 0xb82   :  { %v2966_v51 = vmul.f32 %v4586_v46, %v2901_v11  ;;  %v2958_v10 = vsel %vm2957_vm6, %v4582_v42, %v2954_v20  ;;  %vm2971_vm8 = vweird.f32 %v4586_v46  ;;  %v6954_v42 = vld [vmem:[#allocation22 + $0xd8] sm:$0xff]  ;;  %v6956_v11 = vld [vmem:[#allocation22 + $0xc0] sm:$0xff] }
 0xb83   :  { %4587 = vrcp.f32 %v2902_v61  ;;  %v2963_v35 = vsel %vm2960_vm7, %v2962_v28, %v2958_v10  ;;  %vm2972_vm10 = vmor %vm2970_vm9, %vm2971_vm8  ;;  %v2991_v40 = vand.u32 2147483648, %v2902_v61  ;;  %vm2985_vm13 = vweird.f32 %v2902_v61  ;;  %3289 = vmatpush.msra.mxu2 %v6954_v42  ;;  %3401 = vmatpush.msrb.mxu1 %v6954_v42 }
 0xb84   :  { %3103 = vmatmul.f32.gmra.mxu3 %v2948_v41  ;;  %3144 = vmatmul.f32.gmra.mxu0 %v2948_v41  ;;  %v2967_v3 = vsub.f32 1.0, %v2966_v51  ;;  %v2989_v22 = vand.u32 2147483647, %v2902_v61 }
 0xb85   :  { %3185 = vmatmul.f32.gmra.mxu1 %v2948_v41  ;;  %v2992_v56 = vor.u32 1.1754944e-38, %v2991_v40  ;;  %3290 = vmatpush.msra.mxu2 %v6956_v11  ;;  %v6991_v41 = vld [vmem:[#allocation22 + $0x18] sm:$0xff] }
 0xb86   :  { %v2968_v6 = vmul.f32 %v4586_v46, %v2967_v3  ;;  %vm2990_vm15 = vcmp.eq.f32.partialorder %v2989_v22, 8.507059e+37  ;;  %3402 = vmatpush.msrb.mxu1 %v6956_v11  ;;  %7886 = vst [vmem:[#allocation56_spill] sm:$0xff] %v6991_v41  ;;  %v6995_v3 = vld [vmem:[#allocation22] sm:$0xff] }
 0xb87   :  { %3291 = vmatpush.msra.mxu2 %v6962_v37  ;;  %7887 = vst [vmem:[#allocation49_spill] sm:$0xff] %v6995_v3 }
 0xb88   :  { %v2969_v43 = vadd.f32 %v4586_v46, %v2968_v6  ;;  %3403 = vmatpush.msrb.mxu1 %v6962_v37 }
 0xb89   :  { %v4588_v23 = vpop.eup %4587  ;;  %3292 = vmatpush.msra.mxu2 %v6968_v31 }
 0xb8a   :  { %v2981_v33 = vmul.f32 %v4588_v23, %v2902_v61  ;;  %v2973_v1 = vsel %vm2972_vm10, %v4586_v46, %v2969_v43  ;;  %vm2986_vm12 = vweird.f32 %v4588_v23  ;;  %3404 = vmatpush.msrb.mxu1 %v6968_v31  ;;  %v6979_v46 = vld [vmem:[#allocation22 + $0x48] sm:$0xff] }
 0xb8b   :  { %v2978_v12 = vsel %vm2975_vm11, %v2977_v27, %v2973_v1  ;;  %vm2987_vm14 = vmor %vm2985_vm13, %vm2986_vm12  ;;  %3293 = vmatpush.msra.mxu2 %v6973_v0 }
 0xb8c   :  { %3106 = vmatmul.f32.gmra.mxu3 %v2963_v35  ;;  %3147 = vmatmul.f32.gmra.mxu0 %v2963_v35  ;;  %v2982_v17 = vsub.f32 1.0, %v2981_v33 }
 0xb8d   :  { %3188 = vmatmul.f32.gmra.mxu1 %v2963_v35  ;;  %3294 = vmatpush.msra.mxu2 %v6975_v8 }
 0xb8e   :  { %v2983_v21 = vmul.f32 %v4588_v23, %v2982_v17  ;;  %3405 = vmatpush.msrb.mxu1 %v6973_v0 }
 0xb8f   :  { %3295 = vmatpush.msra.mxu2 %v6979_v46 }
 0xb90   :  { %v2984_v63 = vadd.f32 %v4588_v23, %v2983_v21  ;;  %3406 = vmatpush.msrb.mxu1 %v6975_v8 }
 0xb91   :  { %3296 = vmatpush.msra.mxu2 %v6986_v26 }
 0xb92   :  { %v2988_v15 = vsel %vm2987_vm14, %v4588_v23, %v2984_v63  ;;  %3407 = vmatpush.msrb.mxu1 %v6979_v46  ;;  %v6999_v23 = vld [vmem:[#allocation22 + $0x170] sm:$0xff] }
 0xb93   :  { %v2993_v4 = vsel %vm2990_vm15, %v2992_v56, %v2988_v15  ;;  %3297 = vmatpush.msra.mxu2 %v6991_v41  ;;  %3303 = vmatpush.msra.mxu3 %v6999_v23 }
 0xb94   :  { %3109 = vmatmul.f32.gmra.mxu3 %v2978_v12  ;;  %3150 = vmatmul.f32.gmra.mxu0 %v2978_v12 }
 0xb95   :  { %3191 = vmatmul.f32.gmra.mxu1 %v2978_v12  ;;  %3298 = vmatpush.msra.mxu2 %v6995_v3 }
 0xb96   :  { %3408 = vmatpush.msrb.mxu1 %v6986_v26 }
 0xb97   :  { %3415 = vmatpush.msrb.mxu2 %v6999_v23 }
 0xb98   :  { %3409 = vmatpush.msrb.mxu1 %v6991_v41 }
 0xb9a   :  { %3410 = vmatpush.msrb.mxu1 %v6995_v3 }
 0xb9c   :  { %3112 = vmatmul.f32.gmra.mxu3 %v2993_v4  ;;  %3153 = vmatmul.f32.gmra.mxu0 %v2993_v4 }
 0xb9d   :  { %3194 = vmatmul.f32.gmra.mxu1 %v2993_v4 }
 0xb9e   :  { %3527 = vmatpush.msra.mxu1 %v6999_v23 }
 0xbe9   :  { %v2732_v39 = vpop.f32.mrf.mxu0 }
 0xbea   :  { %v2775_v5 = vadd.f32 %v2732_v39, %v1789_v54  ;;  %v2752_v43 = vpop.f32.mrf.mxu1  ;;  %v7888_v39 = vld [vmem:[#allocation63_spill] sm:$0xff] }
 0xbeb   :  { %v2795_v63 = vadd.f32 %v6838_v47, %v2752_v43  ;;  %v7076_v43 = vld [vmem:[#allocation22 + $0xe8] sm:$0xff] }
 0xbec   :  { %v4317_v19 = vmul.f32 -1.442695, %v2775_v5  ;;  %v1830_v5 = vadd.f32 %v7888_v39, %v6501_v32  ;;  %v7127_v39 = vld [vmem:[#allocation22 + $0x8] sm:$0xff] }
 0xbed   :  { %7891 = vst [vmem:[#allocation45_spill] sm:$0xff] %v7127_v39 }
 0xbee   :  { %4589 = vpow2.f32 %v4317_v19 }
 0xbef   :  { %v2712_v52 = vpop.f32.mrf.mxu3 }
 0xbf0   :  { %v2755_v30 = vadd.f32 %v2712_v52, %v1748_v45  ;;  %v2867_v60 = vpop.f32.mrf.mxu2 }
 0xbf1   :  { %v2868_v24 = vadd.f32 %v6864_v14, %v2867_v60 }
 0xbf2   :  { %v4316_v57 = vmul.f32 -1.442695, %v2755_v30 }
 0xbf3   :  { %v4324_v18 = vmul.f32 -1.442695, %v2868_v24 }
 0xbf4   :  { %v4590_v9 = vpop.eup %4589  ;;  %4591 = vpow2.f32 %v4316_v57 }
 0xbf5   :  { %v6960_v50 = vadd.f32 1.0, %v4590_v9  ;;  %4593 = vpow2.f32 %v4324_v18 }
 0xbf7   :  { %4595 = vrcp.f32 %v6960_v50  ;;  %v2791_v47 = vand.u32 2147483648, %v6960_v50  ;;  %vm2785_vm9 = vweird.f32 %v6960_v50  ;;  %v2789_v45 = vand.u32 2147483647, %v6960_v50 }
 0xbf9   :  { %v2792_v60 = vor.u32 1.1754944e-38, %v2791_v47  ;;  %vm2790_vm11 = vcmp.eq.f32.partialorder %v2789_v45, 8.507059e+37 }
 0xbfa   :  { %v4592_v36 = vpop.eup %4591 }
 0xbfb   :  { %v4594_v53 = vpop.eup %4593  ;;  %v2759_v29 = vadd.f32 1.0, %v4592_v36 }
 0xbfc   :  { %v2903_v62 = vadd.f32 1.0, %v4594_v53  ;;  %v7889_v53 = vmov 0.0  }
 0xbfd   :  { %4597 = vrcp.f32 %v2759_v29  ;;  %v6981_v61 = vpop.eup %4595  ;;  %v2771_v33 = vand.u32 2147483648, %v2759_v29  ;;  %v2769_v25 = vand.u32 2147483647, %v2759_v29  ;;  %vm2765_vm2 = vweird.f32 %v2759_v29 }
 0xbfe   :  { %4599 = vrcp.f32 %v2903_v62  ;;  %v2781_v51 = vmul.f32 %v6981_v61, %v6960_v50  ;;  %v3006_v55 = vand.u32 2147483648, %v2903_v62  ;;  %v3004_v21 = vand.u32 2147483647, %v2903_v62  ;;  %v7020_v50 = vld [vmem:[#allocation22 + $0x140] sm:$0xff] }
 0xbff   :  { %v2772_v40 = vor.u32 1.1754944e-38, %v2771_v33  ;;  %vm3000_vm4 = vweird.f32 %v2903_v62  ;;  %vm2770_vm5 = vcmp.eq.f32.partialorder %v2769_v25, 8.507059e+37  ;;  %vm2786_vm7 = vweird.f32 %v6981_v61  ;;  %v7068_v33 = vld [vmem:[#allocation22 + $0x118] sm:$0xff]  ;;  %v7080_v25 = vld [vmem:[#allocation22 + $0x80] sm:$0xff] }
 0xc00   :  { %v2782_v10 = vsub.f32 1.0, %v2781_v51  ;;  %v3007_v15 = vor.u32 1.1754944e-38, %v3006_v55  ;;  %vm3005_vm8 = vcmp.eq.f32.partialorder %v3004_v21, 8.507059e+37  ;;  %vm2787_vm10 = vmor %vm2785_vm9, %vm2786_vm7  ;;  %v7039_v51 = vld [vmem:[#allocation22 + $0xe0] sm:$0xff]  ;;  %v7084_v55 = vld [vmem:[#allocation22 + $0xd0] sm:$0xff] }
 0xc01   :  { %v7089_v21 = vld [vmem:[#allocation22 + $0x68] sm:$0xff] }
 0xc02   :  { %v2783_v27 = vmul.f32 %v6981_v61, %v2782_v10  ;;  %v7056_v10 = vld [vmem:[#allocation22 + $0xc8] sm:$0xff] }
 0xc03   :  { %v4598_v20 = vpop.eup %4597 }
 0xc04   :  { %v4600_v44 = vpop.eup %4599  ;;  %v2761_v59 = vmul.f32 %v4598_v20, %v2759_v29  ;;  %vm2766_vm0 = vweird.f32 %v4598_v20  ;;  %v2784_v54 = vadd.f32 %v6981_v61, %v2783_v27  ;;  %v7018_v29 = vld [vmem:[#allocation22 + $0x158] sm:$0xff]  ;;  %v7094_v27 = vld [vmem:[#allocation22 + $0xa0] sm:$0xff] }
 0xc05   :  { %v2996_v6 = vmul.f32 %v4600_v44, %v2903_v62  ;;  %vm3001_vm1 = vweird.f32 %v4600_v44  ;;  %vm2767_vm3 = vmor %vm2765_vm2, %vm2766_vm0  ;;  %3304 = vmatpush.msra.mxu3 %v7018_v29  ;;  %3416 = vmatpush.msrb.mxu2 %v7018_v29  ;;  %v7030_v62 = vld [vmem:[#allocation22 + $0x110] sm:$0xff] }
 0xc06   :  { %v2762_v28 = vsub.f32 1.0, %v2761_v59  ;;  %vm3002_vm6 = vmor %vm3000_vm4, %vm3001_vm1  ;;  %v2788_v30 = vsel %vm2787_vm10, %v6981_v61, %v2784_v54  ;;  %3528 = vmatpush.msra.mxu1 %v7018_v29  ;;  %v7034_v61 = vld [vmem:[#allocation22 + $0xf8] sm:$0xff]  ;;  %v7054_v59 = vld [vmem:[#allocation22 + $0x148] sm:$0xff] }
 0xc07   :  { %v2997_v35 = vsub.f32 1.0, %v2996_v6  ;;  %v2793_v24 = vsel %vm2790_vm11, %v2792_v60, %v2788_v30  ;;  %3305 = vmatpush.msra.mxu3 %v7020_v50  ;;  %3417 = vmatpush.msrb.mxu2 %v7020_v50  ;;  %v7058_v6 = vld [vmem:[#allocation22 + $0xb0] sm:$0xff]  ;;  %v7125_v54 = vld [vmem:[#allocation22 + $0x40] sm:$0xff] }
 0xc08   :  { %v2763_v17 = vmul.f32 %v4598_v20, %v2762_v28  ;;  %v2799_v32 = vsub.f32 1.0, %v2793_v24  ;;  %v2801_v9 = vmul.f32 %v2793_v24, %v6898_v16  ;;  %3529 = vmatpush.msra.mxu1 %v7020_v50  ;;  %v7028_v16 = vld [vmem:[#allocation22 + $0x128] sm:$0xff]  ;;  %v7062_v28 = vld [vmem:[#allocation22 + $0x130] sm:$0xff] }
 0xc09   :  { %v2998_v1 = vmul.f32 %v4600_v44, %v2997_v35  ;;  %3306 = vmatpush.msra.mxu3 %v7028_v16  ;;  %3418 = vmatpush.msrb.mxu2 %v7028_v16  ;;  %v7073_v35 = vld [vmem:[#allocation22 + $0x100] sm:$0xff] }
 0xc0a   :  { %v2764_v12 = vadd.f32 %v4598_v20, %v2763_v17  ;;  %3530 = vmatpush.msra.mxu1 %v7028_v16  ;;  %v7078_v17 = vld [vmem:[#allocation22 + $0x98] sm:$0xff] }
 0xc0b   :  { %v2999_v22 = vadd.f32 %v4600_v44, %v2998_v1  ;;  %3307 = vmatpush.msra.mxu3 %v7030_v62  ;;  %3419 = vmatpush.msrb.mxu2 %v7030_v62  ;;  %v7086_v1 = vld [vmem:[#allocation22 + $0xb8] sm:$0xff] }
 0xc0c   :  { %v2768_v56 = vsel %vm2767_vm3, %v4598_v20, %v2764_v12  ;;  %3531 = vmatpush.msra.mxu1 %v7030_v62  ;;  %v7048_v20 = vld [vmem:[#allocation22 + $0x178] sm:$0xff]  ;;  %v7097_v12 = vld [vmem:[#allocation22 + $0x50] sm:$0xff] }
 0xc0d   :  { %v3003_v4 = vsel %vm3002_vm6, %v4600_v44, %v2999_v22  ;;  %v2773_v2 = vsel %vm2770_vm5, %v2772_v40, %v2768_v56  ;;  %3308 = vmatpush.msra.mxu3 %v7034_v61  ;;  %3420 = vmatpush.msrb.mxu2 %v7034_v61  ;;  %v7051_v44 = vld [vmem:[#allocation22 + $0x160] sm:$0xff]  ;;  %v7106_v40 = vld [vmem:[#allocation22 + $0x38] sm:$0xff]  ;;  %v7110_v22 = vld [vmem:[#allocation22 + $0x70] sm:$0xff] }
 0xc0e   :  { %v3008_v19 = vsel %vm3005_vm8, %v3007_v15, %v3003_v4  ;;  %v2796_v34 = vmul.f32 %v2795_v63, %v2773_v2  ;;  %3532 = vmatpush.msra.mxu1 %v7034_v61  ;;  %3323 = vmatpush.msrb.mxu0 %v7048_v20  ;;  %v7102_v63 = vld [vmem:[#allocation22 + $0x88] sm:$0xff]  ;;  %v7118_v56 = vld [vmem:[#allocation22 + $0x20] sm:$0xff]  ;;  %v7120_v4 = vld [vmem:[#allocation22 + $0x58] sm:$0xff] }
 0xc0f   :  { %3115 = vmatmul.f32.gmra.mxu3 %v3008_v19  ;;  %3156 = vmatmul.f32.gmra.mxu0 %v3008_v19  ;;  %7890 = vst [vmem:[#allocation41_spill] sm:$0xff] %v7118_v56 }
 0xc10   :  { %3197 = vmatmul.f32.gmra.mxu1 %v3008_v19  ;;  %v2797_v52 = vadd.f32 %v2796_v34, %v1830_v5  ;;  %3309 = vmatpush.msra.mxu3 %v7039_v51  ;;  %v7133_v19 = vld [vmem:[#allocation22 + $0x28] sm:$0xff] }
 0xc11   :  { %3421 = vmatpush.msrb.mxu2 %v7039_v51  ;;  %3533 = vmatpush.msra.mxu1 %v7039_v51  ;;  %7892 = vst [vmem:[#allocation37_spill] sm:$0xff] %v7133_v19 }
 0xc12   :  { %4601 = vtanh.f32 %v2797_v52  ;;  %3324 = vmatpush.msrb.mxu0 %v7051_v44  ;;  %3310 = vmatpush.msra.mxu3 %v7056_v10 }
 0xc13   :  { %3422 = vmatpush.msrb.mxu2 %v7056_v10  ;;  %3534 = vmatpush.msra.mxu1 %v7056_v10 }
 0xc14   :  { %3325 = vmatpush.msrb.mxu0 %v7054_v59  ;;  %3311 = vmatpush.msra.mxu3 %v7058_v6 }
 0xc15   :  { %3423 = vmatpush.msrb.mxu2 %v7058_v6  ;;  %3535 = vmatpush.msra.mxu1 %v7058_v6 }
 0xc16   :  { %3326 = vmatpush.msrb.mxu0 %v7062_v28  ;;  %3312 = vmatpush.msra.mxu3 %v7078_v17 }
 0xc17   :  { %3424 = vmatpush.msrb.mxu2 %v7078_v17  ;;  %3536 = vmatpush.msra.mxu1 %v7078_v17 }
 0xc18   :  { %v4602_v57 = vpop.eup %4601  ;;  %3327 = vmatpush.msrb.mxu0 %v7068_v33  ;;  %3313 = vmatpush.msra.mxu3 %v7080_v25 }
 0xc19   :  { %v2800_v18 = vmul.f32 %v4602_v57, %v2799_v32  ;;  %3425 = vmatpush.msrb.mxu2 %v7080_v25  ;;  %3537 = vmatpush.msra.mxu1 %v7080_v25 }
 0xc1a   :  { %3328 = vmatpush.msrb.mxu0 %v7073_v35  ;;  %3314 = vmatpush.msra.mxu3 %v7089_v21 }
 0xc1b   :  { %v2802_v36 = vadd.f32 %v2801_v9, %v2800_v18  ;;  %3426 = vmatpush.msrb.mxu2 %v7089_v21  ;;  %3538 = vmatpush.msra.mxu1 %v7089_v21 }
 0xc1c   :  { %3329 = vmatpush.msrb.mxu0 %v7076_v43  ;;  %3315 = vmatpush.msra.mxu3 %v7097_v12 }
 0xc1d   :  { %2869 = vmatmul.f32.gmra.mxu2 %v2802_v36  ;;  %3539 = vmatpush.msra.mxu1 %v7097_v12 }
 0xc1e   :  { %3330 = vmatpush.msrb.mxu0 %v7084_v55  ;;  %3427 = vmatpush.msrb.mxu2 %v7097_v12 }
 0xc1f   :  { %3316 = vmatpush.msra.mxu3 %v7106_v40  ;;  %3540 = vmatpush.msra.mxu1 %v7106_v40 }
 0xc20   :  { %3331 = vmatpush.msrb.mxu0 %v7086_v1  ;;  %3428 = vmatpush.msrb.mxu2 %v7106_v40 }
 0xc21   :  { %3317 = vmatpush.msra.mxu3 %v7118_v56  ;;  %3541 = vmatpush.msra.mxu1 %v7118_v56 }
 0xc22   :  { %3332 = vmatpush.msrb.mxu0 %v7094_v27  ;;  %3429 = vmatpush.msrb.mxu2 %v7118_v56 }
 0xc23   :  { %3318 = vmatpush.msra.mxu3 %v7127_v39  ;;  %3542 = vmatpush.msra.mxu1 %v7127_v39 }
 0xc24   :  { %3333 = vmatpush.msrb.mxu0 %v7102_v63  ;;  %3430 = vmatpush.msrb.mxu2 %v7127_v39 }
 0xc25   :  { %3299 = vmatmul.f32.vlgmr.msra.gmra.mxu2 %v7889_v53  ;;  %3435 = vmatpush.msrb.mxu3 %v7048_v20 }
 0xc26   :  { %3334 = vmatpush.msrb.mxu0 %v7110_v22  ;;  %3547 = vmatpush.msra.mxu2 %v7048_v20 }
 0xc27   :  { %3436 = vmatpush.msrb.mxu3 %v7051_v44 }
 0xc28   :  { %3335 = vmatpush.msrb.mxu0 %v7120_v4  ;;  %3548 = vmatpush.msra.mxu2 %v7051_v44 }
 0xc29   :  { %3437 = vmatpush.msrb.mxu3 %v7054_v59 }
 0xc2a   :  { %3336 = vmatpush.msrb.mxu0 %v7125_v54  ;;  %3549 = vmatpush.msra.mxu2 %v7054_v59 }
 0xc2b   :  { %3438 = vmatpush.msrb.mxu3 %v7062_v28 }
 0xc2c   :  { %3337 = vmatpush.msrb.mxu0 %v7133_v19  ;;  %3550 = vmatpush.msra.mxu2 %v7062_v28 }
 0xc2d   :  { %3439 = vmatpush.msrb.mxu3 %v7068_v33 }
 0xc2e   :  { %3551 = vmatpush.msra.mxu2 %v7068_v33 }
 0xc2f   :  { %3440 = vmatpush.msrb.mxu3 %v7073_v35 }
 0xc30   :  { %3552 = vmatpush.msra.mxu2 %v7073_v35 }
 0xc31   :  { %3441 = vmatpush.msrb.mxu3 %v7076_v43 }
 0xc32   :  { %3553 = vmatpush.msra.mxu2 %v7076_v43 }
 0xc33   :  { %3442 = vmatpush.msrb.mxu3 %v7084_v55 }
 0xc34   :  { %3554 = vmatpush.msra.mxu2 %v7084_v55 }
 0xc35   :  { %3443 = vmatpush.msrb.mxu3 %v7086_v1 }
 0xc36   :  { %3555 = vmatpush.msra.mxu2 %v7086_v1 }
 0xc37   :  { %3444 = vmatpush.msrb.mxu3 %v7094_v27 }
 0xc38   :  { %3556 = vmatpush.msra.mxu2 %v7094_v27 }
 0xc39   :  { %3445 = vmatpush.msrb.mxu3 %v7102_v63 }
 0xc3a   :  { %3557 = vmatpush.msra.mxu2 %v7102_v63 }
 0xc3b   :  { %3446 = vmatpush.msrb.mxu3 %v7110_v22 }
 0xc3c   :  { %3558 = vmatpush.msra.mxu2 %v7110_v22 }
 0xc3d   :  { %3447 = vmatpush.msrb.mxu3 %v7120_v4 }
 0xc3e   :  { %3559 = vmatpush.msra.mxu2 %v7120_v4 }
 0xc3f   :  { %3448 = vmatpush.msrb.mxu3 %v7125_v54 }
 0xc40   :  { %3560 = vmatpush.msra.mxu2 %v7125_v54 }
 0xc41   :  { %3449 = vmatpush.msrb.mxu3 %v7133_v19 }
 0xc42   :  { %3561 = vmatpush.msra.mxu2 %v7133_v19 }
 0xca0   :  { %v2870_v15 = vpop.f32.mrf.mxu2 }
 0xca1   :  { %v2871_v2 = vadd.f32 %v6864_v14, %v2870_v15  ;;  %v7138_v14 = vld [vmem:[#allocation22 + $0x10] sm:$0xff]  ;;  %v3139_v15 = vpop.f32.mrf.mxu0 }
 0xca2   :  { %7893 = vst [vmem:[#allocation38_spill] sm:$0xff] %v7138_v14  ;;  %3338 = vmatpush.msrb.mxu0 %v7138_v14  ;;  %3450 = vmatpush.msrb.mxu3 %v7138_v14 }
 0xca3   :  { %v4325_v5 = vmul.f32 -1.442695, %v2871_v2  ;;  %3562 = vmatpush.msra.mxu2 %v7138_v14 }
 0xca4   :  { %3507 = vmatpush.msra.mxu0 %v6925_v58 }
 0xca5   :  { %4603 = vpow2.f32 %v4325_v5 }
 0xca6   :  { %3508 = vmatpush.msra.mxu0 %v6931_v13 }
 0xca8   :  { %3509 = vmatpush.msra.mxu0 %v6935_v49 }
 0xca9   :  { %v7226_v5 = vpop.f32.mrf.mxu0 }
 0xcaa   :  { %3510 = vmatpush.msra.mxu0 %v6937_v38  ;;  %7895 = vst [vmem:[#allocation42_spill] sm:$0xff] %v7226_v5 }
 0xcab   :  { %v4604_v47 = vpop.eup %4603 }
 0xcac   :  { %v2904_v34 = vadd.f32 1.0, %v4604_v47  ;;  %3511 = vmatpush.msra.mxu0 %v6945_v48 }
 0xcae   :  { %4605 = vrcp.f32 %v2904_v34  ;;  %3512 = vmatpush.msra.mxu0 %v6948_v7  ;;  %v3021_v60 = vand.u32 2147483648, %v2904_v34  ;;  %v3019_v32 = vand.u32 2147483647, %v2904_v34  ;;  %vm3015_vm13 = vweird.f32 %v2904_v34 }
 0xcb0   :  { %3513 = vmatpush.msra.mxu0 %v6954_v42  ;;  %v3022_v18 = vor.u32 1.1754944e-38, %v3021_v60  ;;  %vm3020_vm15 = vcmp.eq.f32.partialorder %v3019_v32, 8.507059e+37 }
 0xcb2   :  { %3514 = vmatpush.msra.mxu0 %v6956_v11 }
 0xcb4   :  { %v4606_v45 = vpop.eup %4605  ;;  %3515 = vmatpush.msra.mxu0 %v6962_v37 }
 0xcb5   :  { %v3011_v52 = vmul.f32 %v4606_v45, %v2904_v34  ;;  %vm3016_vm12 = vweird.f32 %v4606_v45  ;;  %v7230_v34 = vpop.f32.mrf.mxu0 }
 0xcb6   :  { %3516 = vmatpush.msra.mxu0 %v6968_v31  ;;  %vm3017_vm14 = vmor %vm3015_vm13, %vm3016_vm12  ;;  %7897 = vst [vmem:[#allocation34_spill] sm:$0xff] %v7230_v34 }
 0xcb7   :  { %v3012_v30 = vsub.f32 1.0, %v3011_v52  ;;  %v3073_v52 = vld [vmem:[%s7677_s15] sm:$0x7] }
 0xcb8   :  { %3517 = vmatpush.msra.mxu0 %v6973_v0 }
 0xcb9   :  { %v3013_v24 = vmul.f32 %v4606_v45, %v3012_v30  ;;  %v7237_v30 = vperm.slane %v3073_v52, 0 }
 0xcba   :  { %3518 = vmatpush.msra.mxu0 %v6975_v8 }
 0xcbb   :  { %v3014_v57 = vadd.f32 %v4606_v45, %v3013_v24  ;;  %7899 = vst [vmem:[#allocation36_spill] sm:$0xff] %v7237_v30  ;;  %v3300_v24 = vpop.f32.mrf.mxu2 }
 0xcbc   :  { %3519 = vmatpush.msra.mxu0 %v6979_v46 }
 0xcbd   :  { %v3018_v9 = vsel %vm3017_vm14, %v4606_v45, %v3014_v57  ;;  %v7239_v60 = vpop.f32.mrf.mxu0 }
 0xcbe   :  { %v3023_v36 = vsel %vm3020_vm15, %v3022_v18, %v3018_v9  ;;  %3520 = vmatpush.msra.mxu0 %v6986_v26  ;;  %7900 = vst [vmem:[#allocation39_spill] sm:$0xff] %v7239_v60 }
 0xcbf   :  { %3118 = vmatmul.f32.gmra.mxu3 %v3023_v36  ;;  %3159 = vmatmul.f32.gmra.mxu0 %v3023_v36 }
 0xcc0   :  { %3200 = vmatmul.f32.gmra.mxu1 %v3023_v36  ;;  %3521 = vmatpush.msra.mxu0 %v6991_v41 }
 0xcc2   :  { %3522 = vmatpush.msra.mxu0 %v6995_v3 }
 0xcc5   :  { %v7244_v36 = vpop.f32.mrf.mxu0 }
 0xcc6   :  { %7902 = vst [vmem:[#allocation47_spill] sm:$0xff] %v7244_v36 }
 0xcc7   :  { %3319 = vmatmul.f32.vlgmr.msra.gmra.mxu3 %v7889_v53  ;;  %3339 = vmatmul.f32.vlgmr.msrb.gmra.mxu0 %v7889_v53  ;;  %v3098_v53 = vpop.f32.mrf.mxu3 }
 0xcc8   :  { %3619 = vmatpush.msra.mxu3 %v6925_v58  ;;  %3639 = vmatpush.msrb.mxu0 %v6999_v23  ;;  %v3099_v32 = vadd.f32 %v3098_v53, %v7237_v30 }
 0xcca   :  { %3620 = vmatpush.msra.mxu3 %v6931_v13  ;;  %3640 = vmatpush.msrb.mxu0 %v7018_v29  ;;  %v3343_v18 = vadd.f32 %v3300_v24, %v3099_v32 }
 0xccc   :  { %3621 = vmatpush.msra.mxu3 %v6935_v49  ;;  %3641 = vmatpush.msrb.mxu0 %v7020_v50  ;;  %v4326_v9 = vmul.f32 -1.442695, %v3343_v18 }
 0xccd   :  { %v7250_v5 = vpop.f32.mrf.mxu0 }
 0xcce   :  { %3622 = vmatpush.msra.mxu3 %v6937_v38  ;;  %3642 = vmatpush.msrb.mxu0 %v7028_v16  ;;  %4607 = vpow2.f32 %v4326_v9  ;;  %7905 = vst [vmem:[#allocation46_spill] sm:$0xff] %v7250_v5 }
 0xccf   :  { %v7224_v2 = vpop.f32.mrf.mxu3 }
 0xcd0   :  { %3623 = vmatpush.msra.mxu3 %v6945_v48  ;;  %3643 = vmatpush.msrb.mxu0 %v7030_v62  ;;  %7894 = vst [vmem:[#allocation35_spill] sm:$0xff] %v7224_v2 }
 0xcd2   :  { %3624 = vmatpush.msra.mxu3 %v6948_v7  ;;  %3644 = vmatpush.msrb.mxu0 %v7034_v61 }
 0xcd4   :  { %3625 = vmatpush.msra.mxu3 %v6954_v42  ;;  %3645 = vmatpush.msrb.mxu0 %v7039_v51 }
 0xcd6   :  { %3626 = vmatpush.msra.mxu3 %v6956_v11  ;;  %3646 = vmatpush.msrb.mxu0 %v7056_v10 }
 0xcd7   :  { %v7228_v47 = vpop.f32.mrf.mxu3 }
 0xcd8   :  { %3627 = vmatpush.msra.mxu3 %v6962_v37  ;;  %3647 = vmatpush.msrb.mxu0 %v7058_v6  ;;  %7896 = vst [vmem:[#allocation40_spill] sm:$0xff] %v7228_v47 }
 0xcda   :  { %3628 = vmatpush.msra.mxu3 %v6968_v31  ;;  %3648 = vmatpush.msrb.mxu0 %v7078_v17 }
 0xcdc   :  { %3629 = vmatpush.msra.mxu3 %v6973_v0  ;;  %3649 = vmatpush.msrb.mxu0 %v7080_v25 }
 0xcde   :  { %3630 = vmatpush.msra.mxu3 %v6975_v8  ;;  %3650 = vmatpush.msrb.mxu0 %v7089_v21 }
 0xcdf   :  { %v7232_v45 = vpop.f32.mrf.mxu3 }
 0xce0   :  { %3631 = vmatpush.msra.mxu3 %v6979_v46  ;;  %3651 = vmatpush.msrb.mxu0 %v7097_v12  ;;  %7898 = vst [vmem:[#allocation59_spill] sm:$0xff] %v7232_v45  ;;  %v4608_v45 = vpop.eup %4607 }
 0xce1   :  { %v3347_v2 = vadd.f32 1.0, %v4608_v45  ;;  %v7264_v45 = vld [vmem:[%s7678_s16] ss:$0 sm:$0xff] }
 0xce2   :  { %3632 = vmatpush.msra.mxu3 %v6986_v26  ;;  %3652 = vmatpush.msrb.mxu0 %v7106_v40 }
 0xce3   :  { %4609 = vrcp.f32 %v3347_v2  ;;  %vm3353_vm1 = vweird.f32 %v3347_v2 }
 0xce4   :  { %3633 = vmatpush.msra.mxu3 %v6991_v41  ;;  %3653 = vmatpush.msrb.mxu0 %v7118_v56 }
 0xce6   :  { %3634 = vmatpush.msra.mxu3 %v6995_v3  ;;  %3654 = vmatpush.msrb.mxu0 %v7127_v39  ;;  %v7254_v39 = vpop.f32.mrf.mxu0  ;;  %v3359_v3 = vand.u32 2147483648, %v3347_v2 }
 0xce7   :  { %v7242_v57 = vpop.f32.mrf.mxu3  ;;  %7907 = vst [vmem:[#allocation55_spill] sm:$0xff] %v7254_v39 }
 0xce8   :  { %7901 = vst [vmem:[#allocation60_spill] sm:$0xff] %v7242_v57  ;;  %v7256_v57 = vperm.slane %v3073_v52, 1 }
 0xce9   :  { %v4610_v53 = vpop.eup %4609 }
 0xcea   :  { %7908 = vst [vmem:[#allocation54_spill] sm:$0xff] %v7256_v57  ;;  %v3349_v24 = vmul.f32 %v4610_v53, %v3347_v2  ;;  %v3140_v32 = vadd.f32 %v3139_v15, %v7256_v57  ;;  %vm3354_vm0 = vweird.f32 %v4610_v53  ;;  %v3357_v15 = vand.u32 2147483647, %v3347_v2 }
 0xceb   :  { %vm3355_vm2 = vmor %vm3353_vm1, %vm3354_vm0 }
 0xcec   :  { %v3350_v36 = vsub.f32 1.0, %v3349_v24  ;;  %vm3358_vm3 = vcmp.eq.f32.partialorder %v3357_v15, 8.507059e+37 }
 0xcee   :  { %v3351_v5 = vmul.f32 %v4610_v53, %v3350_v36  ;;  %v7267_v36 = vperm.slane %v3073_v52, 2 }
 0xcef   :  { %v7246_v47 = vpop.f32.mrf.mxu3 }
 0xcf0   :  { %7903 = vst [vmem:[#allocation51_spill] sm:$0xff] %v7246_v47 }
 0xcf7   :  { %v7248_v34 = vpop.f32.mrf.mxu3 }
 0xcf8   :  { %7904 = vst [vmem:[#allocation43_spill] sm:$0xff] %v7248_v34 }
 0xd3c   :  { %v7259_v47 = vpop.f32.mrf.mxu0 }
 0xd3d   :  { %7909 = vst [vmem:[#allocation62_spill] sm:$0xff] %v7259_v47 }
 0xd42   :  { %v7252_v60 = vpop.f32.mrf.mxu3 }
 0xd43   :  { %7906 = vst [vmem:[#allocation57_spill] sm:$0xff] %v7252_v60  ;;  %v3352_v60 = vadd.f32 %v4610_v53, %v3351_v5 }
 0xd44   :  { %v3340_v30 = vpop.f32.mrf.mxu0 }
 0xd45   :  { %v3356_v47 = vsel %vm3355_vm2, %v4610_v53, %v3352_v60  ;;  %v3383_v24 = vadd.f32 %v7264_v45, %v3340_v30 }
 0xd4a   :  { %v3320_v18 = vpop.f32.mrf.mxu3 }
 0xd4b   :  { %v3363_v9 = vadd.f32 %v3320_v18, %v3140_v32  ;;  %v3180_v32 = vpop.f32.mrf.mxu1 }
 0xd4c   :  { %v3181_v14 = vadd.f32 %v3180_v32, %v7267_v36 }
 0xd4d   :  { %v4327_v34 = vmul.f32 -1.442695, %v3363_v9 }
 0xd4f   :  { %4611 = vpow2.f32 %v4327_v34  ;;  %v3360_v34 = vor.u32 1.1754944e-38, %v3359_v3 }
 0xd51   :  { %v3361_v18 = vsel %vm3358_vm3, %v3360_v34, %v3356_v47 }
 0xd52   :  { %v3384_v9 = vmul.f32 %v3383_v24, %v3361_v18  ;;  %v7923_v18 = vld [vmem:[#allocation36_spill] sm:$0xff] }
 0xd54   :  { %v3385_v41 = vadd.f32 %v3384_v9, %v3181_v14  ;;  %v7924_v9 = vld [vmem:[#allocation35_spill] sm:$0xff] }
 0xd55   :  { %v4612_v39 = vpop.eup %4611 }
 0xd56   :  { %v3367_v57 = vadd.f32 1.0, %v4612_v39 }
 0xd58   :  { %4613 = vrcp.f32 %v3367_v57  ;;  %v3379_v2 = vand.u32 2147483648, %v3367_v57  ;;  %v3377_v60 = vand.u32 2147483647, %v3367_v57  ;;  %vm3373_vm5 = vweird.f32 %v3367_v57 }
 0xd59   :  { %4615 = vtanh.f32 %v3385_v41 }
 0xd5a   :  { %v3380_v3 = vor.u32 1.1754944e-38, %v3379_v2  ;;  %vm3378_vm7 = vcmp.eq.f32.partialorder %v3377_v60, 8.507059e+37 }
 0xd5e   :  { %v4614_v5 = vpop.eup %4613 }
 0xd5f   :  { %v3369_v56 = vmul.f32 %v4614_v5, %v3367_v57  ;;  %vm3374_vm4 = vweird.f32 %v4614_v5  ;;  %v4616_v15 = vpop.eup %4615 }
 0xd60   :  { %vm3375_vm6 = vmor %vm3373_vm5, %vm3374_vm4 }
 0xd61   :  { %v3370_v19 = vsub.f32 1.0, %v3369_v56 }
 0xd63   :  { %v3371_v39 = vmul.f32 %v4614_v5, %v3370_v19 }
 0xd65   :  { %v3372_v30 = vadd.f32 %v4614_v5, %v3371_v39 }
 0xd67   :  { %v3376_v52 = vsel %vm3375_vm6, %v4614_v5, %v3372_v30  ;;  %v3102_v5 = vadd.f32 %v7924_v9, %v7923_v18  ;;  %v7925_v30 = vld [vmem:[#allocation54_spill] sm:$0xff] }
 0xd68   :  { %v3381_v53 = vsel %vm3378_vm7, %v3380_v3, %v3376_v52  ;;  %v7926_v3 = vld [vmem:[#allocation42_spill] sm:$0xff] }
 0xd69   :  { %v3387_v47 = vsub.f32 1.0, %v3381_v53  ;;  %v3389_v34 = vmul.f32 0.0, %v3381_v53  ;;  %v3143_v52 = vadd.f32 %v7926_v3, %v7925_v30 }
 0xd6b   :  { %v3388_v24 = vmul.f32 %v4616_v15, %v3387_v47 }
 0xd6d   :  { %v7270_v32 = vadd.f32 %v3389_v34, %v3388_v24 }
 0xd6f   :  { %7910 = vst [vmem:[#allocation50_spill] sm:$0xff] %v7270_v32  ;;  %3411 = vmatmul.f32.vlgmr.msrb.gmra.mxu1 %v7270_v32  ;;  %3431 = vmatmul.f32.vlgmr.msrb.gmra.mxu2 %v7270_v32 }
 0xd70   :  { %3451 = vmatmul.f32.vlgmr.msrb.gmra.mxu3 %v7270_v32  ;;  %3659 = vmatpush.msrb.mxu1 %v7048_v20 }
 0xd71   :  { %3731 = vmatpush.msrb.mxu2 %v6925_v58  ;;  %3751 = vmatpush.msrb.mxu3 %v6999_v23  ;;  %v7911_v58 = vld [vmem:[#allocation37_spill] sm:$0xff] }
 0xd72   :  { %3660 = vmatpush.msrb.mxu1 %v7051_v44 }
 0xd73   :  { %3732 = vmatpush.msrb.mxu2 %v6931_v13  ;;  %3752 = vmatpush.msrb.mxu3 %v7018_v29  ;;  %v7912_v13 = vld [vmem:[#allocation56_spill] sm:$0xff] }
 0xd74   :  { %3661 = vmatpush.msrb.mxu1 %v7054_v59 }
 0xd75   :  { %3733 = vmatpush.msrb.mxu2 %v6935_v49  ;;  %3753 = vmatpush.msrb.mxu3 %v7020_v50  ;;  %v7913_v49 = vld [vmem:[#allocation41_spill] sm:$0xff] }
 0xd76   :  { %3662 = vmatpush.msrb.mxu1 %v7062_v28 }
 0xd77   :  { %3734 = vmatpush.msrb.mxu2 %v6937_v38  ;;  %3754 = vmatpush.msrb.mxu3 %v7028_v16  ;;  %v7914_v38 = vld [vmem:[#allocation38_spill] sm:$0xff] }
 0xd78   :  { %3663 = vmatpush.msrb.mxu1 %v7068_v33 }
 0xd79   :  { %3735 = vmatpush.msrb.mxu2 %v6945_v48  ;;  %3755 = vmatpush.msrb.mxu3 %v7030_v62  ;;  %v7915_v48 = vld [vmem:[#allocation49_spill] sm:$0xff] }
 0xd7a   :  { %3664 = vmatpush.msrb.mxu1 %v7073_v35 }
 0xd7b   :  { %3736 = vmatpush.msrb.mxu2 %v6948_v7  ;;  %3756 = vmatpush.msrb.mxu3 %v7034_v61  ;;  %v7916_v7 = vld [vmem:[#allocation45_spill] sm:$0xff] }
 0xd7c   :  { %3665 = vmatpush.msrb.mxu1 %v7076_v43 }
 0xd7d   :  { %3737 = vmatpush.msrb.mxu2 %v6954_v42  ;;  %3757 = vmatpush.msrb.mxu3 %v7039_v51  ;;  %v3183_v42 = vpop.f32.mrf.mxu1 }
 0xd7e   :  { %3666 = vmatpush.msrb.mxu1 %v7084_v55 }
 0xd7f   :  { %3738 = vmatpush.msrb.mxu2 %v6956_v11  ;;  %3758 = vmatpush.msrb.mxu3 %v7056_v10 }
 0xd80   :  { %3667 = vmatpush.msrb.mxu1 %v7086_v1 }
 0xd81   :  { %3739 = vmatpush.msrb.mxu2 %v6962_v37  ;;  %3759 = vmatpush.msrb.mxu3 %v7058_v6 }
 0xd82   :  { %3668 = vmatpush.msrb.mxu1 %v7094_v27 }
 0xd83   :  { %3740 = vmatpush.msrb.mxu2 %v6968_v31  ;;  %3760 = vmatpush.msrb.mxu3 %v7078_v17 }
 0xd84   :  { %3669 = vmatpush.msrb.mxu1 %v7102_v63 }
 0xd85   :  { %3741 = vmatpush.msrb.mxu2 %v6973_v0  ;;  %3761 = vmatpush.msrb.mxu3 %v7080_v25  ;;  %v7323_v11 = vpop.f32.mrf.mxu1 }
 0xd86   :  { %3670 = vmatpush.msrb.mxu1 %v7110_v22  ;;  %7917 = vst [vmem:[#allocation61_spill] sm:$0xff] %v7323_v11 }
 0xd87   :  { %3742 = vmatpush.msrb.mxu2 %v6975_v8  ;;  %3762 = vmatpush.msrb.mxu3 %v7089_v21 }
 0xd88   :  { %3671 = vmatpush.msrb.mxu1 %v7120_v4 }
 0xd89   :  { %3743 = vmatpush.msrb.mxu2 %v6979_v46  ;;  %3763 = vmatpush.msrb.mxu3 %v7097_v12 }
 0xd8a   :  { %3672 = vmatpush.msrb.mxu1 %v7125_v54 }
 0xd8b   :  { %3744 = vmatpush.msrb.mxu2 %v6986_v26  ;;  %3764 = vmatpush.msrb.mxu3 %v7106_v40 }
 0xd8c   :  { %3673 = vmatpush.msrb.mxu1 %v7911_v58 }
 0xd8d   :  { %3745 = vmatpush.msrb.mxu2 %v7912_v13  ;;  %3765 = vmatpush.msrb.mxu3 %v7913_v49  ;;  %v7325_v41 = vpop.f32.mrf.mxu1 }
 0xd8e   :  { %3674 = vmatpush.msrb.mxu1 %v7914_v38  ;;  %7918 = vst [vmem:[#allocation53_spill] sm:$0xff] %v7325_v41 }
 0xd8f   :  { %3746 = vmatpush.msrb.mxu2 %v7915_v48  ;;  %3766 = vmatpush.msrb.mxu3 %v7916_v7 }
 0xd95   :  { %v7327_v56 = vpop.f32.mrf.mxu1 }
 0xd96   :  { %7919 = vst [vmem:[#allocation52_spill] sm:$0xff] %v7327_v56 }
 0xd9d   :  { %v7329_v19 = vpop.f32.mrf.mxu1 }
 0xd9e   :  { %7920 = vst [vmem:[#allocation58_spill] sm:$0xff] %v7329_v19 }
 0xda5   :  { %v7331_v14 = vpop.f32.mrf.mxu1 }
 0xda6   :  { %7921 = vst [vmem:[#allocation48_spill] sm:$0xff] %v7331_v14 }
 0xdad   :  { %v7333_v57 = vpop.f32.mrf.mxu1 }
 0xdae   :  { %7922 = vst [vmem:[#allocation44_spill] sm:$0xff] %v7333_v57 }
 0xdec   :  { %v3412_v2 = vpop.f32.mrf.mxu1 }
 0xded   :  { %v3455_v39 = vadd.f32 %v3412_v2, %v3102_v5 }
 0xdef   :  { %v4328_v60 = vmul.f32 -1.442695, %v3455_v39 }
 0xdf1   :  { %4617 = vpow2.f32 %v4328_v60 }
 0xdf2   :  { %v3432_v53 = vpop.f32.mrf.mxu2 }
 0xdf3   :  { %v3475_v47 = vadd.f32 %v3432_v53, %v3143_v52  ;;  %v3452_v3 = vpop.f32.mrf.mxu3 }
 0xdf5   :  { %v4329_v15 = vmul.f32 -1.442695, %v3475_v47 }
 0xdf7   :  { %v4618_v24 = vpop.eup %4617  ;;  %4619 = vpow2.f32 %v4329_v15  ;;  %v3184_v15 = vadd.f32 %v3183_v42, %v7267_v36 }
 0xdf8   :  { %v3459_v34 = vadd.f32 1.0, %v4618_v24 }
 0xdfa   :  { %4621 = vrcp.f32 %v3459_v34  ;;  %v3471_v41 = vand.u32 2147483648, %v3459_v34  ;;  %v3469_v2 = vand.u32 2147483647, %v3459_v34  ;;  %vm3465_vm9 = vweird.f32 %v3459_v34 }
 0xdfc   :  { %v3472_v52 = vor.u32 1.1754944e-38, %v3471_v41  ;;  %vm3470_vm11 = vcmp.eq.f32.partialorder %v3469_v2, 8.507059e+37 }
 0xdfd   :  { %v4620_v14 = vpop.eup %4619 }
 0xdfe   :  { %v3479_v19 = vadd.f32 1.0, %v4620_v14  ;;  %v3495_v14 = vadd.f32 %v7264_v45, %v3452_v3 }
 0xe00   :  { %v4622_v57 = vpop.eup %4621  ;;  %4623 = vrcp.f32 %v3479_v19  ;;  %v3489_v30 = vand.u32 2147483647, %v3479_v19  ;;  %vm3485_vm13 = vweird.f32 %v3479_v19 }
 0xe01   :  { %v3461_v56 = vmul.f32 %v4622_v57, %v3459_v34  ;;  %vm3466_vm8 = vweird.f32 %v4622_v57 }
 0xe02   :  { %vm3467_vm10 = vmor %vm3465_vm9, %vm3466_vm8  ;;  %vm3490_vm15 = vcmp.eq.f32.partialorder %v3489_v30, 8.507059e+37  ;;  %v7373_v30 = vld [vmem:[#allocation22 + $0xf0] sm:$0xff] }
 0xe03   :  { %v3462_v9 = vsub.f32 1.0, %v3461_v56 }
 0xe05   :  { %v3463_v5 = vmul.f32 %v4622_v57, %v3462_v9  ;;  %v3491_v9 = vand.u32 2147483648, %v3479_v19 }
 0xe06   :  { %v4624_v39 = vpop.eup %4623 }
 0xe07   :  { %v3481_v60 = vmul.f32 %v4624_v39, %v3479_v19  ;;  %v3464_v11 = vadd.f32 %v4622_v57, %v3463_v5  ;;  %vm3486_vm12 = vweird.f32 %v4624_v39  ;;  %v3492_v34 = vor.u32 1.1754944e-38, %v3491_v9  ;;  %v7348_v19 = vld [vmem:[#allocation22 + $0x168] sm:$0xff] }
 0xe08   :  { %vm3487_vm14 = vmor %vm3485_vm13, %vm3486_vm12 }
 0xe09   :  { %v3482_v53 = vsub.f32 1.0, %v3481_v60  ;;  %v3468_v47 = vsel %vm3467_vm10, %v4622_v57, %v3464_v11  ;;  %v7383_v60 = vld [vmem:[#allocation22 + $0xc0] sm:$0xff] }
 0xe0a   :  { %v3473_v24 = vsel %vm3470_vm11, %v3472_v52, %v3468_v47  ;;  %v7931_v52 = vld [vmem:[#allocation36_spill] sm:$0xff] }
 0xe0b   :  { %v3483_v56 = vmul.f32 %v4624_v39, %v3482_v53  ;;  %v3496_v18 = vmul.f32 %v3495_v14, %v3473_v24  ;;  %v7932_v53 = vld [vmem:[#allocation40_spill] sm:$0xff] }
 0xe0d   :  { %v3484_v7 = vadd.f32 %v4624_v39, %v3483_v56  ;;  %v3497_v48 = vadd.f32 %v3496_v18, %v3184_v15  ;;  %v7363_v18 = vld [vmem:[#allocation22 + $0x120] sm:$0xff] }
 0xe0f   :  { %v3488_v5 = vsel %vm3487_vm14, %v4624_v39, %v3484_v7  ;;  %4625 = vtanh.f32 %v3497_v48  ;;  %v7353_v48 = vld [vmem:[#allocation22 + $0x150] sm:$0xff]  ;;  %v7358_v7 = vld [vmem:[#allocation22 + $0x138] sm:$0xff] }
 0xe10   :  { %v3493_v11 = vsel %vm3490_vm15, %v3492_v34, %v3488_v5  ;;  %v7378_v39 = vld [vmem:[#allocation22 + $0xd8] sm:$0xff] }
 0xe11   :  { %v3499_v41 = vsub.f32 1.0, %v3493_v11  ;;  %v3501_v42 = vmul.f32 %v3493_v11, %v7270_v32 }
 0xe15   :  { %v4626_v57 = vpop.eup %4625 }
 0xe16   :  { %v3500_v2 = vmul.f32 %v4626_v57, %v3499_v41 }
 0xe18   :  { %v7342_v3 = vadd.f32 %v3501_v42, %v3500_v2 }
 0xe1a   :  { %3523 = vmatmul.f32.vlgmr.msra.gmra.mxu0 %v7342_v3  ;;  %3543 = vmatmul.f32.vlgmr.msra.gmra.mxu1 %v7342_v3 }
 0xe1b   :  { %3563 = vmatmul.f32.vlgmr.msra.gmra.mxu2 %v7342_v3  ;;  %3771 = vmatpush.msra.mxu0 %v7048_v20 }
 0xe1c   :  { %3843 = vmatpush.msra.mxu1 %v7348_v19  ;;  %3863 = vmatpush.msra.mxu2 %v6999_v23  ;;  %v7368_v23 = vld [vmem:[#allocation22 + $0x108] sm:$0xff] }
 0xe1d   :  { %3772 = vmatpush.msra.mxu0 %v7051_v44 }
 0xe1e   :  { %3844 = vmatpush.msra.mxu1 %v7353_v48  ;;  %3864 = vmatpush.msra.mxu2 %v7018_v29 }
 0xe1f   :  { %3773 = vmatpush.msra.mxu0 %v7054_v59 }
 0xe20   :  { %3845 = vmatpush.msra.mxu1 %v7358_v7  ;;  %3865 = vmatpush.msra.mxu2 %v7020_v50 }
 0xe21   :  { %3774 = vmatpush.msra.mxu0 %v7062_v28 }
 0xe22   :  { %3846 = vmatpush.msra.mxu1 %v7363_v18  ;;  %3866 = vmatpush.msra.mxu2 %v7028_v16 }
 0xe23   :  { %3775 = vmatpush.msra.mxu0 %v7068_v33 }
 0xe24   :  { %3847 = vmatpush.msra.mxu1 %v7368_v23  ;;  %3867 = vmatpush.msra.mxu2 %v7030_v62 }
 0xe25   :  { %3776 = vmatpush.msra.mxu0 %v7073_v35 }
 0xe26   :  { %3848 = vmatpush.msra.mxu1 %v7373_v30  ;;  %3868 = vmatpush.msra.mxu2 %v7034_v61 }
 0xe27   :  { %3777 = vmatpush.msra.mxu0 %v7076_v43 }
 0xe28   :  { %3849 = vmatpush.msra.mxu1 %v7378_v39  ;;  %3869 = vmatpush.msra.mxu2 %v7039_v51 }
 0xe29   :  { %3778 = vmatpush.msra.mxu0 %v7084_v55 }
 0xe2a   :  { %3850 = vmatpush.msra.mxu1 %v7383_v60  ;;  %3870 = vmatpush.msra.mxu2 %v7056_v10 }
 0xe2b   :  { %3779 = vmatpush.msra.mxu0 %v7086_v1 }
 0xe2c   :  { %3851 = vmatpush.msra.mxu1 %v6962_v37  ;;  %3871 = vmatpush.msra.mxu2 %v7058_v6  ;;  %v7927_v37 = vld [vmem:[#allocation49_spill] sm:$0xff] }
 0xe2d   :  { %3780 = vmatpush.msra.mxu0 %v7094_v27 }
 0xe2e   :  { %3852 = vmatpush.msra.mxu1 %v6968_v31  ;;  %3872 = vmatpush.msra.mxu2 %v7078_v17  ;;  %v7928_v31 = vld [vmem:[#allocation45_spill] sm:$0xff] }
 0xe2f   :  { %3781 = vmatpush.msra.mxu0 %v7102_v63 }
 0xe30   :  { %3853 = vmatpush.msra.mxu1 %v6973_v0  ;;  %3873 = vmatpush.msra.mxu2 %v7080_v25  ;;  %v7929_v0 = vld [vmem:[#allocation54_spill] sm:$0xff] }
 0xe31   :  { %3782 = vmatpush.msra.mxu0 %v7110_v22 }
 0xe32   :  { %3854 = vmatpush.msra.mxu1 %v6975_v8  ;;  %3874 = vmatpush.msra.mxu2 %v7089_v21  ;;  %v7930_v8 = vld [vmem:[#allocation34_spill] sm:$0xff] }
 0xe33   :  { %3783 = vmatpush.msra.mxu0 %v7120_v4 }
 0xe34   :  { %3855 = vmatpush.msra.mxu1 %v6979_v46  ;;  %3875 = vmatpush.msra.mxu2 %v7097_v12  ;;  %v3146_v46 = vadd.f32 %v7930_v8, %v7929_v0 }
 0xe35   :  { %3784 = vmatpush.msra.mxu0 %v7125_v54 }
 0xe36   :  { %3856 = vmatpush.msra.mxu1 %v6986_v26  ;;  %3876 = vmatpush.msra.mxu2 %v7106_v40  ;;  %v3105_v26 = vadd.f32 %v7932_v53, %v7931_v52 }
 0xe37   :  { %3785 = vmatpush.msra.mxu0 %v7911_v58 }
 0xe38   :  { %3857 = vmatpush.msra.mxu1 %v7912_v13  ;;  %3877 = vmatpush.msra.mxu2 %v7913_v49 }
 0xe39   :  { %3786 = vmatpush.msra.mxu0 %v7914_v38 }
 0xe3a   :  { %3858 = vmatpush.msra.mxu1 %v7927_v37  ;;  %3878 = vmatpush.msra.mxu2 %v7928_v31 }
 0xe97   :  { %v3524_v47 = vpop.f32.mrf.mxu0  ;;  %v3544_v14 = vpop.f32.mrf.mxu1 }
 0xe98   :  { %v3567_v15 = vadd.f32 %v3524_v47, %v3105_v26  ;;  %v3587_v24 = vadd.f32 %v3544_v14, %v3146_v46 }
 0xe9a   :  { %v4330_v56 = vmul.f32 -1.442695, %v3567_v15  ;;  %v4331_v13 = vmul.f32 -1.442695, %v3587_v24 }
 0xe9c   :  { %4627 = vpow2.f32 %v4330_v56 }
 0xe9d   :  { %4629 = vpow2.f32 %v4331_v13 }
 0xe9e   :  { %v3564_v47 = vpop.f32.mrf.mxu2 }
 0xe9f   :  { %v3607_v56 = vadd.f32 %v7264_v45, %v3564_v47 }
 0xea2   :  { %v4628_v9 = vpop.eup %4627 }
 0xea3   :  { %v4630_v34 = vpop.eup %4629  ;;  %v3571_v5 = vadd.f32 1.0, %v4628_v9 }
 0xea4   :  { %v3591_v11 = vadd.f32 1.0, %v4630_v34  ;;  %v7933_v34 = vld [vmem:[#allocation61_spill] sm:$0xff] }
 0xea5   :  { %4631 = vrcp.f32 %v3571_v5  ;;  %v3583_v53 = vand.u32 2147483648, %v3571_v5  ;;  %v3581_v46 = vand.u32 2147483647, %v3571_v5  ;;  %vm3577_vm1 = vweird.f32 %v3571_v5 }
 0xea6   :  { %4633 = vrcp.f32 %v3591_v11  ;;  %vm3597_vm5 = vweird.f32 %v3591_v11  ;;  %v3601_v52 = vand.u32 2147483647, %v3591_v11 }
 0xea7   :  { %v3584_v15 = vor.u32 1.1754944e-38, %v3583_v53  ;;  %vm3582_vm3 = vcmp.eq.f32.partialorder %v3581_v46, 8.507059e+37 }
 0xea8   :  { %vm3602_vm7 = vcmp.eq.f32.partialorder %v3601_v52, 8.507059e+37 }
 0xeab   :  { %v4632_v41 = vpop.eup %4631 }
 0xeac   :  { %v4634_v57 = vpop.eup %4633  ;;  %v3573_v2 = vmul.f32 %v4632_v41, %v3571_v5  ;;  %vm3578_vm0 = vweird.f32 %v4632_v41 }
 0xead   :  { %v3593_v42 = vmul.f32 %v4634_v57, %v3591_v11  ;;  %vm3579_vm2 = vmor %vm3577_vm1, %vm3578_vm0  ;;  %vm3598_vm4 = vweird.f32 %v4634_v57 }
 0xeae   :  { %v3574_v37 = vsub.f32 1.0, %v3573_v2  ;;  %v3187_v2 = vadd.f32 %v7933_v34, %v7267_v36  ;;  %vm3599_vm6 = vmor %vm3597_vm5, %vm3598_vm4 }
 0xeaf   :  { %v3594_v8 = vsub.f32 1.0, %v3593_v42  ;;  %v3603_v42 = vand.u32 2147483648, %v3591_v11  ;;  %v7426_v11 = vld [vmem:[#allocation22 + $0x170] sm:$0xff] }
 0xeb0   :  { %v3575_v32 = vmul.f32 %v4632_v41, %v3574_v37 }
 0xeb1   :  { %v3595_v26 = vmul.f32 %v4634_v57, %v3594_v8  ;;  %v3604_v5 = vor.u32 1.1754944e-38, %v3603_v42  ;;  %v7937_v42 = vld [vmem:[#allocation53_spill] sm:$0xff] }
 0xeb2   :  { %v3576_v14 = vadd.f32 %v4632_v41, %v3575_v32 }
 0xeb3   :  { %v3596_v13 = vadd.f32 %v4634_v57, %v3595_v26 }
 0xeb4   :  { %v3580_v24 = vsel %vm3579_vm2, %v4632_v41, %v3576_v14 }
 0xeb5   :  { %v3585_v9 = vsel %vm3582_vm3, %v3584_v15, %v3580_v24  ;;  %v3600_v32 = vsel %vm3599_vm6, %v4634_v57, %v3596_v13 }
 0xeb6   :  { %v3608_v37 = vmul.f32 %v3607_v56, %v3585_v9  ;;  %v3605_v41 = vsel %vm3602_vm7, %v3604_v5, %v3600_v32 }
 0xeb7   :  { %v3611_v53 = vsub.f32 1.0, %v3605_v41  ;;  %v3613_v26 = vmul.f32 %v3605_v41, %v7342_v3 }
 0xeb8   :  { %v3609_v8 = vadd.f32 %v3608_v37, %v3187_v2  ;;  %v3190_v37 = vadd.f32 %v7937_v42, %v7267_v36 }
 0xeba   :  { %4635 = vtanh.f32 %v3609_v8 }
 0xec0   :  { %v4636_v46 = vpop.eup %4635 }
 0xec1   :  { %v3612_v47 = vmul.f32 %v4636_v46, %v3611_v53 }
 0xec3   :  { %v7419_v14 = vadd.f32 %v3613_v26, %v3612_v47 }
 0xec5   :  { %3635 = vmatmul.f32.vlgmr.msra.gmra.mxu3 %v7419_v14  ;;  %3655 = vmatmul.f32.vlgmr.msrb.gmra.mxu0 %v7419_v14 }
 0xec6   :  { %3675 = vmatmul.f32.vlgmr.msrb.gmra.mxu1 %v7419_v14  ;;  %3883 = vmatpush.msra.mxu3 %v7048_v20  ;;  %v7481_v20 = vld [vmem:[#allocation22 + $0x18] sm:$0xff] }
 0xec7   :  { %3955 = vmatpush.msrb.mxu0 %v7348_v19  ;;  %3975 = vmatpush.msrb.mxu1 %v7426_v11 }
 0xec8   :  { %3884 = vmatpush.msra.mxu3 %v7051_v44  ;;  %v7486_v44 = vld [vmem:[#allocation22] sm:$0xff] }
 0xec9   :  { %3956 = vmatpush.msrb.mxu0 %v7353_v48  ;;  %3976 = vmatpush.msrb.mxu1 %v7018_v29  ;;  %v7451_v29 = vld [vmem:[#allocation22 + $0xa8] sm:$0xff] }
 0xeca   :  { %3885 = vmatpush.msra.mxu3 %v7054_v59  ;;  %v7934_v59 = vld [vmem:[#allocation39_spill] sm:$0xff] }
 0xecb   :  { %3957 = vmatpush.msrb.mxu0 %v7358_v7  ;;  %3977 = vmatpush.msrb.mxu1 %v7020_v50  ;;  %v7456_v50 = vld [vmem:[#allocation22 + $0x90] sm:$0xff] }
 0xecc   :  { %3886 = vmatpush.msra.mxu3 %v7062_v28 }
 0xecd   :  { %3958 = vmatpush.msrb.mxu0 %v7363_v18  ;;  %3978 = vmatpush.msrb.mxu1 %v7028_v16  ;;  %v7461_v16 = vld [vmem:[#allocation22 + $0x78] sm:$0xff] }
 0xece   :  { %3887 = vmatpush.msra.mxu3 %v7068_v33 }
 0xecf   :  { %3959 = vmatpush.msrb.mxu0 %v7368_v23  ;;  %3979 = vmatpush.msrb.mxu1 %v7030_v62  ;;  %v7466_v62 = vld [vmem:[#allocation22 + $0x60] sm:$0xff] }
 0xed0   :  { %3888 = vmatpush.msra.mxu3 %v7073_v35  ;;  %v7935_v35 = vld [vmem:[#allocation36_spill] sm:$0xff] }
 0xed1   :  { %3960 = vmatpush.msrb.mxu0 %v7373_v30  ;;  %3980 = vmatpush.msrb.mxu1 %v7034_v61  ;;  %v7471_v61 = vld [vmem:[#allocation22 + $0x48] sm:$0xff] }
 0xed2   :  { %3889 = vmatpush.msra.mxu3 %v7076_v43  ;;  %v7936_v43 = vld [vmem:[#allocation59_spill] sm:$0xff] }
 0xed3   :  { %3961 = vmatpush.msrb.mxu0 %v7378_v39  ;;  %3981 = vmatpush.msrb.mxu1 %v7039_v51  ;;  %v7476_v51 = vld [vmem:[#allocation22 + $0x30] sm:$0xff] }
 0xed4   :  { %3890 = vmatpush.msra.mxu3 %v7084_v55 }
 0xed5   :  { %3962 = vmatpush.msrb.mxu0 %v7383_v60  ;;  %3982 = vmatpush.msrb.mxu1 %v7056_v10  ;;  %v3149_v10 = vadd.f32 %v7934_v59, %v7929_v0 }
 0xed6   :  { %3891 = vmatpush.msra.mxu3 %v7086_v1 }
 0xed7   :  { %3963 = vmatpush.msrb.mxu0 %v7451_v29  ;;  %3983 = vmatpush.msrb.mxu1 %v7058_v6 }
 0xed8   :  { %3892 = vmatpush.msra.mxu3 %v7094_v27 }
 0xed9   :  { %3964 = vmatpush.msrb.mxu0 %v7456_v50  ;;  %3984 = vmatpush.msrb.mxu1 %v7078_v17  ;;  %v3108_v17 = vadd.f32 %v7936_v43, %v7935_v35  ;;  %v7508_v43 = vld [vmem:[#allocation22 + $0x160] sm:$0xff] }
 0xeda   :  { %3893 = vmatpush.msra.mxu3 %v7102_v63 }
 0xedb   :  { %3965 = vmatpush.msrb.mxu0 %v7461_v16  ;;  %3985 = vmatpush.msrb.mxu1 %v7080_v25 }
 0xedc   :  { %3894 = vmatpush.msra.mxu3 %v7110_v22 }
 0xedd   :  { %3966 = vmatpush.msrb.mxu0 %v7466_v62  ;;  %3986 = vmatpush.msrb.mxu1 %v7089_v21 }
 0xede   :  { %3895 = vmatpush.msra.mxu3 %v7120_v4 }
 0xedf   :  { %3967 = vmatpush.msrb.mxu0 %v7471_v61  ;;  %3987 = vmatpush.msrb.mxu1 %v7097_v12 }
 0xee0   :  { %3896 = vmatpush.msra.mxu3 %v7125_v54 }
 0xee1   :  { %3968 = vmatpush.msrb.mxu0 %v7476_v51  ;;  %3988 = vmatpush.msrb.mxu1 %v7106_v40 }
 0xee2   :  { %3897 = vmatpush.msra.mxu3 %v7911_v58 }
 0xee3   :  { %3969 = vmatpush.msrb.mxu0 %v7481_v20  ;;  %3989 = vmatpush.msrb.mxu1 %v7913_v49 }
 0xee4   :  { %3898 = vmatpush.msra.mxu3 %v7914_v38 }
 0xee5   :  { %3970 = vmatpush.msrb.mxu0 %v7486_v44  ;;  %3990 = vmatpush.msrb.mxu1 %v7928_v31 }
 0xf42   :  { %v3656_v6 = vpop.f32.mrf.mxu0 }
 0xf43   :  { %v3699_v28 = vadd.f32 %v3656_v6, %v3149_v10  ;;  %v3676_v15 = vpop.f32.mrf.mxu1 }
 0xf44   :  { %v3719_v13 = vadd.f32 %v7264_v45, %v3676_v15 }
 0xf45   :  { %v4333_v33 = vmul.f32 -1.442695, %v3699_v28 }
 0xf47   :  { %4637 = vpow2.f32 %v4333_v33  ;;  %v7503_v33 = vld [vmem:[#allocation22 + $0x178] sm:$0xff] }
 0xf48   :  { %v3636_v25 = vpop.f32.mrf.mxu3 }
 0xf49   :  { %v3679_v55 = vadd.f32 %v3636_v25, %v3108_v17  ;;  %v4804_v17 = vld [vmem:[#allocation22 + $0x158] sm:$0xff]  ;;  %v7512_v25 = vld [vmem:[#allocation22 + $0x148] sm:$0xff] }
 0xf4b   :  { %v4332_v1 = vmul.f32 -1.442695, %v3679_v55  ;;  %v4806_v55 = vld [vmem:[#allocation22 + $0x140] sm:$0xff] }
 0xf4d   :  { %v4638_v21 = vpop.eup %4637  ;;  %4639 = vpow2.f32 %v4332_v1  ;;  %v7516_v1 = vld [vmem:[#allocation22 + $0x130] sm:$0xff] }
 0xf4e   :  { %v3703_v27 = vadd.f32 1.0, %v4638_v21  ;;  %v7524_v21 = vld [vmem:[#allocation22 + $0x100] sm:$0xff] }
 0xf50   :  { %4641 = vrcp.f32 %v3703_v27  ;;  %v3715_v8 = vand.u32 2147483648, %v3703_v27  ;;  %vm3709_vm13 = vweird.f32 %v3703_v27  ;;  %v3713_v5 = vand.u32 2147483647, %v3703_v27 }
 0xf52   :  { %v3716_v46 = vor.u32 1.1754944e-38, %v3715_v8  ;;  %vm3714_vm15 = vcmp.eq.f32.partialorder %v3713_v5, 8.507059e+37 }
 0xf53   :  { %v4640_v12 = vpop.eup %4639 }
 0xf54   :  { %v3683_v63 = vadd.f32 1.0, %v4640_v12  ;;  %v7532_v12 = vld [vmem:[#allocation22 + $0xd0] sm:$0xff] }
 0xf56   :  { %4643 = vrcp.f32 %v3683_v63  ;;  %v4642_v40 = vpop.eup %4641  ;;  %v3695_v38 = vand.u32 2147483648, %v3683_v63  ;;  %v3693_v52 = vand.u32 2147483647, %v3683_v63  ;;  %vm3689_vm9 = vweird.f32 %v3683_v63 }
 0xf57   :  { %v3705_v22 = vmul.f32 %v4642_v40, %v3703_v27  ;;  %vm3710_vm12 = vweird.f32 %v4642_v40  ;;  %v7528_v27 = vld [vmem:[#allocation22 + $0xe8] sm:$0xff] }
 0xf58   :  { %v3696_v56 = vor.u32 1.1754944e-38, %v3695_v38  ;;  %vm3694_vm11 = vcmp.eq.f32.partialorder %v3693_v52, 8.507059e+37  ;;  %vm3711_vm14 = vmor %vm3709_vm13, %vm3710_vm12  ;;  %v7564_v38 = vld [vmem:[#allocation22 + $0x10] sm:$0xff] }
 0xf59   :  { %v3706_v58 = vsub.f32 1.0, %v3705_v22  ;;  %v7544_v22 = vld [vmem:[#allocation22 + $0x88] sm:$0xff]  ;;  %v7939_v52 = vld [vmem:[#allocation60_spill] sm:$0xff] }
 0xf5b   :  { %v3707_v57 = vmul.f32 %v4642_v40, %v3706_v58  ;;  %v7556_v58 = vld [vmem:[#allocation22 + $0x40] sm:$0xff] }
 0xf5c   :  { %v4644_v4 = vpop.eup %4643 }
 0xf5d   :  { %v3685_v54 = vmul.f32 %v4644_v4, %v3683_v63  ;;  %vm3690_vm8 = vweird.f32 %v4644_v4  ;;  %v3708_v34 = vadd.f32 %v4642_v40, %v3707_v57  ;;  %v7536_v63 = vld [vmem:[#allocation22 + $0xb8] sm:$0xff]  ;;  %v3111_v57 = vadd.f32 %v7939_v52, %v7935_v35 }
 0xf5e   :  { %vm3691_vm10 = vmor %vm3689_vm9, %vm3690_vm8 }
 0xf5f   :  { %v3686_v49 = vsub.f32 1.0, %v3685_v54  ;;  %v3712_v53 = vsel %vm3711_vm14, %v4642_v40, %v3708_v34  ;;  %v7540_v40 = vld [vmem:[#allocation22 + $0xa0] sm:$0xff]  ;;  %v7552_v54 = vld [vmem:[#allocation22 + $0x58] sm:$0xff] }
 0xf60   :  { %v3717_v47 = vsel %vm3714_vm15, %v3716_v46, %v3712_v53 }
 0xf61   :  { %v3687_v31 = vmul.f32 %v4644_v4, %v3686_v49  ;;  %v3723_v26 = vsub.f32 1.0, %v3717_v47  ;;  %v3725_v6 = vmul.f32 %v3717_v47, %v7419_v14  ;;  %v7560_v49 = vld [vmem:[#allocation22 + $0x28] sm:$0xff] }
 0xf63   :  { %v3688_v24 = vadd.f32 %v4644_v4, %v3687_v31 }
 0xf65   :  { %v3692_v9 = vsel %vm3691_vm10, %v4644_v4, %v3688_v24  ;;  %v7548_v4 = vld [vmem:[#allocation22 + $0x70] sm:$0xff] }
 0xf66   :  { %v3697_v2 = vsel %vm3694_vm11, %v3696_v56, %v3692_v9 }
 0xf67   :  { %v3720_v32 = vmul.f32 %v3719_v13, %v3697_v2 }
 0xf69   :  { %v3721_v41 = vadd.f32 %v3720_v32, %v3190_v37 }
 0xf6b   :  { %4645 = vtanh.f32 %v3721_v41 }
 0xf71   :  { %v4646_v59 = vpop.eup %4645 }
 0xf72   :  { %v3724_v10 = vmul.f32 %v4646_v59, %v3723_v26 }
 0xf74   :  { %v7498_v28 = vadd.f32 %v3725_v6, %v3724_v10 }
 0xf76   :  { %3747 = vmatmul.f32.vlgmr.msrb.gmra.mxu2 %v7498_v28  ;;  %3767 = vmatmul.f32.vlgmr.msrb.gmra.mxu3 %v7498_v28 }
 0xf77   :  { %3787 = vmatmul.f32.vlgmr.msra.gmra.mxu0 %v7498_v28  ;;  %3995 = vmatpush.msrb.mxu2 %v7503_v33 }
 0xf78   :  { %4067 = vmatpush.msrb.mxu3 %v7348_v19  ;;  %4087 = vmatpush.msra.mxu0 %v7426_v11  ;;  %v4808_v19 = vld [vmem:[#allocation22 + $0x128] sm:$0xff]  ;;  %v7520_v11 = vld [vmem:[#allocation22 + $0x118] sm:$0xff] }
 0xf79   :  { %3996 = vmatpush.msrb.mxu2 %v7508_v43 }
 0xf7a   :  { %4068 = vmatpush.msrb.mxu3 %v7353_v48  ;;  %4088 = vmatpush.msra.mxu0 %v4804_v17  ;;  %v4810_v48 = vld [vmem:[#allocation22 + $0x110] sm:$0xff] }
 0xf7b   :  { %3997 = vmatpush.msrb.mxu2 %v7512_v25 }
 0xf7c   :  { %4069 = vmatpush.msrb.mxu3 %v7358_v7  ;;  %4089 = vmatpush.msra.mxu0 %v4806_v55  ;;  %v4812_v7 = vld [vmem:[#allocation22 + $0xf8] sm:$0xff] }
 0xf7d   :  { %3998 = vmatpush.msrb.mxu2 %v7516_v1 }
 0xf7e   :  { %4070 = vmatpush.msrb.mxu3 %v7363_v18  ;;  %4090 = vmatpush.msra.mxu0 %v4808_v19  ;;  %v4814_v18 = vld [vmem:[#allocation22 + $0xe0] sm:$0xff] }
 0xf7f   :  { %3999 = vmatpush.msrb.mxu2 %v7520_v11 }
 0xf80   :  { %4071 = vmatpush.msrb.mxu3 %v7368_v23  ;;  %4091 = vmatpush.msra.mxu0 %v4810_v48  ;;  %v4816_v23 = vld [vmem:[#allocation22 + $0xc8] sm:$0xff] }
 0xf81   :  { %4000 = vmatpush.msrb.mxu2 %v7524_v21 }
 0xf82   :  { %4072 = vmatpush.msrb.mxu3 %v7373_v30  ;;  %4092 = vmatpush.msra.mxu0 %v4812_v7  ;;  %v4818_v30 = vld [vmem:[#allocation22 + $0xb0] sm:$0xff] }
 0xf83   :  { %4001 = vmatpush.msrb.mxu2 %v7528_v27 }
 0xf84   :  { %4073 = vmatpush.msrb.mxu3 %v7378_v39  ;;  %4093 = vmatpush.msra.mxu0 %v4814_v18  ;;  %v4820_v39 = vld [vmem:[#allocation22 + $0x98] sm:$0xff]  ;;  %v7940_v18 = vld [vmem:[#allocation52_spill] sm:$0xff] }
 0xf85   :  { %4002 = vmatpush.msrb.mxu2 %v7532_v12 }
 0xf86   :  { %4074 = vmatpush.msrb.mxu3 %v7383_v60  ;;  %4094 = vmatpush.msra.mxu0 %v4816_v23  ;;  %v4822_v60 = vld [vmem:[#allocation22 + $0x80] sm:$0xff]  ;;  %v3193_v23 = vadd.f32 %v7940_v18, %v7267_v36 }
 0xf87   :  { %4003 = vmatpush.msrb.mxu2 %v7536_v63 }
 0xf88   :  { %4075 = vmatpush.msrb.mxu3 %v7451_v29  ;;  %4095 = vmatpush.msra.mxu0 %v4818_v30  ;;  %v4824_v29 = vld [vmem:[#allocation22 + $0x68] sm:$0xff] }
 0xf89   :  { %4004 = vmatpush.msrb.mxu2 %v7540_v40 }
 0xf8a   :  { %4076 = vmatpush.msrb.mxu3 %v7456_v50  ;;  %4096 = vmatpush.msra.mxu0 %v4820_v39  ;;  %v4826_v50 = vld [vmem:[#allocation22 + $0x50] sm:$0xff] }
 0xf8b   :  { %4005 = vmatpush.msrb.mxu2 %v7544_v22 }
 0xf8c   :  { %4077 = vmatpush.msrb.mxu3 %v7461_v16  ;;  %4097 = vmatpush.msra.mxu0 %v4822_v60  ;;  %v4828_v16 = vld [vmem:[#allocation22 + $0x38] sm:$0xff] }
 0xf8d   :  { %4006 = vmatpush.msrb.mxu2 %v7548_v4 }
 0xf8e   :  { %4078 = vmatpush.msrb.mxu3 %v7466_v62  ;;  %4098 = vmatpush.msra.mxu0 %v4824_v29  ;;  %v4830_v62 = vld [vmem:[#allocation22 + $0x20] sm:$0xff] }
 0xf8f   :  { %4007 = vmatpush.msrb.mxu2 %v7552_v54 }
 0xf90   :  { %4079 = vmatpush.msrb.mxu3 %v7471_v61  ;;  %4099 = vmatpush.msra.mxu0 %v4826_v50  ;;  %v4832_v61 = vld [vmem:[#allocation22 + $0x8] sm:$0xff] }
 0xf91   :  { %4008 = vmatpush.msrb.mxu2 %v7556_v58 }
 0xf92   :  { %4080 = vmatpush.msrb.mxu3 %v7476_v51  ;;  %4100 = vmatpush.msra.mxu0 %v4828_v16  ;;  %v7938_v51 = vld [vmem:[#allocation47_spill] sm:$0xff] }
 0xf93   :  { %4009 = vmatpush.msrb.mxu2 %v7560_v49  ;;  %v3152_v31 = vadd.f32 %v7938_v51, %v7929_v0 }
 0xf94   :  { %4081 = vmatpush.msrb.mxu3 %v7481_v20  ;;  %4101 = vmatpush.msra.mxu0 %v4830_v62 }
 0xf95   :  { %4010 = vmatpush.msrb.mxu2 %v7564_v38 }
 0xf96   :  { %4082 = vmatpush.msrb.mxu3 %v7486_v44  ;;  %4102 = vmatpush.msra.mxu0 %v4832_v61 }
 0xff4   :  { %v3788_v59 = vpop.f32.mrf.mxu0 }
 0xff5   :  { %v3831_v55 = vadd.f32 %v7264_v45, %v3788_v59 }
 0xff9   :  { %v3748_v15 = vpop.f32.mrf.mxu2  ;;  %v3768_v24 = vpop.f32.mrf.mxu3 }
 0xffa   :  { %v3791_v56 = vadd.f32 %v3748_v15, %v3111_v57  ;;  %v3811_v20 = vadd.f32 %v3768_v24, %v3152_v31  ;;  %v4191_v15 = vld [vmem:[#allocation24 + $0x38] sm:$0xff] }
 0xffc   :  { %v4334_v13 = vmul.f32 -1.442695, %v3791_v56  ;;  %v4335_v9 = vmul.f32 -1.442695, %v3811_v20  ;;  %v4190_v56 = vld [vmem:[#allocation24 + $0x30] sm:$0xff]  ;;  %v4189_v20 = vld [vmem:[#allocation24 + $0x28] sm:$0xff] }
 0xffe   :  { %4647 = vpow2.f32 %v4334_v13 }
 0xfff   :  { %4649 = vpow2.f32 %v4335_v9 }
0x1004   :  { %v4648_v34 = vpop.eup %4647 }
0x1005   :  { %v4650_v2 = vpop.eup %4649  ;;  %v3795_v42 = vadd.f32 1.0, %v4648_v34  ;;  %v4188_v34 = vld [vmem:[#allocation24 + $0x20] sm:$0xff] }
0x1006   :  { %v3815_v44 = vadd.f32 1.0, %v4650_v2  ;;  %v4187_v2 = vld [vmem:[#allocation24 + $0x18] sm:$0xff] }
0x1007   :  { %4651 = vrcp.f32 %v3795_v42  ;;  %v3807_v53 = vand.u32 2147483648, %v3795_v42  ;;  %v3805_v26 = vand.u32 2147483647, %v3795_v42  ;;  %vm3801_vm1 = vweird.f32 %v3795_v42 }
0x1008   :  { %4653 = vrcp.f32 %v3815_v44  ;;  %v3827_v39 = vand.u32 2147483648, %v3815_v44  ;;  %vm3821_vm5 = vweird.f32 %v3815_v44  ;;  %v3825_v60 = vand.u32 2147483647, %v3815_v44 }
0x1009   :  { %v3808_v17 = vor.u32 1.1754944e-38, %v3807_v53  ;;  %vm3806_vm3 = vcmp.eq.f32.partialorder %v3805_v26, 8.507059e+37 }
0x100a   :  { %v3828_v16 = vor.u32 1.1754944e-38, %v3827_v39  ;;  %vm3826_vm7 = vcmp.eq.f32.partialorder %v3825_v60, 8.507059e+37 }
0x100d   :  { %v4652_v37 = vpop.eup %4651 }
0x100e   :  { %v4654_v8 = vpop.eup %4653  ;;  %v3797_v32 = vmul.f32 %v4652_v37, %v3795_v42  ;;  %vm3802_vm0 = vweird.f32 %v4652_v37  ;;  %v4186_v42 = vld [vmem:[#allocation24 + $0x10] sm:$0xff] }
0x100f   :  { %v3817_v5 = vmul.f32 %v4654_v8, %v3815_v44  ;;  %vm3803_vm2 = vmor %vm3801_vm1, %vm3802_vm0  ;;  %vm3822_vm4 = vweird.f32 %v4654_v8 }
0x1010   :  { %v3798_v41 = vsub.f32 1.0, %v3797_v32  ;;  %vm3823_vm6 = vmor %vm3821_vm5, %vm3822_vm4 }
0x1011   :  { %v3818_v46 = vsub.f32 1.0, %v3817_v5  ;;  %v4184_v5 = vld [vmem:[#allocation24] sm:$0xff] }
0x1012   :  { %v3799_v47 = vmul.f32 %v4652_v37, %v3798_v41 }
0x1013   :  { %v3819_v10 = vmul.f32 %v4654_v8, %v3818_v46 }
0x1014   :  { %v3800_v6 = vadd.f32 %v4652_v37, %v3799_v47 }
0x1015   :  { %v3820_v7 = vadd.f32 %v4654_v8, %v3819_v10 }
0x1016   :  { %v3804_v19 = vsel %vm3803_vm2, %v4652_v37, %v3800_v6 }
0x1017   :  { %v3809_v48 = vsel %vm3806_vm3, %v3808_v17, %v3804_v19  ;;  %v3824_v50 = vsel %vm3823_vm6, %v4654_v8, %v3820_v7  ;;  %v4185_v8 = vld [vmem:[#allocation24 + $0x8] sm:$0xff]  ;;  %v7604_v7 = vld [vmem:[%s7678_s16] ss:$0 sm:$0xff] }
0x1018   :  { %v3832_v30 = vmul.f32 %v3831_v55, %v3809_v48  ;;  %v3829_v62 = vsel %vm3826_vm7, %v3828_v16, %v3824_v50 }
0x1019   :  { %v3835_v45 = vsub.f32 1.0, %v3829_v62  ;;  %v3837_v31 = vmul.f32 %v3829_v62, %v7498_v28 }
0x101a   :  { %v3833_v29 = vadd.f32 %v3832_v30, %v3193_v23  ;;  %v7943_v23 = vld [vmem:[#allocation58_spill] sm:$0xff] }
0x101b   :  { %v3196_v30 = vadd.f32 %v7943_v23, %v7267_v36 }
0x101c   :  { %4655 = vtanh.f32 %v3833_v29 }
0x1022   :  { %v4656_v61 = vpop.eup %4655 }
0x1023   :  { %v3836_v51 = vmul.f32 %v4656_v61, %v3835_v45 }
0x1025   :  { %v7576_v52 = vadd.f32 %v3837_v31, %v3836_v51 }
0x1027   :  { %3859 = vmatmul.f32.vlgmr.msra.gmra.mxu1 %v7576_v52  ;;  %3879 = vmatmul.f32.vlgmr.msra.gmra.mxu2 %v7576_v52 }
0x1028   :  { %3899 = vmatmul.f32.vlgmr.msra.gmra.mxu3 %v7576_v52  ;;  %4107 = vmatpush.msra.mxu1 %v7503_v33  ;;  %v4199_v33 = vld [vmem:[#allocation24 + $0x78] sm:$0xff] }
0x1029   :  { %4204 = vmatpush.msra.mxu2 %v4199_v33 }
0x102a   :  { %4108 = vmatpush.msra.mxu1 %v7508_v43  ;;  %v4198_v43 = vld [vmem:[#allocation24 + $0x70] sm:$0xff] }
0x102b   :  { %4205 = vmatpush.msra.mxu2 %v4198_v43 }
0x102c   :  { %4109 = vmatpush.msra.mxu1 %v7512_v25  ;;  %v4197_v25 = vld [vmem:[#allocation24 + $0x68] sm:$0xff] }
0x102d   :  { %4206 = vmatpush.msra.mxu2 %v4197_v25 }
0x102e   :  { %4110 = vmatpush.msra.mxu1 %v7516_v1  ;;  %v4196_v1 = vld [vmem:[#allocation24 + $0x60] sm:$0xff] }
0x102f   :  { %4207 = vmatpush.msra.mxu2 %v4196_v1 }
0x1030   :  { %4111 = vmatpush.msra.mxu1 %v7520_v11  ;;  %v7941_v11 = vld [vmem:[#allocation51_spill] sm:$0xff] }
0x1032   :  { %4112 = vmatpush.msra.mxu1 %v7524_v21  ;;  %v3114_v21 = vadd.f32 %v7941_v11, %v7935_v35 }
0x1034   :  { %4113 = vmatpush.msra.mxu1 %v7528_v27 }
0x1036   :  { %4114 = vmatpush.msra.mxu1 %v7532_v12  ;;  %v4195_v12 = vld [vmem:[#allocation24 + $0x58] sm:$0xff] }
0x1037   :  { %4208 = vmatpush.msra.mxu2 %v4195_v12 }
0x1038   :  { %4115 = vmatpush.msra.mxu1 %v7536_v63 }
0x103a   :  { %4116 = vmatpush.msra.mxu1 %v7540_v40  ;;  %v4194_v40 = vld [vmem:[#allocation24 + $0x50] sm:$0xff] }
0x103b   :  { %4209 = vmatpush.msra.mxu2 %v4194_v40 }
0x103c   :  { %4117 = vmatpush.msra.mxu1 %v7544_v22 }
0x103e   :  { %4118 = vmatpush.msra.mxu1 %v7548_v4  ;;  %v4193_v4 = vld [vmem:[#allocation24 + $0x48] sm:$0xff] }
0x103f   :  { %4210 = vmatpush.msra.mxu2 %v4193_v4 }
0x1040   :  { %4119 = vmatpush.msra.mxu1 %v7552_v54  ;;  %v7942_v54 = vld [vmem:[#allocation46_spill] sm:$0xff] }
0x1042   :  { %4120 = vmatpush.msra.mxu1 %v7556_v58  ;;  %v3155_v58 = vadd.f32 %v7942_v54, %v7929_v0 }
0x1044   :  { %4121 = vmatpush.msra.mxu1 %v7560_v49 }
0x1046   :  { %4122 = vmatpush.msra.mxu1 %v7564_v38  ;;  %v4192_v38 = vld [vmem:[#allocation24 + $0x40] sm:$0xff] }
0x1047   :  { %4211 = vmatpush.msra.mxu2 %v4192_v38 }
0x1049   :  { %4212 = vmatpush.msra.mxu2 %v4191_v15 }
0x104b   :  { %4213 = vmatpush.msra.mxu2 %v4190_v56 }
0x104d   :  { %4214 = vmatpush.msra.mxu2 %v4189_v20 }
0x104f   :  { %4215 = vmatpush.msra.mxu2 %v4188_v34 }
0x1051   :  { %4216 = vmatpush.msra.mxu2 %v4187_v2 }
0x1053   :  { %4217 = vmatpush.msra.mxu2 %v4186_v42 }
0x1055   :  { %4218 = vmatpush.msra.mxu2 %v4185_v8 }
0x1057   :  { %4219 = vmatpush.msra.mxu2 %v4184_v5 }
0x10a4   :  { %v3860_v27 = vpop.f32.mrf.mxu1 }
0x10a5   :  { %v3903_v63 = vadd.f32 %v3860_v27, %v3114_v21  ;;  %v7944_v21 = vld [vmem:[#allocation50_spill] sm:$0xff]  ;;  %v7945_v27 = vld [vmem:[#allocation55_spill] sm:$0xff] }
0x10a6   :  { %v3158_v12 = vadd.f32 %v7945_v27, %v7929_v0 }
0x10a7   :  { %v4336_v22 = vmul.f32 -1.442695, %v3903_v63  ;;  %v7946_v63 = vld [vmem:[#allocation43_spill] sm:$0xff] }
0x10a8   :  { %v3117_v40 = vadd.f32 %v7946_v63, %v7935_v35 }
0x10a9   :  { %4657 = vpow2.f32 %v4336_v22 }
0x10aa   :  { %v3880_v49 = vpop.f32.mrf.mxu2 }
0x10ab   :  { %v3923_v57 = vadd.f32 %v3880_v49, %v3155_v58  ;;  %v3900_v10 = vpop.f32.mrf.mxu3 }
0x10ac   :  { %v3943_v18 = vadd.f32 %v7604_v7, %v3900_v10 }
0x10ad   :  { %v4337_v24 = vmul.f32 -1.442695, %v3923_v57  ;;  %v7628_v57 = vld [vmem:[%s7947_s4] ss:$0 sm:$0xff] }
0x10af   :  { %v4658_v13 = vpop.eup %4657  ;;  %4659 = vpow2.f32 %v4337_v24 }
0x10b0   :  { %v3907_v9 = vadd.f32 1.0, %v4658_v13 }
0x10b2   :  { %4661 = vrcp.f32 %v3907_v9  ;;  %v3919_v46 = vand.u32 2147483648, %v3907_v9  ;;  %v3917_v26 = vand.u32 2147483647, %v3907_v9  ;;  %vm3913_vm9 = vweird.f32 %v3907_v9 }
0x10b4   :  { %v3920_v55 = vor.u32 1.1754944e-38, %v3919_v46  ;;  %vm3918_vm11 = vcmp.eq.f32.partialorder %v3917_v26, 8.507059e+37 }
0x10b5   :  { %v4660_v44 = vpop.eup %4659 }
0x10b6   :  { %v3927_v37 = vadd.f32 1.0, %v4660_v44 }
0x10b8   :  { %v4662_v32 = vpop.eup %4661  ;;  %4663 = vrcp.f32 %v3927_v37  ;;  %v3939_v29 = vand.u32 2147483648, %v3927_v37  ;;  %v3937_v16 = vand.u32 2147483647, %v3927_v37  ;;  %vm3933_vm13 = vweird.f32 %v3927_v37 }
0x10b9   :  { %v3909_v41 = vmul.f32 %v4662_v32, %v3907_v9  ;;  %vm3914_vm8 = vweird.f32 %v4662_v32 }
0x10ba   :  { %vm3915_vm10 = vmor %vm3913_vm9, %vm3914_vm8  ;;  %v3940_v61 = vor.u32 1.1754944e-38, %v3939_v29  ;;  %vm3938_vm15 = vcmp.eq.f32.partialorder %v3937_v16, 8.507059e+37 }
0x10bb   :  { %v3910_v53 = vsub.f32 1.0, %v3909_v41 }
0x10bd   :  { %v3911_v47 = vmul.f32 %v4662_v32, %v3910_v53 }
0x10be   :  { %v4664_v59 = vpop.eup %4663 }
0x10bf   :  { %v3929_v6 = vmul.f32 %v4664_v59, %v3927_v37  ;;  %v3912_v17 = vadd.f32 %v4662_v32, %v3911_v47  ;;  %vm3934_vm12 = vweird.f32 %v4664_v59 }
0x10c0   :  { %vm3935_vm14 = vmor %vm3933_vm13, %vm3934_vm12 }
0x10c1   :  { %v3930_v19 = vsub.f32 1.0, %v3929_v6  ;;  %v3916_v48 = vsel %vm3915_vm10, %v4662_v32, %v3912_v17  ;;  %v7948_v6 = vld [vmem:[#allocation48_spill] sm:$0xff] }
0x10c2   :  { %v3921_v39 = vsel %vm3918_vm11, %v3920_v55, %v3916_v48  ;;  %v3199_v17 = vadd.f32 %v7948_v6, %v7267_v36 }
0x10c3   :  { %v3931_v60 = vmul.f32 %v4664_v59, %v3930_v19  ;;  %v3944_v50 = vmul.f32 %v3943_v18, %v3921_v39 }
0x10c5   :  { %v3932_v62 = vadd.f32 %v4664_v59, %v3931_v60  ;;  %v3945_v45 = vadd.f32 %v3944_v50, %v3196_v30 }
0x10c7   :  { %v3936_v51 = vsel %vm3935_vm14, %v4664_v59, %v3932_v62  ;;  %4665 = vtanh.f32 %v3945_v45 }
0x10c8   :  { %v3941_v31 = vsel %vm3938_vm15, %v3940_v61, %v3936_v51 }
0x10c9   :  { %v3947_v33 = vsub.f32 1.0, %v3941_v31  ;;  %v3949_v1 = vmul.f32 %v3941_v31, %v7576_v52 }
0x10cd   :  { %v4666_v43 = vpop.eup %4665 }
0x10ce   :  { %v3948_v25 = vmul.f32 %v4666_v43, %v3947_v33 }
0x10d0   :  { %v7610_v11 = vadd.f32 %v3949_v1, %v3948_v25 }
0x10d2   :  { %3971 = vmatmul.f32.vlgmr.msrb.gmra.mxu0 %v7610_v11  ;;  %3991 = vmatmul.f32.vlgmr.msrb.gmra.mxu1 %v7610_v11 }
0x10d3   :  { %4011 = vmatmul.f32.vlgmr.msrb.gmra.mxu2 %v7610_v11 }
0x10db   :  { %4220 = vmatmul.f32.vlgmr.msra.gmra.mxu2 %v7944_v21 }
0x10e3   :  { %4223 = vmatmul.f32.gmra.mxu2 %v7342_v3 }
0x10eb   :  { %4226 = vmatmul.f32.gmra.mxu2 %v7419_v14 }
0x10f3   :  { %4229 = vmatmul.f32.gmra.mxu2 %v7498_v28 }
0x10fb   :  { %4232 = vmatmul.f32.gmra.mxu2 %v7576_v52 }
0x1103   :  { %4235 = vmatmul.f32.gmra.mxu2 %v7610_v11 }
0x114f   :  { %v3972_v22 = vpop.f32.mrf.mxu0  ;;  %v3992_v4 = vpop.f32.mrf.mxu1 }
0x1150   :  { %v4015_v54 = vadd.f32 %v3972_v22, %v3117_v40  ;;  %v4035_v58 = vadd.f32 %v3992_v4, %v3158_v12  ;;  %v7950_v40 = vld [vmem:[#allocation57_spill] sm:$0xff] }
0x1151   :  { %v3120_v22 = vadd.f32 %v7950_v40, %v7935_v35 }
0x1152   :  { %v4338_v49 = vmul.f32 -1.442695, %v4015_v54  ;;  %v4339_v3 = vmul.f32 -1.442695, %v4035_v58 }
0x1154   :  { %4667 = vpow2.f32 %v4338_v49 }
0x1155   :  { %4669 = vpow2.f32 %v4339_v3 }
0x1156   :  { %v4012_v14 = vpop.f32.mrf.mxu2 }
0x1157   :  { %v4055_v26 = vadd.f32 %v7604_v7, %v4012_v14 }
0x115a   :  { %v4668_v28 = vpop.eup %4667 }
0x115b   :  { %v4670_v38 = vpop.eup %4669  ;;  %v4019_v52 = vadd.f32 1.0, %v4668_v28 }
0x115c   :  { %v4039_v15 = vadd.f32 1.0, %v4670_v38 }
0x115d   :  { %4671 = vrcp.f32 %v4019_v52  ;;  %v4031_v37 = vand.u32 2147483648, %v4019_v52  ;;  %v4029_v5 = vand.u32 2147483647, %v4019_v52  ;;  %vm4025_vm1 = vweird.f32 %v4019_v52 }
0x115e   :  { %4673 = vrcp.f32 %v4039_v15  ;;  %v4221_v24 = vpop.f32.mrf.mxu2  ;;  %v4051_v55 = vand.u32 2147483648, %v4039_v15  ;;  %vm4045_vm5 = vweird.f32 %v4039_v15  ;;  %v4049_v18 = vand.u32 2147483647, %v4039_v15 }
0x115f   :  { %v4222_v56 = vadd.f32 %v7628_v57, %v4221_v24  ;;  %v4032_v46 = vor.u32 1.1754944e-38, %v4031_v37  ;;  %vm4030_vm3 = vcmp.eq.f32.partialorder %v4029_v5, 8.507059e+37 }
0x1160   :  { %v4052_v60 = vor.u32 1.1754944e-38, %v4051_v55  ;;  %vm4050_vm7 = vcmp.eq.f32.partialorder %v4049_v18, 8.507059e+37 }
0x1161   :  { %4245 = vst [vmem:[#allocation25] sm:$0xff] %v4222_v56 }
0x1163   :  { %v4672_v20 = vpop.eup %4671 }
0x1164   :  { %v4674_v13 = vpop.eup %4673  ;;  %v4021_v9 = vmul.f32 %v4672_v20, %v4019_v52  ;;  %vm4026_vm0 = vweird.f32 %v4672_v20 }
0x1165   :  { %v4041_v34 = vmul.f32 %v4674_v13, %v4039_v15  ;;  %vm4027_vm2 = vmor %vm4025_vm1, %vm4026_vm0  ;;  %vm4046_vm4 = vweird.f32 %v4674_v13 }
0x1166   :  { %v4022_v2 = vsub.f32 1.0, %v4021_v9  ;;  %v4224_v42 = vpop.f32.mrf.mxu2  ;;  %vm4047_vm6 = vmor %vm4045_vm5, %vm4046_vm4 }
0x1167   :  { %v4042_v44 = vsub.f32 1.0, %v4041_v34  ;;  %v4225_v8 = vadd.f32 %v7628_v57, %v4224_v42 }
0x1168   :  { %v4023_v32 = vmul.f32 %v4672_v20, %v4022_v2 }
0x1169   :  { %v4043_v41 = vmul.f32 %v4674_v13, %v4042_v44  ;;  %4246 = vst [vmem:[#allocation25 + $0x8] sm:$0xff] %v4225_v8 }
0x116a   :  { %v4024_v53 = vadd.f32 %v4672_v20, %v4023_v32 }
0x116b   :  { %v4044_v59 = vadd.f32 %v4674_v13, %v4043_v41 }
0x116c   :  { %v4028_v47 = vsel %vm4027_vm2, %v4672_v20, %v4024_v53  ;;  %v7951_v53 = vld [vmem:[#allocation44_spill] sm:$0xff] }
0x116d   :  { %v4033_v10 = vsel %vm4030_vm3, %v4032_v46, %v4028_v47  ;;  %v4048_v39 = vsel %vm4047_vm6, %v4674_v13, %v4044_v59  ;;  %v3202_v46 = vadd.f32 %v7951_v53, %v7267_v36 }
0x116e   :  { %v4056_v19 = vmul.f32 %v4055_v26, %v4033_v10  ;;  %v4227_v48 = vpop.f32.mrf.mxu2  ;;  %v4053_v29 = vsel %vm4050_vm7, %v4052_v60, %v4048_v39 }
0x116f   :  { %v4228_v23 = vadd.f32 %v7628_v57, %v4227_v48  ;;  %v4059_v16 = vsub.f32 1.0, %v4053_v29  ;;  %v4061_v51 = vmul.f32 %v4053_v29, %v7610_v11  ;;  %v7949_v11 = vld [vmem:[#allocation62_spill] sm:$0xff] }
0x1170   :  { %v4057_v30 = vadd.f32 %v4056_v19, %v3199_v17  ;;  %v3161_v21 = vadd.f32 %v7949_v11, %v7929_v0 }
0x1171   :  { %4247 = vst [vmem:[#allocation25 + $0x10] sm:$0xff] %v4228_v23 }
0x1172   :  { %4675 = vtanh.f32 %v4057_v30 }
0x1176   :  { %v4230_v50 = vpop.f32.mrf.mxu2 }
0x1177   :  { %v4231_v62 = vadd.f32 %v7628_v57, %v4230_v50 }
0x1178   :  { %v4676_v45 = vpop.eup %4675 }
0x1179   :  { %v4060_v61 = vmul.f32 %v4676_v45, %v4059_v16  ;;  %4248 = vst [vmem:[#allocation25 + $0x18] sm:$0xff] %v4231_v62 }
0x117b   :  { %v7638_v31 = vadd.f32 %v4061_v51, %v4060_v61 }
0x117d   :  { %4083 = vmatmul.f32.vlgmr.msrb.gmra.mxu3 %v7638_v31  ;;  %4103 = vmatmul.f32.vlgmr.msra.gmra.mxu0 %v7638_v31 }
0x117e   :  { %4123 = vmatmul.f32.vlgmr.msra.gmra.mxu1 %v7638_v31  ;;  %v4233_v33 = vpop.f32.mrf.mxu2  ;;  %4238 = vmatmul.f32.gmra.mxu2 %v7638_v31 }
0x117f   :  { %v4234_v43 = vadd.f32 %v7628_v57, %v4233_v33 }
0x1181   :  { %4249 = vst [vmem:[#allocation25 + $0x20] sm:$0xff] %v4234_v43 }
0x1186   :  { %v4236_v25 = vpop.f32.mrf.mxu2 }
0x1187   :  { %v4237_v1 = vadd.f32 %v7628_v57, %v4236_v25 }
0x1189   :  { %4250 = vst [vmem:[#allocation25 + $0x28] sm:$0xff] %v4237_v1 }
0x11fa   :  { %v4104_v27 = vpop.f32.mrf.mxu0 }
0x11fb   :  { %v4147_v12 = vadd.f32 %v4104_v27, %v3161_v21  ;;  %v4124_v2 = vpop.f32.mrf.mxu1 }
0x11fc   :  { %v4167_v8 = vadd.f32 %v7604_v7, %v4124_v2 }
0x11fd   :  { %v4341_v63 = vmul.f32 -1.442695, %v4147_v12 }
0x11ff   :  { %4677 = vpow2.f32 %v4341_v63 }
0x1200   :  { %v4084_v4 = vpop.f32.mrf.mxu3 }
0x1201   :  { %v4127_v54 = vadd.f32 %v4084_v4, %v3120_v22  ;;  %v4239_v58 = vpop.f32.mrf.mxu2 }
0x1202   :  { %v4240_v49 = vadd.f32 %v7628_v57, %v4239_v58 }
0x1203   :  { %v4340_v3 = vmul.f32 -1.442695, %v4127_v54 }
0x1204   :  { %4251 = vst [vmem:[#allocation25 + $0x30] sm:$0xff] %v4240_v49 }
0x1205   :  { %v4678_v14 = vpop.eup %4677  ;;  %4679 = vpow2.f32 %v4340_v3 }
0x1206   :  { %v4151_v28 = vadd.f32 1.0, %v4678_v14 }
0x1208   :  { %4681 = vrcp.f32 %v4151_v28  ;;  %v4163_v47 = vand.u32 2147483648, %v4151_v28  ;;  %vm4157_vm13 = vweird.f32 %v4151_v28  ;;  %v4161_v59 = vand.u32 2147483647, %v4151_v28 }
0x120a   :  { %v4164_v17 = vor.u32 1.1754944e-38, %v4163_v47  ;;  %vm4162_vm15 = vcmp.eq.f32.partialorder %v4161_v59, 8.507059e+37 }
0x120b   :  { %v4680_v38 = vpop.eup %4679 }
0x120c   :  { %v4131_v0 = vadd.f32 1.0, %v4680_v38 }
0x120e   :  { %4683 = vrcp.f32 %v4131_v0  ;;  %v4682_v52 = vpop.eup %4681  ;;  %v4143_v13 = vand.u32 2147483648, %v4131_v0  ;;  %v4141_v34 = vand.u32 2147483647, %v4131_v0  ;;  %vm4137_vm9 = vweird.f32 %v4131_v0 }
0x120f   :  { %v4153_v15 = vmul.f32 %v4682_v52, %v4151_v28  ;;  %vm4158_vm12 = vweird.f32 %v4682_v52 }
0x1210   :  { %v4144_v37 = vor.u32 1.1754944e-38, %v4143_v13  ;;  %vm4142_vm11 = vcmp.eq.f32.partialorder %v4141_v34, 8.507059e+37  ;;  %vm4159_vm14 = vmor %vm4157_vm13, %vm4158_vm12 }
0x1211   :  { %v4154_v35 = vsub.f32 1.0, %v4153_v15 }
0x1213   :  { %v4155_v42 = vmul.f32 %v4682_v52, %v4154_v35 }
0x1214   :  { %v4684_v24 = vpop.eup %4683 }
0x1215   :  { %v4133_v56 = vmul.f32 %v4684_v24, %v4131_v0  ;;  %vm4138_vm8 = vweird.f32 %v4684_v24  ;;  %v4156_v41 = vadd.f32 %v4682_v52, %v4155_v42 }
0x1216   :  { %vm4139_vm10 = vmor %vm4137_vm9, %vm4138_vm8 }
0x1217   :  { %v4134_v20 = vsub.f32 1.0, %v4133_v56  ;;  %v4160_v6 = vsel %vm4159_vm14, %v4682_v52, %v4156_v41 }
0x1218   :  { %v4165_v55 = vsel %vm4162_vm15, %v4164_v17, %v4160_v6 }
0x1219   :  { %v4135_v9 = vmul.f32 %v4684_v24, %v4134_v20  ;;  %v4171_v7 = vsub.f32 1.0, %v4165_v55  ;;  %v4173_v18 = vmul.f32 %v4165_v55, %v7638_v31 }
0x121b   :  { %v4136_v44 = vadd.f32 %v4684_v24, %v4135_v9 }
0x121d   :  { %v4140_v32 = vsel %vm4139_vm10, %v4684_v24, %v4136_v44 }
0x121e   :  { %v4145_v5 = vsel %vm4142_vm11, %v4144_v37, %v4140_v32 }
0x121f   :  { %v4168_v26 = vmul.f32 %v4167_v8, %v4145_v5 }
0x1221   :  { %v4169_v10 = vadd.f32 %v4168_v26, %v3202_v46 }
0x1223   :  { %4685 = vtanh.f32 %v4169_v10 }
0x1229   :  { %v4686_v19 = vpop.eup %4685 }
0x122a   :  { %v4172_v48 = vmul.f32 %v4686_v19, %v4171_v7 }
0x122c   :  { %v4174_v23 = vadd.f32 %v4173_v18, %v4172_v48 }
0x122e   :  { %4241 = vmatmul.f32.gmra.mxu2 %v4174_v23 }
0x12b1   :  { %v4242_v36 = vpop.f32.mrf.mxu2 }
0x12b2   :  { %v4243_v30 = vadd.f32 %v7628_v57, %v4242_v36 }
0x12b4   :  { %4252 = vst [vmem:[#allocation25 + $0x38] sm:$0xff] %v4243_v30 }
0x12b5   :  { %4265 = dma.vmem_to_hbm [thread:$0]  %s4258_s25, 1024, %s4260_s28, [#allocation6], %s5191_s19, %s5191_s19, %s5192_s18  }
0x12b6   :  { %5184 = dma.done.wait [#allocation6], 1024  }
0x12b7   :  { %5185 = vsyncadd [#allocation6], 4294966272 }
0x12b8   :  { %4270 = vsyncpa [#allocation5], 1 }
0x12b9   :  { %4271 = vsyncpa [#allocation8], 1 }
0x12ba   :  { %4272 = vsyncpa [#allocation11], 1 }
0x12bb   :  { %4273 = vsyncpa [#allocation14], 1 }
0x12bc   :  { %4274 = vsyncpa [#allocation17], 1 }
0x12bd   :  { %4275 = vsyncpa [#allocation20], 1 }
0x12be   :  { %4276 = vsyncpa [#allocation23], 1 }
0x12bf   :  { %4277 = vsyncpa [#allocation6], 1 }

</bundles_post_ra>
